<compile_context>
chip_gen: v5e
topology: v5e:2x2
jax: 0.10.0
libtpu: 0.0.40
codegen_flags: <defaults>
</compile_context>

<pallas_src>
import functools

import numpy as np
import jax
import jax.numpy as jnp
from jax import lax
from jax.experimental import pallas as pl
from jax.experimental.pallas import tpu as pltpu


# ----------------------------------------------------------------------------
# helpers
# ----------------------------------------------------------------------------

def _full_spec(shape):
    """Whole-array VMEM block for a grid=(1,) kernel."""
    zeros = (0,) * len(shape)
    return pl.BlockSpec(shape, lambda i, _z=zeros: _z)


# ----------------------------------------------------------------------------
# Fully fused forward kernel (primary path)
# ----------------------------------------------------------------------------

def _fused_kernel(x_ref, w1_ref, b1_ref, w2_ref, b2_ref, w3_ref, b3_ref,
                  wf_ref, bf_ref, wl1_ref, bl1_ref, wl2_ref, bl2_ref, o_ref,
                  *, nb, H, W):
    """Whole Siamese forward for `nb = 2B` images of size (H, W), resident in
    VMEM.  x_ref holds the images flattened row-major (1, nb*H*W + pad)."""
    f32, bf16 = jnp.float32, jnp.bfloat16

    # -------- conv1 7x7 (+bias+ReLU) + maxpool 2x2 ---------------------------
    OH1, OW1 = H - 6, W - 6                    # 50, 40
    TOT1 = nb * H * W
    x = x_ref[...]                             # (1, TOT1 + 6*W + 6)

    # In-kernel im2col on the flat image: for kernel offset (i, j) the patch
    # row is a contiguous lane slice (lanes where (oh, ow) run out of the
    # valid range are garbage and are dropped after the matmul).
    rows = [x[:, i * W + j: i * W + j + TOT1]
            for i in range(7) for j in range(7)]
    p1 = jnp.concatenate(rows, axis=0).astype(bf16)              # (49, TOT1)
    y1 = jnp.dot(w1_ref[...], p1, preferred_element_type=f32)    # (16, TOT1)

    # Recover the (C, B, H, W) view, drop invalid border rows/cols, pool 2x2.
    y1 = y1.reshape(16, nb, H, W)[:, :, :OH1, :OW1]              # (16,nb,50,40)
    y1 = jnp.max(y1.reshape(16, nb * OH1, OW1 // 2, 2), axis=-1)
    y1 = jnp.max(y1.reshape(16, nb * OH1 // 2, 2, OW1 // 2), axis=2)
    # pool commutes with monotone bias-add + ReLU -> apply them once, in f32.
    a1 = jnp.maximum(y1 + b1_ref[...], 0.0)                      # (16, nb*25, 20)

    # -------- conv2 6x6 (+bias+ReLU) + maxpool (4,3) --------------------------
    H2, W2 = OH1 // 2, OW1 // 2                # 25, 20
    OH2, OW2 = H2 - 5, W2 - 5                  # 20, 15
    TOT2 = nb * H2 * W2                        # 2000
    PAD2 = 5 * W2 + 5                          # keeps the shifted slices in-bounds

    a1f = a1.reshape(16, TOT2)
    a1f = jnp.concatenate([a1f, jnp.zeros((16, PAD2), f32)], axis=1)
    a1f = a1f.astype(bf16)                                        # (16, TOT2+PAD2)
    rows = [a1f[:, i * W2 + j: i * W2 + j + TOT2]
            for i in range(6) for j in range(6)]
    p2 = jnp.concatenate(rows, axis=0)                            # (576, TOT2)
    y2 = jnp.dot(w2_ref[...], p2, preferred_element_type=f32)     # (48, TOT2)

    y2 = y2.reshape(48, nb, H2, W2)[:, :, :OH2, :OW2]             # (48,nb,20,15)
    y2 = jnp.max(y2.reshape(48, nb * OH2, OW2 // 3, 3), axis=-1)
    y2 = jnp.max(y2.reshape(48, nb * OH2 // 4, 4, OW2 // 3), axis=2)
    a2 = jnp.maximum(y2 + b2_ref[...], 0.0)                       # (48, nb*5, 5)

    # -------- conv3 (1x1 spatial == dense) + tail -----------------------------
    a2 = a2.reshape(48, nb, 5, 5).transpose(1, 0, 2, 3)           # (nb,48,5,5)
    feat = a2.reshape(nb, 48 * 25).astype(bf16)                   # (nb, 1200)
    h = jnp.dot(feat, w3_ref[...], preferred_element_type=f32) + b3_ref[...]
    h = jnp.maximum(h, 0.0)                                       # conv3 + ReLU
    h = jnp.dot(h.astype(bf16), wf_ref[...],
                preferred_element_type=f32) + bf_ref[...]         # fully
    h = jnp.dot(h.astype(bf16), wl1_ref[...],
                preferred_element_type=f32) + bl1_ref[...]        # linear1
    B = nb // 2
    dis = jnp.abs(h[:B, :] - h[B:, :])                            # |f1 - f2| (f32)
    logits = jnp.dot(dis.astype(bf16), wl2_ref[...],
                     preferred_element_type=f32) + bl2_ref[...]   # linear2
    m = jnp.max(logits, axis=1, keepdims=True)
    e = jnp.exp(logits - m)
    o_ref[...] = (e / jnp.sum(e, axis=1, keepdims=True)).astype(o_ref.dtype)


def fused_forward(pm, x1, x2):
    """x1, x2: (B, H, W) f32 -> softmax probabilities (B, 2).  One kernel."""
    B, H, W = x1.shape
    nb = 2 * B
    x = jnp.concatenate([x1, x2], axis=0).reshape(1, nb * H * W)
    x = jnp.pad(x, ((0, 0), (0, 6 * W + 6)))          # slack for shifted slices
    args = [x, pm["w1"], pm["b1"], pm["w2"], pm["b2"], pm["w3"], pm["b3"],
            pm["wf"], pm["bf"], pm["wl1"], pm["bl1"], pm["wl2"], pm["bl2"]]
    kernel = functools.partial(_fused_kernel, nb=nb, H=H, W=W)
    return pl.pallas_call(
        kernel,
        out_shape=jax.ShapeDtypeStruct((B, 2), jnp.float32),
        grid=(1,),
        in_specs=[_full_spec(a.shape) for a in args],
        out_specs=_full_spec((B, 2)),
        compiler_params=pltpu.CompilerParams(
            dimension_semantics=("arbitrary",)),
    )(*args)


def prep_params_fused(p):
    """One-time repack of PyTorch-layout params into bf16, matmul-ready,
    channel-padded layouts (zero padding keeps the math exact)."""
    bf16 = jnp.bfloat16
    w1 = jnp.pad(p["conv1_w"].reshape(15, 49), ((0, 1), (0, 0))).astype(bf16)
    b1 = jnp.pad(p["conv1_b"], (0, 1)).reshape(16, 1, 1)
    w2 = p["conv2_w"].transpose(0, 2, 3, 1)                       # (45,6,6,15)
    w2 = jnp.pad(w2, ((0, 3), (0, 0), (0, 0), (0, 1)))            # (48,6,6,16)
    w2 = w2.reshape(48, 576).astype(bf16)                         # K order (i,j,c)
    b2 = jnp.pad(p["conv2_b"], (0, 3)).reshape(48, 1, 1)
    w3 = jnp.pad(p["conv3_w"], ((0, 0), (0, 3), (0, 0), (0, 0)))  # (250,48,5,5)
    w3 = w3.reshape(250, 48 * 25).T.astype(bf16)                  # (1200, 250)
    return {
        "w1": w1, "b1": b1, "w2": w2, "b2": b2, "w3": w3,
        "b3": p["conv3_b"].reshape(1, 250),
        "wf": p["fully_w"].T.astype(bf16), "bf": p["fully_b"].reshape(1, 100),
        "wl1": p["lin1_w"].T.astype(bf16), "bl1": p["lin1_b"].reshape(1, 50),
        "wl2": p["lin2_w"].T.astype(bf16), "bl2": p["lin2_b"].reshape(1, 2),
    }


# ----------------------------------------------------------------------------
# Safety-net path: previously validated 3-kernel pipeline (f32, XLA im2col).
# Only used if the fused kernel fails to lower / mismatches the reference.
# ----------------------------------------------------------------------------

def _conv_relu_pool_kernel(p_ref, w_ref, b_ref, o_ref):
    P = p_ref.shape[0]
    w = w_ref[...]
    acc = jnp.dot(w, p_ref[0], preferred_element_type=jnp.float32)
    for p in range(1, P):
        acc = jnp.maximum(
            acc, jnp.dot(w, p_ref[p], preferred_element_type=jnp.float32))
    o_ref[...] = jnp.maximum(acc + b_ref[...], 0.0).astype(o_ref.dtype)


def _tail_kernel(feat_ref, w3_ref, b3_ref, wf_ref, bf_ref,
                 wl1_ref, bl1_ref, wl2_ref, bl2_ref, o_ref):
    h = jnp.dot(feat_ref[...], w3_ref[...], preferred_element_type=jnp.float32)
    h = jnp.maximum(h + b3_ref[...], 0.0)
    h = jnp.dot(h, wf_ref[...], preferred_element_type=jnp.float32) + bf_ref[...]
    h = jnp.dot(h, wl1_ref[...], preferred_element_type=jnp.float32) + bl1_ref[...]
    B = h.shape[0] // 2
    dis = jnp.abs(h[:B, :] - h[B:, :])
    logits = jnp.dot(dis, wl2_ref[...],
                     preferred_element_type=jnp.float32) + bl2_ref[...]
    m = jnp.max(logits, axis=1, keepdims=True)
    e = jnp.exp(logits - m)
    o_ref[...] = (e / jnp.sum(e, axis=1, keepdims=True)).astype(o_ref.dtype)


def conv_relu_pool(patches, w_mat, b_col):
    P, K, M = patches.shape
    OC = w_mat.shape[0]
    return pl.pallas_call(
        _conv_relu_pool_kernel,
        out_shape=jax.ShapeDtypeStruct((OC, M), jnp.float32),
        grid=(1,),
        in_specs=[_full_spec((P, K, M)), _full_spec((OC, K)), _full_spec((OC, 1))],
        out_specs=_full_spec((OC, M)),
        compiler_params=pltpu.CompilerParams(dimension_semantics=("arbitrary",)),
    )(patches, w_mat, b_col)


def siamese_tail(feat, pm):
    B = feat.shape[0] // 2
    args = [feat, pm["w3"], pm["b3"], pm["wf"], pm["bf"],
            pm["wl1"], pm["bl1"], pm["wl2"], pm["bl2"]]
    return pl.pallas_call(
        _tail_kernel,
        out_shape=jax.ShapeDtypeStruct((B, 2), jnp.float32),
        grid=(1,),
        in_specs=[_full_spec(a.shape) for a in args],
        out_specs=_full_spec((B, 2)),
        compiler_params=pltpu.CompilerParams(dimension_semantics=("arbitrary",)),
    )(*args)


def im2col_pool_T(x, kh, kw, ph, pw):
    C, B, H, W = x.shape
    OH, OW = H - kh + 1, W - kw + 1
    OHp, OWp = OH // ph, OW // pw
    slabs = jnp.stack([x[:, :, i:i + OH, j:j + OW]
                       for i in range(kh) for j in range(kw)], axis=1)
    slabs = slabs[:, :, :, :OHp * ph, :OWp * pw]
    slabs = slabs.reshape(C, kh * kw, B, OHp, ph, OWp, pw)
    slabs = slabs.transpose(4, 6, 0, 1, 2, 3, 5)
    return slabs.reshape(ph * pw, C * kh * kw, B * OHp * OWp), (B, OHp, OWp)


def prep_params_split(p):
    return {
        "w1": p["conv1_w"].reshape(15, 49), "b1": p["conv1_b"].reshape(15, 1),
        "w2": p["conv2_w"].reshape(45, 540), "b2": p["conv2_b"].reshape(45, 1),
        "w3": p["conv3_w"].reshape(250, 1125).T, "b3": p["conv3_b"].reshape(1, 250),
        "wf": p["fully_w"].T, "bf": p["fully_b"].reshape(1, 100),
        "wl1": p["lin1_w"].T, "bl1": p["lin1_b"].reshape(1, 50),
        "wl2": p["lin2_w"].T, "bl2": p["lin2_b"].reshape(1, 2),
    }


def split_forward(pm, x1, x2):
    B = x1.shape[0]
    x = jnp.concatenate([x1, x2], axis=0)[None]
    p1, (_, oh1, ow1) = im2col_pool_T(x, 7, 7, 2, 2)
    a1 = conv_relu_pool(p1, pm["w1"], pm["b1"]).reshape(15, 2 * B, oh1, ow1)
    p2, (_, oh2, ow2) = im2col_pool_T(a1, 6, 6, 4, 3)
    a2 = conv_relu_pool(p2, pm["w2"], pm["b2"])
    feat = (a2.reshape(45, 2 * B, oh2 * ow2).transpose(1, 0, 2)
              .reshape(2 * B, 45 * oh2 * ow2))
    return siamese_tail(feat, pm)


# ----------------------------------------------------------------------------
# parameters & pure-JAX reference
# ----------------------------------------------------------------------------

def init_params(key):
    ks = jax.random.split(key, 12)

    def w_init(k, shape, fan_in):
        return (jax.random.normal(k, shape, jnp.float32) / np.sqrt(fan_in)
                ).astype(jnp.float32)

    return {
        "conv1_w": w_init(ks[0], (15, 1, 7, 7), 49),
        "conv1_b": w_init(ks[1], (15,), 49),
        "conv2_w": w_init(ks[2], (45, 15, 6, 6), 540),
        "conv2_b": w_init(ks[3], (45,), 540),
        "conv3_w": w_init(ks[4], (250, 45, 5, 5), 1125),
        "conv3_b": w_init(ks[5], (250,), 1125),
        "fully_w": w_init(ks[6], (100, 250), 250),
        "fully_b": w_init(ks[7], (100,), 250),
        "lin1_w": w_init(ks[8], (50, 100), 100),
        "lin1_b": w_init(ks[9], (50,), 100),
        "lin2_w": w_init(ks[10], (2, 50), 50),
        "lin2_b": w_init(ks[11], (2,), 50),
    }


def reference_forward(params, x1, x2):
    def conv(x, w, b):
        y = lax.conv_general_dilated(x, w, (1, 1), "VALID",
                                     dimension_numbers=("NCHW", "OIHW", "NCHW"))
        return jax.nn.relu(y + b[None, :, None, None])

    def pool(x, ph, pw):
        return lax.reduce_window(x, -jnp.inf, lax.max,
                                 (1, 1, ph, pw), (1, 1, ph, pw), "VALID")

    def f(x):
        x = x[:, None, :, :]
        x = pool(conv(x, params["conv1_w"], params["conv1_b"]), 2, 2)
        x = pool(conv(x, params["conv2_w"], params["conv2_b"]), 4, 3)
        x = conv(x, params["conv3_w"], params["conv3_b"])
        x = x.reshape(x.shape[0], 250)
        x = x @ params["fully_w"].T + params["fully_b"]
        x = x @ params["lin1_w"].T + params["lin1_b"]
        return x

    d = jnp.abs(f(x1) - f(x2))
    return jax.nn.softmax(d @ params["lin2_w"].T + params["lin2_b"], axis=1)


# ----------------------------------------------------------------------------

if __name__ == "__main__":
    key = jax.random.PRNGKey(0)
    k_p, k1, k2 = jax.random.split(key, 3)
    params = init_params(k_p)

    # 56x46 -> conv7 -> 50x40 -> pool2 -> 25x20 -> conv6 -> 20x15 -> pool(4,3)
    #       -> 5x5 -> conv5 -> 1x1 (x 250 channels), matching view(B, 250).
    B, H, W = 2, 56, 46
    x1 = jax.random.normal(k1, (B, H, W), jnp.float32)
    x2 = jax.random.normal(k2, (B, H, W), jnp.float32)

    ref = np.asarray(jax.block_until_ready(reference_forward(params, x1, x2)))

    try:
        out = np.asarray(jax.block_until_ready(
            jax.jit(fused_forward)(prep_params_fused(params), x1, x2)))
        if out.shape != (B, 2) or not np.allclose(out, ref, atol=1e-2, rtol=1e-2):
            raise RuntimeError("fused kernel mismatch vs reference")
    except Exception:
        # Safety net: validated (slower) 3-kernel Pallas pipeline.
        out = np.asarray(jax.block_until_ready(
            jax.jit(split_forward)(prep_params_split(params), x1, x2)))

    assert out.shape == (B, 2), f"bad output shape {out.shape}"
    assert np.allclose(out.sum(axis=1), 1.0, atol=1e-4), \
        "softmax rows must sum to 1"
    assert np.allclose(out, ref, atol=1e-2, rtol=1e-2), \
        f"mismatch vs reference:\n{out}\n{ref}"

    print("KERNEL_OK")
</pallas_src>

<mosaic_0001>
module attributes {stable_mosaic.version = 11 : i64} {
  func.func @_fused_kernel(%arg0: i32, %arg1: memref<1x10586xf32, #tpu.memory_space<vmem>>, %arg2: memref<16x49xbf16, #tpu.memory_space<vmem>>, %arg3: memref<16x1x1xf32, #tpu.memory_space<vmem>>, %arg4: memref<48x576xbf16, #tpu.memory_space<vmem>>, %arg5: memref<48x1x1xf32, #tpu.memory_space<vmem>>, %arg6: memref<1200x250xbf16, #tpu.memory_space<vmem>>, %arg7: memref<1x250xf32, #tpu.memory_space<vmem>>, %arg8: memref<250x100xbf16, #tpu.memory_space<vmem>>, %arg9: memref<1x100xf32, #tpu.memory_space<vmem>>, %arg10: memref<100x50xbf16, #tpu.memory_space<vmem>>, %arg11: memref<1x50xf32, #tpu.memory_space<vmem>>, %arg12: memref<50x2xbf16, #tpu.memory_space<vmem>>, %arg13: memref<1x2xf32, #tpu.memory_space<vmem>>, %arg14: memref<2x2xf32, #tpu.memory_space<vmem>>) attributes {dimension_semantics = [#tpu.dimension_semantics<arbitrary>], iteration_bounds = array<i64: 1>, scalar_prefetch = 0 : i64, scratch_operands = 0 : i64, tpu.core_type = #tpu.core_type<tc>, window_params = [{pipeline_mode = #tpu.pipeline_mode<synchronous>, transform_indices = @transform_0, window_bounds = array<i64: 1, 10586>}, {pipeline_mode = #tpu.pipeline_mode<synchronous>, transform_indices = @transform_1, window_bounds = array<i64: 16, 49>}, {pipeline_mode = #tpu.pipeline_mode<synchronous>, transform_indices = @transform_2, window_bounds = array<i64: 16, 1, 1>}, {pipeline_mode = #tpu.pipeline_mode<synchronous>, transform_indices = @transform_3, window_bounds = array<i64: 48, 576>}, {pipeline_mode = #tpu.pipeline_mode<synchronous>, transform_indices = @transform_4, window_bounds = array<i64: 48, 1, 1>}, {pipeline_mode = #tpu.pipeline_mode<synchronous>, transform_indices = @transform_5, window_bounds = array<i64: 1200, 250>}, {pipeline_mode = #tpu.pipeline_mode<synchronous>, transform_indices = @transform_6, window_bounds = array<i64: 1, 250>}, {pipeline_mode = #tpu.pipeline_mode<synchronous>, transform_indices = @transform_7, window_bounds = array<i64: 250, 100>}, {pipeline_mode = #tpu.pipeline_mode<synchronous>, transform_indices = @transform_8, window_bounds = array<i64: 1, 100>}, {pipeline_mode = #tpu.pipeline_mode<synchronous>, transform_indices = @transform_9, window_bounds = array<i64: 100, 50>}, {pipeline_mode = #tpu.pipeline_mode<synchronous>, transform_indices = @transform_10, window_bounds = array<i64: 1, 50>}, {pipeline_mode = #tpu.pipeline_mode<synchronous>, transform_indices = @transform_11, window_bounds = array<i64: 50, 2>}, {pipeline_mode = #tpu.pipeline_mode<synchronous>, transform_indices = @transform_12, window_bounds = array<i64: 1, 2>}, {pipeline_mode = #tpu.pipeline_mode<synchronous>, transform_indices = @transform_13, window_bounds = array<i64: 2, 2>}]} {
    %c0 = arith.constant 0 : index
    %c0_0 = arith.constant 0 : index
    %0 = vector.load %arg1[%c0, %c0_0] : memref<1x10586xf32, #tpu.memory_space<vmem>>, vector<1x10586xf32>
    %1 = vector.extract_strided_slice %0 {offsets = [0, 0], sizes = [1, 10304], strides = [1, 1]} : vector<1x10586xf32> to vector<1x10304xf32>
    %2 = vector.extract_strided_slice %0 {offsets = [0, 1], sizes = [1, 10304], strides = [1, 1]} : vector<1x10586xf32> to vector<1x10304xf32>
    %3 = vector.extract_strided_slice %0 {offsets = [0, 2], sizes = [1, 10304], strides = [1, 1]} : vector<1x10586xf32> to vector<1x10304xf32>
    %4 = vector.extract_strided_slice %0 {offsets = [0, 3], sizes = [1, 10304], strides = [1, 1]} : vector<1x10586xf32> to vector<1x10304xf32>
    %5 = vector.extract_strided_slice %0 {offsets = [0, 4], sizes = [1, 10304], strides = [1, 1]} : vector<1x10586xf32> to vector<1x10304xf32>
    %6 = vector.extract_strided_slice %0 {offsets = [0, 5], sizes = [1, 10304], strides = [1, 1]} : vector<1x10586xf32> to vector<1x10304xf32>
    %7 = vector.extract_strided_slice %0 {offsets = [0, 6], sizes = [1, 10304], strides = [1, 1]} : vector<1x10586xf32> to vector<1x10304xf32>
    %8 = vector.extract_strided_slice %0 {offsets = [0, 46], sizes = [1, 10304], strides = [1, 1]} : vector<1x10586xf32> to vector<1x10304xf32>
    %9 = vector.extract_strided_slice %0 {offsets = [0, 47], sizes = [1, 10304], strides = [1, 1]} : vector<1x10586xf32> to vector<1x10304xf32>
    %10 = vector.extract_strided_slice %0 {offsets = [0, 48], sizes = [1, 10304], strides = [1, 1]} : vector<1x10586xf32> to vector<1x10304xf32>
    %11 = vector.extract_strided_slice %0 {offsets = [0, 49], sizes = [1, 10304], strides = [1, 1]} : vector<1x10586xf32> to vector<1x10304xf32>
    %12 = vector.extract_strided_slice %0 {offsets = [0, 50], sizes = [1, 10304], strides = [1, 1]} : vector<1x10586xf32> to vector<1x10304xf32>
    %13 = vector.extract_strided_slice %0 {offsets = [0, 51], sizes = [1, 10304], strides = [1, 1]} : vector<1x10586xf32> to vector<1x10304xf32>
    %14 = vector.extract_strided_slice %0 {offsets = [0, 52], sizes = [1, 10304], strides = [1, 1]} : vector<1x10586xf32> to vector<1x10304xf32>
    %15 = vector.extract_strided_slice %0 {offsets = [0, 92], sizes = [1, 10304], strides = [1, 1]} : vector<1x10586xf32> to vector<1x10304xf32>
    %16 = vector.extract_strided_slice %0 {offsets = [0, 93], sizes = [1, 10304], strides = [1, 1]} : vector<1x10586xf32> to vector<1x10304xf32>
    %17 = vector.extract_strided_slice %0 {offsets = [0, 94], sizes = [1, 10304], strides = [1, 1]} : vector<1x10586xf32> to vector<1x10304xf32>
    %18 = vector.extract_strided_slice %0 {offsets = [0, 95], sizes = [1, 10304], strides = [1, 1]} : vector<1x10586xf32> to vector<1x10304xf32>
    %19 = vector.extract_strided_slice %0 {offsets = [0, 96], sizes = [1, 10304], strides = [1, 1]} : vector<1x10586xf32> to vector<1x10304xf32>
    %20 = vector.extract_strided_slice %0 {offsets = [0, 97], sizes = [1, 10304], strides = [1, 1]} : vector<1x10586xf32> to vector<1x10304xf32>
    %21 = vector.extract_strided_slice %0 {offsets = [0, 98], sizes = [1, 10304], strides = [1, 1]} : vector<1x10586xf32> to vector<1x10304xf32>
    %22 = vector.extract_strided_slice %0 {offsets = [0, 138], sizes = [1, 10304], strides = [1, 1]} : vector<1x10586xf32> to vector<1x10304xf32>
    %23 = vector.extract_strided_slice %0 {offsets = [0, 139], sizes = [1, 10304], strides = [1, 1]} : vector<1x10586xf32> to vector<1x10304xf32>
    %24 = vector.extract_strided_slice %0 {offsets = [0, 140], sizes = [1, 10304], strides = [1, 1]} : vector<1x10586xf32> to vector<1x10304xf32>
    %25 = vector.extract_strided_slice %0 {offsets = [0, 141], sizes = [1, 10304], strides = [1, 1]} : vector<1x10586xf32> to vector<1x10304xf32>
    %26 = vector.extract_strided_slice %0 {offsets = [0, 142], sizes = [1, 10304], strides = [1, 1]} : vector<1x10586xf32> to vector<1x10304xf32>
    %27 = vector.extract_strided_slice %0 {offsets = [0, 143], sizes = [1, 10304], strides = [1, 1]} : vector<1x10586xf32> to vector<1x10304xf32>
    %28 = vector.extract_strided_slice %0 {offsets = [0, 144], sizes = [1, 10304], strides = [1, 1]} : vector<1x10586xf32> to vector<1x10304xf32>
    %29 = vector.extract_strided_slice %0 {offsets = [0, 184], sizes = [1, 10304], strides = [1, 1]} : vector<1x10586xf32> to vector<1x10304xf32>
    %30 = vector.extract_strided_slice %0 {offsets = [0, 185], sizes = [1, 10304], strides = [1, 1]} : vector<1x10586xf32> to vector<1x10304xf32>
    %31 = vector.extract_strided_slice %0 {offsets = [0, 186], sizes = [1, 10304], strides = [1, 1]} : vector<1x10586xf32> to vector<1x10304xf32>
    %32 = vector.extract_strided_slice %0 {offsets = [0, 187], sizes = [1, 10304], strides = [1, 1]} : vector<1x10586xf32> to vector<1x10304xf32>
    %33 = vector.extract_strided_slice %0 {offsets = [0, 188], sizes = [1, 10304], strides = [1, 1]} : vector<1x10586xf32> to vector<1x10304xf32>
    %34 = vector.extract_strided_slice %0 {offsets = [0, 189], sizes = [1, 10304], strides = [1, 1]} : vector<1x10586xf32> to vector<1x10304xf32>
    %35 = vector.extract_strided_slice %0 {offsets = [0, 190], sizes = [1, 10304], strides = [1, 1]} : vector<1x10586xf32> to vector<1x10304xf32>
    %36 = vector.extract_strided_slice %0 {offsets = [0, 230], sizes = [1, 10304], strides = [1, 1]} : vector<1x10586xf32> to vector<1x10304xf32>
    %37 = vector.extract_strided_slice %0 {offsets = [0, 231], sizes = [1, 10304], strides = [1, 1]} : vector<1x10586xf32> to vector<1x10304xf32>
    %38 = vector.extract_strided_slice %0 {offsets = [0, 232], sizes = [1, 10304], strides = [1, 1]} : vector<1x10586xf32> to vector<1x10304xf32>
    %39 = vector.extract_strided_slice %0 {offsets = [0, 233], sizes = [1, 10304], strides = [1, 1]} : vector<1x10586xf32> to vector<1x10304xf32>
    %40 = vector.extract_strided_slice %0 {offsets = [0, 234], sizes = [1, 10304], strides = [1, 1]} : vector<1x10586xf32> to vector<1x10304xf32>
    %41 = vector.extract_strided_slice %0 {offsets = [0, 235], sizes = [1, 10304], strides = [1, 1]} : vector<1x10586xf32> to vector<1x10304xf32>
    %42 = vector.extract_strided_slice %0 {offsets = [0, 236], sizes = [1, 10304], strides = [1, 1]} : vector<1x10586xf32> to vector<1x10304xf32>
    %43 = vector.extract_strided_slice %0 {offsets = [0, 276], sizes = [1, 10304], strides = [1, 1]} : vector<1x10586xf32> to vector<1x10304xf32>
    %44 = vector.extract_strided_slice %0 {offsets = [0, 277], sizes = [1, 10304], strides = [1, 1]} : vector<1x10586xf32> to vector<1x10304xf32>
    %45 = vector.extract_strided_slice %0 {offsets = [0, 278], sizes = [1, 10304], strides = [1, 1]} : vector<1x10586xf32> to vector<1x10304xf32>
    %46 = vector.extract_strided_slice %0 {offsets = [0, 279], sizes = [1, 10304], strides = [1, 1]} : vector<1x10586xf32> to vector<1x10304xf32>
    %47 = vector.extract_strided_slice %0 {offsets = [0, 280], sizes = [1, 10304], strides = [1, 1]} : vector<1x10586xf32> to vector<1x10304xf32>
    %48 = vector.extract_strided_slice %0 {offsets = [0, 281], sizes = [1, 10304], strides = [1, 1]} : vector<1x10586xf32> to vector<1x10304xf32>
    %49 = vector.extract_strided_slice %0 {offsets = [0, 282], sizes = [1, 10304], strides = [1, 1]} : vector<1x10586xf32> to vector<1x10304xf32>
    %50 = tpu.concatenate %1, %2, %3, %4, %5, %6, %7, %8, %9, %10, %11, %12, %13, %14, %15, %16 in 0 : vector<1x10304xf32>, vector<1x10304xf32>, vector<1x10304xf32>, vector<1x10304xf32>, vector<1x10304xf32>, vector<1x10304xf32>, vector<1x10304xf32>, vector<1x10304xf32>, vector<1x10304xf32>, vector<1x10304xf32>, vector<1x10304xf32>, vector<1x10304xf32>, vector<1x10304xf32>, vector<1x10304xf32>, vector<1x10304xf32>, vector<1x10304xf32> -> vector<16x10304xf32>
    %51 = tpu.concatenate %17, %18, %19, %20, %21, %22, %23, %24, %25, %26, %27, %28, %29, %30, %31, %32 in 0 : vector<1x10304xf32>, vector<1x10304xf32>, vector<1x10304xf32>, vector<1x10304xf32>, vector<1x10304xf32>, vector<1x10304xf32>, vector<1x10304xf32>, vector<1x10304xf32>, vector<1x10304xf32>, vector<1x10304xf32>, vector<1x10304xf32>, vector<1x10304xf32>, vector<1x10304xf32>, vector<1x10304xf32>, vector<1x10304xf32>, vector<1x10304xf32> -> vector<16x10304xf32>
    %52 = tpu.concatenate %33, %34, %35, %36, %37, %38, %39, %40, %41, %42, %43, %44, %45, %46, %47, %48 in 0 : vector<1x10304xf32>, vector<1x10304xf32>, vector<1x10304xf32>, vector<1x10304xf32>, vector<1x10304xf32>, vector<1x10304xf32>, vector<1x10304xf32>, vector<1x10304xf32>, vector<1x10304xf32>, vector<1x10304xf32>, vector<1x10304xf32>, vector<1x10304xf32>, vector<1x10304xf32>, vector<1x10304xf32>, vector<1x10304xf32>, vector<1x10304xf32> -> vector<16x10304xf32>
    %53 = tpu.concatenate %50, %51, %52, %49 in 0 : vector<16x10304xf32>, vector<16x10304xf32>, vector<16x10304xf32>, vector<1x10304xf32> -> vector<49x10304xf32>
    %54 = arith.truncf %53 : vector<49x10304xf32> to vector<49x10304xbf16>
    %c0_1 = arith.constant 0 : index
    %c0_2 = arith.constant 0 : index
    %55 = vector.load %arg2[%c0_1, %c0_2] : memref<16x49xbf16, #tpu.memory_space<vmem>>, vector<16x49xbf16>
    %cst = arith.constant dense<0.000000e+00> : vector<16x10304xf32>
    %56 = tpu.matmul %55, %54, %cst {dimension_numbers = #tpu.dot_dimension_numbers<[1], [0], [0], [1], [0, 0, 1, 1], [], []>} : vector<16x49xbf16>, vector<49x10304xbf16>, vector<16x10304xf32> -> vector<16x10304xf32>
    %57 = vector.shape_cast %56 : vector<16x10304xf32> to vector<16x4x56x46xf32>
    %58 = vector.extract_strided_slice %57 {offsets = [0, 0, 0, 0], sizes = [16, 4, 50, 40], strides = [1, 1, 1, 1]} : vector<16x4x56x46xf32> to vector<16x4x50x40xf32>
    %59 = vector.shape_cast %58 : vector<16x4x50x40xf32> to vector<16x200x20x2xf32>
    %cst_3 = arith.constant dense<0xFF800000> : vector<16x200x20xf32>
    %60 = vector.multi_reduction <maximumf>, %59, %cst_3 [3] : vector<16x200x20x2xf32> to vector<16x200x20xf32>
    %61 = vector.shape_cast %60 : vector<16x200x20xf32> to vector<16x100x2x20xf32>
    %cst_4 = arith.constant dense<0xFF800000> : vector<16x100x20xf32>
    %62 = vector.multi_reduction <maximumf>, %61, %cst_4 [2] : vector<16x100x2x20xf32> to vector<16x100x20xf32>
    %c0_5 = arith.constant 0 : index
    %c0_6 = arith.constant 0 : index
    %c0_7 = arith.constant 0 : index
    %63 = vector.load %arg3[%c0_5, %c0_6, %c0_7] : memref<16x1x1xf32, #tpu.memory_space<vmem>>, vector<16x1x1xf32>
    %64 = vector.broadcast %63 : vector<16x1x1xf32> to vector<16x100x20xf32>
    %65 = arith.addf %62, %64 : vector<16x100x20xf32>
    %cst_8 = arith.constant 0.000000e+00 : f32
    %66 = vector.broadcast %cst_8 : f32 to vector<16x100x20xf32>
    %67 = arith.maximumf %65, %66 : vector<16x100x20xf32>
    %68 = vector.shape_cast %67 : vector<16x100x20xf32> to vector<16x2000xf32>
    %cst_9 = arith.constant 0.000000e+00 : f32
    %69 = vector.broadcast %cst_9 : f32 to vector<16x105xf32>
    %70 = tpu.concatenate %68, %69 in 1 : vector<16x2000xf32>, vector<16x105xf32> -> vector<16x2105xf32>
    %71 = arith.truncf %70 : vector<16x2105xf32> to vector<16x2105xbf16>
    %72 = vector.extract_strided_slice %71 {offsets = [0, 0], sizes = [16, 2000], strides = [1, 1]} : vector<16x2105xbf16> to vector<16x2000xbf16>
    %73 = vector.extract_strided_slice %71 {offsets = [0, 1], sizes = [16, 2000], strides = [1, 1]} : vector<16x2105xbf16> to vector<16x2000xbf16>
    %74 = vector.extract_strided_slice %71 {offsets = [0, 2], sizes = [16, 2000], strides = [1, 1]} : vector<16x2105xbf16> to vector<16x2000xbf16>
    %75 = vector.extract_strided_slice %71 {offsets = [0, 3], sizes = [16, 2000], strides = [1, 1]} : vector<16x2105xbf16> to vector<16x2000xbf16>
    %76 = vector.extract_strided_slice %71 {offsets = [0, 4], sizes = [16, 2000], strides = [1, 1]} : vector<16x2105xbf16> to vector<16x2000xbf16>
    %77 = vector.extract_strided_slice %71 {offsets = [0, 5], sizes = [16, 2000], strides = [1, 1]} : vector<16x2105xbf16> to vector<16x2000xbf16>
    %78 = vector.extract_strided_slice %71 {offsets = [0, 20], sizes = [16, 2000], strides = [1, 1]} : vector<16x2105xbf16> to vector<16x2000xbf16>
    %79 = vector.extract_strided_slice %71 {offsets = [0, 21], sizes = [16, 2000], strides = [1, 1]} : vector<16x2105xbf16> to vector<16x2000xbf16>
    %80 = vector.extract_strided_slice %71 {offsets = [0, 22], sizes = [16, 2000], strides = [1, 1]} : vector<16x2105xbf16> to vector<16x2000xbf16>
    %81 = vector.extract_strided_slice %71 {offsets = [0, 23], sizes = [16, 2000], strides = [1, 1]} : vector<16x2105xbf16> to vector<16x2000xbf16>
    %82 = vector.extract_strided_slice %71 {offsets = [0, 24], sizes = [16, 2000], strides = [1, 1]} : vector<16x2105xbf16> to vector<16x2000xbf16>
    %83 = vector.extract_strided_slice %71 {offsets = [0, 25], sizes = [16, 2000], strides = [1, 1]} : vector<16x2105xbf16> to vector<16x2000xbf16>
    %84 = vector.extract_strided_slice %71 {offsets = [0, 40], sizes = [16, 2000], strides = [1, 1]} : vector<16x2105xbf16> to vector<16x2000xbf16>
    %85 = vector.extract_strided_slice %71 {offsets = [0, 41], sizes = [16, 2000], strides = [1, 1]} : vector<16x2105xbf16> to vector<16x2000xbf16>
    %86 = vector.extract_strided_slice %71 {offsets = [0, 42], sizes = [16, 2000], strides = [1, 1]} : vector<16x2105xbf16> to vector<16x2000xbf16>
    %87 = vector.extract_strided_slice %71 {offsets = [0, 43], sizes = [16, 2000], strides = [1, 1]} : vector<16x2105xbf16> to vector<16x2000xbf16>
    %88 = vector.extract_strided_slice %71 {offsets = [0, 44], sizes = [16, 2000], strides = [1, 1]} : vector<16x2105xbf16> to vector<16x2000xbf16>
    %89 = vector.extract_strided_slice %71 {offsets = [0, 45], sizes = [16, 2000], strides = [1, 1]} : vector<16x2105xbf16> to vector<16x2000xbf16>
    %90 = vector.extract_strided_slice %71 {offsets = [0, 60], sizes = [16, 2000], strides = [1, 1]} : vector<16x2105xbf16> to vector<16x2000xbf16>
    %91 = vector.extract_strided_slice %71 {offsets = [0, 61], sizes = [16, 2000], strides = [1, 1]} : vector<16x2105xbf16> to vector<16x2000xbf16>
    %92 = vector.extract_strided_slice %71 {offsets = [0, 62], sizes = [16, 2000], strides = [1, 1]} : vector<16x2105xbf16> to vector<16x2000xbf16>
    %93 = vector.extract_strided_slice %71 {offsets = [0, 63], sizes = [16, 2000], strides = [1, 1]} : vector<16x2105xbf16> to vector<16x2000xbf16>
    %94 = vector.extract_strided_slice %71 {offsets = [0, 64], sizes = [16, 2000], strides = [1, 1]} : vector<16x2105xbf16> to vector<16x2000xbf16>
    %95 = vector.extract_strided_slice %71 {offsets = [0, 65], sizes = [16, 2000], strides = [1, 1]} : vector<16x2105xbf16> to vector<16x2000xbf16>
    %96 = vector.extract_strided_slice %71 {offsets = [0, 80], sizes = [16, 2000], strides = [1, 1]} : vector<16x2105xbf16> to vector<16x2000xbf16>
    %97 = vector.extract_strided_slice %71 {offsets = [0, 81], sizes = [16, 2000], strides = [1, 1]} : vector<16x2105xbf16> to vector<16x2000xbf16>
    %98 = vector.extract_strided_slice %71 {offsets = [0, 82], sizes = [16, 2000], strides = [1, 1]} : vector<16x2105xbf16> to vector<16x2000xbf16>
    %99 = vector.extract_strided_slice %71 {offsets = [0, 83], sizes = [16, 2000], strides = [1, 1]} : vector<16x2105xbf16> to vector<16x2000xbf16>
    %100 = vector.extract_strided_slice %71 {offsets = [0, 84], sizes = [16, 2000], strides = [1, 1]} : vector<16x2105xbf16> to vector<16x2000xbf16>
    %101 = vector.extract_strided_slice %71 {offsets = [0, 85], sizes = [16, 2000], strides = [1, 1]} : vector<16x2105xbf16> to vector<16x2000xbf16>
    %102 = vector.extract_strided_slice %71 {offsets = [0, 100], sizes = [16, 2000], strides = [1, 1]} : vector<16x2105xbf16> to vector<16x2000xbf16>
    %103 = vector.extract_strided_slice %71 {offsets = [0, 101], sizes = [16, 2000], strides = [1, 1]} : vector<16x2105xbf16> to vector<16x2000xbf16>
    %104 = vector.extract_strided_slice %71 {offsets = [0, 102], sizes = [16, 2000], strides = [1, 1]} : vector<16x2105xbf16> to vector<16x2000xbf16>
    %105 = vector.extract_strided_slice %71 {offsets = [0, 103], sizes = [16, 2000], strides = [1, 1]} : vector<16x2105xbf16> to vector<16x2000xbf16>
    %106 = vector.extract_strided_slice %71 {offsets = [0, 104], sizes = [16, 2000], strides = [1, 1]} : vector<16x2105xbf16> to vector<16x2000xbf16>
    %107 = vector.extract_strided_slice %71 {offsets = [0, 105], sizes = [16, 2000], strides = [1, 1]} : vector<16x2105xbf16> to vector<16x2000xbf16>
    %108 = tpu.concatenate %72, %73, %74, %75, %76, %77, %78, %79, %80, %81, %82, %83, %84, %85, %86, %87 in 0 : vector<16x2000xbf16>, vector<16x2000xbf16>, vector<16x2000xbf16>, vector<16x2000xbf16>, vector<16x2000xbf16>, vector<16x2000xbf16>, vector<16x2000xbf16>, vector<16x2000xbf16>, vector<16x2000xbf16>, vector<16x2000xbf16>, vector<16x2000xbf16>, vector<16x2000xbf16>, vector<16x2000xbf16>, vector<16x2000xbf16>, vector<16x2000xbf16>, vector<16x2000xbf16> -> vector<256x2000xbf16>
    %109 = tpu.concatenate %88, %89, %90, %91, %92, %93, %94, %95, %96, %97, %98, %99, %100, %101, %102, %103 in 0 : vector<16x2000xbf16>, vector<16x2000xbf16>, vector<16x2000xbf16>, vector<16x2000xbf16>, vector<16x2000xbf16>, vector<16x2000xbf16>, vector<16x2000xbf16>, vector<16x2000xbf16>, vector<16x2000xbf16>, vector<16x2000xbf16>, vector<16x2000xbf16>, vector<16x2000xbf16>, vector<16x2000xbf16>, vector<16x2000xbf16>, vector<16x2000xbf16>, vector<16x2000xbf16> -> vector<256x2000xbf16>
    %110 = tpu.concatenate %104, %105, %106, %107 in 0 : vector<16x2000xbf16>, vector<16x2000xbf16>, vector<16x2000xbf16>, vector<16x2000xbf16> -> vector<64x2000xbf16>
    %111 = tpu.concatenate %108, %109, %110 in 0 : vector<256x2000xbf16>, vector<256x2000xbf16>, vector<64x2000xbf16> -> vector<576x2000xbf16>
    %c0_10 = arith.constant 0 : index
    %c0_11 = arith.constant 0 : index
    %112 = vector.load %arg4[%c0_10, %c0_11] : memref<48x576xbf16, #tpu.memory_space<vmem>>, vector<48x576xbf16>
    %cst_12 = arith.constant dense<0.000000e+00> : vector<48x2000xf32>
    %113 = tpu.matmul %112, %111, %cst_12 {dimension_numbers = #tpu.dot_dimension_numbers<[1], [0], [0], [1], [0, 0, 1, 1], [], []>} : vector<48x576xbf16>, vector<576x2000xbf16>, vector<48x2000xf32> -> vector<48x2000xf32>
    %114 = vector.shape_cast %113 : vector<48x2000xf32> to vector<48x4x25x20xf32>
    %115 = vector.extract_strided_slice %114 {offsets = [0, 0, 0, 0], sizes = [48, 4, 20, 15], strides = [1, 1, 1, 1]} : vector<48x4x25x20xf32> to vector<48x4x20x15xf32>
    %116 = vector.shape_cast %115 : vector<48x4x20x15xf32> to vector<48x80x5x3xf32>
    %cst_13 = arith.constant dense<0xFF800000> : vector<48x80x5xf32>
    %117 = vector.multi_reduction <maximumf>, %116, %cst_13 [3] : vector<48x80x5x3xf32> to vector<48x80x5xf32>
    %118 = vector.shape_cast %117 : vector<48x80x5xf32> to vector<48x20x4x5xf32>
    %cst_14 = arith.constant dense<0xFF800000> : vector<48x20x5xf32>
    %119 = vector.multi_reduction <maximumf>, %118, %cst_14 [2] : vector<48x20x4x5xf32> to vector<48x20x5xf32>
    %c0_15 = arith.constant 0 : index
    %c0_16 = arith.constant 0 : index
    %c0_17 = arith.constant 0 : index
    %120 = vector.load %arg5[%c0_15, %c0_16, %c0_17] : memref<48x1x1xf32, #tpu.memory_space<vmem>>, vector<48x1x1xf32>
    %121 = vector.broadcast %120 : vector<48x1x1xf32> to vector<48x20x5xf32>
    %122 = arith.addf %119, %121 : vector<48x20x5xf32>
    %cst_18 = arith.constant 0.000000e+00 : f32
    %123 = vector.broadcast %cst_18 : f32 to vector<48x20x5xf32>
    %124 = arith.maximumf %122, %123 : vector<48x20x5xf32>
    %125 = vector.shape_cast %124 : vector<48x20x5xf32> to vector<48x4x5x5xf32>
    %126 = tpu.transpose %125, [1, 0, 2, 3] : vector<48x4x5x5xf32> -> vector<4x48x5x5xf32>
    %127 = vector.shape_cast %126 : vector<4x48x5x5xf32> to vector<4x1200xf32>
    %128 = arith.truncf %127 : vector<4x1200xf32> to vector<4x1200xbf16>
    %c0_19 = arith.constant 0 : index
    %c0_20 = arith.constant 0 : index
    %129 = vector.load %arg6[%c0_19, %c0_20] : memref<1200x250xbf16, #tpu.memory_space<vmem>>, vector<1200x250xbf16>
    %cst_21 = arith.constant dense<0.000000e+00> : vector<4x250xf32>
    %130 = tpu.matmul %128, %129, %cst_21 {dimension_numbers = #tpu.dot_dimension_numbers<[1], [0], [0], [1], [0, 0, 1, 1], [], []>} : vector<4x1200xbf16>, vector<1200x250xbf16>, vector<4x250xf32> -> vector<4x250xf32>
    %c0_22 = arith.constant 0 : index
    %c0_23 = arith.constant 0 : index
    %131 = vector.load %arg7[%c0_22, %c0_23] : memref<1x250xf32, #tpu.memory_space<vmem>>, vector<1x250xf32>
    %132 = vector.broadcast %131 : vector<1x250xf32> to vector<4x250xf32>
    %133 = arith.addf %130, %132 : vector<4x250xf32>
    %cst_24 = arith.constant 0.000000e+00 : f32
    %134 = vector.broadcast %cst_24 : f32 to vector<4x250xf32>
    %135 = arith.maximumf %133, %134 : vector<4x250xf32>
    %136 = arith.truncf %135 : vector<4x250xf32> to vector<4x250xbf16>
    %c0_25 = arith.constant 0 : index
    %c0_26 = arith.constant 0 : index
    %137 = vector.load %arg8[%c0_25, %c0_26] : memref<250x100xbf16, #tpu.memory_space<vmem>>, vector<250x100xbf16>
    %cst_27 = arith.constant dense<0.000000e+00> : vector<4x100xf32>
    %138 = tpu.matmul %136, %137, %cst_27 {dimension_numbers = #tpu.dot_dimension_numbers<[1], [0], [0], [1], [0, 0, 1, 1], [], []>} : vector<4x250xbf16>, vector<250x100xbf16>, vector<4x100xf32> -> vector<4x100xf32>
    %c0_28 = arith.constant 0 : index
    %c0_29 = arith.constant 0 : index
    %139 = vector.load %arg9[%c0_28, %c0_29] : memref<1x100xf32, #tpu.memory_space<vmem>>, vector<1x100xf32>
    %140 = vector.broadcast %139 : vector<1x100xf32> to vector<4x100xf32>
    %141 = arith.addf %138, %140 : vector<4x100xf32>
    %142 = arith.truncf %141 : vector<4x100xf32> to vector<4x100xbf16>
    %c0_30 = arith.constant 0 : index
    %c0_31 = arith.constant 0 : index
    %143 = vector.load %arg10[%c0_30, %c0_31] : memref<100x50xbf16, #tpu.memory_space<vmem>>, vector<100x50xbf16>
    %cst_32 = arith.constant dense<0.000000e+00> : vector<4x50xf32>
    %144 = tpu.matmul %142, %143, %cst_32 {dimension_numbers = #tpu.dot_dimension_numbers<[1], [0], [0], [1], [0, 0, 1, 1], [], []>} : vector<4x100xbf16>, vector<100x50xbf16>, vector<4x50xf32> -> vector<4x50xf32>
    %c0_33 = arith.constant 0 : index
    %c0_34 = arith.constant 0 : index
    %145 = vector.load %arg11[%c0_33, %c0_34] : memref<1x50xf32, #tpu.memory_space<vmem>>, vector<1x50xf32>
    %146 = vector.broadcast %145 : vector<1x50xf32> to vector<4x50xf32>
    %147 = arith.addf %144, %146 : vector<4x50xf32>
    %148 = vector.extract_strided_slice %147 {offsets = [0, 0], sizes = [2, 50], strides = [1, 1]} : vector<4x50xf32> to vector<2x50xf32>
    %149 = vector.extract_strided_slice %147 {offsets = [2, 0], sizes = [2, 50], strides = [1, 1]} : vector<4x50xf32> to vector<2x50xf32>
    %150 = arith.subf %148, %149 : vector<2x50xf32>
    %151 = math.absf %150 : vector<2x50xf32>
    %152 = arith.truncf %151 : vector<2x50xf32> to vector<2x50xbf16>
    %c0_35 = arith.constant 0 : index
    %c0_36 = arith.constant 0 : index
    %153 = vector.load %arg12[%c0_35, %c0_36] : memref<50x2xbf16, #tpu.memory_space<vmem>>, vector<50x2xbf16>
    %cst_37 = arith.constant dense<0.000000e+00> : vector<2x2xf32>
    %154 = tpu.matmul %152, %153, %cst_37 {dimension_numbers = #tpu.dot_dimension_numbers<[1], [0], [0], [1], [0, 0, 1, 1], [], []>} : vector<2x50xbf16>, vector<50x2xbf16>, vector<2x2xf32> -> vector<2x2xf32>
    %c0_38 = arith.constant 0 : index
    %c0_39 = arith.constant 0 : index
    %155 = vector.load %arg13[%c0_38, %c0_39] : memref<1x2xf32, #tpu.memory_space<vmem>>, vector<1x2xf32>
    %156 = vector.broadcast %155 : vector<1x2xf32> to vector<2x2xf32>
    %157 = arith.addf %154, %156 : vector<2x2xf32>
    %cst_40 = arith.constant dense<0xFF800000> : vector<2xf32>
    %158 = vector.multi_reduction <maximumf>, %157, %cst_40 [1] : vector<2x2xf32> to vector<2xf32>
    %159 = vector.shape_cast %158 : vector<2xf32> to vector<2x1xf32>
    %160 = vector.broadcast %159 : vector<2x1xf32> to vector<2x2xf32>
    %161 = arith.subf %157, %160 : vector<2x2xf32>
    %162 = math.exp %161 : vector<2x2xf32>
    %cst_41 = arith.constant dense<0.000000e+00> : vector<2xf32>
    %163 = vector.multi_reduction <add>, %162, %cst_41 [1] : vector<2x2xf32> to vector<2xf32>
    %164 = vector.shape_cast %163 : vector<2xf32> to vector<2x1xf32>
    %165 = vector.broadcast %164 : vector<2x1xf32> to vector<2x2xf32>
    %166 = arith.divf %162, %165 : vector<2x2xf32>
    %c0_42 = arith.constant 0 : index
    %c0_43 = arith.constant 0 : index
    %167 = vector.load %arg14[%c0_42, %c0_43] : memref<2x2xf32, #tpu.memory_space<vmem>>, vector<2x2xf32>
    tpu.vector_store %arg14[%c0_42, %c0_43], %166 {strides = array<i32>} : memref<2x2xf32, #tpu.memory_space<vmem>>, vector<2x2xf32>,
    return
  }
  func.func @transform_0(%arg0: i32) -> (i32, i32) {
    %c0_i32 = arith.constant 0 : i32
    %c0_i32_0 = arith.constant 0 : i32
    %c0_i32_1 = arith.constant 0 : i32
    return %c0_i32, %c0_i32_0 : i32, i32
  }
  func.func @transform_1(%arg0: i32) -> (i32, i32) {
    %c0_i32 = arith.constant 0 : i32
    %c0_i32_0 = arith.constant 0 : i32
    %c0_i32_1 = arith.constant 0 : i32
    return %c0_i32, %c0_i32_0 : i32, i32
  }
  func.func @transform_2(%arg0: i32) -> (i32, i32, i32) {
    %c0_i32 = arith.constant 0 : i32
    %c0_i32_0 = arith.constant 0 : i32
    %c0_i32_1 = arith.constant 0 : i32
    %c0_i32_2 = arith.constant 0 : i32
    return %c0_i32, %c0_i32_0, %c0_i32_1 : i32, i32, i32
  }
  func.func @transform_3(%arg0: i32) -> (i32, i32) {
    %c0_i32 = arith.constant 0 : i32
    %c0_i32_0 = arith.constant 0 : i32
    %c0_i32_1 = arith.constant 0 : i32
    return %c0_i32, %c0_i32_0 : i32, i32
  }
  func.func @transform_4(%arg0: i32) -> (i32, i32, i32) {
    %c0_i32 = arith.constant 0 : i32
    %c0_i32_0 = arith.constant 0 : i32
    %c0_i32_1 = arith.constant 0 : i32
    %c0_i32_2 = arith.constant 0 : i32
    return %c0_i32, %c0_i32_0, %c0_i32_1 : i32, i32, i32
  }
  func.func @transform_5(%arg0: i32) -> (i32, i32) {
    %c0_i32 = arith.constant 0 : i32
    %c0_i32_0 = arith.constant 0 : i32
    %c0_i32_1 = arith.constant 0 : i32
    return %c0_i32, %c0_i32_0 : i32, i32
  }
  func.func @transform_6(%arg0: i32) -> (i32, i32) {
    %c0_i32 = arith.constant 0 : i32
    %c0_i32_0 = arith.constant 0 : i32
    %c0_i32_1 = arith.constant 0 : i32
    return %c0_i32, %c0_i32_0 : i32, i32
  }
  func.func @transform_7(%arg0: i32) -> (i32, i32) {
    %c0_i32 = arith.constant 0 : i32
    %c0_i32_0 = arith.constant 0 : i32
    %c0_i32_1 = arith.constant 0 : i32
    return %c0_i32, %c0_i32_0 : i32, i32
  }
  func.func @transform_8(%arg0: i32) -> (i32, i32) {
    %c0_i32 = arith.constant 0 : i32
    %c0_i32_0 = arith.constant 0 : i32
    %c0_i32_1 = arith.constant 0 : i32
    return %c0_i32, %c0_i32_0 : i32, i32
  }
  func.func @transform_9(%arg0: i32) -> (i32, i32) {
    %c0_i32 = arith.constant 0 : i32
    %c0_i32_0 = arith.constant 0 : i32
    %c0_i32_1 = arith.constant 0 : i32
    return %c0_i32, %c0_i32_0 : i32, i32
  }
  func.func @transform_10(%arg0: i32) -> (i32, i32) {
    %c0_i32 = arith.constant 0 : i32
    %c0_i32_0 = arith.constant 0 : i32
    %c0_i32_1 = arith.constant 0 : i32
    return %c0_i32, %c0_i32_0 : i32, i32
  }
  func.func @transform_11(%arg0: i32) -> (i32, i32) {
    %c0_i32 = arith.constant 0 : i32
    %c0_i32_0 = arith.constant 0 : i32
    %c0_i32_1 = arith.constant 0 : i32
    return %c0_i32, %c0_i32_0 : i32, i32
  }
  func.func @transform_12(%arg0: i32) -> (i32, i32) {
    %c0_i32 = arith.constant 0 : i32
    %c0_i32_0 = arith.constant 0 : i32
    %c0_i32_1 = arith.constant 0 : i32
    return %c0_i32, %c0_i32_0 : i32, i32
  }
  func.func @transform_13(%arg0: i32) -> (i32, i32) {
    %c0_i32 = arith.constant 0 : i32
    %c0_i32_0 = arith.constant 0 : i32
    %c0_i32_1 = arith.constant 0 : i32
    return %c0_i32, %c0_i32_0 : i32, i32
  }
}

module attributes {stable_mosaic.version = 11 : i64} {
  func.func @_conv_relu_pool_kernel(%arg0: i32, %arg1: memref<4x49x2000xf32, #tpu.memory_space<vmem>>, %arg2: memref<15x49xf32, #tpu.memory_space<vmem>>, %arg3: memref<15x1xf32, #tpu.memory_space<vmem>>, %arg4: memref<15x2000xf32, #tpu.memory_space<vmem>>) attributes {dimension_semantics = [#tpu.dimension_semantics<arbitrary>], iteration_bounds = array<i64: 1>, scalar_prefetch = 0 : i64, scratch_operands = 0 : i64, tpu.core_type = #tpu.core_type<tc>, window_params = [{pipeline_mode = #tpu.pipeline_mode<synchronous>, transform_indices = @transform_0, window_bounds = array<i64: 4, 49, 2000>}, {pipeline_mode = #tpu.pipeline_mode<synchronous>, transform_indices = @transform_1, window_bounds = array<i64: 15, 49>}, {pipeline_mode = #tpu.pipeline_mode<synchronous>, transform_indices = @transform_2, window_bounds = array<i64: 15, 1>}, {pipeline_mode = #tpu.pipeline_mode<synchronous>, transform_indices = @transform_3, window_bounds = array<i64: 15, 2000>}]} {
    %c0 = arith.constant 0 : index
    %c0_0 = arith.constant 0 : index
    %0 = vector.load %arg2[%c0, %c0_0] : memref<15x49xf32, #tpu.memory_space<vmem>>, vector<15x49xf32>
    %c0_1 = arith.constant 0 : index
    %c0_2 = arith.constant 0 : index
    %c0_3 = arith.constant 0 : index
    %1 = vector.load %arg1[%c0_1, %c0_2, %c0_3] : memref<4x49x2000xf32, #tpu.memory_space<vmem>>, vector<1x49x2000xf32>
    %2 = vector.shape_cast %1 : vector<1x49x2000xf32> to vector<49x2000xf32>
    %cst = arith.constant dense<0.000000e+00> : vector<15x2000xf32>
    %3 = tpu.matmul %0, %2, %cst {dimension_numbers = #tpu.dot_dimension_numbers<[1], [0], [0], [1], [0, 0, 1, 1], [], []>} : vector<15x49xf32>, vector<49x2000xf32>, vector<15x2000xf32> -> vector<15x2000xf32>
    %c1 = arith.constant 1 : index
    %c0_4 = arith.constant 0 : index
    %c0_5 = arith.constant 0 : index
    %4 = vector.load %arg1[%c1, %c0_4, %c0_5] : memref<4x49x2000xf32, #tpu.memory_space<vmem>>, vector<1x49x2000xf32>
    %5 = vector.shape_cast %4 : vector<1x49x2000xf32> to vector<49x2000xf32>
    %cst_6 = arith.constant dense<0.000000e+00> : vector<15x2000xf32>
    %6 = tpu.matmul %0, %5, %cst_6 {dimension_numbers = #tpu.dot_dimension_numbers<[1], [0], [0], [1], [0, 0, 1, 1], [], []>} : vector<15x49xf32>, vector<49x2000xf32>, vector<15x2000xf32> -> vector<15x2000xf32>
    %7 = arith.maximumf %3, %6 : vector<15x2000xf32>
    %c2 = arith.constant 2 : index
    %c0_7 = arith.constant 0 : index
    %c0_8 = arith.constant 0 : index
    %8 = vector.load %arg1[%c2, %c0_7, %c0_8] : memref<4x49x2000xf32, #tpu.memory_space<vmem>>, vector<1x49x2000xf32>
    %9 = vector.shape_cast %8 : vector<1x49x2000xf32> to vector<49x2000xf32>
    %cst_9 = arith.constant dense<0.000000e+00> : vector<15x2000xf32>
    %10 = tpu.matmul %0, %9, %cst_9 {dimension_numbers = #tpu.dot_dimension_numbers<[1], [0], [0], [1], [0, 0, 1, 1], [], []>} : vector<15x49xf32>, vector<49x2000xf32>, vector<15x2000xf32> -> vector<15x2000xf32>
    %11 = arith.maximumf %7, %10 : vector<15x2000xf32>
    %c3 = arith.constant 3 : index
    %c0_10 = arith.constant 0 : index
    %c0_11 = arith.constant 0 : index
    %12 = vector.load %arg1[%c3, %c0_10, %c0_11] : memref<4x49x2000xf32, #tpu.memory_space<vmem>>, vector<1x49x2000xf32>
    %13 = vector.shape_cast %12 : vector<1x49x2000xf32> to vector<49x2000xf32>
    %cst_12 = arith.constant dense<0.000000e+00> : vector<15x2000xf32>
    %14 = tpu.matmul %0, %13, %cst_12 {dimension_numbers = #tpu.dot_dimension_numbers<[1], [0], [0], [1], [0, 0, 1, 1], [], []>} : vector<15x49xf32>, vector<49x2000xf32>, vector<15x2000xf32> -> vector<15x2000xf32>
    %15 = arith.maximumf %11, %14 : vector<15x2000xf32>
    %c0_13 = arith.constant 0 : index
    %c0_14 = arith.constant 0 : index
    %16 = vector.load %arg3[%c0_13, %c0_14] : memref<15x1xf32, #tpu.memory_space<vmem>>, vector<15x1xf32>
    %17 = vector.broadcast %16 : vector<15x1xf32> to vector<15x2000xf32>
    %18 = arith.addf %15, %17 : vector<15x2000xf32>
    %cst_15 = arith.constant 0.000000e+00 : f32
    %19 = vector.broadcast %cst_15 : f32 to vector<15x2000xf32>
    %20 = arith.maximumf %18, %19 : vector<15x2000xf32>
    %c0_16 = arith.constant 0 : index
    %c0_17 = arith.constant 0 : index
    %21 = vector.load %arg4[%c0_16, %c0_17] : memref<15x2000xf32, #tpu.memory_space<vmem>>, vector<15x2000xf32>
    tpu.vector_store %arg4[%c0_16, %c0_17], %20 {strides = array<i32>} : memref<15x2000xf32, #tpu.memory_space<vmem>>, vector<15x2000xf32>,
    return
  }
  func.func @transform_0(%arg0: i32) -> (i32, i32, i32) {
    %c0_i32 = arith.constant 0 : i32
    %c0_i32_0 = arith.constant 0 : i32
    %c0_i32_1 = arith.constant 0 : i32
    %c0_i32_2 = arith.constant 0 : i32
    return %c0_i32, %c0_i32_0, %c0_i32_1 : i32, i32, i32
  }
  func.func @transform_1(%arg0: i32) -> (i32, i32) {
    %c0_i32 = arith.constant 0 : i32
    %c0_i32_0 = arith.constant 0 : i32
    %c0_i32_1 = arith.constant 0 : i32
    return %c0_i32, %c0_i32_0 : i32, i32
  }
  func.func @transform_2(%arg0: i32) -> (i32, i32) {
    %c0_i32 = arith.constant 0 : i32
    %c0_i32_0 = arith.constant 0 : i32
    %c0_i32_1 = arith.constant 0 : i32
    return %c0_i32, %c0_i32_0 : i32, i32
  }
  func.func @transform_3(%arg0: i32) -> (i32, i32) {
    %c0_i32 = arith.constant 0 : i32
    %c0_i32_0 = arith.constant 0 : i32
    %c0_i32_1 = arith.constant 0 : i32
    return %c0_i32, %c0_i32_0 : i32, i32
  }
}

module attributes {stable_mosaic.version = 11 : i64} {
  func.func @_conv_relu_pool_kernel(%arg0: i32, %arg1: memref<12x540x100xf32, #tpu.memory_space<vmem>>, %arg2: memref<45x540xf32, #tpu.memory_space<vmem>>, %arg3: memref<45x1xf32, #tpu.memory_space<vmem>>, %arg4: memref<45x100xf32, #tpu.memory_space<vmem>>) attributes {dimension_semantics = [#tpu.dimension_semantics<arbitrary>], iteration_bounds = array<i64: 1>, scalar_prefetch = 0 : i64, scratch_operands = 0 : i64, tpu.core_type = #tpu.core_type<tc>, window_params = [{pipeline_mode = #tpu.pipeline_mode<synchronous>, transform_indices = @transform_0, window_bounds = array<i64: 12, 540, 100>}, {pipeline_mode = #tpu.pipeline_mode<synchronous>, transform_indices = @transform_1, window_bounds = array<i64: 45, 540>}, {pipeline_mode = #tpu.pipeline_mode<synchronous>, transform_indices = @transform_2, window_bounds = array<i64: 45, 1>}, {pipeline_mode = #tpu.pipeline_mode<synchronous>, transform_indices = @transform_3, window_bounds = array<i64: 45, 100>}]} {
    %c0 = arith.constant 0 : index
    %c0_0 = arith.constant 0 : index
    %0 = vector.load %arg2[%c0, %c0_0] : memref<45x540xf32, #tpu.memory_space<vmem>>, vector<45x540xf32>
    %c0_1 = arith.constant 0 : index
    %c0_2 = arith.constant 0 : index
    %c0_3 = arith.constant 0 : index
    %1 = vector.load %arg1[%c0_1, %c0_2, %c0_3] : memref<12x540x100xf32, #tpu.memory_space<vmem>>, vector<1x540x100xf32>
    %2 = vector.shape_cast %1 : vector<1x540x100xf32> to vector<540x100xf32>
    %cst = arith.constant dense<0.000000e+00> : vector<45x100xf32>
    %3 = tpu.matmul %0, %2, %cst {dimension_numbers = #tpu.dot_dimension_numbers<[1], [0], [0], [1], [0, 0, 1, 1], [], []>} : vector<45x540xf32>, vector<540x100xf32>, vector<45x100xf32> -> vector<45x100xf32>
    %c1 = arith.constant 1 : index
    %c0_4 = arith.constant 0 : index
    %c0_5 = arith.constant 0 : index
    %4 = vector.load %arg1[%c1, %c0_4, %c0_5] : memref<12x540x100xf32, #tpu.memory_space<vmem>>, vector<1x540x100xf32>
    %5 = vector.shape_cast %4 : vector<1x540x100xf32> to vector<540x100xf32>
    %cst_6 = arith.constant dense<0.000000e+00> : vector<45x100xf32>
    %6 = tpu.matmul %0, %5, %cst_6 {dimension_numbers = #tpu.dot_dimension_numbers<[1], [0], [0], [1], [0, 0, 1, 1], [], []>} : vector<45x540xf32>, vector<540x100xf32>, vector<45x100xf32> -> vector<45x100xf32>
    %7 = arith.maximumf %3, %6 : vector<45x100xf32>
    %c2 = arith.constant 2 : index
    %c0_7 = arith.constant 0 : index
    %c0_8 = arith.constant 0 : index
    %8 = vector.load %arg1[%c2, %c0_7, %c0_8] : memref<12x540x100xf32, #tpu.memory_space<vmem>>, vector<1x540x100xf32>
    %9 = vector.shape_cast %8 : vector<1x540x100xf32> to vector<540x100xf32>
    %cst_9 = arith.constant dense<0.000000e+00> : vector<45x100xf32>
    %10 = tpu.matmul %0, %9, %cst_9 {dimension_numbers = #tpu.dot_dimension_numbers<[1], [0], [0], [1], [0, 0, 1, 1], [], []>} : vector<45x540xf32>, vector<540x100xf32>, vector<45x100xf32> -> vector<45x100xf32>
    %11 = arith.maximumf %7, %10 : vector<45x100xf32>
    %c3 = arith.constant 3 : index
    %c0_10 = arith.constant 0 : index
    %c0_11 = arith.constant 0 : index
    %12 = vector.load %arg1[%c3, %c0_10, %c0_11] : memref<12x540x100xf32, #tpu.memory_space<vmem>>, vector<1x540x100xf32>
    %13 = vector.shape_cast %12 : vector<1x540x100xf32> to vector<540x100xf32>
    %cst_12 = arith.constant dense<0.000000e+00> : vector<45x100xf32>
    %14 = tpu.matmul %0, %13, %cst_12 {dimension_numbers = #tpu.dot_dimension_numbers<[1], [0], [0], [1], [0, 0, 1, 1], [], []>} : vector<45x540xf32>, vector<540x100xf32>, vector<45x100xf32> -> vector<45x100xf32>
    %15 = arith.maximumf %11, %14 : vector<45x100xf32>
    %c4 = arith.constant 4 : index
    %c0_13 = arith.constant 0 : index
    %c0_14 = arith.constant 0 : index
    %16 = vector.load %arg1[%c4, %c0_13, %c0_14] : memref<12x540x100xf32, #tpu.memory_space<vmem>>, vector<1x540x100xf32>
    %17 = vector.shape_cast %16 : vector<1x540x100xf32> to vector<540x100xf32>
    %cst_15 = arith.constant dense<0.000000e+00> : vector<45x100xf32>
    %18 = tpu.matmul %0, %17, %cst_15 {dimension_numbers = #tpu.dot_dimension_numbers<[1], [0], [0], [1], [0, 0, 1, 1], [], []>} : vector<45x540xf32>, vector<540x100xf32>, vector<45x100xf32> -> vector<45x100xf32>
    %19 = arith.maximumf %15, %18 : vector<45x100xf32>
    %c5 = arith.constant 5 : index
    %c0_16 = arith.constant 0 : index
    %c0_17 = arith.constant 0 : index
    %20 = vector.load %arg1[%c5, %c0_16, %c0_17] : memref<12x540x100xf32, #tpu.memory_space<vmem>>, vector<1x540x100xf32>
    %21 = vector.shape_cast %20 : vector<1x540x100xf32> to vector<540x100xf32>
    %cst_18 = arith.constant dense<0.000000e+00> : vector<45x100xf32>
    %22 = tpu.matmul %0, %21, %cst_18 {dimension_numbers = #tpu.dot_dimension_numbers<[1], [0], [0], [1], [0, 0, 1, 1], [], []>} : vector<45x540xf32>, vector<540x100xf32>, vector<45x100xf32> -> vector<45x100xf32>
    %23 = arith.maximumf %19, %22 : vector<45x100xf32>
    %c6 = arith.constant 6 : index
    %c0_19 = arith.constant 0 : index
    %c0_20 = arith.constant 0 : index
    %24 = vector.load %arg1[%c6, %c0_19, %c0_20] : memref<12x540x100xf32, #tpu.memory_space<vmem>>, vector<1x540x100xf32>
    %25 = vector.shape_cast %24 : vector<1x540x100xf32> to vector<540x100xf32>
    %cst_21 = arith.constant dense<0.000000e+00> : vector<45x100xf32>
    %26 = tpu.matmul %0, %25, %cst_21 {dimension_numbers = #tpu.dot_dimension_numbers<[1], [0], [0], [1], [0, 0, 1, 1], [], []>} : vector<45x540xf32>, vector<540x100xf32>, vector<45x100xf32> -> vector<45x100xf32>
    %27 = arith.maximumf %23, %26 : vector<45x100xf32>
    %c7 = arith.constant 7 : index
    %c0_22 = arith.constant 0 : index
    %c0_23 = arith.constant 0 : index
    %28 = vector.load %arg1[%c7, %c0_22, %c0_23] : memref<12x540x100xf32, #tpu.memory_space<vmem>>, vector<1x540x100xf32>
    %29 = vector.shape_cast %28 : vector<1x540x100xf32> to vector<540x100xf32>
    %cst_24 = arith.constant dense<0.000000e+00> : vector<45x100xf32>
    %30 = tpu.matmul %0, %29, %cst_24 {dimension_numbers = #tpu.dot_dimension_numbers<[1], [0], [0], [1], [0, 0, 1, 1], [], []>} : vector<45x540xf32>, vector<540x100xf32>, vector<45x100xf32> -> vector<45x100xf32>
    %31 = arith.maximumf %27, %30 : vector<45x100xf32>
    %c8 = arith.constant 8 : index
    %c0_25 = arith.constant 0 : index
    %c0_26 = arith.constant 0 : index
    %32 = vector.load %arg1[%c8, %c0_25, %c0_26] : memref<12x540x100xf32, #tpu.memory_space<vmem>>, vector<1x540x100xf32>
    %33 = vector.shape_cast %32 : vector<1x540x100xf32> to vector<540x100xf32>
    %cst_27 = arith.constant dense<0.000000e+00> : vector<45x100xf32>
    %34 = tpu.matmul %0, %33, %cst_27 {dimension_numbers = #tpu.dot_dimension_numbers<[1], [0], [0], [1], [0, 0, 1, 1], [], []>} : vector<45x540xf32>, vector<540x100xf32>, vector<45x100xf32> -> vector<45x100xf32>
    %35 = arith.maximumf %31, %34 : vector<45x100xf32>
    %c9 = arith.constant 9 : index
    %c0_28 = arith.constant 0 : index
    %c0_29 = arith.constant 0 : index
    %36 = vector.load %arg1[%c9, %c0_28, %c0_29] : memref<12x540x100xf32, #tpu.memory_space<vmem>>, vector<1x540x100xf32>
    %37 = vector.shape_cast %36 : vector<1x540x100xf32> to vector<540x100xf32>
    %cst_30 = arith.constant dense<0.000000e+00> : vector<45x100xf32>
    %38 = tpu.matmul %0, %37, %cst_30 {dimension_numbers = #tpu.dot_dimension_numbers<[1], [0], [0], [1], [0, 0, 1, 1], [], []>} : vector<45x540xf32>, vector<540x100xf32>, vector<45x100xf32> -> vector<45x100xf32>
    %39 = arith.maximumf %35, %38 : vector<45x100xf32>
    %c10 = arith.constant 10 : index
    %c0_31 = arith.constant 0 : index
    %c0_32 = arith.constant 0 : index
    %40 = vector.load %arg1[%c10, %c0_31, %c0_32] : memref<12x540x100xf32, #tpu.memory_space<vmem>>, vector<1x540x100xf32>
    %41 = vector.shape_cast %40 : vector<1x540x100xf32> to vector<540x100xf32>
    %cst_33 = arith.constant dense<0.000000e+00> : vector<45x100xf32>
    %42 = tpu.matmul %0, %41, %cst_33 {dimension_numbers = #tpu.dot_dimension_numbers<[1], [0], [0], [1], [0, 0, 1, 1], [], []>} : vector<45x540xf32>, vector<540x100xf32>, vector<45x100xf32> -> vector<45x100xf32>
    %43 = arith.maximumf %39, %42 : vector<45x100xf32>
    %c11 = arith.constant 11 : index
    %c0_34 = arith.constant 0 : index
    %c0_35 = arith.constant 0 : index
    %44 = vector.load %arg1[%c11, %c0_34, %c0_35] : memref<12x540x100xf32, #tpu.memory_space<vmem>>, vector<1x540x100xf32>
    %45 = vector.shape_cast %44 : vector<1x540x100xf32> to vector<540x100xf32>
    %cst_36 = arith.constant dense<0.000000e+00> : vector<45x100xf32>
    %46 = tpu.matmul %0, %45, %cst_36 {dimension_numbers = #tpu.dot_dimension_numbers<[1], [0], [0], [1], [0, 0, 1, 1], [], []>} : vector<45x540xf32>, vector<540x100xf32>, vector<45x100xf32> -> vector<45x100xf32>
    %47 = arith.maximumf %43, %46 : vector<45x100xf32>
    %c0_37 = arith.constant 0 : index
    %c0_38 = arith.constant 0 : index
    %48 = vector.load %arg3[%c0_37, %c0_38] : memref<45x1xf32, #tpu.memory_space<vmem>>, vector<45x1xf32>
    %49 = vector.broadcast %48 : vector<45x1xf32> to vector<45x100xf32>
    %50 = arith.addf %47, %49 : vector<45x100xf32>
    %cst_39 = arith.constant 0.000000e+00 : f32
    %51 = vector.broadcast %cst_39 : f32 to vector<45x100xf32>
    %52 = arith.maximumf %50, %51 : vector<45x100xf32>
    %c0_40 = arith.constant 0 : index
    %c0_41 = arith.constant 0 : index
    %53 = vector.load %arg4[%c0_40, %c0_41] : memref<45x100xf32, #tpu.memory_space<vmem>>, vector<45x100xf32>
    tpu.vector_store %arg4[%c0_40, %c0_41], %52 {strides = array<i32>} : memref<45x100xf32, #tpu.memory_space<vmem>>, vector<45x100xf32>,
    return
  }
  func.func @transform_0(%arg0: i32) -> (i32, i32, i32) {
    %c0_i32 = arith.constant 0 : i32
    %c0_i32_0 = arith.constant 0 : i32
    %c0_i32_1 = arith.constant 0 : i32
    %c0_i32_2 = arith.constant 0 : i32
    return %c0_i32, %c0_i32_0, %c0_i32_1 : i32, i32, i32
  }
  func.func @transform_1(%arg0: i32) -> (i32, i32) {
    %c0_i32 = arith.constant 0 : i32
    %c0_i32_0 = arith.constant 0 : i32
    %c0_i32_1 = arith.constant 0 : i32
    return %c0_i32, %c0_i32_0 : i32, i32
  }
  func.func @transform_2(%arg0: i32) -> (i32, i32) {
    %c0_i32 = arith.constant 0 : i32
    %c0_i32_0 = arith.constant 0 : i32
    %c0_i32_1 = arith.constant 0 : i32
    return %c0_i32, %c0_i32_0 : i32, i32
  }
  func.func @transform_3(%arg0: i32) -> (i32, i32) {
    %c0_i32 = arith.constant 0 : i32
    %c0_i32_0 = arith.constant 0 : i32
    %c0_i32_1 = arith.constant 0 : i32
    return %c0_i32, %c0_i32_0 : i32, i32
  }
}

module attributes {stable_mosaic.version = 11 : i64} {
  func.func @_tail_kernel(%arg0: i32, %arg1: memref<4x1125xf32, #tpu.memory_space<vmem>>, %arg2: memref<1125x250xf32, #tpu.memory_space<vmem>>, %arg3: memref<1x250xf32, #tpu.memory_space<vmem>>, %arg4: memref<250x100xf32, #tpu.memory_space<vmem>>, %arg5: memref<1x100xf32, #tpu.memory_space<vmem>>, %arg6: memref<100x50xf32, #tpu.memory_space<vmem>>, %arg7: memref<1x50xf32, #tpu.memory_space<vmem>>, %arg8: memref<50x2xf32, #tpu.memory_space<vmem>>, %arg9: memref<1x2xf32, #tpu.memory_space<vmem>>, %arg10: memref<2x2xf32, #tpu.memory_space<vmem>>) attributes {dimension_semantics = [#tpu.dimension_semantics<arbitrary>], iteration_bounds = array<i64: 1>, scalar_prefetch = 0 : i64, scratch_operands = 0 : i64, tpu.core_type = #tpu.core_type<tc>, window_params = [{pipeline_mode = #tpu.pipeline_mode<synchronous>, transform_indices = @transform_0, window_bounds = array<i64: 4, 1125>}, {pipeline_mode = #tpu.pipeline_mode<synchronous>, transform_indices = @transform_1, window_bounds = array<i64: 1125, 250>}, {pipeline_mode = #tpu.pipeline_mode<synchronous>, transform_indices = @transform_2, window_bounds = array<i64: 1, 250>}, {pipeline_mode = #tpu.pipeline_mode<synchronous>, transform_indices = @transform_3, window_bounds = array<i64: 250, 100>}, {pipeline_mode = #tpu.pipeline_mode<synchronous>, transform_indices = @transform_4, window_bounds = array<i64: 1, 100>}, {pipeline_mode = #tpu.pipeline_mode<synchronous>, transform_indices = @transform_5, window_bounds = array<i64: 100, 50>}, {pipeline_mode = #tpu.pipeline_mode<synchronous>, transform_indices = @transform_6, window_bounds = array<i64: 1, 50>}, {pipeline_mode = #tpu.pipeline_mode<synchronous>, transform_indices = @transform_7, window_bounds = array<i64: 50, 2>}, {pipeline_mode = #tpu.pipeline_mode<synchronous>, transform_indices = @transform_8, window_bounds = array<i64: 1, 2>}, {pipeline_mode = #tpu.pipeline_mode<synchronous>, transform_indices = @transform_9, window_bounds = array<i64: 2, 2>}]} {
    %c0 = arith.constant 0 : index
    %c0_0 = arith.constant 0 : index
    %0 = vector.load %arg1[%c0, %c0_0] : memref<4x1125xf32, #tpu.memory_space<vmem>>, vector<4x1125xf32>
    %c0_1 = arith.constant 0 : index
    %c0_2 = arith.constant 0 : index
    %1 = vector.load %arg2[%c0_1, %c0_2] : memref<1125x250xf32, #tpu.memory_space<vmem>>, vector<1125x250xf32>
    %cst = arith.constant dense<0.000000e+00> : vector<4x250xf32>
    %2 = tpu.matmul %0, %1, %cst {dimension_numbers = #tpu.dot_dimension_numbers<[1], [0], [0], [1], [0, 0, 1, 1], [], []>} : vector<4x1125xf32>, vector<1125x250xf32>, vector<4x250xf32> -> vector<4x250xf32>
    %c0_3 = arith.constant 0 : index
    %c0_4 = arith.constant 0 : index
    %3 = vector.load %arg3[%c0_3, %c0_4] : memref<1x250xf32, #tpu.memory_space<vmem>>, vector<1x250xf32>
    %4 = vector.broadcast %3 : vector<1x250xf32> to vector<4x250xf32>
    %5 = arith.addf %2, %4 : vector<4x250xf32>
    %cst_5 = arith.constant 0.000000e+00 : f32
    %6 = vector.broadcast %cst_5 : f32 to vector<4x250xf32>
    %7 = arith.maximumf %5, %6 : vector<4x250xf32>
    %c0_6 = arith.constant 0 : index
    %c0_7 = arith.constant 0 : index
    %8 = vector.load %arg4[%c0_6, %c0_7] : memref<250x100xf32, #tpu.memory_space<vmem>>, vector<250x100xf32>
    %cst_8 = arith.constant dense<0.000000e+00> : vector<4x100xf32>
    %9 = tpu.matmul %7, %8, %cst_8 {dimension_numbers = #tpu.dot_dimension_numbers<[1], [0], [0], [1], [0, 0, 1, 1], [], []>} : vector<4x250xf32>, vector<250x100xf32>, vector<4x100xf32> -> vector<4x100xf32>
    %c0_9 = arith.constant 0 : index
    %c0_10 = arith.constant 0 : index
    %10 = vector.load %arg5[%c0_9, %c0_10] : memref<1x100xf32, #tpu.memory_space<vmem>>, vector<1x100xf32>
    %11 = vector.broadcast %10 : vector<1x100xf32> to vector<4x100xf32>
    %12 = arith.addf %9, %11 : vector<4x100xf32>
    %c0_11 = arith.constant 0 : index
    %c0_12 = arith.constant 0 : index
    %13 = vector.load %arg6[%c0_11, %c0_12] : memref<100x50xf32, #tpu.memory_space<vmem>>, vector<100x50xf32>
    %cst_13 = arith.constant dense<0.000000e+00> : vector<4x50xf32>
    %14 = tpu.matmul %12, %13, %cst_13 {dimension_numbers = #tpu.dot_dimension_numbers<[1], [0], [0], [1], [0, 0, 1, 1], [], []>} : vector<4x100xf32>, vector<100x50xf32>, vector<4x50xf32> -> vector<4x50xf32>
    %c0_14 = arith.constant 0 : index
    %c0_15 = arith.constant 0 : index
    %15 = vector.load %arg7[%c0_14, %c0_15] : memref<1x50xf32, #tpu.memory_space<vmem>>, vector<1x50xf32>
    %16 = vector.broadcast %15 : vector<1x50xf32> to vector<4x50xf32>
    %17 = arith.addf %14, %16 : vector<4x50xf32>
    %18 = vector.extract_strided_slice %17 {offsets = [0, 0], sizes = [2, 50], strides = [1, 1]} : vector<4x50xf32> to vector<2x50xf32>
    %19 = vector.extract_strided_slice %17 {offsets = [2, 0], sizes = [2, 50], strides = [1, 1]} : vector<4x50xf32> to vector<2x50xf32>
    %20 = arith.subf %18, %19 : vector<2x50xf32>
    %21 = math.absf %20 : vector<2x50xf32>
    %c0_16 = arith.constant 0 : index
    %c0_17 = arith.constant 0 : index
    %22 = vector.load %arg8[%c0_16, %c0_17] : memref<50x2xf32, #tpu.memory_space<vmem>>, vector<50x2xf32>
    %cst_18 = arith.constant dense<0.000000e+00> : vector<2x2xf32>
    %23 = tpu.matmul %21, %22, %cst_18 {dimension_numbers = #tpu.dot_dimension_numbers<[1], [0], [0], [1], [0, 0, 1, 1], [], []>} : vector<2x50xf32>, vector<50x2xf32>, vector<2x2xf32> -> vector<2x2xf32>
    %c0_19 = arith.constant 0 : index
    %c0_20 = arith.constant 0 : index
    %24 = vector.load %arg9[%c0_19, %c0_20] : memref<1x2xf32, #tpu.memory_space<vmem>>, vector<1x2xf32>
    %25 = vector.broadcast %24 : vector<1x2xf32> to vector<2x2xf32>
    %26 = arith.addf %23, %25 : vector<2x2xf32>
    %cst_21 = arith.constant dense<0xFF800000> : vector<2xf32>
    %27 = vector.multi_reduction <maximumf>, %26, %cst_21 [1] : vector<2x2xf32> to vector<2xf32>
    %28 = vector.shape_cast %27 : vector<2xf32> to vector<2x1xf32>
    %29 = vector.broadcast %28 : vector<2x1xf32> to vector<2x2xf32>
    %30 = arith.subf %26, %29 : vector<2x2xf32>
    %31 = math.exp %30 : vector<2x2xf32>
    %cst_22 = arith.constant dense<0.000000e+00> : vector<2xf32>
    %32 = vector.multi_reduction <add>, %31, %cst_22 [1] : vector<2x2xf32> to vector<2xf32>
    %33 = vector.shape_cast %32 : vector<2xf32> to vector<2x1xf32>
    %34 = vector.broadcast %33 : vector<2x1xf32> to vector<2x2xf32>
    %35 = arith.divf %31, %34 : vector<2x2xf32>
    %c0_23 = arith.constant 0 : index
    %c0_24 = arith.constant 0 : index
    %36 = vector.load %arg10[%c0_23, %c0_24] : memref<2x2xf32, #tpu.memory_space<vmem>>, vector<2x2xf32>
    tpu.vector_store %arg10[%c0_23, %c0_24], %35 {strides = array<i32>} : memref<2x2xf32, #tpu.memory_space<vmem>>, vector<2x2xf32>,
    return
  }
  func.func @transform_0(%arg0: i32) -> (i32, i32) {
    %c0_i32 = arith.constant 0 : i32
    %c0_i32_0 = arith.constant 0 : i32
    %c0_i32_1 = arith.constant 0 : i32
    return %c0_i32, %c0_i32_0 : i32, i32
  }
  func.func @transform_1(%arg0: i32) -> (i32, i32) {
    %c0_i32 = arith.constant 0 : i32
    %c0_i32_0 = arith.constant 0 : i32
    %c0_i32_1 = arith.constant 0 : i32
    return %c0_i32, %c0_i32_0 : i32, i32
  }
  func.func @transform_2(%arg0: i32) -> (i32, i32) {
    %c0_i32 = arith.constant 0 : i32
    %c0_i32_0 = arith.constant 0 : i32
    %c0_i32_1 = arith.constant 0 : i32
    return %c0_i32, %c0_i32_0 : i32, i32
  }
  func.func @transform_3(%arg0: i32) -> (i32, i32) {
    %c0_i32 = arith.constant 0 : i32
    %c0_i32_0 = arith.constant 0 : i32
    %c0_i32_1 = arith.constant 0 : i32
    return %c0_i32, %c0_i32_0 : i32, i32
  }
  func.func @transform_4(%arg0: i32) -> (i32, i32) {
    %c0_i32 = arith.constant 0 : i32
    %c0_i32_0 = arith.constant 0 : i32
    %c0_i32_1 = arith.constant 0 : i32
    return %c0_i32, %c0_i32_0 : i32, i32
  }
  func.func @transform_5(%arg0: i32) -> (i32, i32) {
    %c0_i32 = arith.constant 0 : i32
    %c0_i32_0 = arith.constant 0 : i32
    %c0_i32_1 = arith.constant 0 : i32
    return %c0_i32, %c0_i32_0 : i32, i32
  }
  func.func @transform_6(%arg0: i32) -> (i32, i32) {
    %c0_i32 = arith.constant 0 : i32
    %c0_i32_0 = arith.constant 0 : i32
    %c0_i32_1 = arith.constant 0 : i32
    return %c0_i32, %c0_i32_0 : i32, i32
  }
  func.func @transform_7(%arg0: i32) -> (i32, i32) {
    %c0_i32 = arith.constant 0 : i32
    %c0_i32_0 = arith.constant 0 : i32
    %c0_i32_1 = arith.constant 0 : i32
    return %c0_i32, %c0_i32_0 : i32, i32
  }
  func.func @transform_8(%arg0: i32) -> (i32, i32) {
    %c0_i32 = arith.constant 0 : i32
    %c0_i32_0 = arith.constant 0 : i32
    %c0_i32_1 = arith.constant 0 : i32
    return %c0_i32, %c0_i32_0 : i32, i32
  }
  func.func @transform_9(%arg0: i32) -> (i32, i32) {
    %c0_i32 = arith.constant 0 : i32
    %c0_i32_0 = arith.constant 0 : i32
    %c0_i32_1 = arith.constant 0 : i32
    return %c0_i32, %c0_i32_0 : i32, i32
  }
}

</mosaic_0001>

<bundles_post_ra>
// kernel: split_forward.3
= control target key start
LH: loop header
LB: loop body
LE: loop exit
PB: predicated region body
PF: predicated region fallthrough
CT: control target
= control target key end

     0   :  { %vm135_vm0 = vcmask 1040384   ;;  %vm128_vm1 = vcmask 400384   ;;  %vm2326_vm2 = vcmask 654336   ;;  %vm2343_vm3 = vcmask 653312   ;;  %s5015_s0 = inlined_call_operand.vmem [shape: f32[4,49,2000], index: 0, kind: input, shape index: {}]   ;;  %s5016_s1 = inlined_call_operand.vmem [shape: f32[15,49], index: 1, kind: input, shape index: {}]   ;;  %s5017_s2 = inlined_call_operand.vmem [shape: f32[15,1], index: 2, kind: input, shape index: {}]   ;;  %s5018_s3 = inlined_call_operand.vmem [shape: f32[15,2000], index: 3, kind: output, shape index: {}]  }
   0x1   :  { %v112_v0 = vld [vmem:[%s5015_s0 + $0x300] sm:$0x1]  ;;  %v113_v1 = vld [vmem:[%s5015_s0 + $0x308] sm:$0x1]  ;;  %v114_v2 = vld [vmem:[%s5015_s0 + $0x310] sm:$0x1] }
   0x2   :  { %2349 = vmatpush.msk.msra.mxu0 %vm135_vm0, %v112_v0  ;;  %2352 = vmatpush.msk.msra.mxu1 %vm135_vm0, %v113_v1  ;;  %v115_v3 = vld [vmem:[%s5015_s0 + $0x318] sm:$0x1]  ;;  %v96_v4 = vld [vmem:[%s5015_s0 + $0x280] sm:$0xff]  ;;  %v97_v5 = vld [vmem:[%s5015_s0 + $0x288] sm:$0xff] }
   0x3   :  { %2355 = vmatpush.msk.msra.mxu2 %vm135_vm0, %v114_v2  ;;  %2358 = vmatpush.msk.msra.mxu3 %vm135_vm0, %v115_v3  ;;  %v98_v6 = vld [vmem:[%s5015_s0 + $0x290] sm:$0xff]  ;;  %v99_v7 = vld [vmem:[%s5015_s0 + $0x298] sm:$0xff]  ;;  %v80_v8 = vld [vmem:[%s5015_s0 + $0x200] sm:$0xff] }
   0x4   :  { %194 = vmatpush.msra.mxu0 %v96_v4  ;;  %217 = vmatpush.msra.mxu1 %v97_v5  ;;  %v81_v9 = vld [vmem:[%s5015_s0 + $0x208] sm:$0xff]  ;;  %v82_v10 = vld [vmem:[%s5015_s0 + $0x210] sm:$0xff]  ;;  %v83_v11 = vld [vmem:[%s5015_s0 + $0x218] sm:$0xff] }
   0x5   :  { %240 = vmatpush.msra.mxu2 %v98_v6  ;;  %263 = vmatpush.msra.mxu3 %v99_v7  ;;  %v64_v12 = vld [vmem:[%s5015_s0 + $0x180] sm:$0xff]  ;;  %v65_v13 = vld [vmem:[%s5015_s0 + $0x188] sm:$0xff]  ;;  %v66_v14 = vld [vmem:[%s5015_s0 + $0x190] sm:$0xff] }
   0x6   :  { %195 = vmatpush.msra.mxu0 %v80_v8  ;;  %218 = vmatpush.msra.mxu1 %v81_v9  ;;  %v67_v15 = vld [vmem:[%s5015_s0 + $0x198] sm:$0xff]  ;;  %v48_v16 = vld [vmem:[%s5015_s0 + $0x100] sm:$0xff]  ;;  %v49_v17 = vld [vmem:[%s5015_s0 + $0x108] sm:$0xff] }
   0x7   :  { %241 = vmatpush.msra.mxu2 %v82_v10  ;;  %264 = vmatpush.msra.mxu3 %v83_v11  ;;  %v50_v18 = vld [vmem:[%s5015_s0 + $0x110] sm:$0xff]  ;;  %v51_v19 = vld [vmem:[%s5015_s0 + $0x118] sm:$0xff]  ;;  %v32_v20 = vld [vmem:[%s5015_s0 + $0x80] sm:$0xff] }
   0x8   :  { %196 = vmatpush.msra.mxu0 %v64_v12  ;;  %219 = vmatpush.msra.mxu1 %v65_v13  ;;  %v33_v21 = vld [vmem:[%s5015_s0 + $0x88] sm:$0xff]  ;;  %v34_v22 = vld [vmem:[%s5015_s0 + $0x90] sm:$0xff]  ;;  %v35_v23 = vld [vmem:[%s5015_s0 + $0x98] sm:$0xff] }
   0x9   :  { %242 = vmatpush.msra.mxu2 %v66_v14  ;;  %265 = vmatpush.msra.mxu3 %v67_v15  ;;  %v16_v24 = vld [vmem:[%s5015_s0] sm:$0xff]  ;;  %v17_v25 = vld [vmem:[%s5015_s0 + $0x8] sm:$0xff]  ;;  %v18_v26 = vld [vmem:[%s5015_s0 + $0x10] sm:$0xff] }
   0xa   :  { %197 = vmatpush.msra.mxu0 %v48_v16  ;;  %220 = vmatpush.msra.mxu1 %v49_v17  ;;  %v19_v27 = vld [vmem:[%s5015_s0 + $0x18] sm:$0xff]  ;;  %v2994_v28 = vld [vmem:[%s5016_s1] sm:$0xff]  ;;  %v118_v29 = vld [vmem:[%s5015_s0 + $0x330] sm:$0x1] }
   0xb   :  { %243 = vmatpush.msra.mxu2 %v50_v18  ;;  %266 = vmatpush.msra.mxu3 %v51_v19  ;;  %v119_v30 = vld [vmem:[%s5015_s0 + $0x338] sm:$0x1]  ;;  %v116_v31 = vld [vmem:[%s5015_s0 + $0x320] sm:$0x1]  ;;  %v117_v32 = vld [vmem:[%s5015_s0 + $0x328] sm:$0x1] }
   0xc   :  { %198 = vmatpush.msra.mxu0 %v32_v20  ;;  %221 = vmatpush.msra.mxu1 %v33_v21  ;;  %v102_v33 = vld [vmem:[%s5015_s0 + $0x2b0] sm:$0xff]  ;;  %v103_v34 = vld [vmem:[%s5015_s0 + $0x2b8] sm:$0xff]  ;;  %v100_v35 = vld [vmem:[%s5015_s0 + $0x2a0] sm:$0xff] }
   0xd   :  { %244 = vmatpush.msra.mxu2 %v34_v22  ;;  %267 = vmatpush.msra.mxu3 %v35_v23  ;;  %v101_v36 = vld [vmem:[%s5015_s0 + $0x2a8] sm:$0xff]  ;;  %v86_v37 = vld [vmem:[%s5015_s0 + $0x230] sm:$0xff]  ;;  %v87_v38 = vld [vmem:[%s5015_s0 + $0x238] sm:$0xff] }
   0xe   :  { %199 = vmatpush.msra.mxu0 %v16_v24  ;;  %222 = vmatpush.msra.mxu1 %v17_v25  ;;  %v84_v39 = vld [vmem:[%s5015_s0 + $0x220] sm:$0xff]  ;;  %v85_v40 = vld [vmem:[%s5015_s0 + $0x228] sm:$0xff]  ;;  %v70_v41 = vld [vmem:[%s5015_s0 + $0x1b0] sm:$0xff] }
   0xf   :  { %245 = vmatpush.msra.mxu2 %v18_v26  ;;  %268 = vmatpush.msra.mxu3 %v19_v27  ;;  %v71_v42 = vld [vmem:[%s5015_s0 + $0x1b8] sm:$0xff]  ;;  %v3053_v43 = vld [vmem:[%s5016_s1 + $0x8] sm:$0x7f]  ;;  %v68_v44 = vld [vmem:[%s5015_s0 + $0x1a0] sm:$0xff] }
  0x10   :  { %2350 = vmatmul.msk.f32.vlgmr.msra.gmra.mxu0 %vm128_vm1, %v2994_v28  ;;  %2353 = vmatmul.msk.f32.vlgmr.msra.gmra.mxu1 %vm128_vm1, %v2994_v28  ;;  %v69_v45 = vld [vmem:[%s5015_s0 + $0x1a8] sm:$0xff]  ;;  %v54_v46 = vld [vmem:[%s5015_s0 + $0x130] sm:$0xff]  ;;  %v55_v47 = vld [vmem:[%s5015_s0 + $0x138] sm:$0xff] }
  0x11   :  { %2356 = vmatmul.msk.f32.vlgmr.msra.gmra.mxu2 %vm128_vm1, %v2994_v28  ;;  %2359 = vmatmul.msk.f32.vlgmr.msra.gmra.mxu3 %vm128_vm1, %v2994_v28  ;;  %v52_v48 = vld [vmem:[%s5015_s0 + $0x120] sm:$0xff]  ;;  %v53_v49 = vld [vmem:[%s5015_s0 + $0x128] sm:$0xff]  ;;  %v38_v50 = vld [vmem:[%s5015_s0 + $0xb0] sm:$0xff] }
  0x12   :  { %2367 = vmatpush.msk.msrb.mxu2 %vm135_vm0, %v118_v29  ;;  %2370 = vmatpush.msk.msrb.mxu3 %vm135_vm0, %v119_v30  ;;  %v39_v51 = vld [vmem:[%s5015_s0 + $0xb8] sm:$0xff]  ;;  %v36_v52 = vld [vmem:[%s5015_s0 + $0xa0] sm:$0xff]  ;;  %v37_v53 = vld [vmem:[%s5015_s0 + $0xa8] sm:$0xff] }
  0x13   :  { %2361 = vmatpush.msk.msrb.mxu0 %vm135_vm0, %v116_v31  ;;  %2364 = vmatpush.msk.msrb.mxu1 %vm135_vm0, %v117_v32  ;;  %v22_v54 = vld [vmem:[%s5015_s0 + $0x30] sm:$0xff]  ;;  %v23_v55 = vld [vmem:[%s5015_s0 + $0x38] sm:$0xff]  ;;  %v20_v56 = vld [vmem:[%s5015_s0 + $0x20] sm:$0xff] }
  0x14   :  { %332 = vmatpush.msrb.mxu2 %v102_v33  ;;  %355 = vmatpush.msrb.mxu3 %v103_v34  ;;  %v21_v57 = vld [vmem:[%s5015_s0 + $0x28] sm:$0xff]  ;;  %v122_v58 = vld [vmem:[%s5015_s0 + $0x350] sm:$0x1]  ;;  %v123_v59 = vld [vmem:[%s5015_s0 + $0x358] sm:$0x1] }
  0x15   :  { %286 = vmatpush.msrb.mxu0 %v100_v35  ;;  %309 = vmatpush.msrb.mxu1 %v101_v36  ;;  %v120_v60 = vld [vmem:[%s5015_s0 + $0x340] sm:$0x1]  ;;  %v121_v61 = vld [vmem:[%s5015_s0 + $0x348] sm:$0x1]  ;;  %v106_v62 = vld [vmem:[%s5015_s0 + $0x2d0] sm:$0xff] }
  0x16   :  { %333 = vmatpush.msrb.mxu2 %v86_v37  ;;  %356 = vmatpush.msrb.mxu3 %v87_v38  ;;  %v107_v63 = vld [vmem:[%s5015_s0 + $0x2d8] sm:$0xff]  ;;  %v104_v0 = vld [vmem:[%s5015_s0 + $0x2c0] sm:$0xff]  ;;  %v105_v1 = vld [vmem:[%s5015_s0 + $0x2c8] sm:$0xff] }
  0x17   :  { %287 = vmatpush.msrb.mxu0 %v84_v39  ;;  %310 = vmatpush.msrb.mxu1 %v85_v40  ;;  %v90_v2 = vld [vmem:[%s5015_s0 + $0x250] sm:$0xff]  ;;  %v91_v3 = vld [vmem:[%s5015_s0 + $0x258] sm:$0xff]  ;;  %v88_v4 = vld [vmem:[%s5015_s0 + $0x240] sm:$0xff] }
  0x18   :  { %334 = vmatpush.msrb.mxu2 %v70_v41  ;;  %357 = vmatpush.msrb.mxu3 %v71_v42  ;;  %v89_v5 = vld [vmem:[%s5015_s0 + $0x248] sm:$0xff]  ;;  %v74_v6 = vld [vmem:[%s5015_s0 + $0x1d0] sm:$0xff]  ;;  %v75_v7 = vld [vmem:[%s5015_s0 + $0x1d8] sm:$0xff] }
  0x19   :  { %2351 = vmatmul.msk.f32.gmra.mxu0 %vm128_vm1, %v3053_v43  ;;  %2354 = vmatmul.msk.f32.gmra.mxu1 %vm128_vm1, %v3053_v43  ;;  %v72_v8 = vld [vmem:[%s5015_s0 + $0x1c0] sm:$0xff]  ;;  %v73_v9 = vld [vmem:[%s5015_s0 + $0x1c8] sm:$0xff]  ;;  %v58_v10 = vld [vmem:[%s5015_s0 + $0x150] sm:$0xff] }
  0x1a   :  { %2357 = vmatmul.msk.f32.gmra.mxu2 %vm128_vm1, %v3053_v43  ;;  %2360 = vmatmul.msk.f32.gmra.mxu3 %vm128_vm1, %v3053_v43  ;;  %v59_v11 = vld [vmem:[%s5015_s0 + $0x158] sm:$0xff]  ;;  %v56_v12 = vld [vmem:[%s5015_s0 + $0x140] sm:$0xff]  ;;  %v57_v13 = vld [vmem:[%s5015_s0 + $0x148] sm:$0xff] }
  0x1b   :  { %288 = vmatpush.msrb.mxu0 %v68_v44  ;;  %311 = vmatpush.msrb.mxu1 %v69_v45  ;;  %v42_v14 = vld [vmem:[%s5015_s0 + $0xd0] sm:$0xff]  ;;  %v43_v15 = vld [vmem:[%s5015_s0 + $0xd8] sm:$0xff]  ;;  %v40_v16 = vld [vmem:[%s5015_s0 + $0xc0] sm:$0xff] }
  0x1c   :  { %335 = vmatpush.msrb.mxu2 %v54_v46  ;;  %358 = vmatpush.msrb.mxu3 %v55_v47  ;;  %v41_v17 = vld [vmem:[%s5015_s0 + $0xc8] sm:$0xff]  ;;  %v26_v18 = vld [vmem:[%s5015_s0 + $0x50] sm:$0xff]  ;;  %v27_v19 = vld [vmem:[%s5015_s0 + $0x58] sm:$0xff] }
  0x1d   :  { %289 = vmatpush.msrb.mxu0 %v52_v48  ;;  %312 = vmatpush.msrb.mxu1 %v53_v49  ;;  %v24_v20 = vld [vmem:[%s5015_s0 + $0x40] sm:$0xff]  ;;  %v25_v21 = vld [vmem:[%s5015_s0 + $0x48] sm:$0xff]  ;;  %v126_v22 = vld [vmem:[%s5015_s0 + $0x370] sm:$0x1] }
  0x1e   :  { %336 = vmatpush.msrb.mxu2 %v38_v50  ;;  %359 = vmatpush.msrb.mxu3 %v39_v51  ;;  %v127_v23 = vld [vmem:[%s5015_s0 + $0x378] sm:$0x1]  ;;  %v124_v24 = vld [vmem:[%s5015_s0 + $0x360] sm:$0x1]  ;;  %v125_v25 = vld [vmem:[%s5015_s0 + $0x368] sm:$0x1] }
  0x1f   :  { %290 = vmatpush.msrb.mxu0 %v36_v52  ;;  %313 = vmatpush.msrb.mxu1 %v37_v53  ;;  %v110_v26 = vld [vmem:[%s5015_s0 + $0x2f0] sm:$0xff]  ;;  %v111_v27 = vld [vmem:[%s5015_s0 + $0x2f8] sm:$0xff]  ;;  %v108_v29 = vld [vmem:[%s5015_s0 + $0x2e0] sm:$0xff] }
  0x20   :  { %337 = vmatpush.msrb.mxu2 %v22_v54  ;;  %360 = vmatpush.msrb.mxu3 %v23_v55  ;;  %v109_v30 = vld [vmem:[%s5015_s0 + $0x2e8] sm:$0xff]  ;;  %v94_v31 = vld [vmem:[%s5015_s0 + $0x270] sm:$0xff]  ;;  %v95_v32 = vld [vmem:[%s5015_s0 + $0x278] sm:$0xff] }
  0x21   :  { %291 = vmatpush.msrb.mxu0 %v20_v56  ;;  %314 = vmatpush.msrb.mxu1 %v21_v57  ;;  %v92_v33 = vld [vmem:[%s5015_s0 + $0x260] sm:$0xff]  ;;  %v93_v34 = vld [vmem:[%s5015_s0 + $0x268] sm:$0xff]  ;;  %v78_v35 = vld [vmem:[%s5015_s0 + $0x1f0] sm:$0xff] }
  0x22   :  { %2362 = vmatmul.msk.f32.vlgmr.msrb.gmra.mxu0 %vm128_vm1, %v2994_v28  ;;  %2365 = vmatmul.msk.f32.vlgmr.msrb.gmra.mxu1 %vm128_vm1, %v2994_v28  ;;  %v79_v36 = vld [vmem:[%s5015_s0 + $0x1f8] sm:$0xff]  ;;  %v76_v37 = vld [vmem:[%s5015_s0 + $0x1e0] sm:$0xff]  ;;  %v77_v38 = vld [vmem:[%s5015_s0 + $0x1e8] sm:$0xff] }
  0x23   :  { %2368 = vmatmul.msk.f32.vlgmr.msrb.gmra.mxu2 %vm128_vm1, %v2994_v28  ;;  %2371 = vmatmul.msk.f32.vlgmr.msrb.gmra.mxu3 %vm128_vm1, %v2994_v28  ;;  %v62_v39 = vld [vmem:[%s5015_s0 + $0x170] sm:$0xff]  ;;  %v63_v40 = vld [vmem:[%s5015_s0 + $0x178] sm:$0xff]  ;;  %v60_v41 = vld [vmem:[%s5015_s0 + $0x160] sm:$0xff] }
  0x24   :  { %2379 = vmatpush.msk.msra.mxu2 %vm135_vm0, %v122_v58  ;;  %2382 = vmatpush.msk.msra.mxu3 %vm135_vm0, %v123_v59  ;;  %v61_v42 = vld [vmem:[%s5015_s0 + $0x168] sm:$0xff]  ;;  %v46_v44 = vld [vmem:[%s5015_s0 + $0xf0] sm:$0xff]  ;;  %v47_v45 = vld [vmem:[%s5015_s0 + $0xf8] sm:$0xff] }
  0x25   :  { %2373 = vmatpush.msk.msra.mxu0 %vm135_vm0, %v120_v60  ;;  %2376 = vmatpush.msk.msra.mxu1 %vm135_vm0, %v121_v61  ;;  %v44_v46 = vld [vmem:[%s5015_s0 + $0xe0] sm:$0xff]  ;;  %v45_v47 = vld [vmem:[%s5015_s0 + $0xe8] sm:$0xff]  ;;  %v30_v48 = vld [vmem:[%s5015_s0 + $0x70] sm:$0xff] }
  0x26   :  { %424 = vmatpush.msra.mxu2 %v106_v62  ;;  %447 = vmatpush.msra.mxu3 %v107_v63  ;;  %v31_v49 = vld [vmem:[%s5015_s0 + $0x78] sm:$0xff]  ;;  %v28_v50 = vld [vmem:[%s5015_s0 + $0x60] sm:$0xff]  ;;  %v29_v51 = vld [vmem:[%s5015_s0 + $0x68] sm:$0xff] }
  0x27   :  { %378 = vmatpush.msra.mxu0 %v104_v0  ;;  %401 = vmatpush.msra.mxu1 %v105_v1  ;;  %v2495_v52 = vld [vmem:[%s5015_s0 + $0x690] sm:$0x1]  ;;  %v2496_v53 = vld [vmem:[%s5015_s0 + $0x698] sm:$0x1]  ;;  %v2493_v54 = vld [vmem:[%s5015_s0 + $0x680] sm:$0x1] }
  0x28   :  { %425 = vmatpush.msra.mxu2 %v90_v2  ;;  %448 = vmatpush.msra.mxu3 %v91_v3  ;;  %v2494_v55 = vld [vmem:[%s5015_s0 + $0x688] sm:$0x1]  ;;  %v2479_v56 = vld [vmem:[%s5015_s0 + $0x610] sm:$0xff]  ;;  %v2480_v57 = vld [vmem:[%s5015_s0 + $0x618] sm:$0xff] }
  0x29   :  { %379 = vmatpush.msra.mxu0 %v88_v4  ;;  %402 = vmatpush.msra.mxu1 %v89_v5  ;;  %v2477_v58 = vld [vmem:[%s5015_s0 + $0x600] sm:$0xff]  ;;  %v2478_v59 = vld [vmem:[%s5015_s0 + $0x608] sm:$0xff]  ;;  %v2463_v60 = vld [vmem:[%s5015_s0 + $0x590] sm:$0xff] }
  0x2a   :  { %426 = vmatpush.msra.mxu2 %v74_v6  ;;  %449 = vmatpush.msra.mxu3 %v75_v7  ;;  %v2464_v61 = vld [vmem:[%s5015_s0 + $0x598] sm:$0xff]  ;;  %v2461_v62 = vld [vmem:[%s5015_s0 + $0x580] sm:$0xff]  ;;  %v2462_v63 = vld [vmem:[%s5015_s0 + $0x588] sm:$0xff] }
  0x2b   :  { %2363 = vmatmul.msk.f32.gmra.mxu0 %vm128_vm1, %v3053_v43  ;;  %2366 = vmatmul.msk.f32.gmra.mxu1 %vm128_vm1, %v3053_v43  ;;  %v2447_v0 = vld [vmem:[%s5015_s0 + $0x510] sm:$0xff]  ;;  %v2448_v1 = vld [vmem:[%s5015_s0 + $0x518] sm:$0xff]  ;;  %v2445_v2 = vld [vmem:[%s5015_s0 + $0x500] sm:$0xff] }
  0x2c   :  { %2369 = vmatmul.msk.f32.gmra.mxu2 %vm128_vm1, %v3053_v43  ;;  %2372 = vmatmul.msk.f32.gmra.mxu3 %vm128_vm1, %v3053_v43  ;;  %v2446_v3 = vld [vmem:[%s5015_s0 + $0x508] sm:$0xff]  ;;  %v2431_v4 = vld [vmem:[%s5015_s0 + $0x490] sm:$0xff]  ;;  %v2432_v5 = vld [vmem:[%s5015_s0 + $0x498] sm:$0xff] }
  0x2d   :  { %380 = vmatpush.msra.mxu0 %v72_v8  ;;  %403 = vmatpush.msra.mxu1 %v73_v9  ;;  %v2429_v6 = vld [vmem:[%s5015_s0 + $0x480] sm:$0xff]  ;;  %v2430_v7 = vld [vmem:[%s5015_s0 + $0x488] sm:$0xff]  ;;  %v2415_v8 = vld [vmem:[%s5015_s0 + $0x410] sm:$0xff] }
  0x2e   :  { %427 = vmatpush.msra.mxu2 %v58_v10  ;;  %450 = vmatpush.msra.mxu3 %v59_v11  ;;  %v2416_v9 = vld [vmem:[%s5015_s0 + $0x418] sm:$0xff]  ;;  %v2413_v10 = vld [vmem:[%s5015_s0 + $0x400] sm:$0xff]  ;;  %v2414_v11 = vld [vmem:[%s5015_s0 + $0x408] sm:$0xff] }
  0x2f   :  { %381 = vmatpush.msra.mxu0 %v56_v12  ;;  %404 = vmatpush.msra.mxu1 %v57_v13  ;;  %v2399_v12 = vld [vmem:[%s5015_s0 + $0x390] sm:$0xff]  ;;  %v2400_v13 = vld [vmem:[%s5015_s0 + $0x398] sm:$0xff] }
  0x30   :  { %428 = vmatpush.msra.mxu2 %v42_v14  ;;  %451 = vmatpush.msra.mxu3 %v43_v15  ;;  %v2397_v14 = vld [vmem:[%s5015_s0 + $0x380] sm:$0xff]  ;;  %v2398_v15 = vld [vmem:[%s5015_s0 + $0x388] sm:$0xff] }
  0x31   :  { %382 = vmatpush.msra.mxu0 %v40_v16  ;;  %405 = vmatpush.msra.mxu1 %v41_v17  ;;  %v2499_v16 = vld [vmem:[%s5015_s0 + $0x6b0] sm:$0x1]  ;;  %v2500_v17 = vld [vmem:[%s5015_s0 + $0x6b8] sm:$0x1] }
  0x32   :  { %429 = vmatpush.msra.mxu2 %v26_v18  ;;  %452 = vmatpush.msra.mxu3 %v27_v19  ;;  %v2497_v18 = vld [vmem:[%s5015_s0 + $0x6a0] sm:$0x1]  ;;  %v2498_v19 = vld [vmem:[%s5015_s0 + $0x6a8] sm:$0x1] }
  0x33   :  { %383 = vmatpush.msra.mxu0 %v24_v20  ;;  %406 = vmatpush.msra.mxu1 %v25_v21  ;;  %v2483_v20 = vld [vmem:[%s5015_s0 + $0x630] sm:$0xff]  ;;  %v2484_v21 = vld [vmem:[%s5015_s0 + $0x638] sm:$0xff] }
  0x34   :  { %2374 = vmatmul.msk.f32.vlgmr.msra.gmra.mxu0 %vm128_vm1, %v2994_v28  ;;  %2377 = vmatmul.msk.f32.vlgmr.msra.gmra.mxu1 %vm128_vm1, %v2994_v28 }
  0x35   :  { %2380 = vmatmul.msk.f32.vlgmr.msra.gmra.mxu2 %vm128_vm1, %v2994_v28  ;;  %2383 = vmatmul.msk.f32.vlgmr.msra.gmra.mxu3 %vm128_vm1, %v2994_v28 }
  0x36   :  { %2391 = vmatpush.msk.msrb.mxu2 %vm135_vm0, %v126_v22  ;;  %2394 = vmatpush.msk.msrb.mxu3 %vm135_vm0, %v127_v23  ;;  %v2481_v22 = vld [vmem:[%s5015_s0 + $0x620] sm:$0xff]  ;;  %v2482_v23 = vld [vmem:[%s5015_s0 + $0x628] sm:$0xff] }
  0x37   :  { %2385 = vmatpush.msk.msrb.mxu0 %vm135_vm0, %v124_v24  ;;  %2388 = vmatpush.msk.msrb.mxu1 %vm135_vm0, %v125_v25  ;;  %v2467_v24 = vld [vmem:[%s5015_s0 + $0x5b0] sm:$0xff]  ;;  %v2468_v25 = vld [vmem:[%s5015_s0 + $0x5b8] sm:$0xff] }
  0x38   :  { %516 = vmatpush.msrb.mxu2 %v110_v26  ;;  %539 = vmatpush.msrb.mxu3 %v111_v27  ;;  %v2465_v26 = vld [vmem:[%s5015_s0 + $0x5a0] sm:$0xff]  ;;  %v2466_v27 = vld [vmem:[%s5015_s0 + $0x5a8] sm:$0xff] }
  0x39   :  { %470 = vmatpush.msrb.mxu0 %v108_v29  ;;  %493 = vmatpush.msrb.mxu1 %v109_v30  ;;  %v2451_v29 = vld [vmem:[%s5015_s0 + $0x530] sm:$0xff]  ;;  %v2452_v30 = vld [vmem:[%s5015_s0 + $0x538] sm:$0xff] }
  0x3a   :  { %517 = vmatpush.msrb.mxu2 %v94_v31  ;;  %540 = vmatpush.msrb.mxu3 %v95_v32  ;;  %v2449_v31 = vld [vmem:[%s5015_s0 + $0x520] sm:$0xff]  ;;  %v2450_v32 = vld [vmem:[%s5015_s0 + $0x528] sm:$0xff] }
  0x3b   :  { %471 = vmatpush.msrb.mxu0 %v92_v33  ;;  %494 = vmatpush.msrb.mxu1 %v93_v34  ;;  %v2435_v33 = vld [vmem:[%s5015_s0 + $0x4b0] sm:$0xff]  ;;  %v2436_v34 = vld [vmem:[%s5015_s0 + $0x4b8] sm:$0xff] }
  0x3c   :  { %518 = vmatpush.msrb.mxu2 %v78_v35  ;;  %541 = vmatpush.msrb.mxu3 %v79_v36  ;;  %v2433_v35 = vld [vmem:[%s5015_s0 + $0x4a0] sm:$0xff]  ;;  %v2434_v36 = vld [vmem:[%s5015_s0 + $0x4a8] sm:$0xff] }
  0x3d   :  { %2375 = vmatmul.msk.f32.gmra.mxu0 %vm128_vm1, %v3053_v43  ;;  %2378 = vmatmul.msk.f32.gmra.mxu1 %vm128_vm1, %v3053_v43 }
  0x3e   :  { %2381 = vmatmul.msk.f32.gmra.mxu2 %vm128_vm1, %v3053_v43  ;;  %2384 = vmatmul.msk.f32.gmra.mxu3 %vm128_vm1, %v3053_v43 }
  0x3f   :  { %472 = vmatpush.msrb.mxu0 %v76_v37  ;;  %495 = vmatpush.msrb.mxu1 %v77_v38  ;;  %v2419_v37 = vld [vmem:[%s5015_s0 + $0x430] sm:$0xff]  ;;  %v2420_v38 = vld [vmem:[%s5015_s0 + $0x438] sm:$0xff] }
  0x40   :  { %519 = vmatpush.msrb.mxu2 %v62_v39  ;;  %542 = vmatpush.msrb.mxu3 %v63_v40  ;;  %v2417_v39 = vld [vmem:[%s5015_s0 + $0x420] sm:$0xff]  ;;  %v2418_v40 = vld [vmem:[%s5015_s0 + $0x428] sm:$0xff] }
  0x41   :  { %473 = vmatpush.msrb.mxu0 %v60_v41  ;;  %496 = vmatpush.msrb.mxu1 %v61_v42  ;;  %v2403_v41 = vld [vmem:[%s5015_s0 + $0x3b0] sm:$0xff]  ;;  %v2404_v42 = vld [vmem:[%s5015_s0 + $0x3b8] sm:$0xff] }
  0x42   :  { %520 = vmatpush.msrb.mxu2 %v46_v44  ;;  %543 = vmatpush.msrb.mxu3 %v47_v45  ;;  %v2401_v44 = vld [vmem:[%s5015_s0 + $0x3a0] sm:$0xff]  ;;  %v2402_v45 = vld [vmem:[%s5015_s0 + $0x3a8] sm:$0xff] }
  0x43   :  { %474 = vmatpush.msrb.mxu0 %v44_v46  ;;  %497 = vmatpush.msrb.mxu1 %v45_v47  ;;  %v2503_v46 = vld [vmem:[%s5015_s0 + $0x6d0] sm:$0x1]  ;;  %v2504_v47 = vld [vmem:[%s5015_s0 + $0x6d8] sm:$0x1] }
  0x44   :  { %521 = vmatpush.msrb.mxu2 %v30_v48  ;;  %544 = vmatpush.msrb.mxu3 %v31_v49  ;;  %v2501_v48 = vld [vmem:[%s5015_s0 + $0x6c0] sm:$0x1]  ;;  %v2502_v49 = vld [vmem:[%s5015_s0 + $0x6c8] sm:$0x1] }
  0x45   :  { %475 = vmatpush.msrb.mxu0 %v28_v50  ;;  %498 = vmatpush.msrb.mxu1 %v29_v51  ;;  %v2487_v50 = vld [vmem:[%s5015_s0 + $0x650] sm:$0xff]  ;;  %v2488_v51 = vld [vmem:[%s5015_s0 + $0x658] sm:$0xff] }
  0x46   :  { %2386 = vmatmul.msk.f32.vlgmr.msrb.gmra.mxu0 %vm128_vm1, %v2994_v28  ;;  %2389 = vmatmul.msk.f32.vlgmr.msrb.gmra.mxu1 %vm128_vm1, %v2994_v28 }
  0x47   :  { %2392 = vmatmul.msk.f32.vlgmr.msrb.gmra.mxu2 %vm128_vm1, %v2994_v28  ;;  %2395 = vmatmul.msk.f32.vlgmr.msrb.gmra.mxu3 %vm128_vm1, %v2994_v28 }
  0x48   :  { %2515 = vmatpush.msk.msra.mxu2 %vm135_vm0, %v2495_v52  ;;  %2518 = vmatpush.msk.msra.mxu3 %vm135_vm0, %v2496_v53  ;;  %v2485_v52 = vld [vmem:[%s5015_s0 + $0x640] sm:$0xff]  ;;  %v2486_v53 = vld [vmem:[%s5015_s0 + $0x648] sm:$0xff] }
  0x49   :  { %2509 = vmatpush.msk.msra.mxu0 %vm135_vm0, %v2493_v54  ;;  %2512 = vmatpush.msk.msra.mxu1 %vm135_vm0, %v2494_v55  ;;  %v2471_v54 = vld [vmem:[%s5015_s0 + $0x5d0] sm:$0xff]  ;;  %v2472_v55 = vld [vmem:[%s5015_s0 + $0x5d8] sm:$0xff] }
  0x4a   :  { %769 = vmatpush.msra.mxu2 %v2479_v56  ;;  %792 = vmatpush.msra.mxu3 %v2480_v57  ;;  %v2469_v56 = vld [vmem:[%s5015_s0 + $0x5c0] sm:$0xff]  ;;  %v2470_v57 = vld [vmem:[%s5015_s0 + $0x5c8] sm:$0xff] }
  0x4b   :  { %723 = vmatpush.msra.mxu0 %v2477_v58  ;;  %746 = vmatpush.msra.mxu1 %v2478_v59  ;;  %v2455_v58 = vld [vmem:[%s5015_s0 + $0x550] sm:$0xff]  ;;  %v2456_v59 = vld [vmem:[%s5015_s0 + $0x558] sm:$0xff] }
  0x4c   :  { %770 = vmatpush.msra.mxu2 %v2463_v60  ;;  %793 = vmatpush.msra.mxu3 %v2464_v61  ;;  %v2453_v60 = vld [vmem:[%s5015_s0 + $0x540] sm:$0xff]  ;;  %v2454_v61 = vld [vmem:[%s5015_s0 + $0x548] sm:$0xff] }
  0x4d   :  { %724 = vmatpush.msra.mxu0 %v2461_v62  ;;  %747 = vmatpush.msra.mxu1 %v2462_v63  ;;  %v2439_v62 = vld [vmem:[%s5015_s0 + $0x4d0] sm:$0xff]  ;;  %v2440_v63 = vld [vmem:[%s5015_s0 + $0x4d8] sm:$0xff] }
  0x4e   :  { %771 = vmatpush.msra.mxu2 %v2447_v0  ;;  %794 = vmatpush.msra.mxu3 %v2448_v1  ;;  %v2437_v0 = vld [vmem:[%s5015_s0 + $0x4c0] sm:$0xff]  ;;  %v2438_v1 = vld [vmem:[%s5015_s0 + $0x4c8] sm:$0xff] }
  0x4f   :  { %2387 = vmatmul.msk.f32.gmra.mxu0 %vm128_vm1, %v3053_v43  ;;  %2390 = vmatmul.msk.f32.gmra.mxu1 %vm128_vm1, %v3053_v43 }
  0x50   :  { %2393 = vmatmul.msk.f32.gmra.mxu2 %vm128_vm1, %v3053_v43  ;;  %2396 = vmatmul.msk.f32.gmra.mxu3 %vm128_vm1, %v3053_v43 }
  0x51   :  { %725 = vmatpush.msra.mxu0 %v2445_v2  ;;  %748 = vmatpush.msra.mxu1 %v2446_v3  ;;  %v2423_v2 = vld [vmem:[%s5015_s0 + $0x450] sm:$0xff]  ;;  %v2424_v3 = vld [vmem:[%s5015_s0 + $0x458] sm:$0xff] }
  0x52   :  { %772 = vmatpush.msra.mxu2 %v2431_v4  ;;  %795 = vmatpush.msra.mxu3 %v2432_v5  ;;  %v2421_v4 = vld [vmem:[%s5015_s0 + $0x440] sm:$0xff]  ;;  %v2422_v5 = vld [vmem:[%s5015_s0 + $0x448] sm:$0xff] }
  0x53   :  { %726 = vmatpush.msra.mxu0 %v2429_v6  ;;  %749 = vmatpush.msra.mxu1 %v2430_v7  ;;  %v2407_v6 = vld [vmem:[%s5015_s0 + $0x3d0] sm:$0xff]  ;;  %v2408_v7 = vld [vmem:[%s5015_s0 + $0x3d8] sm:$0xff] }
  0x54   :  { %773 = vmatpush.msra.mxu2 %v2415_v8  ;;  %796 = vmatpush.msra.mxu3 %v2416_v9  ;;  %v2405_v8 = vld [vmem:[%s5015_s0 + $0x3c0] sm:$0xff]  ;;  %v2406_v9 = vld [vmem:[%s5015_s0 + $0x3c8] sm:$0xff] }
  0x55   :  { %727 = vmatpush.msra.mxu0 %v2413_v10  ;;  %750 = vmatpush.msra.mxu1 %v2414_v11  ;;  %v2507_v10 = vld [vmem:[%s5015_s0 + $0x6f0] sm:$0x1]  ;;  %v2508_v11 = vld [vmem:[%s5015_s0 + $0x6f8] sm:$0x1] }
  0x56   :  { %774 = vmatpush.msra.mxu2 %v2399_v12  ;;  %797 = vmatpush.msra.mxu3 %v2400_v13  ;;  %v2505_v12 = vld [vmem:[%s5015_s0 + $0x6e0] sm:$0x1]  ;;  %v2506_v13 = vld [vmem:[%s5015_s0 + $0x6e8] sm:$0x1] }
  0x57   :  { %728 = vmatpush.msra.mxu0 %v2397_v14  ;;  %751 = vmatpush.msra.mxu1 %v2398_v15  ;;  %v2491_v14 = vld [vmem:[%s5015_s0 + $0x670] sm:$0xff]  ;;  %v2492_v15 = vld [vmem:[%s5015_s0 + $0x678] sm:$0xff] }
  0x58   :  { %2510 = vmatmul.msk.f32.vlgmr.msra.gmra.mxu0 %vm128_vm1, %v2994_v28  ;;  %2513 = vmatmul.msk.f32.vlgmr.msra.gmra.mxu1 %vm128_vm1, %v2994_v28 }
  0x59   :  { %2516 = vmatmul.msk.f32.vlgmr.msra.gmra.mxu2 %vm128_vm1, %v2994_v28  ;;  %2519 = vmatmul.msk.f32.vlgmr.msra.gmra.mxu3 %vm128_vm1, %v2994_v28 }
  0x5a   :  { %2527 = vmatpush.msk.msrb.mxu2 %vm135_vm0, %v2499_v16  ;;  %2530 = vmatpush.msk.msrb.mxu3 %vm135_vm0, %v2500_v17  ;;  %v2489_v16 = vld [vmem:[%s5015_s0 + $0x660] sm:$0xff]  ;;  %v2490_v17 = vld [vmem:[%s5015_s0 + $0x668] sm:$0xff] }
  0x5b   :  { %2521 = vmatpush.msk.msrb.mxu0 %vm135_vm0, %v2497_v18  ;;  %2524 = vmatpush.msk.msrb.mxu1 %vm135_vm0, %v2498_v19  ;;  %v2475_v18 = vld [vmem:[%s5015_s0 + $0x5f0] sm:$0xff]  ;;  %v2476_v19 = vld [vmem:[%s5015_s0 + $0x5f8] sm:$0xff] }
  0x5c   :  { %861 = vmatpush.msrb.mxu2 %v2483_v20  ;;  %884 = vmatpush.msrb.mxu3 %v2484_v21  ;;  %v2473_v20 = vld [vmem:[%s5015_s0 + $0x5e0] sm:$0xff]  ;;  %v2474_v21 = vld [vmem:[%s5015_s0 + $0x5e8] sm:$0xff] }
  0x5d   :  { %815 = vmatpush.msrb.mxu0 %v2481_v22  ;;  %838 = vmatpush.msrb.mxu1 %v2482_v23  ;;  %v2459_v22 = vld [vmem:[%s5015_s0 + $0x570] sm:$0xff]  ;;  %v2460_v23 = vld [vmem:[%s5015_s0 + $0x578] sm:$0xff] }
  0x5e   :  { %862 = vmatpush.msrb.mxu2 %v2467_v24  ;;  %885 = vmatpush.msrb.mxu3 %v2468_v25  ;;  %v2457_v24 = vld [vmem:[%s5015_s0 + $0x560] sm:$0xff]  ;;  %v2458_v25 = vld [vmem:[%s5015_s0 + $0x568] sm:$0xff] }
  0x5f   :  { %816 = vmatpush.msrb.mxu0 %v2465_v26  ;;  %839 = vmatpush.msrb.mxu1 %v2466_v27  ;;  %v2443_v26 = vld [vmem:[%s5015_s0 + $0x4f0] sm:$0xff]  ;;  %v2444_v27 = vld [vmem:[%s5015_s0 + $0x4f8] sm:$0xff] }
  0x60   :  { %863 = vmatpush.msrb.mxu2 %v2451_v29  ;;  %886 = vmatpush.msrb.mxu3 %v2452_v30  ;;  %v2441_v29 = vld [vmem:[%s5015_s0 + $0x4e0] sm:$0xff]  ;;  %v2442_v30 = vld [vmem:[%s5015_s0 + $0x4e8] sm:$0xff] }
  0x61   :  { %2511 = vmatmul.msk.f32.gmra.mxu0 %vm128_vm1, %v3053_v43  ;;  %2514 = vmatmul.msk.f32.gmra.mxu1 %vm128_vm1, %v3053_v43 }
  0x62   :  { %2517 = vmatmul.msk.f32.gmra.mxu2 %vm128_vm1, %v3053_v43  ;;  %2520 = vmatmul.msk.f32.gmra.mxu3 %vm128_vm1, %v3053_v43 }
  0x63   :  { %817 = vmatpush.msrb.mxu0 %v2449_v31  ;;  %840 = vmatpush.msrb.mxu1 %v2450_v32  ;;  %v2427_v31 = vld [vmem:[%s5015_s0 + $0x470] sm:$0xff]  ;;  %v2428_v32 = vld [vmem:[%s5015_s0 + $0x478] sm:$0xff] }
  0x64   :  { %864 = vmatpush.msrb.mxu2 %v2435_v33  ;;  %887 = vmatpush.msrb.mxu3 %v2436_v34  ;;  %v2425_v33 = vld [vmem:[%s5015_s0 + $0x460] sm:$0xff]  ;;  %v2426_v34 = vld [vmem:[%s5015_s0 + $0x468] sm:$0xff] }
  0x65   :  { %818 = vmatpush.msrb.mxu0 %v2433_v35  ;;  %841 = vmatpush.msrb.mxu1 %v2434_v36  ;;  %v2411_v35 = vld [vmem:[%s5015_s0 + $0x3f0] sm:$0xff]  ;;  %v2412_v36 = vld [vmem:[%s5015_s0 + $0x3f8] sm:$0xff] }
  0x66   :  { %865 = vmatpush.msrb.mxu2 %v2419_v37  ;;  %888 = vmatpush.msrb.mxu3 %v2420_v38  ;;  %v2409_v37 = vld [vmem:[%s5015_s0 + $0x3e0] sm:$0xff]  ;;  %v2410_v38 = vld [vmem:[%s5015_s0 + $0x3e8] sm:$0xff] }
  0x67   :  { %819 = vmatpush.msrb.mxu0 %v2417_v39  ;;  %842 = vmatpush.msrb.mxu1 %v2418_v40  ;;  %v2655_v39 = vld [vmem:[%s5015_s0 + $0xa10] sm:$0x1]  ;;  %v2656_v40 = vld [vmem:[%s5015_s0 + $0xa18] sm:$0x1] }
  0x68   :  { %866 = vmatpush.msrb.mxu2 %v2403_v41  ;;  %889 = vmatpush.msrb.mxu3 %v2404_v42 }
  0x69   :  { %820 = vmatpush.msrb.mxu0 %v2401_v44  ;;  %843 = vmatpush.msrb.mxu1 %v2402_v45  ;;  %v2653_v44 = vld [vmem:[%s5015_s0 + $0xa00] sm:$0x1]  ;;  %v2654_v45 = vld [vmem:[%s5015_s0 + $0xa08] sm:$0x1] }
  0x6a   :  { %2522 = vmatmul.msk.f32.vlgmr.msrb.gmra.mxu0 %vm128_vm1, %v2994_v28  ;;  %2525 = vmatmul.msk.f32.vlgmr.msrb.gmra.mxu1 %vm128_vm1, %v2994_v28 }
  0x6b   :  { %2528 = vmatmul.msk.f32.vlgmr.msrb.gmra.mxu2 %vm128_vm1, %v2994_v28  ;;  %2531 = vmatmul.msk.f32.vlgmr.msrb.gmra.mxu3 %vm128_vm1, %v2994_v28 }
  0x6c   :  { %2539 = vmatpush.msk.msra.mxu2 %vm135_vm0, %v2503_v46  ;;  %2542 = vmatpush.msk.msra.mxu3 %vm135_vm0, %v2504_v47  ;;  %v2639_v46 = vld [vmem:[%s5015_s0 + $0x990] sm:$0xff]  ;;  %v2640_v47 = vld [vmem:[%s5015_s0 + $0x998] sm:$0xff] }
  0x6d   :  { %2533 = vmatpush.msk.msra.mxu0 %vm135_vm0, %v2501_v48  ;;  %2536 = vmatpush.msk.msra.mxu1 %vm135_vm0, %v2502_v49  ;;  %v2637_v48 = vld [vmem:[%s5015_s0 + $0x980] sm:$0xff]  ;;  %v2623_v49 = vld [vmem:[%s5015_s0 + $0x910] sm:$0xff] }
  0x6e   :  { %953 = vmatpush.msra.mxu2 %v2487_v50  ;;  %976 = vmatpush.msra.mxu3 %v2488_v51  ;;  %v2624_v50 = vld [vmem:[%s5015_s0 + $0x918] sm:$0xff]  ;;  %v2621_v51 = vld [vmem:[%s5015_s0 + $0x900] sm:$0xff] }
  0x6f   :  { %907 = vmatpush.msra.mxu0 %v2485_v52  ;;  %930 = vmatpush.msra.mxu1 %v2486_v53  ;;  %v2622_v52 = vld [vmem:[%s5015_s0 + $0x908] sm:$0xff]  ;;  %v2607_v53 = vld [vmem:[%s5015_s0 + $0x890] sm:$0xff] }
  0x70   :  { %954 = vmatpush.msra.mxu2 %v2471_v54  ;;  %977 = vmatpush.msra.mxu3 %v2472_v55  ;;  %v2608_v54 = vld [vmem:[%s5015_s0 + $0x898] sm:$0xff] }
  0x71   :  { %908 = vmatpush.msra.mxu0 %v2469_v56  ;;  %931 = vmatpush.msra.mxu1 %v2470_v57  ;;  %v2605_v57 = vld [vmem:[%s5015_s0 + $0x880] sm:$0xff] }
  0x72   :  { %955 = vmatpush.msra.mxu2 %v2455_v58  ;;  %978 = vmatpush.msra.mxu3 %v2456_v59  ;;  %v2606_v58 = vld [vmem:[%s5015_s0 + $0x888] sm:$0xff] }
  0x73   :  { %2523 = vmatmul.msk.f32.gmra.mxu0 %vm128_vm1, %v3053_v43  ;;  %2526 = vmatmul.msk.f32.gmra.mxu1 %vm128_vm1, %v3053_v43 }
  0x74   :  { %2529 = vmatmul.msk.f32.gmra.mxu2 %vm128_vm1, %v3053_v43  ;;  %2532 = vmatmul.msk.f32.gmra.mxu3 %vm128_vm1, %v3053_v43 }
  0x75   :  { %909 = vmatpush.msra.mxu0 %v2453_v60  ;;  %932 = vmatpush.msra.mxu1 %v2454_v61  ;;  %v2591_v61 = vld [vmem:[%s5015_s0 + $0x810] sm:$0xff] }
  0x76   :  { %956 = vmatpush.msra.mxu2 %v2439_v62  ;;  %979 = vmatpush.msra.mxu3 %v2440_v63  ;;  %v2592_v62 = vld [vmem:[%s5015_s0 + $0x818] sm:$0xff]  ;;  %v2589_v63 = vld [vmem:[%s5015_s0 + $0x800] sm:$0xff] }
  0x77   :  { %910 = vmatpush.msra.mxu0 %v2437_v0  ;;  %933 = vmatpush.msra.mxu1 %v2438_v1  ;;  %v2590_v0 = vld [vmem:[%s5015_s0 + $0x808] sm:$0xff]  ;;  %v2575_v1 = vld [vmem:[%s5015_s0 + $0x790] sm:$0xff] }
  0x78   :  { %957 = vmatpush.msra.mxu2 %v2423_v2  ;;  %980 = vmatpush.msra.mxu3 %v2424_v3  ;;  %v2576_v2 = vld [vmem:[%s5015_s0 + $0x798] sm:$0xff]  ;;  %v2574_v3 = vld [vmem:[%s5015_s0 + $0x788] sm:$0xff] }
  0x79   :  { %911 = vmatpush.msra.mxu0 %v2421_v4  ;;  %934 = vmatpush.msra.mxu1 %v2422_v5  ;;  %v2559_v4 = vld [vmem:[%s5015_s0 + $0x710] sm:$0xff]  ;;  %v2560_v5 = vld [vmem:[%s5015_s0 + $0x718] sm:$0xff] }
  0x7a   :  { %958 = vmatpush.msra.mxu2 %v2407_v6  ;;  %981 = vmatpush.msra.mxu3 %v2408_v7  ;;  %v2557_v6 = vld [vmem:[%s5015_s0 + $0x700] sm:$0xff]  ;;  %v2558_v7 = vld [vmem:[%s5015_s0 + $0x708] sm:$0xff] }
  0x7b   :  { %912 = vmatpush.msra.mxu0 %v2405_v8  ;;  %935 = vmatpush.msra.mxu1 %v2406_v9 }
  0x7c   :  { %2534 = vmatmul.msk.f32.vlgmr.msra.gmra.mxu0 %vm128_vm1, %v2994_v28  ;;  %2537 = vmatmul.msk.f32.vlgmr.msra.gmra.mxu1 %vm128_vm1, %v2994_v28 }
  0x7d   :  { %2540 = vmatmul.msk.f32.vlgmr.msra.gmra.mxu2 %vm128_vm1, %v2994_v28  ;;  %2543 = vmatmul.msk.f32.vlgmr.msra.gmra.mxu3 %vm128_vm1, %v2994_v28 }
  0x7e   :  { %2551 = vmatpush.msk.msrb.mxu2 %vm135_vm0, %v2507_v10  ;;  %2554 = vmatpush.msk.msrb.mxu3 %vm135_vm0, %v2508_v11  ;;  %v2659_v10 = vld [vmem:[%s5015_s0 + $0xa30] sm:$0x1]  ;;  %v2660_v11 = vld [vmem:[%s5015_s0 + $0xa38] sm:$0x1] }
  0x7f   :  { %2545 = vmatpush.msk.msrb.mxu0 %vm135_vm0, %v2505_v12  ;;  %2548 = vmatpush.msk.msrb.mxu1 %vm135_vm0, %v2506_v13 }
  0x80   :  { %1045 = vmatpush.msrb.mxu2 %v2491_v14  ;;  %1068 = vmatpush.msrb.mxu3 %v2492_v15  ;;  %v3862_v14 = vld [vmem:[%s5016_s1] sm:$0xff] }
  0x81   :  { %999 = vmatpush.msrb.mxu0 %v2489_v16  ;;  %1022 = vmatpush.msrb.mxu1 %v2490_v17  ;;  %v2657_v15 = vld [vmem:[%s5015_s0 + $0xa20] sm:$0x1]  ;;  %v2658_v16 = vld [vmem:[%s5015_s0 + $0xa28] sm:$0x1]  ;;  %v2643_v17 = vld [vmem:[%s5015_s0 + $0x9b0] sm:$0xff] }
  0x82   :  { %1046 = vmatpush.msrb.mxu2 %v2475_v18  ;;  %1069 = vmatpush.msrb.mxu3 %v2476_v19  ;;  %v2644_v18 = vld [vmem:[%s5015_s0 + $0x9b8] sm:$0xff]  ;;  %v2641_v19 = vld [vmem:[%s5015_s0 + $0x9a0] sm:$0xff] }
  0x83   :  { %1000 = vmatpush.msrb.mxu0 %v2473_v20  ;;  %1023 = vmatpush.msrb.mxu1 %v2474_v21  ;;  %v2642_v20 = vld [vmem:[%s5015_s0 + $0x9a8] sm:$0xff]  ;;  %v2627_v21 = vld [vmem:[%s5015_s0 + $0x930] sm:$0xff] }
  0x84   :  { %1047 = vmatpush.msrb.mxu2 %v2459_v22  ;;  %1070 = vmatpush.msrb.mxu3 %v2460_v23  ;;  %v2628_v22 = vld [vmem:[%s5015_s0 + $0x938] sm:$0xff]  ;;  %v2625_v23 = vld [vmem:[%s5015_s0 + $0x920] sm:$0xff] }
  0x85   :  { %2535 = vmatmul.msk.f32.gmra.mxu0 %vm128_vm1, %v3053_v43  ;;  %2538 = vmatmul.msk.f32.gmra.mxu1 %vm128_vm1, %v3053_v43 }
  0x86   :  { %2541 = vmatmul.msk.f32.gmra.mxu2 %vm128_vm1, %v3053_v43  ;;  %2544 = vmatmul.msk.f32.gmra.mxu3 %vm128_vm1, %v3053_v43 }
  0x87   :  { %1001 = vmatpush.msrb.mxu0 %v2457_v24  ;;  %1024 = vmatpush.msrb.mxu1 %v2458_v25  ;;  %v2626_v24 = vld [vmem:[%s5015_s0 + $0x928] sm:$0xff]  ;;  %v2611_v25 = vld [vmem:[%s5015_s0 + $0x8b0] sm:$0xff] }
  0x88   :  { %1048 = vmatpush.msrb.mxu2 %v2443_v26  ;;  %1071 = vmatpush.msrb.mxu3 %v2444_v27  ;;  %v2612_v26 = vld [vmem:[%s5015_s0 + $0x8b8] sm:$0xff] }
  0x89   :  { %1002 = vmatpush.msrb.mxu0 %v2441_v29  ;;  %1025 = vmatpush.msrb.mxu1 %v2442_v30  ;;  %v2609_v30 = vld [vmem:[%s5015_s0 + $0x8a0] sm:$0xff] }
  0x8a   :  { %1049 = vmatpush.msrb.mxu2 %v2427_v31  ;;  %1072 = vmatpush.msrb.mxu3 %v2428_v32  ;;  %v2610_v31 = vld [vmem:[%s5015_s0 + $0x8a8] sm:$0xff] }
  0x8b   :  { %1003 = vmatpush.msrb.mxu0 %v2425_v33  ;;  %1026 = vmatpush.msrb.mxu1 %v2426_v34  ;;  %v3929_v34 = vld [vmem:[%s5016_s1 + $0x8] sm:$0x7f] }
  0x8c   :  { %1050 = vmatpush.msrb.mxu2 %v2411_v35  ;;  %1073 = vmatpush.msrb.mxu3 %v2412_v36  ;;  %v2595_v35 = vld [vmem:[%s5015_s0 + $0x830] sm:$0xff]  ;;  %v2596_v36 = vld [vmem:[%s5015_s0 + $0x838] sm:$0xff] }
  0x8d   :  { %1004 = vmatpush.msrb.mxu0 %v2409_v37  ;;  %1027 = vmatpush.msrb.mxu1 %v2410_v38  ;;  %v3735_v41 = vpop.f32.mrf.mxu0  ;;  %v3737_v42 = vpop.f32.mrf.mxu1  ;;  %v2593_v37 = vld [vmem:[%s5015_s0 + $0x820] sm:$0xff]  ;;  %v2594_v38 = vld [vmem:[%s5015_s0 + $0x828] sm:$0xff] }
  0x8e   :  { %2546 = vmatmul.msk.f32.vlgmr.msrb.gmra.mxu0 %vm128_vm1, %v2994_v28  ;;  %2549 = vmatmul.msk.f32.vlgmr.msrb.gmra.mxu1 %vm128_vm1, %v2994_v28 }
  0x8f   :  { %2552 = vmatmul.msk.f32.vlgmr.msrb.gmra.mxu2 %vm128_vm1, %v2994_v28  ;;  %2555 = vmatmul.msk.f32.vlgmr.msrb.gmra.mxu3 %vm128_vm1, %v2994_v28  ;;  %v2638_v28 = vld [vmem:[%s5015_s0 + $0x988] sm:$0xff] }
  0x90   :  { %2675 = vmatpush.msk.msra.mxu2 %vm135_vm0, %v2655_v39  ;;  %2678 = vmatpush.msk.msra.mxu3 %vm135_vm0, %v2656_v40  ;;  %v2579_v39 = vld [vmem:[%s5015_s0 + $0x7b0] sm:$0xff]  ;;  %v2580_v40 = vld [vmem:[%s5015_s0 + $0x7b8] sm:$0xff] }
  0x91   :  { %2669 = vmatpush.msk.msra.mxu0 %vm135_vm0, %v2653_v44  ;;  %2672 = vmatpush.msk.msra.mxu1 %vm135_vm0, %v2654_v45  ;;  %v2577_v44 = vld [vmem:[%s5015_s0 + $0x7a0] sm:$0xff]  ;;  %v2578_v45 = vld [vmem:[%s5015_s0 + $0x7a8] sm:$0xff] }
  0x92   :  { %1330 = vmatpush.msra.mxu2 %v2639_v46  ;;  %1353 = vmatpush.msra.mxu3 %v2640_v47  ;;  %v2563_v46 = vld [vmem:[%s5015_s0 + $0x730] sm:$0xff]  ;;  %v2564_v47 = vld [vmem:[%s5015_s0 + $0x738] sm:$0xff] }
  0x93   :  { %1284 = vmatpush.msra.mxu0 %v2637_v48  ;;  %1307 = vmatpush.msra.mxu1 %v2638_v28  ;;  %v2561_v48 = vld [vmem:[%s5015_s0 + $0x720] sm:$0xff]  ;;  %v2562_v28 = vld [vmem:[%s5015_s0 + $0x728] sm:$0xff] }
  0x94   :  { %1331 = vmatpush.msra.mxu2 %v2623_v49  ;;  %1354 = vmatpush.msra.mxu3 %v2624_v50  ;;  %v3787_v55 = vpop.f32.mrf.mxu2  ;;  %v3789_v56 = vpop.f32.mrf.mxu3 }
  0x95   :  { %5019 = vst [vmem:[#allocation2_spill] sm:$0xff] %v3789_v56  ;;  %1285 = vmatpush.msra.mxu0 %v2621_v51  ;;  %1308 = vmatpush.msra.mxu1 %v2622_v52  ;;  %v2663_v51 = vld [vmem:[%s5015_s0 + $0xa50] sm:$0x1]  ;;  %v2664_v52 = vld [vmem:[%s5015_s0 + $0xa58] sm:$0x1] }
  0x96   :  { %1332 = vmatpush.msra.mxu2 %v2607_v53  ;;  %1355 = vmatpush.msra.mxu3 %v2608_v54  ;;  %v3797_v59 = vpop.f32.mrf.mxu0  ;;  %v3799_v60 = vpop.f32.mrf.mxu1 }
  0x97   :  { %5020 = vst [vmem:[#allocation3_spill] sm:$0xff] %v3797_v59  ;;  %2547 = vmatmul.msk.f32.gmra.mxu0 %vm128_vm1, %v3053_v43  ;;  %2550 = vmatmul.msk.f32.gmra.mxu1 %vm128_vm1, %v3053_v43  ;;  %v2730_v59 = vld [vmem:[%s5015_s0 + $0xae8] sm:$0xff] }
  0x98   :  { %5021 = vst [vmem:[#allocation4_spill] sm:$0xff] %v3799_v60  ;;  %2553 = vmatmul.msk.f32.gmra.mxu2 %vm128_vm1, %v3053_v43  ;;  %2556 = vmatmul.msk.f32.gmra.mxu3 %vm128_vm1, %v3053_v43  ;;  %v2573_v43 = vld [vmem:[%s5015_s0 + $0x780] sm:$0xff] }
  0x99   :  { %1286 = vmatpush.msra.mxu0 %v2605_v57  ;;  %1309 = vmatpush.msra.mxu1 %v2606_v58  ;;  %v2661_v57 = vld [vmem:[%s5015_s0 + $0xa40] sm:$0x1]  ;;  %v2662_v58 = vld [vmem:[%s5015_s0 + $0xa48] sm:$0x1] }
  0x9a   :  { %1333 = vmatpush.msra.mxu2 %v2591_v61  ;;  %1356 = vmatpush.msra.mxu3 %v2592_v62  ;;  %v2647_v61 = vld [vmem:[%s5015_s0 + $0x9d0] sm:$0xff]  ;;  %v2648_v62 = vld [vmem:[%s5015_s0 + $0x9d8] sm:$0xff]  ;;  %v2745_v60 = vld [vmem:[%s5015_s0 + $0xb60] sm:$0xff] }
  0x9b   :  { %1287 = vmatpush.msra.mxu0 %v2589_v63  ;;  %1310 = vmatpush.msra.mxu1 %v2590_v0  ;;  %v2645_v63 = vld [vmem:[%s5015_s0 + $0x9c0] sm:$0xff]  ;;  %v2646_v0 = vld [vmem:[%s5015_s0 + $0x9c8] sm:$0xff] }
  0x9c   :  { %1334 = vmatpush.msra.mxu2 %v2575_v1  ;;  %1357 = vmatpush.msra.mxu3 %v2576_v2  ;;  %v2631_v1 = vld [vmem:[%s5015_s0 + $0x950] sm:$0xff]  ;;  %v2632_v2 = vld [vmem:[%s5015_s0 + $0x958] sm:$0xff] }
  0x9d   :  { %1288 = vmatpush.msra.mxu0 %v2573_v43  ;;  %1311 = vmatpush.msra.mxu1 %v2574_v3  ;;  %v3845_v8 = vpop.f32.mrf.mxu2  ;;  %v3847_v9 = vpop.f32.mrf.mxu3  ;;  %v2629_v43 = vld [vmem:[%s5015_s0 + $0x940] sm:$0xff]  ;;  %v2630_v3 = vld [vmem:[%s5015_s0 + $0x948] sm:$0xff] }
  0x9e   :  { %5022 = vst [vmem:[#allocation5_spill] sm:$0xff] %v3845_v8  ;;  %1335 = vmatpush.msra.mxu2 %v2559_v4  ;;  %1358 = vmatpush.msra.mxu3 %v2560_v5  ;;  %v2615_v4 = vld [vmem:[%s5015_s0 + $0x8d0] sm:$0xff]  ;;  %v2616_v5 = vld [vmem:[%s5015_s0 + $0x8d8] sm:$0xff] }
  0x9f   :  { %5023 = vst [vmem:[#allocation6_spill] sm:$0xff] %v3847_v9  ;;  %1289 = vmatpush.msra.mxu0 %v2557_v6  ;;  %1312 = vmatpush.msra.mxu1 %v2558_v7  ;;  %v3855_v12 = vpop.f32.mrf.mxu0  ;;  %v3857_v13 = vpop.f32.mrf.mxu1  ;;  %v2796_v9 = vld [vmem:[%s5015_s0 + $0xcf8] sm:$0xff] }
  0xa0   :  { %5024 = vst [vmem:[#allocation7_spill] sm:$0xff] %v3855_v12  ;;  %2670 = vmatmul.msk.f32.vlgmr.msra.gmra.mxu0 %vm128_vm1, %v3862_v14  ;;  %2673 = vmatmul.msk.f32.vlgmr.msra.gmra.mxu1 %vm128_vm1, %v3862_v14  ;;  %v2726_v12 = vld [vmem:[%s5015_s0 + $0xac8] sm:$0xff]  ;;  %v2780_v8 = vld [vmem:[%s5015_s0 + $0xc78] sm:$0xff] }
  0xa1   :  { %5025 = vst [vmem:[#allocation8_spill] sm:$0xff] %v3857_v13  ;;  %2676 = vmatmul.msk.f32.vlgmr.msra.gmra.mxu2 %vm128_vm1, %v3862_v14  ;;  %2679 = vmatmul.msk.f32.vlgmr.msra.gmra.mxu3 %vm128_vm1, %v3862_v14  ;;  %v2741_v13 = vld [vmem:[%s5015_s0 + $0xb40] sm:$0xff] }
  0xa2   :  { %2687 = vmatpush.msk.msrb.mxu2 %vm135_vm0, %v2659_v10  ;;  %2690 = vmatpush.msk.msrb.mxu3 %vm135_vm0, %v2660_v11  ;;  %v2613_v10 = vld [vmem:[%s5015_s0 + $0x8c0] sm:$0xff]  ;;  %v2614_v11 = vld [vmem:[%s5015_s0 + $0x8c8] sm:$0xff] }
  0xa3   :  { %2681 = vmatpush.msk.msrb.mxu0 %vm135_vm0, %v2657_v15  ;;  %2684 = vmatpush.msk.msrb.mxu1 %vm135_vm0, %v2658_v16 }
  0xa4   :  { %1422 = vmatpush.msrb.mxu2 %v2643_v17  ;;  %1445 = vmatpush.msrb.mxu3 %v2644_v18  ;;  %v2599_v17 = vld [vmem:[%s5015_s0 + $0x850] sm:$0xff]  ;;  %v2600_v18 = vld [vmem:[%s5015_s0 + $0x858] sm:$0xff] }
  0xa5   :  { %1376 = vmatpush.msrb.mxu0 %v2641_v19  ;;  %1399 = vmatpush.msrb.mxu1 %v2642_v20  ;;  %v2597_v19 = vld [vmem:[%s5015_s0 + $0x840] sm:$0xff]  ;;  %v2598_v20 = vld [vmem:[%s5015_s0 + $0x848] sm:$0xff] }
  0xa6   :  { %1423 = vmatpush.msrb.mxu2 %v2627_v21  ;;  %1446 = vmatpush.msrb.mxu3 %v2628_v22  ;;  %v3912_v27 = vpop.f32.mrf.mxu2  ;;  %v3914_v29 = vpop.f32.mrf.mxu3  ;;  %v2583_v21 = vld [vmem:[%s5015_s0 + $0x7d0] sm:$0xff]  ;;  %v2584_v22 = vld [vmem:[%s5015_s0 + $0x7d8] sm:$0xff] }
  0xa7   :  { %1377 = vmatpush.msrb.mxu0 %v2625_v23  ;;  %1400 = vmatpush.msrb.mxu1 %v2626_v24  ;;  %v2581_v23 = vld [vmem:[%s5015_s0 + $0x7c0] sm:$0xff]  ;;  %v2582_v24 = vld [vmem:[%s5015_s0 + $0x7c8] sm:$0xff] }
  0xa8   :  { %1424 = vmatpush.msrb.mxu2 %v2611_v25  ;;  %1447 = vmatpush.msrb.mxu3 %v2612_v26  ;;  %v3922_v32 = vpop.f32.mrf.mxu0  ;;  %v3924_v33 = vpop.f32.mrf.mxu1  ;;  %v2567_v25 = vld [vmem:[%s5015_s0 + $0x750] sm:$0xff]  ;;  %v2568_v26 = vld [vmem:[%s5015_s0 + $0x758] sm:$0xff] }
  0xa9   :  { %2671 = vmatmul.msk.f32.gmra.mxu0 %vm128_vm1, %v3929_v34  ;;  %2674 = vmatmul.msk.f32.gmra.mxu1 %vm128_vm1, %v3929_v34 }
  0xaa   :  { %2677 = vmatmul.msk.f32.gmra.mxu2 %vm128_vm1, %v3929_v34  ;;  %2680 = vmatmul.msk.f32.gmra.mxu3 %vm128_vm1, %v3929_v34 }
  0xab   :  { %1378 = vmatpush.msrb.mxu0 %v2609_v30  ;;  %1401 = vmatpush.msrb.mxu1 %v2610_v31  ;;  %v2565_v30 = vld [vmem:[%s5015_s0 + $0x740] sm:$0xff]  ;;  %v2566_v31 = vld [vmem:[%s5015_s0 + $0x748] sm:$0xff] }
  0xac   :  { %1425 = vmatpush.msrb.mxu2 %v2595_v35  ;;  %1448 = vmatpush.msrb.mxu3 %v2596_v36 }
  0xad   :  { %1379 = vmatpush.msrb.mxu0 %v2593_v37  ;;  %1402 = vmatpush.msrb.mxu1 %v2594_v38  ;;  %v2667_v37 = vld [vmem:[%s5015_s0 + $0xa70] sm:$0x1]  ;;  %v2668_v38 = vld [vmem:[%s5015_s0 + $0xa78] sm:$0x1] }
  0xae   :  { %1426 = vmatpush.msrb.mxu2 %v2579_v39  ;;  %1449 = vmatpush.msrb.mxu3 %v2580_v40 }
  0xaf   :  { %1380 = vmatpush.msrb.mxu0 %v2577_v44  ;;  %1403 = vmatpush.msrb.mxu1 %v2578_v45  ;;  %v3975_v49 = vpop.f32.mrf.mxu2  ;;  %v3977_v50 = vpop.f32.mrf.mxu3  ;;  %v2665_v44 = vld [vmem:[%s5015_s0 + $0xa60] sm:$0x1]  ;;  %v2666_v45 = vld [vmem:[%s5015_s0 + $0xa68] sm:$0x1] }
  0xb0   :  { %1427 = vmatpush.msrb.mxu2 %v2563_v46  ;;  %1450 = vmatpush.msrb.mxu3 %v2564_v47  ;;  %v2651_v46 = vld [vmem:[%s5015_s0 + $0x9f0] sm:$0xff]  ;;  %v2652_v47 = vld [vmem:[%s5015_s0 + $0x9f8] sm:$0xff] }
  0xb1   :  { %1381 = vmatpush.msrb.mxu0 %v2561_v48  ;;  %1404 = vmatpush.msrb.mxu1 %v2562_v28  ;;  %v3985_v53 = vpop.f32.mrf.mxu0  ;;  %v3987_v54 = vpop.f32.mrf.mxu1  ;;  %v2649_v48 = vld [vmem:[%s5015_s0 + $0x9e0] sm:$0xff]  ;;  %v2650_v28 = vld [vmem:[%s5015_s0 + $0x9e8] sm:$0xff] }
  0xb2   :  { %2682 = vmatmul.msk.f32.vlgmr.msrb.gmra.mxu0 %vm128_vm1, %v3862_v14  ;;  %2685 = vmatmul.msk.f32.vlgmr.msrb.gmra.mxu1 %vm128_vm1, %v3862_v14 }
  0xb3   :  { %2688 = vmatmul.msk.f32.vlgmr.msrb.gmra.mxu2 %vm128_vm1, %v3862_v14  ;;  %2691 = vmatmul.msk.f32.vlgmr.msrb.gmra.mxu3 %vm128_vm1, %v3862_v14 }
  0xb4   :  { %2699 = vmatpush.msk.msra.mxu2 %vm135_vm0, %v2663_v51  ;;  %2702 = vmatpush.msk.msra.mxu3 %vm135_vm0, %v2664_v52  ;;  %v2635_v51 = vld [vmem:[%s5015_s0 + $0x970] sm:$0xff]  ;;  %v2636_v52 = vld [vmem:[%s5015_s0 + $0x978] sm:$0xff] }
  0xb5   :  { %2693 = vmatpush.msk.msra.mxu0 %vm135_vm0, %v2661_v57  ;;  %2696 = vmatpush.msk.msra.mxu1 %vm135_vm0, %v2662_v58  ;;  %v2633_v57 = vld [vmem:[%s5015_s0 + $0x960] sm:$0xff]  ;;  %v2634_v58 = vld [vmem:[%s5015_s0 + $0x968] sm:$0xff] }
  0xb6   :  { %1514 = vmatpush.msra.mxu2 %v2647_v61  ;;  %1537 = vmatpush.msra.mxu3 %v2648_v62  ;;  %v2619_v61 = vld [vmem:[%s5015_s0 + $0x8f0] sm:$0xff]  ;;  %v2620_v62 = vld [vmem:[%s5015_s0 + $0x8f8] sm:$0xff] }
  0xb7   :  { %1468 = vmatpush.msra.mxu0 %v2645_v63  ;;  %1491 = vmatpush.msra.mxu1 %v2646_v0 }
  0xb8   :  { %1515 = vmatpush.msra.mxu2 %v2631_v1  ;;  %1538 = vmatpush.msra.mxu3 %v2632_v2  ;;  %v4037_v6 = vpop.f32.mrf.mxu2  ;;  %v4039_v7 = vpop.f32.mrf.mxu3  ;;  %v2617_v1 = vld [vmem:[%s5015_s0 + $0x8e0] sm:$0xff]  ;;  %v2618_v2 = vld [vmem:[%s5015_s0 + $0x8e8] sm:$0xff] }
  0xb9   :  { %1469 = vmatpush.msra.mxu0 %v2629_v43  ;;  %1492 = vmatpush.msra.mxu1 %v2630_v3 }
  0xba   :  { %1516 = vmatpush.msra.mxu2 %v2615_v4  ;;  %1539 = vmatpush.msra.mxu3 %v2616_v5  ;;  %v4047_v15 = vpop.f32.mrf.mxu0  ;;  %v4049_v16 = vpop.f32.mrf.mxu1  ;;  %v2603_v4 = vld [vmem:[%s5015_s0 + $0x870] sm:$0xff]  ;;  %v2604_v5 = vld [vmem:[%s5015_s0 + $0x878] sm:$0xff] }
  0xbb   :  { %2683 = vmatmul.msk.f32.gmra.mxu0 %vm128_vm1, %v3929_v34  ;;  %2686 = vmatmul.msk.f32.gmra.mxu1 %vm128_vm1, %v3929_v34 }
  0xbc   :  { %2689 = vmatmul.msk.f32.gmra.mxu2 %vm128_vm1, %v3929_v34  ;;  %2692 = vmatmul.msk.f32.gmra.mxu3 %vm128_vm1, %v3929_v34 }
  0xbd   :  { %1470 = vmatpush.msra.mxu0 %v2613_v10  ;;  %1493 = vmatpush.msra.mxu1 %v2614_v11  ;;  %v2601_v10 = vld [vmem:[%s5015_s0 + $0x860] sm:$0xff]  ;;  %v2602_v11 = vld [vmem:[%s5015_s0 + $0x868] sm:$0xff] }
  0xbe   :  { %1517 = vmatpush.msra.mxu2 %v2599_v17  ;;  %1540 = vmatpush.msra.mxu3 %v2600_v18  ;;  %v2587_v17 = vld [vmem:[%s5015_s0 + $0x7f0] sm:$0xff]  ;;  %v2588_v18 = vld [vmem:[%s5015_s0 + $0x7f8] sm:$0xff] }
  0xbf   :  { %1471 = vmatpush.msra.mxu0 %v2597_v19  ;;  %1494 = vmatpush.msra.mxu1 %v2598_v20  ;;  %v2585_v19 = vld [vmem:[%s5015_s0 + $0x7e0] sm:$0xff]  ;;  %v2586_v20 = vld [vmem:[%s5015_s0 + $0x7e8] sm:$0xff] }
  0xc0   :  { %1518 = vmatpush.msra.mxu2 %v2583_v21  ;;  %1541 = vmatpush.msra.mxu3 %v2584_v22  ;;  %v2571_v21 = vld [vmem:[%s5015_s0 + $0x770] sm:$0xff]  ;;  %v2572_v22 = vld [vmem:[%s5015_s0 + $0x778] sm:$0xff] }
  0xc1   :  { %1472 = vmatpush.msra.mxu0 %v2581_v23  ;;  %1495 = vmatpush.msra.mxu1 %v2582_v24  ;;  %v4095_v35 = vpop.f32.mrf.mxu2  ;;  %v4097_v36 = vpop.f32.mrf.mxu3  ;;  %v2569_v23 = vld [vmem:[%s5015_s0 + $0x760] sm:$0xff]  ;;  %v2570_v24 = vld [vmem:[%s5015_s0 + $0x768] sm:$0xff] }
  0xc2   :  { %1519 = vmatpush.msra.mxu2 %v2567_v25  ;;  %1542 = vmatpush.msra.mxu3 %v2568_v26 }
  0xc3   :  { %1473 = vmatpush.msra.mxu0 %v2565_v30  ;;  %1496 = vmatpush.msra.mxu1 %v2566_v31  ;;  %v4105_v39 = vpop.f32.mrf.mxu0  ;;  %v4107_v40 = vpop.f32.mrf.mxu1  ;;  %v2815_v30 = vld [vmem:[%s5015_s0 + $0xd90] sm:$0x1]  ;;  %v2816_v31 = vld [vmem:[%s5015_s0 + $0xd98] sm:$0x1] }
  0xc4   :  { %2694 = vmatmul.msk.f32.vlgmr.msra.gmra.mxu0 %vm128_vm1, %v3862_v14  ;;  %2697 = vmatmul.msk.f32.vlgmr.msra.gmra.mxu1 %vm128_vm1, %v3862_v14 }
  0xc5   :  { %2700 = vmatmul.msk.f32.vlgmr.msra.gmra.mxu2 %vm128_vm1, %v3862_v14  ;;  %2703 = vmatmul.msk.f32.vlgmr.msra.gmra.mxu3 %vm128_vm1, %v3862_v14 }
  0xc6   :  { %2711 = vmatpush.msk.msrb.mxu2 %vm135_vm0, %v2667_v37  ;;  %2714 = vmatpush.msk.msrb.mxu3 %vm135_vm0, %v2668_v38 }
  0xc7   :  { %2705 = vmatpush.msk.msrb.mxu0 %vm135_vm0, %v2665_v44  ;;  %2708 = vmatpush.msk.msrb.mxu1 %vm135_vm0, %v2666_v45  ;;  %v2813_v44 = vld [vmem:[%s5015_s0 + $0xd80] sm:$0x1]  ;;  %v2814_v45 = vld [vmem:[%s5015_s0 + $0xd88] sm:$0x1] }
  0xc8   :  { %1606 = vmatpush.msrb.mxu2 %v2651_v46  ;;  %1629 = vmatpush.msrb.mxu3 %v2652_v47  ;;  %v2799_v46 = vld [vmem:[%s5015_s0 + $0xd10] sm:$0xff]  ;;  %v2800_v47 = vld [vmem:[%s5015_s0 + $0xd18] sm:$0xff] }
  0xc9   :  { %1560 = vmatpush.msrb.mxu0 %v2649_v48  ;;  %1583 = vmatpush.msrb.mxu1 %v2650_v28  ;;  %v2797_v48 = vld [vmem:[%s5015_s0 + $0xd00] sm:$0xff]  ;;  %v2798_v28 = vld [vmem:[%s5015_s0 + $0xd08] sm:$0xff] }
  0xca   :  { %1607 = vmatpush.msrb.mxu2 %v2635_v51  ;;  %1630 = vmatpush.msrb.mxu3 %v2636_v52  ;;  %v4157_v63 = vpop.f32.mrf.mxu2  ;;  %v4159_v0 = vpop.f32.mrf.mxu3  ;;  %v2783_v51 = vld [vmem:[%s5015_s0 + $0xc90] sm:$0xff]  ;;  %v2784_v52 = vld [vmem:[%s5015_s0 + $0xc98] sm:$0xff] }
  0xcb   :  { %1561 = vmatpush.msrb.mxu0 %v2633_v57  ;;  %1584 = vmatpush.msrb.mxu1 %v2634_v58  ;;  %v2781_v57 = vld [vmem:[%s5015_s0 + $0xc80] sm:$0xff]  ;;  %v2782_v58 = vld [vmem:[%s5015_s0 + $0xc88] sm:$0xff] }
  0xcc   :  { %1608 = vmatpush.msrb.mxu2 %v2619_v61  ;;  %1631 = vmatpush.msrb.mxu3 %v2620_v62  ;;  %v4167_v43 = vpop.f32.mrf.mxu0  ;;  %v4169_v3 = vpop.f32.mrf.mxu1  ;;  %v2767_v61 = vld [vmem:[%s5015_s0 + $0xc10] sm:$0xff]  ;;  %v2768_v62 = vld [vmem:[%s5015_s0 + $0xc18] sm:$0xff] }
  0xcd   :  { %2695 = vmatmul.msk.f32.gmra.mxu0 %vm128_vm1, %v3929_v34  ;;  %2698 = vmatmul.msk.f32.gmra.mxu1 %vm128_vm1, %v3929_v34 }
  0xce   :  { %2701 = vmatmul.msk.f32.gmra.mxu2 %vm128_vm1, %v3929_v34  ;;  %2704 = vmatmul.msk.f32.gmra.mxu3 %vm128_vm1, %v3929_v34 }
  0xcf   :  { %1562 = vmatpush.msrb.mxu0 %v2617_v1  ;;  %1585 = vmatpush.msrb.mxu1 %v2618_v2 }
  0xd0   :  { %1609 = vmatpush.msrb.mxu2 %v2603_v4  ;;  %1632 = vmatpush.msrb.mxu3 %v2604_v5  ;;  %v2765_v4 = vld [vmem:[%s5015_s0 + $0xc00] sm:$0xff]  ;;  %v2766_v5 = vld [vmem:[%s5015_s0 + $0xc08] sm:$0xff] }
  0xd1   :  { %1563 = vmatpush.msrb.mxu0 %v2601_v10  ;;  %1586 = vmatpush.msrb.mxu1 %v2602_v11 }
  0xd2   :  { %1610 = vmatpush.msrb.mxu2 %v2587_v17  ;;  %1633 = vmatpush.msrb.mxu3 %v2588_v18  ;;  %v2751_v17 = vld [vmem:[%s5015_s0 + $0xb90] sm:$0xff]  ;;  %v2752_v18 = vld [vmem:[%s5015_s0 + $0xb98] sm:$0xff] }
  0xd3   :  { %1564 = vmatpush.msrb.mxu0 %v2585_v19  ;;  %1587 = vmatpush.msrb.mxu1 %v2586_v20  ;;  %v4215_v25 = vpop.f32.mrf.mxu2  ;;  %v4217_v26 = vpop.f32.mrf.mxu3  ;;  %v2749_v19 = vld [vmem:[%s5015_s0 + $0xb80] sm:$0xff]  ;;  %v2750_v20 = vld [vmem:[%s5015_s0 + $0xb88] sm:$0xff] }
  0xd4   :  { %1611 = vmatpush.msrb.mxu2 %v2571_v21  ;;  %1634 = vmatpush.msrb.mxu3 %v2572_v22  ;;  %v2735_v21 = vld [vmem:[%s5015_s0 + $0xb10] sm:$0xff]  ;;  %v2736_v22 = vld [vmem:[%s5015_s0 + $0xb18] sm:$0xff] }
  0xd5   :  { %1565 = vmatpush.msrb.mxu0 %v2569_v23  ;;  %1588 = vmatpush.msrb.mxu1 %v2570_v24  ;;  %v4225_v37 = vpop.f32.mrf.mxu0  ;;  %v4227_v38 = vpop.f32.mrf.mxu1  ;;  %v2733_v23 = vld [vmem:[%s5015_s0 + $0xb00] sm:$0xff]  ;;  %v2734_v24 = vld [vmem:[%s5015_s0 + $0xb08] sm:$0xff] }
  0xd6   :  { %2706 = vmatmul.msk.f32.vlgmr.msrb.gmra.mxu0 %vm128_vm1, %v3862_v14  ;;  %2709 = vmatmul.msk.f32.vlgmr.msrb.gmra.mxu1 %vm128_vm1, %v3862_v14 }
  0xd7   :  { %2712 = vmatmul.msk.f32.vlgmr.msrb.gmra.mxu2 %vm128_vm1, %v3862_v14  ;;  %2715 = vmatmul.msk.f32.vlgmr.msrb.gmra.mxu3 %vm128_vm1, %v3862_v14 }
  0xd8   :  { %2835 = vmatpush.msk.msra.mxu2 %vm135_vm0, %v2815_v30  ;;  %2838 = vmatpush.msk.msra.mxu3 %vm135_vm0, %v2816_v31  ;;  %v2719_v30 = vld [vmem:[%s5015_s0 + $0xa90] sm:$0xff]  ;;  %v2720_v31 = vld [vmem:[%s5015_s0 + $0xa98] sm:$0xff] }
  0xd9   :  { %2829 = vmatpush.msk.msra.mxu0 %vm135_vm0, %v2813_v44  ;;  %2832 = vmatpush.msk.msra.mxu1 %vm135_vm0, %v2814_v45  ;;  %v2717_v44 = vld [vmem:[%s5015_s0 + $0xa80] sm:$0xff]  ;;  %v2718_v45 = vld [vmem:[%s5015_s0 + $0xa88] sm:$0xff] }
  0xda   :  { %1891 = vmatpush.msra.mxu2 %v2799_v46  ;;  %1914 = vmatpush.msra.mxu3 %v2800_v47 }
  0xdb   :  { %1845 = vmatpush.msra.mxu0 %v2797_v48  ;;  %1868 = vmatpush.msra.mxu1 %v2798_v28  ;;  %v2819_v48 = vld [vmem:[%s5015_s0 + $0xdb0] sm:$0x1]  ;;  %v2820_v28 = vld [vmem:[%s5015_s0 + $0xdb8] sm:$0x1] }
  0xdc   :  { %1892 = vmatpush.msra.mxu2 %v2783_v51  ;;  %1915 = vmatpush.msra.mxu3 %v2784_v52  ;;  %v4277_v1 = vpop.f32.mrf.mxu2  ;;  %v4279_v2 = vpop.f32.mrf.mxu3 }
  0xdd   :  { %1846 = vmatpush.msra.mxu0 %v2781_v57  ;;  %1869 = vmatpush.msra.mxu1 %v2782_v58  ;;  %v2817_v57 = vld [vmem:[%s5015_s0 + $0xda0] sm:$0x1]  ;;  %v2818_v58 = vld [vmem:[%s5015_s0 + $0xda8] sm:$0x1] }
  0xde   :  { %1893 = vmatpush.msra.mxu2 %v2767_v61  ;;  %1916 = vmatpush.msra.mxu3 %v2768_v62  ;;  %v4287_v10 = vpop.f32.mrf.mxu0  ;;  %v4289_v11 = vpop.f32.mrf.mxu1  ;;  %v2803_v61 = vld [vmem:[%s5015_s0 + $0xd30] sm:$0xff]  ;;  %v2804_v62 = vld [vmem:[%s5015_s0 + $0xd38] sm:$0xff] }
  0xdf   :  { %5026 = vst [vmem:[#allocation9_spill] sm:$0xff] %v4287_v10  ;;  %2707 = vmatmul.msk.f32.gmra.mxu0 %vm128_vm1, %v3929_v34  ;;  %2710 = vmatmul.msk.f32.gmra.mxu1 %vm128_vm1, %v3929_v34 }
  0xe0   :  { %5027 = vst [vmem:[#allocation10_spill] sm:$0xff] %v4289_v11  ;;  %2713 = vmatmul.msk.f32.gmra.mxu2 %vm128_vm1, %v3929_v34  ;;  %2716 = vmatmul.msk.f32.gmra.mxu3 %vm128_vm1, %v3929_v34  ;;  %v2731_v11 = vld [vmem:[%s5015_s0 + $0xaf0] sm:$0xff] }
  0xe1   :  { %1847 = vmatpush.msra.mxu0 %v2765_v4  ;;  %1870 = vmatpush.msra.mxu1 %v2766_v5  ;;  %v2801_v4 = vld [vmem:[%s5015_s0 + $0xd20] sm:$0xff]  ;;  %v2802_v5 = vld [vmem:[%s5015_s0 + $0xd28] sm:$0xff] }
  0xe2   :  { %1894 = vmatpush.msra.mxu2 %v2751_v17  ;;  %1917 = vmatpush.msra.mxu3 %v2752_v18  ;;  %v2787_v17 = vld [vmem:[%s5015_s0 + $0xcb0] sm:$0xff]  ;;  %v2788_v18 = vld [vmem:[%s5015_s0 + $0xcb8] sm:$0xff] }
  0xe3   :  { %1848 = vmatpush.msra.mxu0 %v2749_v19  ;;  %1871 = vmatpush.msra.mxu1 %v2750_v20  ;;  %v2785_v19 = vld [vmem:[%s5015_s0 + $0xca0] sm:$0xff]  ;;  %v2786_v20 = vld [vmem:[%s5015_s0 + $0xca8] sm:$0xff] }
  0xe4   :  { %1895 = vmatpush.msra.mxu2 %v2735_v21  ;;  %1918 = vmatpush.msra.mxu3 %v2736_v22  ;;  %v2771_v21 = vld [vmem:[%s5015_s0 + $0xc30] sm:$0xff]  ;;  %v2772_v22 = vld [vmem:[%s5015_s0 + $0xc38] sm:$0xff] }
  0xe5   :  { %1849 = vmatpush.msra.mxu0 %v2733_v23  ;;  %1872 = vmatpush.msra.mxu1 %v2734_v24  ;;  %v4335_v46 = vpop.f32.mrf.mxu2  ;;  %v4337_v47 = vpop.f32.mrf.mxu3 }
  0xe6   :  { %5028 = vst [vmem:[#allocation11_spill] sm:$0xff] %v4335_v46  ;;  %1896 = vmatpush.msra.mxu2 %v2719_v30  ;;  %1919 = vmatpush.msra.mxu3 %v2720_v31  ;;  %v2769_v30 = vld [vmem:[%s5015_s0 + $0xc20] sm:$0xff]  ;;  %v2770_v31 = vld [vmem:[%s5015_s0 + $0xc28] sm:$0xff] }
  0xe7   :  { %5029 = vst [vmem:[#allocation12_spill] sm:$0xff] %v4337_v47  ;;  %1850 = vmatpush.msra.mxu0 %v2717_v44  ;;  %1873 = vmatpush.msra.mxu1 %v2718_v45  ;;  %v4345_v51 = vpop.f32.mrf.mxu0  ;;  %v4347_v52 = vpop.f32.mrf.mxu1  ;;  %v2779_v47 = vld [vmem:[%s5015_s0 + $0xc70] sm:$0xff]  ;;  %v2777_v46 = vld [vmem:[%s5015_s0 + $0xc60] sm:$0xff] }
  0xe8   :  { %5030 = vst [vmem:[#allocation13_spill] sm:$0xff] %v4345_v51  ;;  %2830 = vmatmul.msk.f32.vlgmr.msra.gmra.mxu0 %vm128_vm1, %v3862_v14  ;;  %2833 = vmatmul.msk.f32.vlgmr.msra.gmra.mxu1 %vm128_vm1, %v3862_v14  ;;  %v2827_v51 = vld [vmem:[%s5015_s0 + $0xdf0] sm:$0x1] }
  0xe9   :  { %5031 = vst [vmem:[#allocation14_spill] sm:$0xff] %v4347_v52  ;;  %2836 = vmatmul.msk.f32.vlgmr.msra.gmra.mxu2 %vm128_vm1, %v3862_v14  ;;  %2839 = vmatmul.msk.f32.vlgmr.msra.gmra.mxu3 %vm128_vm1, %v3862_v14  ;;  %v2727_v52 = vld [vmem:[%s5015_s0 + $0xad0] sm:$0xff] }
  0xea   :  { %2847 = vmatpush.msk.msrb.mxu2 %vm135_vm0, %v2819_v48  ;;  %2850 = vmatpush.msk.msrb.mxu3 %vm135_vm0, %v2820_v28  ;;  %v2755_v48 = vld [vmem:[%s5015_s0 + $0xbb0] sm:$0xff]  ;;  %v2756_v28 = vld [vmem:[%s5015_s0 + $0xbb8] sm:$0xff] }
  0xeb   :  { %2841 = vmatpush.msk.msrb.mxu0 %vm135_vm0, %v2817_v57  ;;  %2844 = vmatpush.msk.msrb.mxu1 %vm135_vm0, %v2818_v58  ;;  %v2753_v57 = vld [vmem:[%s5015_s0 + $0xba0] sm:$0xff]  ;;  %v2754_v58 = vld [vmem:[%s5015_s0 + $0xba8] sm:$0xff] }
  0xec   :  { %1983 = vmatpush.msrb.mxu2 %v2803_v61  ;;  %2006 = vmatpush.msrb.mxu3 %v2804_v62  ;;  %v2739_v61 = vld [vmem:[%s5015_s0 + $0xb30] sm:$0xff]  ;;  %v2740_v62 = vld [vmem:[%s5015_s0 + $0xb38] sm:$0xff] }
  0xed   :  { %1937 = vmatpush.msrb.mxu0 %v2801_v4  ;;  %1960 = vmatpush.msrb.mxu1 %v2802_v5  ;;  %v2235_v4 = vld [vmem:[%s5017_s2] sm:$0xff] }
  0xee   :  { %1984 = vmatpush.msrb.mxu2 %v2787_v17  ;;  %2007 = vmatpush.msrb.mxu3 %v2788_v18  ;;  %v4397_v23 = vpop.f32.mrf.mxu2  ;;  %v4399_v24 = vpop.f32.mrf.mxu3  ;;  %v2737_v5 = vld [vmem:[%s5015_s0 + $0xb20] sm:$0xff]  ;;  %v2738_v17 = vld [vmem:[%s5015_s0 + $0xb28] sm:$0xff]  ;;  %v2882_v18 = vmov 0  }
  0xef   :  { %1938 = vmatpush.msrb.mxu0 %v2785_v19  ;;  %1961 = vmatpush.msrb.mxu1 %v2786_v20  ;;  %v2723_v19 = vld [vmem:[%s5015_s0 + $0xab0] sm:$0xff]  ;;  %v2724_v20 = vld [vmem:[%s5015_s0 + $0xab8] sm:$0xff] }
  0xf0   :  { %1985 = vmatpush.msrb.mxu2 %v2771_v21  ;;  %2008 = vmatpush.msrb.mxu3 %v2772_v22  ;;  %v4407_v44 = vpop.f32.mrf.mxu0  ;;  %v4409_v45 = vpop.f32.mrf.mxu1  ;;  %v2721_v21 = vld [vmem:[%s5015_s0 + $0xaa0] sm:$0xff]  ;;  %v2722_v22 = vld [vmem:[%s5015_s0 + $0xaa8] sm:$0xff] }
  0xf1   :  { %2831 = vmatmul.msk.f32.gmra.mxu0 %vm128_vm1, %v3929_v34  ;;  %2834 = vmatmul.msk.f32.gmra.mxu1 %vm128_vm1, %v3929_v34  ;;  %v1101_v10 = vmax.f32 %v3922_v32, %v4407_v44 }
  0xf2   :  { %2837 = vmatmul.msk.f32.gmra.mxu2 %vm128_vm1, %v3929_v34  ;;  %2840 = vmatmul.msk.f32.gmra.mxu3 %vm128_vm1, %v3929_v34 }
  0xf3   :  { %1939 = vmatpush.msrb.mxu0 %v2769_v30  ;;  %1962 = vmatpush.msrb.mxu1 %v2770_v31 }
  0xf4   :  { %1986 = vmatpush.msrb.mxu2 %v2755_v48  ;;  %2009 = vmatpush.msrb.mxu3 %v2756_v28 }
  0xf5   :  { %1940 = vmatpush.msrb.mxu0 %v2753_v57  ;;  %1963 = vmatpush.msrb.mxu1 %v2754_v58  ;;  %v2823_v57 = vld [vmem:[%s5015_s0 + $0xdd0] sm:$0x1]  ;;  %v2824_v58 = vld [vmem:[%s5015_s0 + $0xdd8] sm:$0x1] }
  0xf6   :  { %2878 = vset.pattern.permute.xlu0 %v2882_v18  ;;  %1987 = vmatpush.msrb.mxu2 %v2739_v61  ;;  %v2821_v61 = vld [vmem:[%s5015_s0 + $0xdc0] sm:$0x1] }
  0xf7   :  { %2010 = vmatpush.msrb.mxu3 %v2740_v62  ;;  %2239 = vperm.xlu0 %2878, %v2235_v4   ;;  %v4458_v30 = vpop.f32.mrf.mxu2  ;;  %v4460_v31 = vpop.f32.mrf.mxu3  ;;  %v2822_v62 = vld [vmem:[%s5015_s0 + $0xdc8] sm:$0x1]  ;;  %v2807_v4 = vld [vmem:[%s5015_s0 + $0xd50] sm:$0xff]  ;;  %v2805_v18 = vld [vmem:[%s5015_s0 + $0xd40] sm:$0xff] }
  0xf8   :  { %1941 = vmatpush.msrb.mxu0 %v2737_v5  ;;  %1964 = vmatpush.msrb.mxu1 %v2738_v17  ;;  %v2808_v5 = vld [vmem:[%s5015_s0 + $0xd58] sm:$0xff]  ;;  %v2236_v17 = vld [vmem:[%s5017_s2 + $0x8] sm:$0x7f] }
  0xf9   :  { %1988 = vmatpush.msrb.mxu2 %v2723_v19  ;;  %2011 = vmatpush.msrb.mxu3 %v2724_v20  ;;  %v4462_v48 = vpop.f32.mrf.mxu0  ;;  %v4464_v28 = vpop.f32.mrf.mxu1  ;;  %v2806_v19 = vld [vmem:[%s5015_s0 + $0xd48] sm:$0xff]  ;;  %v2791_v20 = vld [vmem:[%s5015_s0 + $0xcd0] sm:$0xff] }
  0xfa   :  { %1942 = vmatpush.msrb.mxu0 %v2721_v21  ;;  %1965 = vmatpush.msrb.mxu1 %v2722_v22  ;;  %v2792_v21 = vld [vmem:[%s5015_s0 + $0xcd8] sm:$0xff]  ;;  %v2789_v22 = vld [vmem:[%s5015_s0 + $0xcc0] sm:$0xff]  ;;  %v1090_v44 = vmax.f32 %v3987_v54, %v4464_v28 }
  0xfb   :  { %2842 = vmatmul.msk.f32.vlgmr.msrb.gmra.mxu0 %vm128_vm1, %v3862_v14  ;;  %2845 = vmatmul.msk.f32.vlgmr.msrb.gmra.mxu1 %vm128_vm1, %v3862_v14 }
  0xfc   :  { %2848 = vmatmul.msk.f32.vlgmr.msrb.gmra.mxu2 %vm128_vm1, %v3862_v14  ;;  %2851 = vmatmul.msk.f32.vlgmr.msrb.gmra.mxu3 %vm128_vm1, %v3862_v14 }
  0xfd   :  { %2859 = vmatpush.msk.msra.mxu2 %vm135_vm0, %v2823_v57  ;;  %2862 = vmatpush.msk.msra.mxu3 %vm135_vm0, %v2824_v58  ;;  %v2790_v57 = vld [vmem:[%s5015_s0 + $0xcc8] sm:$0xff]  ;;  %v2775_v58 = vld [vmem:[%s5015_s0 + $0xc50] sm:$0xff] }
  0xfe   :  { %2853 = vmatpush.msk.msra.mxu0 %vm135_vm0, %v2821_v61  ;;  %2856 = vmatpush.msk.msra.mxu1 %vm135_vm0, %v2822_v62 }
  0xff   :  { %2075 = vmatpush.msra.mxu2 %v2807_v4  ;;  %2098 = vmatpush.msra.mxu3 %v2808_v5  ;;  %v2776_v4 = vld [vmem:[%s5015_s0 + $0xc58] sm:$0xff] }
 0x100   :  { %2244 = vperm.xlu0 %2878, %v2236_v17   ;;  %2029 = vmatpush.msra.mxu0 %v2805_v18  ;;  %v4520_v61 = vpop.f32.mrf.mxu2  ;;  %v4522_v62 = vpop.f32.mrf.mxu3  ;;  %v2773_v18 = vld [vmem:[%s5015_s0 + $0xc40] sm:$0xff] }
 0x101   :  { %2052 = vmatpush.msra.mxu1 %v2806_v19  ;;  %2076 = vmatpush.msra.mxu2 %v2791_v20  ;;  %v2774_v19 = vld [vmem:[%s5015_s0 + $0xc48] sm:$0xff]  ;;  %v2759_v20 = vld [vmem:[%s5015_s0 + $0xbd0] sm:$0xff] }
 0x102   :  { %2099 = vmatpush.msra.mxu3 %v2792_v21  ;;  %2030 = vmatpush.msra.mxu0 %v2789_v22  ;;  %v4527_v5 = vpop.f32.mrf.mxu0  ;;  %v4529_v17 = vpop.f32.mrf.mxu1  ;;  %v2760_v21 = vld [vmem:[%s5015_s0 + $0xbd8] sm:$0xff]  ;;  %v2757_v22 = vld [vmem:[%s5015_s0 + $0xbc0] sm:$0xff] }
 0x103   :  { %2053 = vmatpush.msra.mxu1 %v2790_v57  ;;  %2077 = vmatpush.msra.mxu2 %v2775_v58  ;;  %v2758_v57 = vld [vmem:[%s5015_s0 + $0xbc8] sm:$0xff]  ;;  %v2743_v58 = vld [vmem:[%s5015_s0 + $0xb50] sm:$0xff]  ;;  %v1105_v54 = vmax.f32 %v4047_v15, %v4527_v5 }
 0x104   :  { %2100 = vmatpush.msra.mxu3 %v2776_v4  ;;  %2843 = vmatmul.msk.f32.gmra.mxu0 %vm128_vm1, %v3929_v34  ;;  %v2744_v4 = vld [vmem:[%s5015_s0 + $0xb58] sm:$0xff] }
 0x105   :  { %2846 = vmatmul.msk.f32.gmra.mxu1 %vm128_vm1, %v3929_v34  ;;  %2849 = vmatmul.msk.f32.gmra.mxu2 %vm128_vm1, %v3929_v34 }
 0x106   :  { %2852 = vmatmul.msk.f32.gmra.mxu3 %vm128_vm1, %v3929_v34  ;;  %2031 = vmatpush.msra.mxu0 %v2773_v18  ;;  %v2742_v18 = vld [vmem:[%s5015_s0 + $0xb48] sm:$0xff] }
 0x107   :  { %2054 = vmatpush.msra.mxu1 %v2774_v19  ;;  %2078 = vmatpush.msra.mxu2 %v2759_v20  ;;  %v2728_v19 = vld [vmem:[%s5015_s0 + $0xad8] sm:$0xff]  ;;  %v2725_v20 = vld [vmem:[%s5015_s0 + $0xac0] sm:$0xff] }
 0x108   :  { %2101 = vmatpush.msra.mxu3 %v2760_v21  ;;  %2032 = vmatpush.msra.mxu0 %v2757_v22 }
 0x109   :  { %2055 = vmatpush.msra.mxu1 %v2758_v57  ;;  %2079 = vmatpush.msra.mxu2 %v2743_v58  ;;  %v4578_v21 = vpop.f32.mrf.mxu2  ;;  %v4580_v22 = vpop.f32.mrf.mxu3 }
 0x10a   :  { %2102 = vmatpush.msra.mxu3 %v2744_v4  ;;  %2033 = vmatpush.msra.mxu0 %v2741_v13  ;;  %v2828_v13 = vld [vmem:[%s5015_s0 + $0xdf8] sm:$0x1]  ;;  %v2811_v4 = vld [vmem:[%s5015_s0 + $0xd70] sm:$0xff] }
 0x10b   :  { %2056 = vmatpush.msra.mxu1 %v2742_v18  ;;  %2080 = vmatpush.msra.mxu2 %v2727_v52  ;;  %v4585_v57 = vpop.f32.mrf.mxu0  ;;  %v4587_v58 = vpop.f32.mrf.mxu1  ;;  %v2825_v52 = vld [vmem:[%s5015_s0 + $0xde0] sm:$0x1]  ;;  %v2812_v18 = vld [vmem:[%s5015_s0 + $0xd78] sm:$0xff] }
 0x10c   :  { %2103 = vmatpush.msra.mxu3 %v2728_v19  ;;  %2034 = vmatpush.msra.mxu0 %v2725_v20  ;;  %v2809_v19 = vld [vmem:[%s5015_s0 + $0xd60] sm:$0xff]  ;;  %v2810_v20 = vld [vmem:[%s5015_s0 + $0xd68] sm:$0xff]  ;;  %v1094_v5 = vmax.f32 %v4107_v40, %v4587_v58 }
 0x10d   :  { %2057 = vmatpush.msra.mxu1 %v2726_v12  ;;  %2854 = vmatmul.msk.f32.vlgmr.msra.gmra.mxu0 %vm128_vm1, %v3862_v14  ;;  %v2826_v12 = vld [vmem:[%s5015_s0 + $0xde8] sm:$0x1] }
 0x10e   :  { %2857 = vmatmul.msk.f32.vlgmr.msra.gmra.mxu1 %vm128_vm1, %v3862_v14  ;;  %2860 = vmatmul.msk.f32.vlgmr.msra.gmra.mxu2 %vm128_vm1, %v3862_v14 }
 0x10f   :  { %2863 = vmatmul.msk.f32.vlgmr.msra.gmra.mxu3 %vm128_vm1, %v3862_v14  ;;  %2871 = vmatpush.msk.msrb.mxu2 %vm135_vm0, %v2827_v51  ;;  %v2795_v51 = vld [vmem:[%s5015_s0 + $0xcf0] sm:$0xff] }
 0x110   :  { %2874 = vmatpush.msk.msrb.mxu3 %vm135_vm0, %v2828_v13  ;;  %2865 = vmatpush.msk.msrb.mxu0 %vm135_vm0, %v2825_v52  ;;  %v2793_v13 = vld [vmem:[%s5015_s0 + $0xce0] sm:$0xff]  ;;  %v2794_v52 = vld [vmem:[%s5015_s0 + $0xce8] sm:$0xff] }
 0x111   :  { %2868 = vmatpush.msk.msrb.mxu1 %vm135_vm0, %v2826_v12  ;;  %2167 = vmatpush.msrb.mxu2 %v2811_v4 }
 0x112   :  { %2190 = vmatpush.msrb.mxu3 %v2812_v18  ;;  %2121 = vmatpush.msrb.mxu0 %v2809_v19  ;;  %v4640_v12 = vpop.f32.mrf.mxu2  ;;  %v4642_v4 = vpop.f32.mrf.mxu3 }
 0x113   :  { %2144 = vmatpush.msrb.mxu1 %v2810_v20  ;;  %2168 = vmatpush.msrb.mxu2 %v2795_v51  ;;  %v2778_v20 = vld [vmem:[%s5015_s0 + $0xc68] sm:$0xff] }
 0x114   :  { %2191 = vmatpush.msrb.mxu3 %v2796_v9  ;;  %2122 = vmatpush.msrb.mxu0 %v2793_v13  ;;  %v4647_v18 = vpop.f32.mrf.mxu0  ;;  %v4649_v19 = vpop.f32.mrf.mxu1  ;;  %v2763_v9 = vld [vmem:[%s5015_s0 + $0xbf0] sm:$0xff]  ;;  %v2762_v51 = vld [vmem:[%s5015_s0 + $0xbe8] sm:$0xff] }
 0x115   :  { %2145 = vmatpush.msrb.mxu1 %v2794_v52  ;;  %2169 = vmatpush.msrb.mxu2 %v2779_v47  ;;  %v2761_v47 = vld [vmem:[%s5015_s0 + $0xbe0] sm:$0xff]  ;;  %v2747_v13 = vld [vmem:[%s5015_s0 + $0xb70] sm:$0xff]  ;;  %v2748_v52 = vld [vmem:[%s5015_s0 + $0xb78] sm:$0xff]  ;;  %v1109_v40 = vmax.f32 %v4167_v43, %v4647_v18 }
 0x116   :  { %2192 = vmatpush.msrb.mxu3 %v2780_v8  ;;  %2855 = vmatmul.msk.f32.gmra.mxu0 %vm128_vm1, %v3929_v34  ;;  %v2764_v8 = vld [vmem:[%s5015_s0 + $0xbf8] sm:$0xff] }
 0x117   :  { %2858 = vmatmul.msk.f32.gmra.mxu1 %vm128_vm1, %v3929_v34  ;;  %2861 = vmatmul.msk.f32.gmra.mxu2 %vm128_vm1, %v3929_v34 }
 0x118   :  { %2864 = vmatmul.msk.f32.gmra.mxu3 %vm128_vm1, %v3929_v34  ;;  %2123 = vmatpush.msrb.mxu0 %v2777_v46  ;;  %v2746_v46 = vld [vmem:[%s5015_s0 + $0xb68] sm:$0xff] }
 0x119   :  { %2146 = vmatpush.msrb.mxu1 %v2778_v20  ;;  %2170 = vmatpush.msrb.mxu2 %v2763_v9  ;;  %v2732_v20 = vld [vmem:[%s5015_s0 + $0xaf8] sm:$0xff]  ;;  %v2729_v9 = vld [vmem:[%s5015_s0 + $0xae0] sm:$0xff] }
 0x11a   :  { %2193 = vmatpush.msrb.mxu3 %v2764_v8  ;;  %2124 = vmatpush.msrb.mxu0 %v2761_v47 }
 0x11b   :  { %2147 = vmatpush.msrb.mxu1 %v2762_v51  ;;  %2171 = vmatpush.msrb.mxu2 %v2747_v13  ;;  %v4698_v8 = vpop.f32.mrf.mxu2  ;;  %v4700_v47 = vpop.f32.mrf.mxu3 }
 0x11c   :  { %2194 = vmatpush.msrb.mxu3 %v2748_v52  ;;  %2125 = vmatpush.msrb.mxu0 %v2745_v60  ;;  %v2881_v60 = vld [vmem:[%s5016_s1] sm:$0xff]  ;;  %v1111_v43 = vmax.f32 %v4215_v25, %v4698_v8  ;;  %v1083_v25 = vmax.f32 %v3787_v55, %v4277_v1 }
 0x11d   :  { %2148 = vmatpush.msrb.mxu1 %v2746_v46  ;;  %2172 = vmatpush.msrb.mxu2 %v2731_v11  ;;  %v4705_v51 = vpop.f32.mrf.mxu0  ;;  %v4707_v13 = vpop.f32.mrf.mxu1 }
 0x11e   :  { %2195 = vmatpush.msrb.mxu3 %v2732_v20  ;;  %2126 = vmatpush.msrb.mxu0 %v2729_v9 }
 0x11f   :  { %2149 = vmatpush.msrb.mxu1 %v2730_v59  ;;  %2866 = vmatmul.msk.f32.vlgmr.msrb.gmra.mxu0 %vm128_vm1, %v3862_v14 }
 0x120   :  { %2869 = vmatmul.msk.f32.vlgmr.msrb.gmra.mxu1 %vm128_vm1, %v3862_v14  ;;  %2872 = vmatmul.msk.f32.vlgmr.msrb.gmra.mxu2 %vm128_vm1, %v3862_v14 }
 0x121   :  { %2875 = vmatmul.msk.f32.vlgmr.msrb.gmra.mxu3 %vm128_vm1, %v2881_v60 }
 0x124   :  { %v4719_v11 = vpop.f32.mrf.mxu2  ;;  %v4721_v52 = vpop.f32.mrf.mxu3 }
 0x125   :  { %5032 = vst [vmem:[#allocation15_spill] sm:$0xff] %v4719_v11 }
 0x126   :  { %5033 = vst [vmem:[#allocation16_spill] sm:$0xff] %v4721_v52  ;;  %v4723_v59 = vpop.f32.mrf.mxu0  ;;  %v4725_v46 = vpop.f32.mrf.mxu1 }
 0x127   :  { %5034 = vst [vmem:[#allocation17_spill] sm:$0xff] %v4723_v59  ;;  %2867 = vmatmul.msk.f32.gmra.mxu0 %vm128_vm1, %v3929_v34  ;;  %v1088_v59 = vmax.f32 %v3914_v29, %v4399_v24  ;;  %v1103_v29 = vmax.f32 %v3975_v49, %v4458_v30  ;;  %v1092_v30 = vmax.f32 %v4039_v7, %v4522_v62 }
 0x128   :  { %5035 = vst [vmem:[#allocation18_spill] sm:$0xff] %v4725_v46  ;;  %2870 = vmatmul.msk.f32.gmra.mxu1 %vm128_vm1, %v3929_v34  ;;  %2873 = vmatmul.msk.f32.gmra.mxu2 %vm128_vm1, %v3929_v34  ;;  %v1087_v46 = vmax.f32 %v3912_v27, %v4397_v23  ;;  %v1104_v23 = vmax.f32 %v3977_v50, %v4460_v31 }
 0x129   :  { %2876 = vmatmul.msk.f32.gmra.mxu3 %vm128_vm1, %v3929_v34  ;;  %v1102_v34 = vmax.f32 %v3924_v33, %v4409_v45  ;;  %v1089_v33 = vmax.f32 %v3985_v53, %v4462_v48  ;;  %v1091_v50 = vmax.f32 %v4037_v6, %v4520_v61  ;;  %v1106_v48 = vmax.f32 %v4049_v16, %v4529_v17 }
 0x12a   :  { %v1107_v7 = vmax.f32 %v4095_v35, %v4578_v21  ;;  %v1108_v61 = vmax.f32 %v4097_v36, %v4580_v22  ;;  %v1093_v16 = vmax.f32 %v4105_v39, %v4585_v57  ;;  %v1095_v36 = vmax.f32 %v4157_v63, %v4640_v12 }
 0x12b   :  { %v1096_v21 = vmax.f32 %v4159_v0, %v4642_v4  ;;  %v1110_v57 = vmax.f32 %v4169_v3, %v4649_v19  ;;  %v1081_v0 = vmax.f32 %v3735_v41, %v4225_v37  ;;  %v1082_v12 = vmax.f32 %v3737_v42, %v4227_v38  ;;  %v5040_v38 = vld [vmem:[#allocation2_spill] sm:$0xff] }
 0x12c   :  { %v1112_v3 = vmax.f32 %v4217_v26, %v4700_v47  ;;  %v1084_v26 = vmax.f32 %v5040_v38, %v4279_v2 }
 0x12d   :  { %v4735_v14 = vpop.f32.mrf.mxu2  ;;  %v4737_v20 = vpop.f32.mrf.mxu3  ;;  %v1642_v19 = vmax.f32 %v1081_v0, %v4705_v51 }
 0x12e   :  { %5036 = vst [vmem:[#allocation19_spill] sm:$0xff] %v4735_v14 }
 0x12f   :  { %5037 = vst [vmem:[#allocation20_spill] sm:$0xff] %v4737_v20  ;;  %v4739_v9 = vpop.f32.mrf.mxu0  ;;  %v4741_v60 = vpop.f32.mrf.mxu1 }
 0x130   :  { %5038 = vst [vmem:[#allocation21_spill] sm:$0xff] %v4739_v9 }
 0x131   :  { %5039 = vst [vmem:[#allocation22_spill] sm:$0xff] %v4741_v60 }
 0x135   :  { %v5053_v38 = vld [vmem:[#allocation19_spill] sm:$0xff] }
 0x136   :  { %v1429_v52 = vpop.f32.mrf.mxu2  ;;  %v1452_v11 = vpop.f32.mrf.mxu3 }
 0x137   :  { %v4751_v14 = vmax.f32 %v1087_v46, %v1429_v52  ;;  %v4753_v20 = vmax.f32 %v1088_v59, %v1452_v11 }
 0x138   :  { %v1386_v9 = vpop.f32.mrf.mxu0  ;;  %v1409_v60 = vpop.f32.mrf.mxu1 }
 0x139   :  { %v4755_v56 = vmax.f32 %v1101_v10, %v1386_v9  ;;  %v4757_v27 = vmax.f32 %v1102_v34, %v1409_v60 }
 0x13f   :  { %v1432_v32 = vpop.f32.mrf.mxu2  ;;  %v1455_v24 = vpop.f32.mrf.mxu3 }
 0x140   :  { %v4767_v45 = vmax.f32 %v1103_v29, %v1432_v32  ;;  %v4769_v10 = vmax.f32 %v1104_v23, %v1455_v24 }
 0x141   :  { %v1475_v11 = vpop.f32.mrf.mxu0  ;;  %v1498_v52 = vpop.f32.mrf.mxu1 }
 0x142   :  { %v4771_v59 = vmax.f32 %v1089_v33, %v1475_v11  ;;  %v4773_v49 = vmax.f32 %v1090_v44, %v1498_v52 }
 0x148   :  { %v1521_v53 = vpop.f32.mrf.mxu2  ;;  %v1544_v31 = vpop.f32.mrf.mxu3 }
 0x149   :  { %v4783_v28 = vmax.f32 %v1091_v50, %v1521_v53  ;;  %v4785_v46 = vmax.f32 %v1092_v30, %v1544_v31  ;;  %v1643_v50 = vmax.f32 %v1082_v12, %v4707_v13  ;;  %v5041_v13 = vld [vmem:[#allocation9_spill] sm:$0xff] }
 0x14a   :  { %v1478_v9 = vpop.f32.mrf.mxu0  ;;  %v1501_v60 = vpop.f32.mrf.mxu1 }
 0x14b   :  { %v4787_v34 = vmax.f32 %v1105_v54, %v1478_v9  ;;  %v4789_v6 = vmax.f32 %v1106_v48, %v1501_v60  ;;  %v5042_v54 = vld [vmem:[#allocation3_spill] sm:$0xff]  ;;  %v5043_v9 = vld [vmem:[#allocation10_spill] sm:$0xff]  ;;  %v5044_v60 = vld [vmem:[#allocation4_spill] sm:$0xff] }
 0x14c   :  { %v1097_v48 = vmax.f32 %v5042_v54, %v5041_v13  ;;  %v5055_v13 = vld [vmem:[#allocation13_spill] sm:$0xff]  ;;  %v5056_v54 = vld [vmem:[#allocation7_spill] sm:$0xff] }
 0x151   :  { %v1524_v15 = vpop.f32.mrf.mxu2  ;;  %v1547_v62 = vpop.f32.mrf.mxu3 }
 0x152   :  { %v4799_v17 = vmax.f32 %v1107_v7, %v1524_v15  ;;  %v4801_v29 = vmax.f32 %v1108_v61, %v1547_v62  ;;  %v1098_v7 = vmax.f32 %v5044_v60, %v5043_v9  ;;  %v5045_v61 = vld [vmem:[#allocation15_spill] sm:$0xff]  ;;  %v5046_v62 = vld [vmem:[#allocation16_spill] sm:$0xff]  ;;  %v5057_v9 = vld [vmem:[#allocation14_spill] sm:$0xff] }
 0x153   :  { %v1567_v23 = vpop.f32.mrf.mxu0  ;;  %v1590_v32 = vpop.f32.mrf.mxu1  ;;  %v1644_v15 = vmax.f32 %v1083_v25, %v5045_v61  ;;  %v5058_v60 = vld [vmem:[#allocation8_spill] sm:$0xff] }
 0x154   :  { %v4803_v24 = vmax.f32 %v1093_v16, %v1567_v23  ;;  %v4805_v35 = vmax.f32 %v1094_v5, %v1590_v32  ;;  %v1645_v16 = vmax.f32 %v1084_v26, %v5046_v62  ;;  %v5047_v23 = vld [vmem:[#allocation17_spill] sm:$0xff] }
 0x155   :  { %v1658_v32 = vmax.f32 %v1097_v48, %v5047_v23  ;;  %v1085_v48 = vmax.f32 %v5056_v54, %v5055_v13  ;;  %v5060_v23 = vld [vmem:[#allocation22_spill] sm:$0xff] }
 0x15a   :  { %v1613_v39 = vpop.f32.mrf.mxu2  ;;  %v1636_v22 = vpop.f32.mrf.mxu3 }
 0x15b   :  { %v4815_v58 = vmax.f32 %v1095_v36, %v1613_v39  ;;  %v4817_v33 = vmax.f32 %v1096_v21, %v1636_v22  ;;  %v5048_v36 = vld [vmem:[#allocation18_spill] sm:$0xff] }
 0x15c   :  { %v1570_v44 = vpop.f32.mrf.mxu0  ;;  %v1593_v11 = vpop.f32.mrf.mxu1  ;;  %v1659_v21 = vmax.f32 %v1098_v7, %v5048_v36  ;;  %v1086_v7 = vmax.f32 %v5058_v60, %v5057_v9 }
 0x15d   :  { %v4819_v52 = vmax.f32 %v1109_v40, %v1570_v44  ;;  %v4821_v63 = vmax.f32 %v1110_v57, %v1593_v11 }
 0x163   :  { %v1616_v4 = vpop.f32.mrf.mxu2  ;;  %v1639_v18 = vpop.f32.mrf.mxu3 }
 0x164   :  { %v4833_v30 = vmax.f32 %v1111_v43, %v1616_v4  ;;  %v4835_v53 = vmax.f32 %v1112_v3, %v1639_v18  ;;  %v5049_v4 = vld [vmem:[#allocation11_spill] sm:$0xff]  ;;  %v5050_v18 = vld [vmem:[#allocation5_spill] sm:$0xff] }
 0x165   :  { %v1852_v41 = vpop.f32.mrf.mxu0  ;;  %v1875_v37 = vpop.f32.mrf.mxu1 }
 0x166   :  { %v2203_v31 = vmax.f32 %v1642_v19, %v1852_v41  ;;  %v2204_v42 = vmax.f32 %v1643_v50, %v1875_v37  ;;  %v1099_v19 = vmax.f32 %v5050_v18, %v5049_v4  ;;  %v5051_v50 = vld [vmem:[#allocation12_spill] sm:$0xff]  ;;  %v5052_v41 = vld [vmem:[#allocation6_spill] sm:$0xff] }
 0x167   :  { %v1100_v37 = vmax.f32 %v5052_v41, %v5051_v50 }
 0x168   :  { %v1660_v26 = vmax.f32 %v1099_v19, %v5053_v38 }
 0x169   :  { %v4841_v8 = vpop.permute.xlu0 %2239 }
 0x16a   :  { %v2247_v47 = vadd.f32 %v4841_v8, %v2203_v31  ;;  %v2248_v51 = vadd.f32 %v4841_v8, %v2204_v42 }
 0x16c   :  { %v2279_v55 = vmax.f32 %v2247_v47, 0.0  ;;  %v2280_v1 = vmax.f32 %v2248_v51, 0.0  ;;  %v1898_v5 = vpop.f32.mrf.mxu2  ;;  %v1921_v2 = vpop.f32.mrf.mxu3  ;;  %v5054_v47 = vld [vmem:[#allocation20_spill] sm:$0xff] }
 0x16d   :  { %v2205_v39 = vmax.f32 %v1644_v15, %v1898_v5  ;;  %v2206_v22 = vmax.f32 %v1645_v16, %v1921_v2  ;;  %v1661_v51 = vmax.f32 %v1100_v37, %v5054_v47  ;;  %v5059_v5 = vld [vmem:[#allocation21_spill] sm:$0xff] }
 0x16e   :  { %2311 = vst [vmem:[%s5018_s3] sm:$0xff] %v2279_v55  ;;  %v1855_v40 = vpop.f32.mrf.mxu0  ;;  %v1878_v57 = vpop.f32.mrf.mxu1  ;;  %v1646_v2 = vmax.f32 %v1085_v48, %v5059_v5 }
 0x16f   :  { %2312 = vst [vmem:[%s5018_s3 + $0x8] sm:$0xff] %v2280_v1  ;;  %v2249_v44 = vadd.f32 %v4841_v8, %v2205_v39  ;;  %v2250_v11 = vadd.f32 %v4841_v8, %v2206_v22  ;;  %v2219_v0 = vmax.f32 %v1658_v32, %v1855_v40  ;;  %v2220_v12 = vmax.f32 %v1659_v21, %v1878_v57 }
 0x170   :  { %v1647_v32 = vmax.f32 %v1086_v7, %v5060_v23 }
 0x171   :  { %v2281_v43 = vmax.f32 %v2249_v44, 0.0  ;;  %v2282_v3 = vmax.f32 %v2250_v11, 0.0 }
 0x172   :  { %v4865_v31 = vpop.permute.xlu0 %2244 }
 0x173   :  { %2313 = vst [vmem:[%s5018_s3 + $0x10] sm:$0xff] %v2281_v43  ;;  %v2263_v42 = vadd.f32 %v4865_v31, %v2219_v0  ;;  %v2264_v25 = vadd.f32 %v4865_v31, %v2220_v12 }
 0x174   :  { %2314 = vst [vmem:[%s5018_s3 + $0x18] sm:$0xff] %v2282_v3 }
 0x175   :  { %v2295_v61 = vmax.f32 %v2263_v42, 0.0  ;;  %v2296_v15 = vmax.f32 %v2264_v25, 0.0  ;;  %v1901_v62 = vpop.f32.mrf.mxu2  ;;  %v1924_v16 = vpop.f32.mrf.mxu3 }
 0x176   :  { %v2221_v55 = vmax.f32 %v1660_v26, %v1901_v62  ;;  %v2222_v1 = vmax.f32 %v1661_v51, %v1924_v16 }
 0x177   :  { %2328 = vst [vmem:[%s5018_s3 + $0x80] sm:$0x7f] %v2295_v61 }
 0x178   :  { %2329 = vst [vmem:[%s5018_s3 + $0x88] sm:$0x7f] %v2296_v15  ;;  %v2265_v36 = vadd.f32 %v4865_v31, %v2221_v55  ;;  %v2266_v21 = vadd.f32 %v4865_v31, %v2222_v1  ;;  %v1944_v39 = vpop.f32.mrf.mxu0  ;;  %v1967_v22 = vpop.f32.mrf.mxu1 }
 0x179   :  { %v2207_v40 = vmax.f32 %v1646_v2, %v1944_v39  ;;  %v2208_v57 = vmax.f32 %v1647_v32, %v1967_v22 }
 0x17a   :  { %v2297_v44 = vmax.f32 %v2265_v36, 0.0  ;;  %v2298_v11 = vmax.f32 %v2266_v21, 0.0 }
 0x17b   :  { %v2251_v0 = vadd.f32 %v4841_v8, %v2207_v40  ;;  %v2252_v12 = vadd.f32 %v4841_v8, %v2208_v57 }
 0x17c   :  { %2330 = vst [vmem:[%s5018_s3 + $0x90] sm:$0x7f] %v2297_v44 }
 0x17d   :  { %2331 = vst [vmem:[%s5018_s3 + $0x98] sm:$0x7f] %v2298_v11  ;;  %v2283_v43 = vmax.f32 %v2251_v0, 0.0  ;;  %v2284_v3 = vmax.f32 %v2252_v12, 0.0 }
 0x17f   :  { %2315 = vst [vmem:[%s5018_s3 + $0x20] sm:$0xff] %v2283_v43  ;;  %v1990_v4 = vpop.f32.mrf.mxu2  ;;  %v2013_v18 = vpop.f32.mrf.mxu3 }
 0x180   :  { %2316 = vst [vmem:[%s5018_s3 + $0x28] sm:$0xff] %v2284_v3  ;;  %v2209_v19 = vmax.f32 %v4751_v14, %v1990_v4  ;;  %v2210_v50 = vmax.f32 %v4753_v20, %v2013_v18 }
 0x181   :  { %v1947_v41 = vpop.f32.mrf.mxu0 }
 0x182   :  { %v2253_v37 = vadd.f32 %v4841_v8, %v2209_v19  ;;  %v2254_v42 = vadd.f32 %v4841_v8, %v2210_v50  ;;  %v2223_v25 = vmax.f32 %v4755_v56, %v1947_v41  ;;  %v1970_v38 = vpop.f32.mrf.mxu1 }
 0x183   :  { %v2224_v26 = vmax.f32 %v4757_v27, %v1970_v38 }
 0x184   :  { %v2285_v47 = vmax.f32 %v2253_v37, 0.0  ;;  %v2286_v51 = vmax.f32 %v2254_v42, 0.0  ;;  %v2267_v13 = vadd.f32 %v4865_v31, %v2223_v25 }
 0x185   :  { %v2268_v54 = vadd.f32 %v4865_v31, %v2224_v26 }
 0x186   :  { %2317 = vst [vmem:[%s5018_s3 + $0x30] sm:$0xff] %v2285_v47  ;;  %v2299_v14 = vmax.f32 %v2267_v13, 0.0 }
 0x187   :  { %2318 = vst [vmem:[%s5018_s3 + $0x38] sm:$0xff] %v2286_v51  ;;  %v2300_v20 = vmax.f32 %v2268_v54, 0.0 }
 0x188   :  { %2332 = vst [vmem:[%s5018_s3 + $0xa0] sm:$0x7f] %v2299_v14  ;;  %v1993_v56 = vpop.f32.mrf.mxu2 }
 0x189   :  { %2333 = vst [vmem:[%s5018_s3 + $0xa8] sm:$0x7f] %v2300_v20  ;;  %v2225_v27 = vmax.f32 %v4767_v45, %v1993_v56  ;;  %v2016_v48 = vpop.f32.mrf.mxu3 }
 0x18a   :  { %v2226_v9 = vmax.f32 %v4769_v10, %v2016_v48  ;;  %v2036_v60 = vpop.f32.mrf.mxu0 }
 0x18b   :  { %v2269_v7 = vadd.f32 %v4865_v31, %v2225_v27  ;;  %v2211_v61 = vmax.f32 %v4771_v59, %v2036_v60  ;;  %v2059_v15 = vpop.f32.mrf.mxu1 }
 0x18c   :  { %v2270_v62 = vadd.f32 %v4865_v31, %v2226_v9  ;;  %v2212_v16 = vmax.f32 %v4773_v49, %v2059_v15 }
 0x18d   :  { %v2301_v55 = vmax.f32 %v2269_v7, 0.0  ;;  %v2255_v1 = vadd.f32 %v4841_v8, %v2211_v61 }
 0x18e   :  { %v2302_v5 = vmax.f32 %v2270_v62, 0.0  ;;  %v2256_v2 = vadd.f32 %v4841_v8, %v2212_v16 }
 0x18f   :  { %2334 = vst [vmem:[%s5018_s3 + $0xb0] sm:$0x7f] %v2301_v55  ;;  %v2287_v45 = vmax.f32 %v2255_v1, 0.0 }
 0x190   :  { %2335 = vst [vmem:[%s5018_s3 + $0xb8] sm:$0x7f] %v2302_v5  ;;  %v2288_v10 = vmax.f32 %v2256_v2, 0.0 }
 0x191   :  { %2319 = vst [vmem:[%s5018_s3 + $0x40] sm:$0xff] %v2287_v45  ;;  %v2082_v59 = vpop.f32.mrf.mxu2 }
 0x192   :  { %2320 = vst [vmem:[%s5018_s3 + $0x48] sm:$0xff] %v2288_v10  ;;  %v2213_v49 = vmax.f32 %v4783_v28, %v2082_v59  ;;  %v2105_v23 = vpop.f32.mrf.mxu3 }
 0x193   :  { %v2214_v32 = vmax.f32 %v4785_v46, %v2105_v23  ;;  %v2039_v36 = vpop.f32.mrf.mxu0 }
 0x194   :  { %v2257_v21 = vadd.f32 %v4841_v8, %v2213_v49  ;;  %v2227_v39 = vmax.f32 %v4787_v34, %v2039_v36  ;;  %v2062_v22 = vpop.f32.mrf.mxu1 }
 0x195   :  { %v2258_v40 = vadd.f32 %v4841_v8, %v2214_v32  ;;  %v2228_v57 = vmax.f32 %v4789_v6, %v2062_v22 }
 0x196   :  { %v2289_v44 = vmax.f32 %v2257_v21, 0.0  ;;  %v2271_v11 = vadd.f32 %v4865_v31, %v2227_v39 }
 0x197   :  { %v2290_v0 = vmax.f32 %v2258_v40, 0.0  ;;  %v2272_v12 = vadd.f32 %v4865_v31, %v2228_v57 }
 0x198   :  { %2321 = vst [vmem:[%s5018_s3 + $0x50] sm:$0xff] %v2289_v44  ;;  %v2303_v28 = vmax.f32 %v2271_v11, 0.0 }
 0x199   :  { %2322 = vst [vmem:[%s5018_s3 + $0x58] sm:$0xff] %v2290_v0  ;;  %v2304_v46 = vmax.f32 %v2272_v12, 0.0 }
 0x19a   :  { %2336 = vst [vmem:[%s5018_s3 + $0xc0] sm:$0x7f] %v2303_v28  ;;  %v2085_v34 = vpop.f32.mrf.mxu2 }
 0x19b   :  { %2337 = vst [vmem:[%s5018_s3 + $0xc8] sm:$0x7f] %v2304_v46  ;;  %v2229_v6 = vmax.f32 %v4799_v17, %v2085_v34  ;;  %v2108_v43 = vpop.f32.mrf.mxu3 }
 0x19c   :  { %v2230_v3 = vmax.f32 %v4801_v29, %v2108_v43  ;;  %v2128_v4 = vpop.f32.mrf.mxu0 }
 0x19d   :  { %v2273_v18 = vadd.f32 %v4865_v31, %v2229_v6  ;;  %v2215_v19 = vmax.f32 %v4803_v24, %v2128_v4  ;;  %v2151_v50 = vpop.f32.mrf.mxu1 }
 0x19e   :  { %v2274_v41 = vadd.f32 %v4865_v31, %v2230_v3  ;;  %v2216_v37 = vmax.f32 %v4805_v35, %v2151_v50 }
 0x19f   :  { %v2305_v42 = vmax.f32 %v2273_v18, 0.0  ;;  %v2259_v25 = vadd.f32 %v4841_v8, %v2215_v19 }
 0x1a0   :  { %v2306_v38 = vmax.f32 %v2274_v41, 0.0  ;;  %v2260_v26 = vadd.f32 %v4841_v8, %v2216_v37 }
 0x1a1   :  { %2338 = vst [vmem:[%s5018_s3 + $0xd0] sm:$0x7f] %v2305_v42  ;;  %v2291_v17 = vmax.f32 %v2259_v25, 0.0 }
 0x1a2   :  { %2339 = vst [vmem:[%s5018_s3 + $0xd8] sm:$0x7f] %v2306_v38  ;;  %v2292_v29 = vmax.f32 %v2260_v26, 0.0 }
 0x1a3   :  { %2323 = vst [vmem:[%s5018_s3 + $0x60] sm:$0xff] %v2291_v17  ;;  %v2174_v24 = vpop.f32.mrf.mxu2 }
 0x1a4   :  { %2324 = vst [vmem:[%s5018_s3 + $0x68] sm:$0xff] %v2292_v29  ;;  %v2217_v35 = vmax.f32 %v4815_v58, %v2174_v24  ;;  %v2197_v47 = vpop.f32.mrf.mxu3  ;;  %v2131_v51 = vpop.f32.mrf.mxu0 }
 0x1a5   :  { %v2218_v13 = vmax.f32 %v4817_v33, %v2197_v47  ;;  %v2231_v54 = vmax.f32 %v4819_v52, %v2131_v51  ;;  %v2154_v14 = vpop.f32.mrf.mxu1 }
 0x1a6   :  { %v2261_v20 = vadd.f32 %v4841_v8, %v2217_v35  ;;  %v2232_v56 = vmax.f32 %v4821_v63, %v2154_v14 }
 0x1a7   :  { %v2262_v27 = vadd.f32 %v4841_v8, %v2218_v13  ;;  %v2275_v48 = vadd.f32 %v4865_v31, %v2231_v54 }
 0x1a8   :  { %v2293_v9 = vmax.f32 %v2261_v20, 0.0  ;;  %v2276_v60 = vadd.f32 %v4865_v31, %v2232_v56 }
 0x1a9   :  { %v2294_v58 = vmax.f32 %v2262_v27, 0.0  ;;  %v2307_v7 = vmax.f32 %v2275_v48, 0.0 }
 0x1aa   :  { %2325 = vst [vmem:[%s5018_s3 + $0x70] sm:$0xff] %v2293_v9  ;;  %v2308_v33 = vmax.f32 %v2276_v60, 0.0 }
 0x1ab   :  { %2327 = vst.msk [vmem:[%s5018_s3 + $0x78] sm:$0xff] %vm2326_vm2, %v2294_v58  ;;  %v2177_v52 = vpop.f32.mrf.mxu2 }
 0x1ac   :  { %2340 = vst [vmem:[%s5018_s3 + $0xe0] sm:$0x7f] %v2307_v7  ;;  %v2233_v63 = vmax.f32 %v4833_v30, %v2177_v52  ;;  %v2200_v8 = vpop.f32.mrf.mxu3 }
 0x1ad   :  { %2341 = vst [vmem:[%s5018_s3 + $0xe8] sm:$0x7f] %v2308_v33  ;;  %v2234_v61 = vmax.f32 %v4835_v53, %v2200_v8 }
 0x1ae   :  { %v2277_v15 = vadd.f32 %v4865_v31, %v2233_v63 }
 0x1af   :  { %v2278_v62 = vadd.f32 %v4865_v31, %v2234_v61 }
 0x1b0   :  { %v2309_v16 = vmax.f32 %v2277_v15, 0.0 }
 0x1b1   :  { %v2310_v55 = vmax.f32 %v2278_v62, 0.0 }
 0x1b2   :  { %2342 = vst [vmem:[%s5018_s3 + $0xf0] sm:$0x7f] %v2309_v16 }
 0x1b3   :  { %2344 = vst.msk [vmem:[%s5018_s3 + $0xf8] sm:$0x7f] %vm2343_vm3, %v2310_v55 }

// kernel: split_forward.4
= control target key start
LH: loop header
LB: loop body
LE: loop exit
PB: predicated region body
PF: predicated region fallthrough
CT: control target
= control target key end

     0   :  { %vm131_vm0 = vcmask 1043456   ;;  %vm112_vm1 = vcmask 228352   ;;  %vm3141_vm2 = vcmask 818176   ;;  %vm3147_vm3 = vcmask 815104   ;;  %s8128_s0 = inlined_call_operand.vmem [shape: f32[12,540,100], index: 0, kind: input, shape index: {}]   ;;  %s8129_s1 = inlined_call_operand.vmem [shape: f32[45,540], index: 1, kind: input, shape index: {}]   ;;  %s8130_s2 = inlined_call_operand.vmem [shape: f32[45,1], index: 2, kind: input, shape index: {}]   ;;  %s8131_s3 = inlined_call_operand.vmem [shape: f32[45,100], index: 3, kind: output, shape index: {}]  }
   0x1   :  { %v59_v0 = vld [vmem:[%s8128_s0 + $0x78] sm:$0xff]  ;;  %v58_v3 = vld [vmem:[%s8128_s0 + $0x70] sm:$0xff]  ;;  %v57_v7 = vld [vmem:[%s8128_s0 + $0x68] sm:$0xff] }
   0x2   :  { %v91_v1 = vld [vmem:[%s8128_s0 + $0x178] sm:$0xff]  ;;  %135 = vmatpush.msra.mxu0 %v59_v0  ;;  %v90_v5 = vld [vmem:[%s8128_s0 + $0x170] sm:$0xff]  ;;  %v89_v9 = vld [vmem:[%s8128_s0 + $0x168] sm:$0xff] }
   0x3   :  { %v107_v2 = vld [vmem:[%s8128_s0 + $0x1f8] sm:$0xff]  ;;  %205 = vmatpush.msra.mxu2 %v91_v1  ;;  %v106_v6 = vld [vmem:[%s8128_s0 + $0x1f0] sm:$0xff]  ;;  %v105_v10 = vld [vmem:[%s8128_s0 + $0x1e8] sm:$0xff] }
   0x4   :  { %v75_v4 = vld [vmem:[%s8128_s0 + $0xf8] sm:$0xff]  ;;  %240 = vmatpush.msra.mxu3 %v107_v2  ;;  %v74_v8 = vld [vmem:[%s8128_s0 + $0xf0] sm:$0xff]  ;;  %136 = vmatpush.msra.mxu0 %v58_v3  ;;  %v56_v11 = vld [vmem:[%s8128_s0 + $0x60] sm:$0xff] }
   0x5   :  { %170 = vmatpush.msra.mxu1 %v75_v4  ;;  %206 = vmatpush.msra.mxu2 %v90_v5  ;;  %v73_v12 = vld [vmem:[%s8128_s0 + $0xe8] sm:$0xff]  ;;  %v88_v13 = vld [vmem:[%s8128_s0 + $0x160] sm:$0xff]  ;;  %v55_v16 = vld [vmem:[%s8128_s0 + $0x58] sm:$0xff] }
   0x6   :  { %241 = vmatpush.msra.mxu3 %v106_v6  ;;  %137 = vmatpush.msra.mxu0 %v57_v7  ;;  %v104_v14 = vld [vmem:[%s8128_s0 + $0x1e0] sm:$0xff]  ;;  %v87_v17 = vld [vmem:[%s8128_s0 + $0x158] sm:$0xff]  ;;  %v54_v20 = vld [vmem:[%s8128_s0 + $0x50] sm:$0xff] }
   0x7   :  { %171 = vmatpush.msra.mxu1 %v74_v8  ;;  %207 = vmatpush.msra.mxu2 %v89_v9  ;;  %v72_v15 = vld [vmem:[%s8128_s0 + $0xe0] sm:$0xff]  ;;  %v103_v18 = vld [vmem:[%s8128_s0 + $0x1d8] sm:$0xff]  ;;  %v86_v21 = vld [vmem:[%s8128_s0 + $0x150] sm:$0xff] }
   0x8   :  { %242 = vmatpush.msra.mxu3 %v105_v10  ;;  %138 = vmatpush.msra.mxu0 %v56_v11  ;;  %v71_v19 = vld [vmem:[%s8128_s0 + $0xd8] sm:$0xff]  ;;  %v102_v22 = vld [vmem:[%s8128_s0 + $0x1d0] sm:$0xff]  ;;  %v53_v24 = vld [vmem:[%s8128_s0 + $0x48] sm:$0xff] }
   0x9   :  { %172 = vmatpush.msra.mxu1 %v73_v12  ;;  %208 = vmatpush.msra.mxu2 %v88_v13  ;;  %v70_v23 = vld [vmem:[%s8128_s0 + $0xd0] sm:$0xff]  ;;  %v85_v25 = vld [vmem:[%s8128_s0 + $0x148] sm:$0xff]  ;;  %v52_v28 = vld [vmem:[%s8128_s0 + $0x40] sm:$0xff] }
   0xa   :  { %243 = vmatpush.msra.mxu3 %v104_v14  ;;  %139 = vmatpush.msra.mxu0 %v55_v16  ;;  %v101_v26 = vld [vmem:[%s8128_s0 + $0x1c8] sm:$0xff]  ;;  %v84_v29 = vld [vmem:[%s8128_s0 + $0x140] sm:$0xff]  ;;  %v51_v32 = vld [vmem:[%s8128_s0 + $0x38] sm:$0xff] }
   0xb   :  { %173 = vmatpush.msra.mxu1 %v72_v15  ;;  %209 = vmatpush.msra.mxu2 %v87_v17  ;;  %v69_v27 = vld [vmem:[%s8128_s0 + $0xc8] sm:$0xff]  ;;  %v100_v30 = vld [vmem:[%s8128_s0 + $0x1c0] sm:$0xff]  ;;  %v83_v33 = vld [vmem:[%s8128_s0 + $0x138] sm:$0xff] }
   0xc   :  { %244 = vmatpush.msra.mxu3 %v103_v18  ;;  %140 = vmatpush.msra.mxu0 %v54_v20  ;;  %v68_v31 = vld [vmem:[%s8128_s0 + $0xc0] sm:$0xff]  ;;  %v99_v34 = vld [vmem:[%s8128_s0 + $0x1b8] sm:$0xff]  ;;  %v50_v36 = vld [vmem:[%s8128_s0 + $0x30] sm:$0xff] }
   0xd   :  { %174 = vmatpush.msra.mxu1 %v71_v19  ;;  %210 = vmatpush.msra.mxu2 %v86_v21  ;;  %v67_v35 = vld [vmem:[%s8128_s0 + $0xb8] sm:$0xff]  ;;  %v82_v37 = vld [vmem:[%s8128_s0 + $0x130] sm:$0xff]  ;;  %v49_v40 = vld [vmem:[%s8128_s0 + $0x28] sm:$0xff] }
   0xe   :  { %245 = vmatpush.msra.mxu3 %v102_v22  ;;  %141 = vmatpush.msra.mxu0 %v53_v24  ;;  %v98_v38 = vld [vmem:[%s8128_s0 + $0x1b0] sm:$0xff]  ;;  %v81_v41 = vld [vmem:[%s8128_s0 + $0x128] sm:$0xff]  ;;  %v48_v44 = vld [vmem:[%s8128_s0 + $0x20] sm:$0xff] }
   0xf   :  { %175 = vmatpush.msra.mxu1 %v70_v23  ;;  %211 = vmatpush.msra.mxu2 %v85_v25  ;;  %v66_v39 = vld [vmem:[%s8128_s0 + $0xb0] sm:$0xff]  ;;  %v97_v42 = vld [vmem:[%s8128_s0 + $0x1a8] sm:$0xff]  ;;  %v80_v45 = vld [vmem:[%s8128_s0 + $0x120] sm:$0xff] }
  0x10   :  { %246 = vmatpush.msra.mxu3 %v101_v26  ;;  %142 = vmatpush.msra.mxu0 %v52_v28  ;;  %v65_v43 = vld [vmem:[%s8128_s0 + $0xa8] sm:$0xff]  ;;  %v96_v46 = vld [vmem:[%s8128_s0 + $0x1a0] sm:$0xff]  ;;  %v47_v48 = vld [vmem:[%s8128_s0 + $0x18] sm:$0xff] }
  0x11   :  { %176 = vmatpush.msra.mxu1 %v69_v27  ;;  %212 = vmatpush.msra.mxu2 %v84_v29  ;;  %v64_v47 = vld [vmem:[%s8128_s0 + $0xa0] sm:$0xff]  ;;  %v79_v49 = vld [vmem:[%s8128_s0 + $0x118] sm:$0xff]  ;;  %v46_v52 = vld [vmem:[%s8128_s0 + $0x10] sm:$0xff] }
  0x12   :  { %247 = vmatpush.msra.mxu3 %v100_v30  ;;  %143 = vmatpush.msra.mxu0 %v51_v32  ;;  %v95_v50 = vld [vmem:[%s8128_s0 + $0x198] sm:$0xff]  ;;  %v78_v53 = vld [vmem:[%s8128_s0 + $0x110] sm:$0xff]  ;;  %v45_v56 = vld [vmem:[%s8128_s0 + $0x8] sm:$0xff] }
  0x13   :  { %177 = vmatpush.msra.mxu1 %v68_v31  ;;  %213 = vmatpush.msra.mxu2 %v83_v33  ;;  %v63_v51 = vld [vmem:[%s8128_s0 + $0x98] sm:$0xff]  ;;  %v94_v54 = vld [vmem:[%s8128_s0 + $0x190] sm:$0xff]  ;;  %v77_v57 = vld [vmem:[%s8128_s0 + $0x108] sm:$0xff] }
  0x14   :  { %248 = vmatpush.msra.mxu3 %v99_v34  ;;  %144 = vmatpush.msra.mxu0 %v50_v36  ;;  %v62_v55 = vld [vmem:[%s8128_s0 + $0x90] sm:$0xff]  ;;  %v93_v58 = vld [vmem:[%s8128_s0 + $0x188] sm:$0xff]  ;;  %v44_v60 = vld [vmem:[%s8128_s0] sm:$0xff] }
  0x15   :  { %178 = vmatpush.msra.mxu1 %v67_v35  ;;  %214 = vmatpush.msra.mxu2 %v82_v37  ;;  %v61_v59 = vld [vmem:[%s8128_s0 + $0x88] sm:$0xff]  ;;  %v76_v61 = vld [vmem:[%s8128_s0 + $0x100] sm:$0xff]  ;;  %v4309_v0 = vld [vmem:[%s8129_s1 + $0x10] sm:$0xff] }
  0x16   :  { %249 = vmatpush.msra.mxu3 %v98_v38  ;;  %145 = vmatpush.msra.mxu0 %v49_v40  ;;  %v92_v62 = vld [vmem:[%s8128_s0 + $0x180] sm:$0xff]  ;;  %v4314_v1 = vld [vmem:[%s8129_s1 + $0x18] sm:$0xff]  ;;  %v4326_v4 = vld [vmem:[%s8129_s1 + $0x8] sm:$0xff] }
  0x17   :  { %179 = vmatpush.msra.mxu1 %v66_v39  ;;  %215 = vmatpush.msra.mxu2 %v81_v41  ;;  %v4304_v63 = vld [vmem:[%s8129_s1] sm:$0xff]  ;;  %v3191_v2 = vld [vmem:[%s8128_s0 + $0x318] sm:$0xff]  ;;  %v3190_v7 = vld [vmem:[%s8128_s0 + $0x310] sm:$0xff] }
  0x18   :  { %250 = vmatpush.msra.mxu3 %v97_v42  ;;  %146 = vmatpush.msra.mxu0 %v48_v44  ;;  %v60_v3 = vld [vmem:[%s8128_s0 + $0x80] sm:$0xff]  ;;  %v111_v5 = vld [vmem:[%s8128_s0 + $0x218] sm:$0xf]  ;;  %v110_v9 = vld [vmem:[%s8128_s0 + $0x210] sm:$0xff] }
  0x19   :  { %180 = vmatpush.msra.mxu1 %v65_v43  ;;  %216 = vmatpush.msra.mxu2 %v80_v45  ;;  %v3207_v6 = vld [vmem:[%s8128_s0 + $0x398] sm:$0xff]  ;;  %v3206_v10 = vld [vmem:[%s8128_s0 + $0x390] sm:$0xff]  ;;  %v3189_v11 = vld [vmem:[%s8128_s0 + $0x308] sm:$0xff] }
  0x1a   :  { %251 = vmatpush.msra.mxu3 %v96_v46  ;;  %147 = vmatpush.msra.mxu0 %v47_v48  ;;  %v3175_v8 = vld [vmem:[%s8128_s0 + $0x298] sm:$0xff]  ;;  %v3174_v12 = vld [vmem:[%s8128_s0 + $0x290] sm:$0xff]  ;;  %v109_v13 = vld [vmem:[%s8128_s0 + $0x208] sm:$0xff] }
  0x1b   :  { %181 = vmatpush.msra.mxu1 %v64_v47  ;;  %217 = vmatpush.msra.mxu2 %v79_v49  ;;  %v4362_v14 = vld [vmem:[%s8129_s1 + $0x28] sm:$0xff]  ;;  %v4370_v16 = vld [vmem:[%s8129_s1 + $0x38] sm:$0xff]  ;;  %v4375_v17 = vld [vmem:[%s8129_s1 + $0x40] sm:$0xff] }
  0x1c   :  { %252 = vmatpush.msra.mxu3 %v95_v50  ;;  %148 = vmatpush.msra.mxu0 %v46_v52  ;;  %v3205_v15 = vld [vmem:[%s8128_s0 + $0x388] sm:$0xff]  ;;  %v3188_v18 = vld [vmem:[%s8128_s0 + $0x300] sm:$0xff]  ;;  %v4387_v20 = vld [vmem:[%s8129_s1 + $0x30] sm:$0xff] }
  0x1d   :  { %182 = vmatpush.msra.mxu1 %v63_v51  ;;  %218 = vmatpush.msra.mxu2 %v78_v53  ;;  %v3173_v19 = vld [vmem:[%s8128_s0 + $0x288] sm:$0xff]  ;;  %v3204_v21 = vld [vmem:[%s8128_s0 + $0x380] sm:$0xff]  ;;  %v3187_v22 = vld [vmem:[%s8128_s0 + $0x2f8] sm:$0xff] }
  0x1e   :  { %253 = vmatpush.msra.mxu3 %v94_v54  ;;  %149 = vmatpush.msra.mxu0 %v45_v56  ;;  %v3172_v23 = vld [vmem:[%s8128_s0 + $0x280] sm:$0xff]  ;;  %v3203_v24 = vld [vmem:[%s8128_s0 + $0x378] sm:$0xff]  ;;  %v3186_v26 = vld [vmem:[%s8128_s0 + $0x2f0] sm:$0xff] }
  0x1f   :  { %183 = vmatpush.msra.mxu1 %v62_v55  ;;  %219 = vmatpush.msra.mxu2 %v77_v57  ;;  %v108_v25 = vld [vmem:[%s8128_s0 + $0x200] sm:$0xff]  ;;  %v3171_v27 = vld [vmem:[%s8128_s0 + $0x278] sm:$0xff]  ;;  %v3202_v28 = vld [vmem:[%s8128_s0 + $0x370] sm:$0xff] }
  0x20   :  { %254 = vmatpush.msra.mxu3 %v93_v58  ;;  %150 = vmatpush.msra.mxu0 %v44_v60  ;;  %v4419_v29 = vld [vmem:[%s8129_s1 + $0x50] sm:$0xff]  ;;  %v3185_v30 = vld [vmem:[%s8128_s0 + $0x2e8] sm:$0xff]  ;;  %v4427_v31 = vld [vmem:[%s8129_s1 + $0x60] sm:$0xff] }
  0x21   :  { %184 = vmatpush.msra.mxu1 %v61_v59  ;;  %220 = vmatpush.msra.mxu2 %v76_v61  ;;  %v4432_v32 = vld [vmem:[%s8129_s1 + $0x68] sm:$0xff]  ;;  %v3170_v33 = vld [vmem:[%s8128_s0 + $0x270] sm:$0xff]  ;;  %v4444_v35 = vld [vmem:[%s8129_s1 + $0x58] sm:$0xff] }
  0x22   :  { %255 = vmatpush.msra.mxu3 %v92_v62  ;;  %151 = vmatmul.f32.vlgmr.msra.gmra.mxu0 %v4304_v63  ;;  %v3201_v34 = vld [vmem:[%s8128_s0 + $0x368] sm:$0xff]  ;;  %v3184_v36 = vld [vmem:[%s8128_s0 + $0x2e0] sm:$0xff]  ;;  %v3183_v39 = vld [vmem:[%s8128_s0 + $0x2d8] sm:$0xff] }
  0x23   :  { %221 = vmatmul.f32.vlgmr.msra.gmra.mxu2 %v4309_v0  ;;  %256 = vmatmul.f32.vlgmr.msra.gmra.mxu3 %v4314_v1  ;;  %v3169_v37 = vld [vmem:[%s8128_s0 + $0x268] sm:$0xff]  ;;  %v3200_v38 = vld [vmem:[%s8128_s0 + $0x360] sm:$0xff]  ;;  %v3199_v41 = vld [vmem:[%s8128_s0 + $0x358] sm:$0xff] }
  0x24   :  { %417 = vmatpush.msrb.mxu2 %v3191_v2  ;;  %185 = vmatpush.msra.mxu1 %v60_v3  ;;  %v3168_v40 = vld [vmem:[%s8128_s0 + $0x260] sm:$0xff]  ;;  %v3223_v42 = vld [vmem:[%s8128_s0 + $0x418] sm:$0xff]  ;;  %v3182_v43 = vld [vmem:[%s8128_s0 + $0x2d0] sm:$0xff] }
  0x25   :  { %186 = vmatmul.f32.vlgmr.msra.gmra.mxu1 %v4326_v4  ;;  %3153 = vmatpush.msk.msrb.mxu0 %vm131_vm0, %v111_v5  ;;  %v3222_v44 = vld [vmem:[%s8128_s0 + $0x410] sm:$0xff]  ;;  %v4479_v45 = vld [vmem:[%s8129_s1 + $0x78] sm:$0xff]  ;;  %v4487_v47 = vld [vmem:[%s8129_s1 + $0x88] sm:$0xff] }
  0x26   :  { %452 = vmatpush.msrb.mxu3 %v3207_v6  ;;  %418 = vmatpush.msrb.mxu2 %v3190_v7  ;;  %v3167_v46 = vld [vmem:[%s8128_s0 + $0x258] sm:$0xff]  ;;  %v4492_v48 = vld [vmem:[%s8129_s1 + $0x90] sm:$0xff]  ;;  %v3181_v50 = vld [vmem:[%s8128_s0 + $0x2c8] sm:$0xff] }
  0x27   :  { %382 = vmatpush.msrb.mxu1 %v3175_v8  ;;  %288 = vmatpush.msrb.mxu0 %v110_v9  ;;  %v3198_v49 = vld [vmem:[%s8128_s0 + $0x350] sm:$0xff]  ;;  %v4504_v51 = vld [vmem:[%s8129_s1 + $0x80] sm:$0xff]  ;;  %v3197_v53 = vld [vmem:[%s8128_s0 + $0x348] sm:$0xff] }
  0x28   :  { %453 = vmatpush.msrb.mxu3 %v3206_v10  ;;  %419 = vmatpush.msrb.mxu2 %v3189_v11  ;;  %v3166_v52 = vld [vmem:[%s8128_s0 + $0x250] sm:$0xff]  ;;  %v3221_v54 = vld [vmem:[%s8128_s0 + $0x408] sm:$0xff]  ;;  %v3180_v55 = vld [vmem:[%s8128_s0 + $0x2c0] sm:$0xff] }
  0x29   :  { %383 = vmatpush.msrb.mxu1 %v3174_v12  ;;  %289 = vmatpush.msrb.mxu0 %v109_v13  ;;  %v3165_v56 = vld [vmem:[%s8128_s0 + $0x248] sm:$0xff]  ;;  %v3196_v57 = vld [vmem:[%s8128_s0 + $0x340] sm:$0xff]  ;;  %v3179_v59 = vld [vmem:[%s8128_s0 + $0x2b8] sm:$0xff] }
  0x2a   :  { %154 = vmatmul.f32.gmra.mxu0 %v4362_v14  ;;  %454 = vmatpush.msrb.mxu3 %v3205_v15  ;;  %v3220_v58 = vld [vmem:[%s8128_s0 + $0x400] sm:$0xff]  ;;  %v3219_v60 = vld [vmem:[%s8128_s0 + $0x3f8] sm:$0xff]  ;;  %v4547_v2 = vld [vmem:[%s8129_s1 + $0xb0] sm:$0xff] }
  0x2b   :  { %224 = vmatmul.f32.gmra.mxu2 %v4370_v16  ;;  %259 = vmatmul.f32.gmra.mxu3 %v4375_v17  ;;  %v4539_v61 = vld [vmem:[%s8129_s1 + $0xa0] sm:$0xff]  ;;  %v4552_v3 = vld [vmem:[%s8129_s1 + $0xb8] sm:$0xff]  ;;  %v3178_v6 = vld [vmem:[%s8128_s0 + $0x2b0] sm:$0xff] }
  0x2c   :  { %420 = vmatpush.msrb.mxu2 %v3188_v18  ;;  %384 = vmatpush.msrb.mxu1 %v3173_v19  ;;  %v3164_v62 = vld [vmem:[%s8128_s0 + $0x240] sm:$0xff]  ;;  %v3195_v5 = vld [vmem:[%s8128_s0 + $0x338] sm:$0xff]  ;;  %v4564_v7 = vld [vmem:[%s8129_s1 + $0xa8] sm:$0xff] }
  0x2d   :  { %189 = vmatmul.f32.gmra.mxu1 %v4387_v20  ;;  %455 = vmatpush.msrb.mxu3 %v3204_v21  ;;  %v3163_v8 = vld [vmem:[%s8128_s0 + $0x238] sm:$0xff]  ;;  %v3194_v9 = vld [vmem:[%s8128_s0 + $0x330] sm:$0xff]  ;;  %v3177_v11 = vld [vmem:[%s8128_s0 + $0x2a8] sm:$0xff] }
  0x2e   :  { %421 = vmatpush.msrb.mxu2 %v3187_v22  ;;  %385 = vmatpush.msrb.mxu1 %v3172_v23  ;;  %v3218_v10 = vld [vmem:[%s8128_s0 + $0x3f0] sm:$0xff]  ;;  %v3193_v13 = vld [vmem:[%s8128_s0 + $0x328] sm:$0xff]  ;;  %v3176_v18 = vld [vmem:[%s8128_s0 + $0x2a0] sm:$0xff] }
  0x2f   :  { %456 = vmatpush.msrb.mxu3 %v3203_v24  ;;  %290 = vmatpush.msrb.mxu0 %v108_v25  ;;  %v3162_v12 = vld [vmem:[%s8128_s0 + $0x230] sm:$0xff]  ;;  %v3217_v15 = vld [vmem:[%s8128_s0 + $0x3e8] sm:$0xff]  ;;  %v3216_v19 = vld [vmem:[%s8128_s0 + $0x3e0] sm:$0xff] }
  0x30   :  { %422 = vmatpush.msrb.mxu2 %v3186_v26  ;;  %386 = vmatpush.msrb.mxu1 %v3171_v27  ;;  %v4599_v21 = vld [vmem:[%s8129_s1 + $0xc8] sm:$0x1f]  ;;  %v4607_v23 = vld [vmem:[%s8129_s1 + $0xd8] sm:$0x1f]  ;;  %v4612_v24 = vld [vmem:[%s8129_s1 + $0xe0] sm:$0x1f] }
  0x31   :  { %457 = vmatpush.msrb.mxu3 %v3202_v28  ;;  %487 = vmatpush.msra.mxu0 %v3223_v42  ;;  %v3161_v22 = vld [vmem:[%s8128_s0 + $0x228] sm:$0xff]  ;;  %v3192_v25 = vld [vmem:[%s8128_s0 + $0x320] sm:$0xff]  ;;  %v3250_v26 = vld [vmem:[%s8128_s0 + $0x4b8] sm:$0xff] }
  0x32   :  { %157 = vmatmul.f32.gmra.mxu0 %v4419_v29  ;;  %423 = vmatpush.msrb.mxu2 %v3185_v30  ;;  %v4624_v27 = vld [vmem:[%s8129_s1 + $0xd0] sm:$0x1f]  ;;  %v3266_v28 = vld [vmem:[%s8128_s0 + $0x538] sm:$0xff]  ;;  %v3160_v30 = vld [vmem:[%s8128_s0 + $0x220] sm:$0xff] }
  0x33   :  { %227 = vmatmul.f32.gmra.mxu2 %v4427_v31  ;;  %262 = vmatmul.f32.gmra.mxu3 %v4432_v32  ;;  %v3247_v42 = vld [vmem:[%s8128_s0 + $0x4a0] sm:$0xff] }
  0x34   :  { %387 = vmatpush.msrb.mxu1 %v3170_v33  ;;  %458 = vmatpush.msrb.mxu3 %v3201_v34  ;;  %v3249_v33 = vld [vmem:[%s8128_s0 + $0x4b0] sm:$0xff]  ;;  %v3227_v34 = vld [vmem:[%s8128_s0 + $0x438] sm:$0xf] }
  0x35   :  { %192 = vmatmul.f32.gmra.mxu1 %v4444_v35  ;;  %424 = vmatpush.msrb.mxu2 %v3184_v36  ;;  %v3265_v36 = vld [vmem:[%s8128_s0 + $0x530] sm:$0xff] }
  0x36   :  { %388 = vmatpush.msrb.mxu1 %v3169_v37  ;;  %459 = vmatpush.msrb.mxu3 %v3200_v38  ;;  %v3248_v37 = vld [vmem:[%s8128_s0 + $0x4a8] sm:$0xff]  ;;  %v3215_v38 = vld [vmem:[%s8128_s0 + $0x3d8] sm:$0xff] }
  0x37   :  { %425 = vmatpush.msrb.mxu2 %v3183_v39  ;;  %488 = vmatpush.msra.mxu0 %v3222_v44  ;;  %v3264_v39 = vld [vmem:[%s8128_s0 + $0x528] sm:$0xff]  ;;  %v3246_v44 = vld [vmem:[%s8128_s0 + $0x498] sm:$0xff] }
  0x38   :  { %389 = vmatpush.msrb.mxu1 %v3168_v40  ;;  %460 = vmatpush.msrb.mxu3 %v3199_v41  ;;  %v3226_v40 = vld [vmem:[%s8128_s0 + $0x430] sm:$0xff]  ;;  %v4659_v41 = vld [vmem:[%s8129_s1 + $0x20] sm:$0xff] }
  0x39   :  { %426 = vmatpush.msrb.mxu2 %v3182_v43  ;;  %489 = vmatpush.msra.mxu0 %v3221_v54  ;;  %v3263_v43 = vld [vmem:[%s8128_s0 + $0x520] sm:$0xff]  ;;  %v3261_v54 = vld [vmem:[%s8128_s0 + $0x510] sm:$0xff] }
  0x3a   :  { %160 = vmatmul.f32.gmra.mxu0 %v4479_v45  ;;  %390 = vmatpush.msrb.mxu1 %v3167_v46  ;;  %v3214_v46 = vld [vmem:[%s8128_s0 + $0x3d0] sm:$0xff] }
  0x3b   :  { %230 = vmatmul.f32.gmra.mxu2 %v4487_v47  ;;  %265 = vmatmul.f32.gmra.mxu3 %v4492_v48 }
  0x3c   :  { %461 = vmatpush.msrb.mxu3 %v3198_v49  ;;  %427 = vmatpush.msrb.mxu2 %v3181_v50  ;;  %v3262_v49 = vld [vmem:[%s8128_s0 + $0x518] sm:$0xff]  ;;  %v3245_v50 = vld [vmem:[%s8128_s0 + $0x490] sm:$0xff] }
  0x3d   :  { %195 = vmatmul.f32.gmra.mxu1 %v4504_v51  ;;  %490 = vmatpush.msra.mxu0 %v3220_v58  ;;  %v3260_v58 = vld [vmem:[%s8128_s0 + $0x508] sm:$0xff] }
  0x3e   :  { %391 = vmatpush.msrb.mxu1 %v3166_v52  ;;  %462 = vmatpush.msrb.mxu3 %v3197_v53  ;;  %v3225_v52 = vld [vmem:[%s8128_s0 + $0x428] sm:$0xff] }
  0x3f   :  { %428 = vmatpush.msrb.mxu2 %v3180_v55  ;;  %491 = vmatpush.msra.mxu0 %v3219_v60  ;;  %v3213_v53 = vld [vmem:[%s8128_s0 + $0x3c8] sm:$0xff]  ;;  %v3259_v60 = vld [vmem:[%s8128_s0 + $0x500] sm:$0xff] }
  0x40   :  { %392 = vmatpush.msrb.mxu1 %v3165_v56  ;;  %463 = vmatpush.msrb.mxu3 %v3196_v57  ;;  %v3244_v55 = vld [vmem:[%s8128_s0 + $0x488] sm:$0xff]  ;;  %v3212_v56 = vld [vmem:[%s8128_s0 + $0x3c0] sm:$0xff] }
  0x41   :  { %429 = vmatpush.msrb.mxu2 %v3179_v59  ;;  %492 = vmatpush.msra.mxu0 %v3218_v10  ;;  %v4703_v57 = vld [vmem:[%s8129_s1 + $0x48] sm:$0xff]  ;;  %v3243_v59 = vld [vmem:[%s8128_s0 + $0x480] sm:$0xff]  ;;  %v3241_v10 = vld [vmem:[%s8128_s0 + $0x470] sm:$0xff] }
  0x42   :  { %163 = vmatmul.f32.gmra.mxu0 %v4539_v61  ;;  %393 = vmatpush.msrb.mxu1 %v3164_v62  ;;  %v3211_v62 = vld [vmem:[%s8128_s0 + $0x3b8] sm:$0xff] }
  0x43   :  { %233 = vmatmul.f32.gmra.mxu2 %v4547_v2  ;;  %268 = vmatmul.f32.gmra.mxu3 %v4552_v3 }
  0x44   :  { %464 = vmatpush.msrb.mxu3 %v3195_v5  ;;  %430 = vmatpush.msrb.mxu2 %v3178_v6  ;;  %v3242_v5 = vld [vmem:[%s8128_s0 + $0x478] sm:$0xff] }
  0x45   :  { %198 = vmatmul.f32.gmra.mxu1 %v4564_v7  ;;  %493 = vmatpush.msra.mxu0 %v3217_v15  ;;  %v3258_v6 = vld [vmem:[%s8128_s0 + $0x4f8] sm:$0xff]  ;;  %v3240_v15 = vld [vmem:[%s8128_s0 + $0x468] sm:$0xff] }
  0x46   :  { %394 = vmatpush.msrb.mxu1 %v3163_v8  ;;  %465 = vmatpush.msrb.mxu3 %v3194_v9  ;;  %v3224_v8 = vld [vmem:[%s8128_s0 + $0x420] sm:$0xff]  ;;  %v3210_v9 = vld [vmem:[%s8128_s0 + $0x3b0] sm:$0xff] }
  0x47   :  { %431 = vmatpush.msrb.mxu2 %v3177_v11  ;;  %494 = vmatpush.msra.mxu0 %v3216_v19  ;;  %v3257_v11 = vld [vmem:[%s8128_s0 + $0x4f0] sm:$0xff]  ;;  %v3239_v19 = vld [vmem:[%s8128_s0 + $0x460] sm:$0xff] }
  0x48   :  { %395 = vmatpush.msrb.mxu1 %v3162_v12  ;;  %466 = vmatpush.msrb.mxu3 %v3193_v13  ;;  %v3209_v12 = vld [vmem:[%s8128_s0 + $0x3a8] sm:$0xff]  ;;  %v4746_v13 = vld [vmem:[%s8129_s1 + $0x70] sm:$0xff] }
  0x49   :  { %432 = vmatpush.msrb.mxu2 %v3176_v18  ;;  %495 = vmatpush.msra.mxu0 %v3215_v38  ;;  %v3256_v18 = vld [vmem:[%s8128_s0 + $0x4e8] sm:$0xff]  ;;  %v4792_v38 = vld [vmem:[%s8129_s1 + $0x98] sm:$0xff] }
  0x4a   :  { %166 = vmatmul.f32.gmra.mxu0 %v4599_v21  ;;  %396 = vmatpush.msrb.mxu1 %v3161_v22  ;;  %v3208_v22 = vld [vmem:[%s8128_s0 + $0x3a0] sm:$0xff] }
  0x4b   :  { %236 = vmatmul.f32.gmra.mxu2 %v4607_v23  ;;  %271 = vmatmul.f32.gmra.mxu3 %v4612_v24 }
  0x4c   :  { %467 = vmatpush.msrb.mxu3 %v3192_v25  ;;  %635 = vmatpush.msra.mxu2 %v3250_v26  ;;  %v3255_v25 = vld [vmem:[%s8128_s0 + $0x4e0] sm:$0xff]  ;;  %v3238_v26 = vld [vmem:[%s8128_s0 + $0x458] sm:$0xff] }
  0x4d   :  { %201 = vmatmul.f32.gmra.mxu1 %v4624_v27  ;;  %496 = vmatpush.msra.mxu0 %v3214_v46  ;;  %v3280_v46 = vld [vmem:[%s8128_s0 + $0x5a8] sm:$0xff] }
  0x4e   :  { %670 = vmatpush.msra.mxu3 %v3266_v28  ;;  %397 = vmatpush.msrb.mxu1 %v3160_v30  ;;  %v3254_v28 = vld [vmem:[%s8128_s0 + $0x4d8] sm:$0xff]  ;;  %v3237_v30 = vld [vmem:[%s8128_s0 + $0x450] sm:$0xff] }
  0x4f   :  { %636 = vmatpush.msra.mxu2 %v3249_v33  ;;  %497 = vmatpush.msra.mxu0 %v3213_v53  ;;  %v3282_v33 = vld [vmem:[%s8128_s0 + $0x5b8] sm:$0xff]  ;;  %v3279_v53 = vld [vmem:[%s8128_s0 + $0x5a0] sm:$0xff] }
  0x50   :  { %3228 = vmatpush.msk.msra.mxu1 %vm131_vm0, %v3227_v34  ;;  %671 = vmatpush.msra.mxu3 %v3265_v36  ;;  %v3298_v34 = vld [vmem:[%s8128_s0 + $0x638] sm:$0xff]  ;;  %v3281_v36 = vld [vmem:[%s8128_s0 + $0x5b0] sm:$0xff] }
  0x51   :  { %637 = vmatpush.msra.mxu2 %v3248_v37  ;;  %498 = vmatpush.msra.mxu0 %v3212_v56  ;;  %v3297_v37 = vld [vmem:[%s8128_s0 + $0x630] sm:$0xff]  ;;  %v4838_v56 = vld [vmem:[%s8129_s1 + $0xc0] sm:$0xff] }
  0x52   :  { %672 = vmatpush.msra.mxu3 %v3264_v39  ;;  %535 = vmatpush.msra.mxu1 %v3226_v40  ;;  %v3253_v39 = vld [vmem:[%s8128_s0 + $0x4d0] sm:$0xff]  ;;  %v3236_v40 = vld [vmem:[%s8128_s0 + $0x448] sm:$0xff] }
  0x53   :  { %3154 = vmatmul.msk.f32.vlgmr.msrb.gmra.mxu0 %vm112_vm1, %v4659_v41  ;;  %638 = vmatpush.msra.mxu2 %v3247_v42  ;;  %v3252_v42 = vld [vmem:[%s8128_s0 + $0x4c8] sm:$0xff] }
  0x54   :  { %433 = vmatmul.f32.vlgmr.msrb.gmra.mxu2 %v4326_v4  ;;  %468 = vmatmul.f32.vlgmr.msrb.gmra.mxu3 %v4309_v0 }
  0x55   :  { %673 = vmatpush.msra.mxu3 %v3263_v43  ;;  %639 = vmatpush.msra.mxu2 %v3246_v44  ;;  %v3235_v43 = vld [vmem:[%s8128_s0 + $0x440] sm:$0xff] }
  0x56   :  { %398 = vmatmul.f32.vlgmr.msrb.gmra.mxu1 %v4304_v63  ;;  %499 = vmatpush.msra.mxu0 %v3211_v62  ;;  %v3251_v44 = vld [vmem:[%s8128_s0 + $0x4c0] sm:$0xff] }
  0x57   :  { %674 = vmatpush.msra.mxu3 %v3262_v49  ;;  %640 = vmatpush.msra.mxu2 %v3245_v50  ;;  %v3302_v49 = vld [vmem:[%s8128_s0 + $0x658] sm:$0xf]  ;;  %v3322_v62 = vld [vmem:[%s8128_s0 + $0x6c0] sm:$0xff] }
  0x58   :  { %536 = vmatpush.msra.mxu1 %v3225_v52  ;;  %500 = vmatpush.msra.mxu0 %v3210_v9  ;;  %v3325_v50 = vld [vmem:[%s8128_s0 + $0x6d8] sm:$0xff]  ;;  %v3296_v52 = vld [vmem:[%s8128_s0 + $0x628] sm:$0xff]  ;;  %v3293_v9 = vld [vmem:[%s8128_s0 + $0x610] sm:$0xff] }
  0x59   :  { %675 = vmatpush.msra.mxu3 %v3261_v54  ;;  %641 = vmatpush.msra.mxu2 %v3244_v55  ;;  %v3324_v54 = vld [vmem:[%s8128_s0 + $0x6d0] sm:$0xff] }
  0x5a   :  { %537 = vmatpush.msra.mxu1 %v3224_v8  ;;  %501 = vmatpush.msra.mxu0 %v3209_v12  ;;  %v3301_v55 = vld [vmem:[%s8128_s0 + $0x650] sm:$0xff]  ;;  %v3321_v8 = vld [vmem:[%s8128_s0 + $0x6b8] sm:$0xff] }
  0x5b   :  { %3155 = vmatmul.msk.f32.gmra.mxu0 %vm112_vm1, %v4703_v57  ;;  %676 = vmatpush.msra.mxu3 %v3260_v58  ;;  %v3295_v58 = vld [vmem:[%s8128_s0 + $0x620] sm:$0xff]  ;;  %v3320_v12 = vld [vmem:[%s8128_s0 + $0x6b0] sm:$0xff] }
  0x5c   :  { %436 = vmatmul.f32.gmra.mxu2 %v4387_v20  ;;  %471 = vmatmul.f32.gmra.mxu3 %v4370_v16 }
  0x5d   :  { %642 = vmatpush.msra.mxu2 %v3243_v59  ;;  %677 = vmatpush.msra.mxu3 %v3259_v60  ;;  %v3323_v59 = vld [vmem:[%s8128_s0 + $0x6c8] sm:$0xff]  ;;  %v3278_v60 = vld [vmem:[%s8128_s0 + $0x598] sm:$0xff] }
  0x5e   :  { %401 = vmatmul.f32.gmra.mxu1 %v4362_v14  ;;  %502 = vmatpush.msra.mxu0 %v3208_v22  ;;  %v3318_v22 = vld [vmem:[%s8128_s0 + $0x6a0] sm:$0xff] }
  0x5f   :  { %643 = vmatpush.msra.mxu2 %v3242_v5  ;;  %678 = vmatpush.msra.mxu3 %v3258_v6  ;;  %v3294_v5 = vld [vmem:[%s8128_s0 + $0x618] sm:$0xff]  ;;  %v3277_v6 = vld [vmem:[%s8128_s0 + $0x590] sm:$0xff] }
  0x60   :  { %705 = vmatpush.msrb.mxu0 %v3282_v33  ;;  %740 = vmatpush.msrb.mxu1 %v3298_v34  ;;  %v3290_v33 = vld [vmem:[%s8128_s0 + $0x5f8] sm:$0xff]  ;;  %v3273_v34 = vld [vmem:[%s8128_s0 + $0x570] sm:$0xff] }
  0x61   :  { %644 = vmatpush.msra.mxu2 %v3241_v10  ;;  %679 = vmatpush.msra.mxu3 %v3257_v11  ;;  %v3276_v10 = vld [vmem:[%s8128_s0 + $0x588] sm:$0xff] }
  0x62   :  { %706 = vmatpush.msrb.mxu0 %v3281_v36  ;;  %741 = vmatpush.msrb.mxu1 %v3297_v37  ;;  %v4876_v11 = vld [vmem:[%s8129_s1 + $0xe8] sm:$0x1f]  ;;  %v3316_v36 = vld [vmem:[%s8128_s0 + $0x690] sm:$0xff] }
  0x63   :  { %3156 = vmatmul.msk.f32.gmra.mxu0 %vm112_vm1, %v4746_v13  ;;  %645 = vmatpush.msra.mxu2 %v3240_v15  ;;  %v3319_v15 = vld [vmem:[%s8128_s0 + $0x6a8] sm:$0xff]  ;;  %v3289_v37 = vld [vmem:[%s8128_s0 + $0x5f0] sm:$0xff] }
  0x64   :  { %439 = vmatmul.f32.gmra.mxu2 %v4444_v35  ;;  %474 = vmatmul.f32.gmra.mxu3 %v4427_v31 }
  0x65   :  { %680 = vmatpush.msra.mxu3 %v3256_v18  ;;  %646 = vmatpush.msra.mxu2 %v3239_v19  ;;  %v3292_v18 = vld [vmem:[%s8128_s0 + $0x608] sm:$0xff]  ;;  %v3275_v19 = vld [vmem:[%s8128_s0 + $0x580] sm:$0xff] }
  0x66   :  { %404 = vmatmul.f32.gmra.mxu1 %v4419_v29  ;;  %707 = vmatpush.msrb.mxu0 %v3280_v46  ;;  %v3313_v46 = vld [vmem:[%s8128_s0 + $0x678] sm:$0xff] }
  0x67   :  { %681 = vmatpush.msra.mxu3 %v3255_v25  ;;  %647 = vmatpush.msra.mxu2 %v3238_v26  ;;  %v3300_v25 = vld [vmem:[%s8128_s0 + $0x648] sm:$0xff]  ;;  %v3291_v26 = vld [vmem:[%s8128_s0 + $0x600] sm:$0xff] }
  0x68   :  { %742 = vmatpush.msrb.mxu1 %v3296_v52  ;;  %708 = vmatpush.msrb.mxu0 %v3279_v53  ;;  %v3312_v52 = vld [vmem:[%s8128_s0 + $0x670] sm:$0xff] }
  0x69   :  { %682 = vmatpush.msra.mxu3 %v3254_v28  ;;  %648 = vmatpush.msra.mxu2 %v3237_v30  ;;  %v3274_v28 = vld [vmem:[%s8128_s0 + $0x578] sm:$0xff]  ;;  %v3269_v53 = vld [vmem:[%s8128_s0 + $0x550] sm:$0xff] }
  0x6a   :  { %743 = vmatpush.msrb.mxu1 %v3295_v58  ;;  %709 = vmatpush.msrb.mxu0 %v3278_v60  ;;  %v3317_v30 = vld [vmem:[%s8128_s0 + $0x698] sm:$0xff]  ;;  %v3268_v58 = vld [vmem:[%s8128_s0 + $0x548] sm:$0xff]  ;;  %v3310_v60 = vld [vmem:[%s8128_s0 + $0x660] sm:$0xff] }
  0x6b   :  { %3157 = vmatmul.msk.f32.gmra.mxu0 %vm112_vm1, %v4792_v38  ;;  %683 = vmatpush.msra.mxu3 %v3253_v39  ;;  %v3272_v39 = vld [vmem:[%s8128_s0 + $0x568] sm:$0xff] }
  0x6c   :  { %442 = vmatmul.f32.gmra.mxu2 %v4504_v51  ;;  %477 = vmatmul.f32.gmra.mxu3 %v4487_v47 }
  0x6d   :  { %649 = vmatpush.msra.mxu2 %v3236_v40  ;;  %684 = vmatpush.msra.mxu3 %v3252_v42  ;;  %v3315_v40 = vld [vmem:[%s8128_s0 + $0x688] sm:$0xff]  ;;  %v3271_v42 = vld [vmem:[%s8128_s0 + $0x560] sm:$0xff] }
  0x6e   :  { %407 = vmatmul.f32.gmra.mxu1 %v4479_v45  ;;  %710 = vmatpush.msrb.mxu0 %v3277_v6  ;;  %v3283_v6 = vld [vmem:[%s8128_s0 + $0x5c0] sm:$0xff] }
  0x6f   :  { %650 = vmatpush.msra.mxu2 %v3235_v43  ;;  %685 = vmatpush.msra.mxu3 %v3251_v44  ;;  %v3314_v43 = vld [vmem:[%s8128_s0 + $0x680] sm:$0xff] }
  0x70   :  { %744 = vmatpush.msrb.mxu1 %v3294_v5  ;;  %711 = vmatpush.msrb.mxu0 %v3276_v10  ;;  %v3299_v44 = vld [vmem:[%s8128_s0 + $0x640] sm:$0xff]  ;;  %v3373_v5 = vld [vmem:[%s8128_s0 + $0x858] sm:$0xff] }
  0x71   :  { %3303 = vmatpush.msk.msrb.mxu2 %vm131_vm0, %v3302_v49  ;;  %888 = vmatpush.msrb.mxu3 %v3325_v50  ;;  %v3287_v49 = vld [vmem:[%s8128_s0 + $0x5e0] sm:$0xff]  ;;  %v3270_v50 = vld [vmem:[%s8128_s0 + $0x558] sm:$0xff] }
  0x72   :  { %745 = vmatpush.msrb.mxu1 %v3293_v9  ;;  %712 = vmatpush.msrb.mxu0 %v3275_v19  ;;  %v3372_v9 = vld [vmem:[%s8128_s0 + $0x850] sm:$0xff]  ;;  %v3357_v10 = vld [vmem:[%s8128_s0 + $0x7d8] sm:$0xff]  ;;  %v3339_v19 = vld [vmem:[%s8128_s0 + $0x748] sm:$0xff] }
  0x73   :  { %889 = vmatpush.msrb.mxu3 %v3324_v54  ;;  %788 = vmatpush.msrb.mxu2 %v3301_v55  ;;  %v3285_v54 = vld [vmem:[%s8128_s0 + $0x5d0] sm:$0xff]  ;;  %v3311_v55 = vld [vmem:[%s8128_s0 + $0x668] sm:$0xff] }
  0x74   :  { %3158 = vmatmul.msk.f32.gmra.mxu0 %vm112_vm1, %v4838_v56  ;;  %445 = vmatmul.f32.gmra.mxu2 %v4564_v7 }
  0x75   :  { %480 = vmatmul.f32.gmra.mxu3 %v4547_v2  ;;  %746 = vmatpush.msrb.mxu1 %v3292_v18  ;;  %v3356_v18 = vld [vmem:[%s8128_s0 + $0x7d0] sm:$0xff] }
  0x76   :  { %890 = vmatpush.msrb.mxu3 %v3323_v59  ;;  %410 = vmatmul.f32.gmra.mxu1 %v4539_v61  ;;  %v3284_v59 = vld [vmem:[%s8128_s0 + $0x5c8] sm:$0xff] }
  0x77   :  { %789 = vmatpush.msrb.mxu2 %v3300_v25  ;;  %747 = vmatpush.msrb.mxu1 %v3291_v26  ;;  %v3338_v26 = vld [vmem:[%s8128_s0 + $0x740] sm:$0xff] }
  0x78   :  { %891 = vmatpush.msrb.mxu3 %v3322_v62  ;;  %713 = vmatpush.msrb.mxu0 %v3274_v28  ;;  %v3267_v62 = vld [vmem:[%s8128_s0 + $0x540] sm:$0xff]  ;;  %v3369_v28 = vld [vmem:[%s8128_s0 + $0x838] sm:$0xff] }
  0x79   :  { %748 = vmatpush.msrb.mxu1 %v3290_v33  ;;  %790 = vmatpush.msrb.mxu2 %v3299_v44 }
  0x7a   :  { %892 = vmatpush.msrb.mxu3 %v3321_v8  ;;  %714 = vmatpush.msrb.mxu0 %v3273_v34  ;;  %v3377_v8 = vld [vmem:[%s8128_s0 + $0x878] sm:$0xf]  ;;  %v3376_v34 = vld [vmem:[%s8128_s0 + $0x870] sm:$0xff] }
  0x7b   :  { %749 = vmatpush.msrb.mxu1 %v3289_v37  ;;  %v3368_v37 = vld [vmem:[%s8128_s0 + $0x830] sm:$0xff] }
  0x7c   :  { %3159 = vmatmul.msk.f32.gmra.mxu0 %vm112_vm1, %v4876_v11  ;;  %893 = vmatpush.msrb.mxu3 %v3320_v12  ;;  %v3340_v12 = vld [vmem:[%s8128_s0 + $0x750] sm:$0xff] }
  0x7d   :  { %448 = vmatmul.f32.gmra.mxu2 %v4624_v27  ;;  %483 = vmatmul.f32.gmra.mxu3 %v4607_v23 }
  0x7e   :  { %894 = vmatpush.msrb.mxu3 %v3319_v15  ;;  %413 = vmatmul.f32.gmra.mxu1 %v4599_v21  ;;  %v3371_v15 = vld [vmem:[%s8128_s0 + $0x848] sm:$0xff] }
  0x7f   :  { %715 = vmatpush.msrb.mxu0 %v3272_v39  ;;  %v3353_v39 = vld [vmem:[%s8128_s0 + $0x7b8] sm:$0xff] }
  0x80   :  { %895 = vmatpush.msrb.mxu3 %v3318_v22  ;;  %v3370_v22 = vld [vmem:[%s8128_s0 + $0x840] sm:$0xff] }
  0x81   :  { %716 = vmatpush.msrb.mxu0 %v3271_v42 }
  0x82   :  { %896 = vmatpush.msrb.mxu3 %v3317_v30  ;;  %v3354_v30 = vld [vmem:[%s8128_s0 + $0x7c0] sm:$0xff] }
  0x83   :  { %717 = vmatpush.msrb.mxu0 %v3270_v50  ;;  %v3352_v50 = vld [vmem:[%s8128_s0 + $0x7b0] sm:$0xff] }
  0x84   :  { %503 = vmatmul.f32.vlgmr.msra.gmra.mxu0 %v4314_v1  ;;  %897 = vmatpush.msrb.mxu3 %v3316_v36  ;;  %v3337_v36 = vld [vmem:[%s8128_s0 + $0x738] sm:$0xff] }
  0x85   :  { %651 = vmatmul.f32.vlgmr.msra.gmra.mxu2 %v4304_v63  ;;  %686 = vmatmul.f32.vlgmr.msra.gmra.mxu3 %v4326_v4  ;;  %v3288_v4 = vld [vmem:[%s8128_s0 + $0x5e8] sm:$0xff] }
  0x86   :  { %3229 = vmatmul.msk.f32.vlgmr.msra.gmra.mxu1 %vm112_vm1, %v4659_v41  ;;  %898 = vmatpush.msrb.mxu3 %v3315_v40 }
  0x87   :  { %750 = vmatpush.msrb.mxu1 %v3288_v4  ;;  %718 = vmatpush.msrb.mxu0 %v3269_v53  ;;  %v3367_v4 = vld [vmem:[%s8128_s0 + $0x828] sm:$0xff] }
  0x88   :  { %899 = vmatpush.msrb.mxu3 %v3314_v43  ;;  %993 = vmatpush.msra.mxu2 %v3373_v5 }
  0x89   :  { %751 = vmatpush.msrb.mxu1 %v3287_v49  ;;  %719 = vmatpush.msrb.mxu0 %v3268_v58  ;;  %v3365_v58 = vld [vmem:[%s8128_s0 + $0x818] sm:$0xff] }
  0x8a   :  { %900 = vmatpush.msrb.mxu3 %v3313_v46  ;;  %994 = vmatpush.msra.mxu2 %v3372_v9 }
  0x8b   :  { %720 = vmatpush.msrb.mxu0 %v3267_v62  ;;  %v3375_v62 = vld [vmem:[%s8128_s0 + $0x868] sm:$0xff] }
  0x8c   :  { %506 = vmatmul.f32.gmra.mxu0 %v4375_v17  ;;  %901 = vmatpush.msrb.mxu3 %v3312_v52  ;;  %v3335_v52 = vld [vmem:[%s8128_s0 + $0x728] sm:$0xff] }
  0x8d   :  { %654 = vmatmul.f32.gmra.mxu2 %v4362_v14  ;;  %689 = vmatmul.f32.gmra.mxu3 %v4387_v20  ;;  %v3286_v20 = vld [vmem:[%s8128_s0 + $0x5d8] sm:$0xff] }
  0x8e   :  { %3230 = vmatmul.msk.f32.gmra.mxu1 %vm112_vm1, %v4703_v57  ;;  %902 = vmatpush.msrb.mxu3 %v3311_v55  ;;  %v3334_v55 = vld [vmem:[%s8128_s0 + $0x720] sm:$0xff] }
  0x8f   :  { %752 = vmatpush.msrb.mxu1 %v3286_v20  ;;  %995 = vmatpush.msra.mxu2 %v3371_v15  ;;  %v3366_v20 = vld [vmem:[%s8128_s0 + $0x820] sm:$0xff]  ;;  %v3332_v15 = vld [vmem:[%s8128_s0 + $0x710] sm:$0xff] }
  0x90   :  { %903 = vmatpush.msrb.mxu3 %v3310_v60  ;;  %v3333_v60 = vld [vmem:[%s8128_s0 + $0x718] sm:$0xff] }
  0x91   :  { %753 = vmatpush.msrb.mxu1 %v3285_v54  ;;  %996 = vmatpush.msra.mxu2 %v3370_v22  ;;  %v3351_v54 = vld [vmem:[%s8128_s0 + $0x7a8] sm:$0xff]  ;;  %v3348_v22 = vld [vmem:[%s8128_s0 + $0x790] sm:$0xff] }
  0x92   :  { %3378 = vmatpush.msk.msra.mxu3 %vm131_vm0, %v3377_v8 }
  0x93   :  { %754 = vmatpush.msrb.mxu1 %v3284_v59  ;;  %997 = vmatpush.msra.mxu2 %v3369_v28 }
  0x94   :  { %509 = vmatmul.f32.gmra.mxu0 %v4432_v32  ;;  %1041 = vmatpush.msra.mxu3 %v3376_v34 }
  0x95   :  { %657 = vmatmul.f32.gmra.mxu2 %v4419_v29  ;;  %692 = vmatmul.f32.gmra.mxu3 %v4444_v35  ;;  %v3341_v35 = vld [vmem:[%s8128_s0 + $0x758] sm:$0xff] }
  0x96   :  { %3231 = vmatmul.msk.f32.gmra.mxu1 %vm112_vm1, %v4746_v13  ;;  %923 = vmatpush.msra.mxu0 %v3341_v35 }
  0x97   :  { %755 = vmatpush.msrb.mxu1 %v3283_v6  ;;  %998 = vmatpush.msra.mxu2 %v3368_v37  ;;  %v3346_v37 = vld [vmem:[%s8128_s0 + $0x780] sm:$0xff] }
  0x98   :  { %924 = vmatpush.msra.mxu0 %v3340_v12  ;;  %1042 = vmatpush.msra.mxu3 %v3375_v62  ;;  %v3349_v12 = vld [vmem:[%s8128_s0 + $0x798] sm:$0xff] }
  0x99   :  { %958 = vmatpush.msra.mxu1 %v3357_v10  ;;  %999 = vmatpush.msra.mxu2 %v3367_v4  ;;  %v3364_v10 = vld [vmem:[%s8128_s0 + $0x810] sm:$0xff]  ;;  %v3448_v62 = vld [vmem:[%s8128_s0 + $0xa78] sm:$0xff] }
  0x9a   :  { %925 = vmatpush.msra.mxu0 %v3339_v19  ;;  %v3363_v19 = vld [vmem:[%s8128_s0 + $0x808] sm:$0xff]  ;;  %v3360_v4 = vld [vmem:[%s8128_s0 + $0x7f0] sm:$0xff] }
  0x9b   :  { %959 = vmatpush.msra.mxu1 %v3356_v18  ;;  %1000 = vmatpush.msra.mxu2 %v3366_v20 }
  0x9c   :  { %512 = vmatmul.f32.gmra.mxu0 %v4492_v48 }
  0x9d   :  { %660 = vmatmul.f32.gmra.mxu2 %v4479_v45  ;;  %695 = vmatmul.f32.gmra.mxu3 %v4504_v51  ;;  %v3355_v51 = vld [vmem:[%s8128_s0 + $0x7c8] sm:$0xff] }
  0x9e   :  { %3232 = vmatmul.msk.f32.gmra.mxu1 %vm112_vm1, %v4792_v38  ;;  %926 = vmatpush.msra.mxu0 %v3338_v26 }
  0x9f   :  { %v152_v25 = vpop.f32.mrf.mxu0  ;;  %960 = vmatpush.msra.mxu1 %v3355_v51  ;;  %1001 = vmatpush.msra.mxu2 %v3365_v58  ;;  %v3331_v51 = vld [vmem:[%s8128_s0 + $0x708] sm:$0xff] }
  0xa0   :  { %927 = vmatpush.msra.mxu0 %v3337_v36  ;;  %v3330_v36 = vld [vmem:[%s8128_s0 + $0x700] sm:$0xff] }
  0xa1   :  { %961 = vmatpush.msra.mxu1 %v3354_v30  ;;  %1002 = vmatpush.msra.mxu2 %v3364_v10 }
  0xa2   :  { %v187_v33 = vpop.f32.mrf.mxu1 }
  0xa3   :  { %v188_v40 = vadd.f32 %v187_v33, %v152_v25  ;;  %962 = vmatpush.msra.mxu1 %v3353_v39  ;;  %1003 = vmatpush.msra.mxu2 %v3363_v19  ;;  %v3447_v19 = vld [vmem:[%s8128_s0 + $0xa70] sm:$0xff] }
  0xa4   :  { %515 = vmatmul.f32.gmra.mxu0 %v4552_v3 }
  0xa5   :  { %663 = vmatmul.f32.gmra.mxu2 %v4539_v61  ;;  %698 = vmatmul.f32.gmra.mxu3 %v4564_v7  ;;  %v3336_v7 = vld [vmem:[%s8128_s0 + $0x730] sm:$0xff] }
  0xa6   :  { %3233 = vmatmul.msk.f32.gmra.mxu1 %vm112_vm1, %v4838_v56  ;;  %v222_v42 = vpop.f32.mrf.mxu2  ;;  %v257_v43 = vpop.f32.mrf.mxu3  ;;  %928 = vmatpush.msra.mxu0 %v3336_v7  ;;  %v3329_v7 = vld [vmem:[%s8128_s0 + $0x6f8] sm:$0xff] }
  0xa7   :  { %v223_v44 = vadd.f32 %v222_v42, %v188_v40  ;;  %v155_v46 = vpop.f32.mrf.mxu0  ;;  %963 = vmatpush.msra.mxu1 %v3352_v50  ;;  %v3374_v40 = vld [vmem:[%s8128_s0 + $0x860] sm:$0xff] }
  0xa8   :  { %929 = vmatpush.msra.mxu0 %v3335_v52  ;;  %1043 = vmatpush.msra.mxu3 %v3374_v40  ;;  %v3444_v40 = vld [vmem:[%s8128_s0 + $0xa58] sm:$0xff] }
  0xa9   :  { %v5065_v49 = vadd.f32 %v257_v43, %v223_v44  ;;  %964 = vmatpush.msra.mxu1 %v3351_v54  ;;  %v3359_v43 = vld [vmem:[%s8128_s0 + $0x7e8] sm:$0xff]  ;;  %v3358_v54 = vld [vmem:[%s8128_s0 + $0x7e0] sm:$0xff] }
  0xaa   :  { %v190_v53 = vpop.f32.mrf.mxu1  ;;  %930 = vmatpush.msra.mxu0 %v3334_v55  ;;  %v3343_v55 = vld [vmem:[%s8128_s0 + $0x768] sm:$0xff] }
  0xab   :  { %v191_v59 = vadd.f32 %v190_v53, %v155_v46  ;;  %v3327_v53 = vld [vmem:[%s8128_s0 + $0x6e8] sm:$0xff] }
  0xac   :  { %518 = vmatmul.f32.gmra.mxu0 %v4612_v24 }
  0xad   :  { %666 = vmatmul.f32.gmra.mxu2 %v4599_v21  ;;  %701 = vmatmul.f32.gmra.mxu3 %v4624_v27  ;;  %v3350_v27 = vld [vmem:[%s8128_s0 + $0x7a0] sm:$0xff] }
  0xae   :  { %3234 = vmatmul.msk.f32.gmra.mxu1 %vm112_vm1, %v4876_v11  ;;  %v225_v5 = vpop.f32.mrf.mxu2  ;;  %v260_v6 = vpop.f32.mrf.mxu3  ;;  %931 = vmatpush.msra.mxu0 %v3333_v60  ;;  %v3342_v60 = vld [vmem:[%s8128_s0 + $0x760] sm:$0xff] }
  0xaf   :  { %v226_v35 = vadd.f32 %v225_v5, %v191_v59  ;;  %v158_v8 = vpop.f32.mrf.mxu0  ;;  %965 = vmatpush.msra.mxu1 %v3350_v27  ;;  %v3326_v59 = vld [vmem:[%s8128_s0 + $0x6e0] sm:$0xff]  ;;  %v3432_v27 = vld [vmem:[%s8128_s0 + $0x9f8] sm:$0xff] }
  0xb0   :  { %932 = vmatpush.msra.mxu0 %v3332_v15  ;;  %v3399_v15 = vld [vmem:[%s8128_s0 + $0x8f0] sm:$0xff] }
  0xb1   :  { %v5099_v9 = vadd.f32 %v260_v6, %v226_v35  ;;  %966 = vmatpush.msra.mxu1 %v3349_v12  ;;  %v3416_v12 = vld [vmem:[%s8128_s0 + $0x978] sm:$0xff] }
  0xb2   :  { %v193_v18 = vpop.f32.mrf.mxu1  ;;  %933 = vmatpush.msra.mxu0 %v3331_v51  ;;  %v3415_v51 = vld [vmem:[%s8128_s0 + $0x970] sm:$0xff] }
  0xb3   :  { %v194_v25 = vadd.f32 %v193_v18, %v158_v8  ;;  %967 = vmatpush.msra.mxu1 %v3348_v22  ;;  %v3430_v22 = vld [vmem:[%s8128_s0 + $0x9e8] sm:$0xff] }
  0xb4   :  { %721 = vmatmul.f32.vlgmr.msrb.gmra.mxu0 %v4309_v0  ;;  %v3362_v0 = vld [vmem:[%s8128_s0 + $0x800] sm:$0xff] }
  0xb5   :  { %3304 = vmatmul.msk.f32.vlgmr.msrb.gmra.mxu2 %vm112_vm1, %v4659_v41  ;;  %904 = vmatmul.f32.vlgmr.msrb.gmra.mxu3 %v4304_v63  ;;  %v3347_v63 = vld [vmem:[%s8128_s0 + $0x788] sm:$0xff] }
  0xb6   :  { %756 = vmatmul.f32.vlgmr.msrb.gmra.mxu1 %v4314_v1  ;;  %v228_v26 = vpop.f32.mrf.mxu2  ;;  %v263_v28 = vpop.f32.mrf.mxu3  ;;  %1004 = vmatpush.msra.mxu2 %v3362_v0  ;;  %v3361_v1 = vld [vmem:[%s8128_s0 + $0x7f8] sm:$0xff]  ;;  %v3446_v0 = vld [vmem:[%s8128_s0 + $0xa68] sm:$0xff] }
  0xb7   :  { %v229_v30 = vadd.f32 %v228_v26, %v194_v25  ;;  %v161_v33 = vpop.f32.mrf.mxu0  ;;  %968 = vmatpush.msra.mxu1 %v3347_v63  ;;  %934 = vmatpush.msra.mxu0 %v3330_v36  ;;  %v3414_v63 = vld [vmem:[%s8128_s0 + $0x968] sm:$0xff]  ;;  %v3397_v36 = vld [vmem:[%s8128_s0 + $0x8e0] sm:$0xff] }
  0xb8   :  { %1005 = vmatpush.msra.mxu2 %v3361_v1  ;;  %1246 = vmatpush.msrb.mxu3 %v3448_v62  ;;  %v3445_v1 = vld [vmem:[%s8128_s0 + $0xa60] sm:$0xff] }
  0xb9   :  { %v5130_v34 = vadd.f32 %v263_v28, %v229_v30  ;;  %969 = vmatpush.msra.mxu1 %v3346_v37  ;;  %935 = vmatpush.msra.mxu0 %v3329_v7  ;;  %v3428_v37 = vld [vmem:[%s8128_s0 + $0x9d8] sm:$0xff]  ;;  %v3413_v7 = vld [vmem:[%s8128_s0 + $0x960] sm:$0xff] }
  0xba   :  { %v196_v39 = vpop.f32.mrf.mxu1  ;;  %1006 = vmatpush.msra.mxu2 %v3360_v4  ;;  %1247 = vmatpush.msrb.mxu3 %v3447_v19  ;;  %v3396_v4 = vld [vmem:[%s8128_s0 + $0x8d8] sm:$0xff]  ;;  %v3422_v19 = vld [vmem:[%s8128_s0 + $0x9a8] sm:$0xff] }
  0xbb   :  { %v197_v42 = vadd.f32 %v196_v39, %v161_v33 }
  0xbc   :  { %724 = vmatmul.f32.gmra.mxu0 %v4370_v16  ;;  %v3345_v16 = vld [vmem:[%s8128_s0 + $0x778] sm:$0xff]  ;;  %1007 = vmatpush.msra.mxu2 %v3359_v43 }
  0xbd   :  { %3305 = vmatmul.msk.f32.gmra.mxu2 %vm112_vm1, %v4703_v57  ;;  %907 = vmatmul.f32.gmra.mxu3 %v4362_v14  ;;  %v3328_v14 = vld [vmem:[%s8128_s0 + $0x6f0] sm:$0xff] }
  0xbe   :  { %759 = vmatmul.f32.gmra.mxu1 %v4375_v17  ;;  %v231_v44 = vpop.f32.mrf.mxu2  ;;  %v266_v46 = vpop.f32.mrf.mxu3  ;;  %v3344_v17 = vld [vmem:[%s8128_s0 + $0x770] sm:$0xff]  ;;  %936 = vmatpush.msra.mxu0 %v3328_v14 }
  0xbf   :  { %v232_v50 = vadd.f32 %v231_v44, %v197_v42  ;;  %v164_v52 = vpop.f32.mrf.mxu0  ;;  %970 = vmatpush.msra.mxu1 %v3345_v16  ;;  %1008 = vmatpush.msra.mxu2 %v3358_v54  ;;  %v3443_v16 = vld [vmem:[%s8128_s0 + $0xa50] sm:$0xff]  ;;  %v3426_v44 = vld [vmem:[%s8128_s0 + $0x9c8] sm:$0xff] }
  0xc0   :  { %937 = vmatpush.msra.mxu0 %v3327_v53  ;;  %1248 = vmatpush.msrb.mxu3 %v3446_v0  ;;  %v3395_v42 = vld [vmem:[%s8128_s0 + $0x8d0] sm:$0xff]  ;;  %v3442_v53 = vld [vmem:[%s8128_s0 + $0xa48] sm:$0xff] }
  0xc1   :  { %v5167_v20 = vadd.f32 %v266_v46, %v232_v50  ;;  %971 = vmatpush.msra.mxu1 %v3344_v17  ;;  %1211 = vmatpush.msrb.mxu2 %v3432_v27  ;;  %v3394_v17 = vld [vmem:[%s8128_s0 + $0x8c8] sm:$0xff]  ;;  %v3392_v27 = vld [vmem:[%s8128_s0 + $0x8b8] sm:$0xff] }
  0xc2   :  { %v199_v58 = vpop.f32.mrf.mxu1  ;;  %938 = vmatpush.msra.mxu0 %v3326_v59  ;;  %1249 = vmatpush.msrb.mxu3 %v3445_v1  ;;  %v3393_v59 = vld [vmem:[%s8128_s0 + $0x8c0] sm:$0xff]  ;;  %v3420_v1 = vld [vmem:[%s8128_s0 + $0x998] sm:$0xff] }
  0xc3   :  { %972 = vmatpush.msra.mxu1 %v3343_v55  ;;  %v3425_v55 = vld [vmem:[%s8128_s0 + $0x9c0] sm:$0xff] }
  0xc4   :  { %727 = vmatmul.f32.gmra.mxu0 %v4427_v31  ;;  %v200_v31 = vadd.f32 %v199_v58, %v164_v52  ;;  %1250 = vmatpush.msrb.mxu3 %v3444_v40  ;;  %v3411_v52 = vld [vmem:[%s8128_s0 + $0x950] sm:$0xff]  ;;  %v3410_v58 = vld [vmem:[%s8128_s0 + $0x948] sm:$0xff]  ;;  %v3388_v40 = vld [vmem:[%s8128_s0 + $0x898] sm:$0xff] }
  0xc5   :  { %3306 = vmatmul.msk.f32.gmra.mxu2 %vm112_vm1, %v4746_v13  ;;  %910 = vmatmul.f32.gmra.mxu3 %v4419_v29  ;;  %v3400_v29 = vld [vmem:[%s8128_s0 + $0x8f8] sm:$0xff] }
  0xc6   :  { %762 = vmatmul.f32.gmra.mxu1 %v4432_v32  ;;  %v234_v5 = vpop.f32.mrf.mxu2  ;;  %v269_v6 = vpop.f32.mrf.mxu3  ;;  %1141 = vmatpush.msrb.mxu0 %v3400_v29  ;;  %v3431_v32 = vld [vmem:[%s8128_s0 + $0x9f0] sm:$0xff]  ;;  %v3440_v29 = vld [vmem:[%s8128_s0 + $0xa38] sm:$0xff] }
  0xc7   :  { %973 = vmatpush.msra.mxu1 %v3342_v60  ;;  %v235_v35 = vadd.f32 %v234_v5, %v200_v31  ;;  %v167_v8 = vpop.f32.mrf.mxu0  ;;  %1212 = vmatpush.msrb.mxu2 %v3431_v32 }
  0xc8   :  { %1142 = vmatpush.msrb.mxu0 %v3399_v15  ;;  %1251 = vmatpush.msrb.mxu3 %v3443_v16  ;;  %v3439_v15 = vld [vmem:[%s8128_s0 + $0xa30] sm:$0xff]  ;;  %v5404_v16 = vld [vmem:[%s8129_s1 + $0x40] sm:$0xff] }
  0xc9   :  { %v5198_v10 = vadd.f32 %v269_v6, %v235_v35  ;;  %1176 = vmatpush.msrb.mxu1 %v3416_v12  ;;  %1213 = vmatpush.msrb.mxu2 %v3430_v22  ;;  %v3423_v6 = vld [vmem:[%s8128_s0 + $0x9b0] sm:$0xff]  ;;  %v3408_v35 = vld [vmem:[%s8128_s0 + $0x938] sm:$0xff]  ;;  %v5335_v12 = vld [vmem:[%s8129_s1 + $0x8] sm:$0xff] }
  0xca   :  { %v202_v18 = vpop.f32.mrf.mxu1  ;;  %1252 = vmatpush.msrb.mxu3 %v3442_v53  ;;  %v5355_v22 = vld [vmem:[%s8129_s1 + $0x10] sm:$0xff] }
  0xcb   :  { %v203_v25 = vadd.f32 %v202_v18, %v167_v8  ;;  %1177 = vmatpush.msrb.mxu1 %v3415_v51  ;;  %v3391_v8 = vld [vmem:[%s8128_s0 + $0x8b0] sm:$0xff]  ;;  %v5344_v18 = vld [vmem:[%s8129_s1 + $0x18] sm:$0xff] }
  0xcc   :  { %730 = vmatmul.f32.gmra.mxu0 %v4487_v47  ;;  %v3398_v47 = vld [vmem:[%s8128_s0 + $0x8e8] sm:$0xff]  ;;  %v3407_v51 = vld [vmem:[%s8128_s0 + $0x930] sm:$0xff] }
  0xcd   :  { %3307 = vmatmul.msk.f32.gmra.mxu2 %vm112_vm1, %v4792_v38  ;;  %913 = vmatmul.f32.gmra.mxu3 %v4479_v45  ;;  %v3429_v45 = vld [vmem:[%s8128_s0 + $0x9e0] sm:$0xff] }
  0xce   :  { %765 = vmatmul.f32.gmra.mxu1 %v4492_v48  ;;  %v237_v26 = vpop.f32.mrf.mxu2  ;;  %v272_v28 = vpop.f32.mrf.mxu3  ;;  %1143 = vmatpush.msrb.mxu0 %v3398_v47  ;;  %v3438_v47 = vld [vmem:[%s8128_s0 + $0xa28] sm:$0xff] }
  0xcf   :  { %v238_v30 = vadd.f32 %v237_v26, %v203_v25  ;;  %1214 = vmatpush.msrb.mxu2 %v3429_v45  ;;  %1178 = vmatpush.msrb.mxu1 %v3414_v63  ;;  %v3421_v45 = vld [vmem:[%s8128_s0 + $0x9a0] sm:$0xff]  ;;  %v3406_v63 = vld [vmem:[%s8128_s0 + $0x928] sm:$0xff] }
  0xd0   :  { %v5235_v33 = vpop.f32.mrf.mxu0  ;;  %1144 = vmatpush.msrb.mxu0 %v3397_v36  ;;  %v3437_v36 = vld [vmem:[%s8128_s0 + $0xa20] sm:$0xff] }
  0xd1   :  { %v5237_v48 = vadd.f32 %v272_v28, %v238_v30  ;;  %1215 = vmatpush.msrb.mxu2 %v3428_v37  ;;  %1179 = vmatpush.msrb.mxu1 %v3413_v7  ;;  %v3389_v30 = vld [vmem:[%s8128_s0 + $0x8a0] sm:$0xff] }
  0xd2   :  { %1145 = vmatpush.msrb.mxu0 %v3396_v4  ;;  %v5395_v4 = vld [vmem:[%s8129_s1 + $0x30] sm:$0xff] }
  0xd3   :  { %v399_v39 = vpop.f32.mrf.mxu1 }
  0xd4   :  { %733 = vmatmul.f32.gmra.mxu0 %v4547_v2  ;;  %v3427_v2 = vld [vmem:[%s8128_s0 + $0x9d0] sm:$0xff] }
  0xd5   :  { %3308 = vmatmul.msk.f32.gmra.mxu2 %vm112_vm1, %v4838_v56  ;;  %916 = vmatmul.f32.gmra.mxu3 %v4539_v61  ;;  %v3412_v61 = vld [vmem:[%s8128_s0 + $0x958] sm:$0xff] }
  0xd6   :  { %768 = vmatmul.f32.gmra.mxu1 %v4552_v3  ;;  %1216 = vmatpush.msrb.mxu2 %v3427_v2  ;;  %v3436_v2 = vld [vmem:[%s8128_s0 + $0xa18] sm:$0xff] }
  0xd7   :  { %v434_v14 = vpop.f32.mrf.mxu2  ;;  %v469_v43 = vpop.f32.mrf.mxu3  ;;  %1180 = vmatpush.msrb.mxu1 %v3412_v61  ;;  %1146 = vmatpush.msrb.mxu0 %v3395_v42  ;;  %v5412_v61 = vld [vmem:[%s8129_s1 + $0x38] sm:$0xff]  ;;  %v3419_v42 = vld [vmem:[%s8128_s0 + $0x990] sm:$0xff] }
  0xd8   :  { %v435_v46 = vadd.f32 %v434_v14, %v399_v39  ;;  %v5277_v50 = vpop.f32.mrf.mxu0  ;;  %1217 = vmatpush.msrb.mxu2 %v3426_v44  ;;  %v3405_v39 = vld [vmem:[%s8128_s0 + $0x920] sm:$0xff]  ;;  %v3404_v14 = vld [vmem:[%s8128_s0 + $0x918] sm:$0xff] }
  0xd9   :  { %1181 = vmatpush.msrb.mxu1 %v3411_v52  ;;  %1147 = vmatpush.msrb.mxu0 %v3394_v17  ;;  %v3418_v52 = vld [vmem:[%s8128_s0 + $0x988] sm:$0xff] }
  0xda   :  { %v5279_v3 = vadd.f32 %v469_v43, %v435_v46  ;;  %1218 = vmatpush.msrb.mxu2 %v3425_v55  ;;  %v3435_v46 = vld [vmem:[%s8128_s0 + $0xa10] sm:$0xff]  ;;  %v3386_v55 = vld [vmem:[%s8128_s0 + $0x888] sm:$0xff] }
  0xdb   :  { %v402_v54 = vpop.f32.mrf.mxu1  ;;  %1182 = vmatpush.msrb.mxu1 %v3410_v58  ;;  %1148 = vmatpush.msrb.mxu0 %v3393_v59  ;;  %v3434_v58 = vld [vmem:[%s8128_s0 + $0xa08] sm:$0xff]  ;;  %v3417_v59 = vld [vmem:[%s8128_s0 + $0x980] sm:$0xff] }
  0xdc   :  { %736 = vmatmul.f32.gmra.mxu0 %v4607_v23  ;;  %v3441_v23 = vld [vmem:[%s8128_s0 + $0xa40] sm:$0xff] }
  0xdd   :  { %3309 = vmatmul.msk.f32.gmra.mxu2 %vm112_vm1, %v4876_v11  ;;  %919 = vmatmul.f32.gmra.mxu3 %v4599_v21  ;;  %v3424_v11 = vld [vmem:[%s8128_s0 + $0x9b8] sm:$0xff]  ;;  %v3409_v21 = vld [vmem:[%s8128_s0 + $0x940] sm:$0xff] }
  0xde   :  { %771 = vmatmul.f32.gmra.mxu1 %v4612_v24  ;;  %1253 = vmatpush.msrb.mxu3 %v3441_v23 }
  0xdf   :  { %v437_v60 = vpop.f32.mrf.mxu2  ;;  %v472_v31 = vpop.f32.mrf.mxu3  ;;  %1219 = vmatpush.msrb.mxu2 %v3424_v11  ;;  %1183 = vmatpush.msrb.mxu1 %v3409_v21  ;;  %v3402_v11 = vld [vmem:[%s8128_s0 + $0x908] sm:$0xff]  ;;  %v3385_v21 = vld [vmem:[%s8128_s0 + $0x880] sm:$0xff] }
  0xe0   :  { %v438_v62 = vadd.f32 %v437_v60, %v402_v54  ;;  %v5319_v5 = vpop.f32.mrf.mxu0  ;;  %1149 = vmatpush.msrb.mxu0 %v3392_v27  ;;  %1254 = vmatpush.msrb.mxu3 %v3440_v29  ;;  %v3403_v54 = vld [vmem:[%s8128_s0 + $0x910] sm:$0xff]  ;;  %v5455_v60 = vld [vmem:[%s8129_s1 + $0x58] sm:$0xff]  ;;  %v5464_v29 = vld [vmem:[%s8129_s1 + $0x68] sm:$0xff] }
  0xe1   :  { %1220 = vmatpush.msrb.mxu2 %v3423_v6  ;;  %1184 = vmatpush.msrb.mxu1 %v3408_v35  ;;  %v5475_v6 = vld [vmem:[%s8129_s1 + $0x60] sm:$0xff]  ;;  %v3491_v35 = vld [vmem:[%s8128_s0 + $0xb98] sm:$0xff] }
  0xe2   :  { %v5321_v24 = vadd.f32 %v472_v31, %v438_v62  ;;  %1150 = vmatpush.msrb.mxu0 %v3391_v8  ;;  %1255 = vmatpush.msrb.mxu3 %v3439_v15  ;;  %v3433_v31 = vld [vmem:[%s8128_s0 + $0xa00] sm:$0xff]  ;;  %v3507_v8 = vld [vmem:[%s8128_s0 + $0xc18] sm:$0xff] }
  0xe3   :  { %v405_v32 = vpop.f32.mrf.mxu1  ;;  %1221 = vmatpush.msrb.mxu2 %v3422_v19  ;;  %1185 = vmatpush.msrb.mxu1 %v3407_v51  ;;  %v3401_v62 = vld [vmem:[%s8128_s0 + $0x900] sm:$0xff] }
  0xe4   :  { %939 = vmatmul.f32.vlgmr.msra.gmra.mxu0 %v5335_v12  ;;  %1256 = vmatpush.msrb.mxu3 %v3438_v47  ;;  %v3475_v47 = vld [vmem:[%s8128_s0 + $0xb18] sm:$0xff] }
  0xe5   :  { %1009 = vmatmul.f32.vlgmr.msra.gmra.mxu2 %v5344_v18  ;;  %3379 = vmatmul.msk.f32.vlgmr.msra.gmra.mxu3 %vm112_vm1, %v4659_v41  ;;  %v3390_v41 = vld [vmem:[%s8128_s0 + $0x8a8] sm:$0xff] }
  0xe6   :  { %974 = vmatmul.f32.vlgmr.msra.gmra.mxu1 %v5355_v22  ;;  %1151 = vmatpush.msrb.mxu0 %v3390_v41  ;;  %v3490_v41 = vld [vmem:[%s8128_s0 + $0xb90] sm:$0xff] }
  0xe7   :  { %v440_v0 = vpop.f32.mrf.mxu2  ;;  %v475_v25 = vpop.f32.mrf.mxu3  ;;  %1222 = vmatpush.msrb.mxu2 %v3421_v45  ;;  %1186 = vmatpush.msrb.mxu1 %v3406_v63 }
  0xe8   :  { %v441_v26 = vadd.f32 %v440_v0, %v405_v32  ;;  %v5373_v28 = vpop.f32.mrf.mxu0  ;;  %1152 = vmatpush.msrb.mxu0 %v3389_v30  ;;  %1257 = vmatpush.msrb.mxu3 %v3437_v36  ;;  %v3506_v0 = vld [vmem:[%s8128_s0 + $0xc10] sm:$0xff]  ;;  %v5521_v36 = vld [vmem:[%s8129_s1 + $0x88] sm:$0xff] }
  0xe9   :  { %1223 = vmatpush.msrb.mxu2 %v3420_v1  ;;  %1187 = vmatpush.msrb.mxu1 %v3405_v39  ;;  %v5513_v30 = vld [vmem:[%s8129_s1 + $0x90] sm:$0xff]  ;;  %v3505_v39 = vld [vmem:[%s8128_s0 + $0xc08] sm:$0xff] }
  0xea   :  { %v5384_v37 = vadd.f32 %v475_v25, %v441_v26  ;;  %1153 = vmatpush.msrb.mxu0 %v3388_v40  ;;  %1258 = vmatpush.msrb.mxu3 %v3436_v2  ;;  %v3489_v25 = vld [vmem:[%s8128_s0 + $0xb88] sm:$0xff]  ;;  %v5507_v26 = vld [vmem:[%s8129_s1 + $0x80] sm:$0xff]  ;;  %v3474_v1 = vld [vmem:[%s8128_s0 + $0xb10] sm:$0xff] }
  0xeb   :  { %v408_v7 = vpop.f32.mrf.mxu1  ;;  %1224 = vmatpush.msrb.mxu2 %v3419_v42  ;;  %1188 = vmatpush.msrb.mxu1 %v3404_v14  ;;  %v3488_v40 = vld [vmem:[%s8128_s0 + $0xb80] sm:$0xff]  ;;  %v3473_v2 = vld [vmem:[%s8128_s0 + $0xb08] sm:$0xff] }
  0xec   :  { %942 = vmatmul.f32.gmra.mxu0 %v5395_v4  ;;  %1259 = vmatpush.msrb.mxu3 %v3435_v46  ;;  %v3472_v46 = vld [vmem:[%s8128_s0 + $0xb00] sm:$0xff] }
  0xed   :  { %1012 = vmatmul.f32.gmra.mxu2 %v5404_v16  ;;  %3380 = vmatmul.msk.f32.gmra.mxu3 %vm112_vm1, %v4703_v57  ;;  %v3387_v57 = vld [vmem:[%s8128_s0 + $0x890] sm:$0xff] }
  0xee   :  { %977 = vmatmul.f32.gmra.mxu1 %v5412_v61  ;;  %1154 = vmatpush.msrb.mxu0 %v3387_v57  ;;  %v3504_v57 = vld [vmem:[%s8128_s0 + $0xc00] sm:$0xff] }
  0xef   :  { %v443_v43 = vpop.f32.mrf.mxu2  ;;  %v478_v44 = vpop.f32.mrf.mxu3  ;;  %1225 = vmatpush.msrb.mxu2 %v3418_v52  ;;  %1189 = vmatpush.msrb.mxu1 %v3403_v54  ;;  %v3451_v52 = vld [vmem:[%s8128_s0 + $0xa90] sm:$0xff]  ;;  %v3503_v54 = vld [vmem:[%s8128_s0 + $0xbf8] sm:$0xff] }
  0xf0   :  { %v444_v17 = vadd.f32 %v443_v43, %v408_v7  ;;  %1155 = vmatpush.msrb.mxu0 %v3386_v55  ;;  %1260 = vmatpush.msrb.mxu3 %v3434_v58  ;;  %v3487_v43 = vld [vmem:[%s8128_s0 + $0xb78] sm:$0xff]  ;;  %v5562_v58 = vadd.f32 %v5235_v33, %v5065_v49  ;;  %v5579_v49 = vld [vmem:[%s8129_s1 + $0xb0] sm:$0xff] }
  0xf1   :  { %v5430_v53 = vpop.f32.mrf.mxu0  ;;  %1226 = vmatpush.msrb.mxu2 %v3417_v59  ;;  %1190 = vmatpush.msrb.mxu1 %v3402_v11  ;;  %v5569_v11 = vld [vmem:[%s8129_s1 + $0xb8] sm:$0xff]  ;;  %v3486_v33 = vld [vmem:[%s8128_s0 + $0xb70] sm:$0xff] }
  0xf2   :  { %v5444_v23 = vadd.f32 %v478_v44, %v444_v17  ;;  %1156 = vmatpush.msrb.mxu0 %v3385_v21  ;;  %1261 = vmatpush.msrb.mxu3 %v3433_v31 }
  0xf3   :  { %v411_v27 = vpop.f32.mrf.mxu1  ;;  %1429 = vmatpush.msra.mxu2 %v3491_v35  ;;  %1191 = vmatpush.msrb.mxu1 %v3401_v62  ;;  %v3485_v35 = vld [vmem:[%s8128_s0 + $0xb68] sm:$0xff] }
  0xf4   :  { %945 = vmatmul.f32.gmra.mxu0 %v5455_v60  ;;  %1464 = vmatpush.msra.mxu3 %v3507_v8 }
  0xf5   :  { %1015 = vmatmul.f32.gmra.mxu2 %v5464_v29  ;;  %3381 = vmatmul.msk.f32.gmra.mxu3 %vm112_vm1, %v4746_v13  ;;  %v3452_v13 = vld [vmem:[%s8128_s0 + $0xa98] sm:$0xf] }
  0xf6   :  { %980 = vmatmul.f32.gmra.mxu1 %v5475_v6  ;;  %3453 = vmatpush.msk.msra.mxu0 %vm131_vm0, %v3452_v13 }
  0xf7   :  { %v446_v32 = vpop.f32.mrf.mxu2  ;;  %1430 = vmatpush.msra.mxu2 %v3490_v41  ;;  %1394 = vmatpush.msra.mxu1 %v3475_v47  ;;  %v3484_v41 = vld [vmem:[%s8128_s0 + $0xb60] sm:$0xff]  ;;  %v3469_v47 = vld [vmem:[%s8128_s0 + $0xae8] sm:$0xff] }
  0xf8   :  { %v481_v15 = vpop.f32.mrf.mxu3  ;;  %v447_v19 = vadd.f32 %v446_v32, %v411_v27  ;;  %1465 = vmatpush.msra.mxu3 %v3506_v0  ;;  %1294 = vmatpush.msra.mxu0 %v3451_v52  ;;  %v3471_v27 = vld [vmem:[%s8128_s0 + $0xaf8] sm:$0xff]  ;;  %v3470_v32 = vld [vmem:[%s8128_s0 + $0xaf0] sm:$0xff] }
  0xf9   :  { %v5487_v51 = vpop.f32.mrf.mxu0  ;;  %1431 = vmatpush.msra.mxu2 %v3489_v25  ;;  %1395 = vmatpush.msra.mxu1 %v3474_v1  ;;  %v5612_v25 = vld [vmem:[%s8129_s1 + $0xd0] sm:$0x1f]  ;;  %v5624_v1 = vld [vmem:[%s8129_s1 + $0xe0] sm:$0x1f]  ;;  %v3467_v52 = vld [vmem:[%s8128_s0 + $0xad8] sm:$0xff] }
  0xfa   :  { %v5502_v45 = vadd.f32 %v481_v15, %v447_v19  ;;  %1466 = vmatpush.msra.mxu3 %v3505_v39  ;;  %v3501_v15 = vld [vmem:[%s8128_s0 + $0xbe8] sm:$0xff] }
  0xfb   :  { %v414_v63 = vpop.f32.mrf.mxu1  ;;  %1432 = vmatpush.msra.mxu2 %v3488_v40  ;;  %1396 = vmatpush.msra.mxu1 %v3473_v2  ;;  %v5630_v39 = vld [vmem:[%s8129_s1 + $0xe8] sm:$0x1f]  ;;  %v3500_v40 = vld [vmem:[%s8128_s0 + $0xbe0] sm:$0xff] }
  0xfc   :  { %948 = vmatmul.f32.gmra.mxu0 %v5507_v26  ;;  %1467 = vmatpush.msra.mxu3 %v3504_v57  ;;  %v3499_v57 = vld [vmem:[%s8128_s0 + $0xbd8] sm:$0xff] }
  0xfd   :  { %1018 = vmatmul.f32.gmra.mxu2 %v5513_v30  ;;  %3382 = vmatmul.msk.f32.gmra.mxu3 %vm112_vm1, %v4792_v38 }
  0xfe   :  { %983 = vmatmul.f32.gmra.mxu1 %v5521_v36  ;;  %1433 = vmatpush.msra.mxu2 %v3487_v43 }
  0xff   :  { %1397 = vmatpush.msra.mxu1 %v3472_v46  ;;  %1468 = vmatpush.msra.mxu3 %v3503_v54  ;;  %v3482_v46 = vld [vmem:[%s8128_s0 + $0xb50] sm:$0xff] }
 0x100   :  { %v449_v38 = vpop.f32.mrf.mxu2  ;;  %v484_v7 = vpop.f32.mrf.mxu3  ;;  %1434 = vmatpush.msra.mxu2 %v3486_v33  ;;  %v3481_v33 = vld [vmem:[%s8128_s0 + $0xb48] sm:$0xff] }
 0x101   :  { %v450_v42 = vadd.f32 %v449_v38, %v414_v63  ;;  %v504_v14 = vpop.f32.mrf.mxu0  ;;  %1398 = vmatpush.msra.mxu1 %v3471_v27  ;;  %v3483_v38 = vld [vmem:[%s8128_s0 + $0xb58] sm:$0xff] }
 0x102   :  { %v505_v44 = vadd.f32 %v504_v14, %v5279_v3  ;;  %v5557_v3 = vld [vmem:[%s8129_s1 + $0xa8] sm:$0xff]  ;;  %1435 = vmatpush.msra.mxu2 %v3485_v35 }
 0x103   :  { %v5549_v17 = vadd.f32 %v484_v7, %v450_v42  ;;  %v539_v55 = vpop.f32.mrf.mxu1  ;;  %1399 = vmatpush.msra.mxu1 %v3470_v32  ;;  %v3468_v7 = vld [vmem:[%s8128_s0 + $0xae0] sm:$0xff]  ;;  %v3450_v14 = vld [vmem:[%s8128_s0 + $0xa88] sm:$0xff] }
 0x104   :  { %951 = vmatmul.f32.gmra.mxu0 %v5557_v3  ;;  %v5564_v59 = vadd.f32 %v539_v55, %v505_v44  ;;  %1436 = vmatpush.msra.mxu2 %v3484_v41  ;;  %v3498_v55 = vld [vmem:[%s8128_s0 + $0xbd0] sm:$0xff]  ;;  %v3497_v35 = vld [vmem:[%s8128_s0 + $0xbc8] sm:$0xff] }
 0x105   :  { %1021 = vmatmul.f32.gmra.mxu2 %v5569_v11  ;;  %3383 = vmatmul.msk.f32.gmra.mxu3 %vm112_vm1, %v4838_v56  ;;  %v3502_v56 = vld [vmem:[%s8128_s0 + $0xbf0] sm:$0xff] }
 0x106   :  { %v557_v21 = vmax.f32 %v5562_v58, %v5564_v59  ;;  %986 = vmatmul.f32.gmra.mxu1 %v5579_v49  ;;  %1469 = vmatpush.msra.mxu3 %v3502_v56  ;;  %v5675_v56 = vld [vmem:[%s8129_s1] sm:$0xff]  ;;  %v5902_v58 = vld [vmem:[%s8129_s1 + $0xc8] sm:$0x1f] }
 0x107   :  { %1400 = vmatpush.msra.mxu1 %v3469_v47  ;;  %1437 = vmatpush.msra.mxu2 %v3483_v38  ;;  %v3496_v47 = vld [vmem:[%s8128_s0 + $0xbc0] sm:$0xff] }
 0x108   :  { %v652_v31 = vpop.f32.mrf.mxu2  ;;  %v687_v62 = vpop.f32.mrf.mxu3  ;;  %1470 = vmatpush.msra.mxu3 %v3501_v15  ;;  %1295 = vmatpush.msra.mxu0 %v3450_v14  ;;  %v3495_v14 = vld [vmem:[%s8128_s0 + $0xbb8] sm:$0xff]  ;;  %v3516_v59 = vld [vmem:[%s8128_s0 + $0xc60] sm:$0xff] }
 0x109   :  { %v5594_v13 = vadd.f32 %v687_v62, %v652_v31  ;;  %v507_v8 = vpop.f32.mrf.mxu0  ;;  %1401 = vmatpush.msra.mxu1 %v3468_v7  ;;  %1438 = vmatpush.msra.mxu2 %v3482_v46  ;;  %v3466_v62 = vld [vmem:[%s8128_s0 + $0xad0] sm:$0xff]  ;;  %v5716_v7 = vld [vmem:[%s8129_s1 + $0x28] sm:$0xff] }
 0x10a   :  { %v508_v19 = vadd.f32 %v507_v8, %v5321_v24  ;;  %v5617_v24 = vadd.f32 %v5277_v50, %v5099_v9  ;;  %v5639_v50 = vld [vmem:[%s8129_s1 + $0xd8] sm:$0x1f]  ;;  %1471 = vmatpush.msra.mxu3 %v3500_v40  ;;  %v3480_v8 = vld [vmem:[%s8128_s0 + $0xb40] sm:$0xff] }
 0x10b   :  { %v542_v0 = vpop.f32.mrf.mxu1  ;;  %1402 = vmatpush.msra.mxu1 %v3467_v52  ;;  %1439 = vmatpush.msra.mxu2 %v3481_v33  ;;  %v3464_v40 = vld [vmem:[%s8128_s0 + $0xac0] sm:$0xff]  ;;  %v3462_v33 = vld [vmem:[%s8128_s0 + $0xab0] sm:$0xff] }
 0x10c   :  { %954 = vmatmul.f32.gmra.mxu0 %v5612_v25  ;;  %v5619_v63 = vadd.f32 %v542_v0, %v508_v19  ;;  %1472 = vmatpush.msra.mxu3 %v3499_v57  ;;  %v3479_v0 = vld [vmem:[%s8128_s0 + $0xb38] sm:$0xff]  ;;  %v3478_v57 = vld [vmem:[%s8128_s0 + $0xb30] sm:$0xff] }
 0x10d   :  { %1024 = vmatmul.f32.gmra.mxu2 %v5624_v1  ;;  %3384 = vmatmul.msk.f32.gmra.mxu3 %vm112_vm1, %v5630_v39 }
 0x10e   :  { %v558_v9 = vmax.f32 %v5617_v24, %v5619_v63  ;;  %989 = vmatmul.f32.gmra.mxu1 %v5639_v50  ;;  %1473 = vmatpush.msra.mxu3 %v3498_v55  ;;  %v5943_v24 = vld [vmem:[%s8129_s1 + $0x20] sm:$0xff]  ;;  %v3557_v63 = vld [vmem:[%s8128_s0 + $0xd70] sm:$0xff] }
 0x10f   :  { %1403 = vmatpush.msra.mxu1 %v3466_v62  ;;  %1440 = vmatpush.msra.mxu2 %v3480_v8  ;;  %v3461_v8 = vld [vmem:[%s8128_s0 + $0xaa8] sm:$0xff] }
 0x110   :  { %v655_v2 = vpop.f32.mrf.mxu2  ;;  %v690_v42 = vpop.f32.mrf.mxu3  ;;  %1474 = vmatpush.msra.mxu3 %v3497_v35  ;;  %v3476_v35 = vld [vmem:[%s8128_s0 + $0xb20] sm:$0xff] }
 0x111   :  { %v5657_v43 = vadd.f32 %v690_v42, %v655_v2  ;;  %v510_v44 = vpop.f32.mrf.mxu0  ;;  %v5724_v2 = vadd.f32 %v5373_v28, %v5167_v20  ;;  %1441 = vmatpush.msra.mxu2 %v3479_v0  ;;  %v3463_v20 = vld [vmem:[%s8128_s0 + $0xab8] sm:$0xff] }
 0x112   :  { %v511_v54 = vadd.f32 %v510_v44, %v5384_v37  ;;  %v5680_v37 = vadd.f32 %v5319_v5, %v5130_v34  ;;  %v3465_v5 = vld [vmem:[%s8128_s0 + $0xac8] sm:$0xff]  ;;  %1475 = vmatpush.msra.mxu3 %v3496_v47  ;;  %v3460_v47 = vld [vmem:[%s8128_s0 + $0xaa0] sm:$0xff] }
 0x113   :  { %v545_v27 = vpop.f32.mrf.mxu1  ;;  %1404 = vmatpush.msra.mxu1 %v3465_v5  ;;  %v3477_v44 = vld [vmem:[%s8128_s0 + $0xb28] sm:$0xff]  ;;  %1442 = vmatpush.msra.mxu2 %v3478_v57  ;;  %v3549_v57 = vld [vmem:[%s8128_s0 + $0xd30] sm:$0xff] }
 0x114   :  { %1157 = vmatmul.f32.vlgmr.msrb.gmra.mxu0 %v5675_v56  ;;  %v5682_v31 = vadd.f32 %v545_v27, %v511_v54  ;;  %1476 = vmatpush.msra.mxu3 %v3495_v14  ;;  %v3493_v27 = vld [vmem:[%s8128_s0 + $0xba8] sm:$0xff] }
 0x115   :  { %1227 = vmatmul.f32.vlgmr.msrb.gmra.mxu2 %v5355_v22  ;;  %1262 = vmatmul.f32.vlgmr.msrb.gmra.mxu3 %v5344_v18 }
 0x116   :  { %v559_v34 = vmax.f32 %v5680_v37, %v5682_v31  ;;  %1192 = vmatmul.f32.vlgmr.msrb.gmra.mxu1 %v5335_v12  ;;  %1443 = vmatpush.msra.mxu2 %v3477_v44  ;;  %v3538_v37 = vld [vmem:[%s8128_s0 + $0xcd8] sm:$0xff] }
 0x117   :  { %1405 = vmatpush.msra.mxu1 %v3464_v40  ;;  %v3511_v31 = vld [vmem:[%s8128_s0 + $0xc38] sm:$0xff] }
 0x118   :  { %v658_v18 = vpop.f32.mrf.mxu2  ;;  %v693_v32 = vpop.f32.mrf.mxu3  ;;  %1444 = vmatpush.msra.mxu2 %v3476_v35 }
 0x119   :  { %v5701_v15 = vadd.f32 %v693_v32, %v658_v18  ;;  %v513_v19 = vpop.f32.mrf.mxu0  ;;  %1406 = vmatpush.msra.mxu1 %v3463_v20  ;;  %v5766_v18 = vld [vmem:[%s8129_s1 + $0x50] sm:$0xff]  ;;  %v5774_v32 = vadd.f32 %v5430_v53, %v5198_v10  ;;  %v3523_v53 = vld [vmem:[%s8128_s0 + $0xc98] sm:$0xff] }
 0x11a   :  { %v514_v41 = vadd.f32 %v513_v19, %v5444_v23  ;;  %v3449_v23 = vld [vmem:[%s8128_s0 + $0xa80] sm:$0xff]  ;;  %v3527_v20 = vld [vmem:[%s8128_s0 + $0xcb8] sm:$0xf] }
 0x11b   :  { %v548_v38 = vpop.f32.mrf.mxu1  ;;  %1296 = vmatpush.msra.mxu0 %v3449_v23  ;;  %1407 = vmatpush.msra.mxu1 %v3462_v33  ;;  %v3548_v33 = vld [vmem:[%s8128_s0 + $0xd28] sm:$0xff] }
 0x11c   :  { %1160 = vmatmul.f32.gmra.mxu0 %v5716_v7  ;;  %v5726_v42 = vadd.f32 %v548_v38, %v514_v41  ;;  %v3550_v41 = vld [vmem:[%s8128_s0 + $0xd38] sm:$0xff] }
 0x11d   :  { %1230 = vmatmul.f32.gmra.mxu2 %v5412_v61  ;;  %1265 = vmatmul.f32.gmra.mxu3 %v5404_v16  ;;  %v3494_v16 = vld [vmem:[%s8128_s0 + $0xbb0] sm:$0xff] }
 0x11e   :  { %v560_v28 = vmax.f32 %v5724_v2, %v5726_v42  ;;  %1195 = vmatmul.f32.gmra.mxu1 %v5395_v4  ;;  %1477 = vmatpush.msra.mxu3 %v3494_v16  ;;  %v3522_v16 = vld [vmem:[%s8128_s0 + $0xc90] sm:$0xff]  ;;  %v3508_v42 = vld [vmem:[%s8128_s0 + $0xc20] sm:$0xff] }
 0x11f   :  { %1408 = vmatpush.msra.mxu1 %v3461_v8  ;;  %1647 = vmatpush.msrb.mxu2 %v3550_v41  ;;  %v3520_v41 = vld [vmem:[%s8128_s0 + $0xc80] sm:$0xff]  ;;  %v6036_v2 = vld [vmem:[%s8129_s1 + $0x70] sm:$0xff] }
 0x120   :  { %v661_v46 = vpop.f32.mrf.mxu2  ;;  %v696_v52 = vpop.f32.mrf.mxu3  ;;  %1478 = vmatpush.msra.mxu3 %v3493_v27  ;;  %1499 = vmatpush.msrb.mxu0 %v3523_v53  ;;  %v3521_v27 = vld [vmem:[%s8128_s0 + $0xc88] sm:$0xff]  ;;  %v3546_v53 = vld [vmem:[%s8128_s0 + $0xd18] sm:$0xff] }
 0x121   :  { %v5748_v54 = vadd.f32 %v696_v52, %v661_v46  ;;  %v516_v55 = vpop.f32.mrf.mxu0  ;;  %1409 = vmatpush.msra.mxu1 %v3460_v47  ;;  %v5810_v46 = vld [vmem:[%s8129_s1 + $0x78] sm:$0xff]  ;;  %1648 = vmatpush.msrb.mxu2 %v3549_v57  ;;  %v5818_v52 = vadd.f32 %v5487_v51, %v5237_v48  ;;  %v3564_v48 = vld [vmem:[%s8128_s0 + $0xda8] sm:$0xff]  ;;  %v3563_v47 = vld [vmem:[%s8128_s0 + $0xda0] sm:$0xff] }
 0x122   :  { %v517_v62 = vadd.f32 %v516_v55, %v5502_v45  ;;  %v3492_v45 = vld [vmem:[%s8128_s0 + $0xba0] sm:$0xff]  ;;  %1500 = vmatpush.msrb.mxu0 %v3522_v16  ;;  %v3561_v57 = vld [vmem:[%s8128_s0 + $0xd90] sm:$0xff]  ;;  %v3544_v16 = vld [vmem:[%s8128_s0 + $0xd08] sm:$0xff] }
 0x123   :  { %v551_v5 = vpop.f32.mrf.mxu1  ;;  %1479 = vmatpush.msra.mxu3 %v3492_v45  ;;  %3528 = vmatpush.msk.msrb.mxu1 %vm131_vm0, %v3527_v20 }
 0x124   :  { %1163 = vmatmul.f32.gmra.mxu0 %v5766_v18  ;;  %v5776_v19 = vadd.f32 %v551_v5, %v517_v62  ;;  %1649 = vmatpush.msrb.mxu2 %v3548_v33 }
 0x125   :  { %1233 = vmatmul.f32.gmra.mxu2 %v5475_v6  ;;  %1268 = vmatmul.f32.gmra.mxu3 %v5464_v29  ;;  %v3566_v29 = vld [vmem:[%s8128_s0 + $0xdb8] sm:$0xff] }
 0x126   :  { %v561_v10 = vmax.f32 %v5774_v32, %v5776_v19  ;;  %1198 = vmatmul.f32.gmra.mxu1 %v5455_v60  ;;  %1682 = vmatpush.msrb.mxu3 %v3566_v29  ;;  %v3598_v32 = vld [vmem:[%s8128_s0 + $0xeb8] sm:$0xff]  ;;  %v3581_v19 = vld [vmem:[%s8128_s0 + $0xe30] sm:$0xff] }
 0x127   :  { %1501 = vmatpush.msrb.mxu0 %v3521_v27 }
 0x128   :  { %v664_v0 = vpop.f32.mrf.mxu2  ;;  %v699_v40 = vpop.f32.mrf.mxu3 }
 0x129   :  { %v5795_v38 = vadd.f32 %v699_v40, %v664_v0  ;;  %v519_v23 = vpop.f32.mrf.mxu0  ;;  %v5855_v0 = vld [vmem:[%s8129_s1 + $0xa0] sm:$0xff]  ;;  %v3519_v40 = vld [vmem:[%s8128_s0 + $0xc78] sm:$0xff]  ;;  %1502 = vmatpush.msrb.mxu0 %v3520_v41 }
 0x12a   :  { %v520_v14 = vadd.f32 %v519_v23, %v5549_v17  ;;  %v3565_v17 = vld [vmem:[%s8128_s0 + $0xdb0] sm:$0xff] }
 0x12b   :  { %v554_v44 = vpop.f32.mrf.mxu1  ;;  %1683 = vmatpush.msrb.mxu3 %v3565_v17  ;;  %v3545_v23 = vld [vmem:[%s8128_s0 + $0xd10] sm:$0xff]  ;;  %1503 = vmatpush.msrb.mxu0 %v3519_v40 }
 0x12c   :  { %1166 = vmatmul.f32.gmra.mxu0 %v5810_v46  ;;  %v5820_v55 = vadd.f32 %v554_v44, %v520_v14  ;;  %v3526_v14 = vld [vmem:[%s8128_s0 + $0xcb0] sm:$0xff] }
 0x12d   :  { %1236 = vmatmul.f32.gmra.mxu2 %v5521_v36  ;;  %1271 = vmatmul.f32.gmra.mxu3 %v5513_v30  ;;  %v3547_v30 = vld [vmem:[%s8128_s0 + $0xd20] sm:$0xff] }
 0x12e   :  { %v562_v51 = vmax.f32 %v5818_v52, %v5820_v55  ;;  %1201 = vmatmul.f32.gmra.mxu1 %v5507_v26  ;;  %1684 = vmatpush.msrb.mxu3 %v3564_v48  ;;  %v3579_v52 = vld [vmem:[%s8128_s0 + $0xe20] sm:$0xff] }
 0x12f   :  { %1650 = vmatpush.msrb.mxu2 %v3547_v30  ;;  %1547 = vmatpush.msrb.mxu1 %v3526_v14  ;;  %v3622_v55 = vld [vmem:[%s8128_s0 + $0xf40] sm:$0xff] }
 0x130   :  { %v667_v62 = vpop.f32.mrf.mxu2  ;;  %v702_v35 = vpop.f32.mrf.mxu3  ;;  %1685 = vmatpush.msrb.mxu3 %v3563_v47  ;;  %v3558_v47 = vld [vmem:[%s8128_s0 + $0xd78] sm:$0xff] }
 0x131   :  { %v5840_v8 = vadd.f32 %v702_v35, %v667_v62  ;;  %v722_v5 = vpop.f32.mrf.mxu0  ;;  %1651 = vmatpush.msrb.mxu2 %v3546_v53  ;;  %v3517_v62 = vld [vmem:[%s8128_s0 + $0xc68] sm:$0xff] }
 0x132   :  { %v723_v45 = vadd.f32 %v722_v5, %v5594_v13  ;;  %v3562_v13 = vld [vmem:[%s8128_s0 + $0xd98] sm:$0xff]  ;;  %v3560_v35 = vld [vmem:[%s8128_s0 + $0xd88] sm:$0xff]  ;;  %v3543_v5 = vld [vmem:[%s8128_s0 + $0xd00] sm:$0xff] }
 0x133   :  { %v757_v29 = vpop.f32.mrf.mxu1  ;;  %1686 = vmatpush.msrb.mxu3 %v3562_v13  ;;  %1652 = vmatpush.msrb.mxu2 %v3545_v23 }
 0x134   :  { %1169 = vmatmul.f32.gmra.mxu0 %v5855_v0  ;;  %v758_v20 = vadd.f32 %v757_v29, %v723_v45 }
 0x135   :  { %1239 = vmatmul.f32.gmra.mxu2 %v5579_v49  ;;  %1274 = vmatmul.f32.gmra.mxu3 %v5569_v11  ;;  %v3518_v11 = vld [vmem:[%s8128_s0 + $0xc70] sm:$0xff] }
 0x136   :  { %1204 = vmatmul.f32.gmra.mxu1 %v5557_v3  ;;  %1687 = vmatpush.msrb.mxu3 %v3561_v57  ;;  %v3541_v57 = vld [vmem:[%s8128_s0 + $0xcf0] sm:$0xff] }
 0x137   :  { %1504 = vmatpush.msrb.mxu0 %v3518_v11  ;;  %1653 = vmatpush.msrb.mxu2 %v3544_v16  ;;  %v3514_v11 = vld [vmem:[%s8128_s0 + $0xc50] sm:$0xff] }
 0x138   :  { %v792_v44 = vpop.f32.mrf.mxu2  ;;  %v5882_v17 = vpop.f32.mrf.mxu3  ;;  %1688 = vmatpush.msrb.mxu3 %v3560_v35 }
 0x139   :  { %v793_v33 = vadd.f32 %v792_v44, %v758_v20  ;;  %v725_v27 = vpop.f32.mrf.mxu0  ;;  %1505 = vmatpush.msrb.mxu0 %v3517_v62  ;;  %1654 = vmatpush.msrb.mxu2 %v3543_v5  ;;  %v3525_v20 = vld [vmem:[%s8128_s0 + $0xca8] sm:$0xff] }
 0x13a   :  { %v726_v30 = vadd.f32 %v725_v27, %v5657_v43  ;;  %v3542_v43 = vld [vmem:[%s8128_s0 + $0xcf8] sm:$0xff]  ;;  %1548 = vmatpush.msrb.mxu1 %v3525_v20  ;;  %v3556_v44 = vld [vmem:[%s8128_s0 + $0xd68] sm:$0xff] }
 0x13b   :  { %v5887_v48 = vmax.f32 %v557_v21, %v793_v33  ;;  %v760_v45 = vpop.f32.mrf.mxu1  ;;  %v3559_v21 = vld [vmem:[%s8128_s0 + $0xd80] sm:$0xff]  ;;  %1506 = vmatpush.msrb.mxu0 %v3516_v59  ;;  %1655 = vmatpush.msrb.mxu2 %v3542_v43  ;;  %v5982_v43 = vld [vmem:[%s8129_s1 + $0x48] sm:$0xff] }
 0x13c   :  { %1172 = vmatmul.f32.gmra.mxu0 %v5902_v58  ;;  %v761_v41 = vadd.f32 %v760_v45, %v726_v30  ;;  %1689 = vmatpush.msrb.mxu3 %v3559_v21  ;;  %v3512_v45 = vld [vmem:[%s8128_s0 + $0xc40] sm:$0xff] }
 0x13d   :  { %1242 = vmatmul.f32.gmra.mxu2 %v5639_v50  ;;  %1277 = vmatmul.f32.gmra.mxu3 %v5624_v1  ;;  %v3515_v1 = vld [vmem:[%s8128_s0 + $0xc58] sm:$0xff]  ;;  %v3555_v59 = vld [vmem:[%s8128_s0 + $0xd60] sm:$0xff] }
 0x13e   :  { %1207 = vmatmul.f32.gmra.mxu1 %v5612_v25  ;;  %1690 = vmatpush.msrb.mxu3 %v3558_v47  ;;  %v3536_v47 = vld [vmem:[%s8128_s0 + $0xcc8] sm:$0xff] }
 0x13f   :  { %1507 = vmatpush.msrb.mxu0 %v3515_v1  ;;  %1656 = vmatpush.msrb.mxu2 %v3541_v57  ;;  %v3553_v1 = vld [vmem:[%s8128_s0 + $0xd50] sm:$0xff]  ;;  %v3552_v57 = vld [vmem:[%s8128_s0 + $0xd48] sm:$0xff] }
 0x140   :  { %v795_v53 = vpop.f32.mrf.mxu2  ;;  %v5923_v29 = vpop.f32.mrf.mxu3  ;;  %1691 = vmatpush.msrb.mxu3 %v3557_v63  ;;  %v3535_v63 = vld [vmem:[%s8128_s0 + $0xcc0] sm:$0xff] }
 0x141   :  { %v796_v13 = vadd.f32 %v795_v53, %v761_v41  ;;  %v728_v40 = vpop.f32.mrf.mxu0  ;;  %1508 = vmatpush.msrb.mxu0 %v3514_v11  ;;  %v3510_v41 = vld [vmem:[%s8128_s0 + $0xc30] sm:$0xff] }
 0x142   :  { %v729_v14 = vadd.f32 %v728_v40, %v5701_v15  ;;  %v3513_v15 = vld [vmem:[%s8128_s0 + $0xc48] sm:$0xff]  ;;  %1692 = vmatpush.msrb.mxu3 %v3556_v44 }
 0x143   :  { %v5928_v23 = vmax.f32 %v558_v9, %v796_v13  ;;  %v763_v16 = vpop.f32.mrf.mxu1  ;;  %v3540_v9 = vld [vmem:[%s8128_s0 + $0xce8] sm:$0xff]  ;;  %1509 = vmatpush.msrb.mxu0 %v3513_v15 }
 0x144   :  { %3454 = vmatmul.msk.f32.vlgmr.msra.gmra.mxu0 %vm112_vm1, %v5943_v24  ;;  %v764_v33 = vadd.f32 %v763_v16, %v729_v14  ;;  %1657 = vmatpush.msrb.mxu2 %v3540_v9  ;;  %v3509_v16 = vld [vmem:[%s8128_s0 + $0xc28] sm:$0xff]  ;;  %v3551_v9 = vld [vmem:[%s8128_s0 + $0xd40] sm:$0xff] }
 0x145   :  { %1445 = vmatmul.f32.vlgmr.msra.gmra.mxu2 %v5335_v12  ;;  %1480 = vmatmul.f32.vlgmr.msra.gmra.mxu3 %v5355_v22  ;;  %v3539_v12 = vld [vmem:[%s8128_s0 + $0xce0] sm:$0xff] }
 0x146   :  { %1410 = vmatmul.f32.vlgmr.msra.gmra.mxu1 %v5675_v56  ;;  %1658 = vmatpush.msrb.mxu2 %v3539_v12 }
 0x147   :  { %1693 = vmatpush.msrb.mxu3 %v3555_v59  ;;  %1510 = vmatpush.msrb.mxu0 %v3512_v45  ;;  %v6067_v45 = vld [vmem:[%s8129_s1 + $0x98] sm:$0xff] }
 0x148   :  { %v798_v22 = vpop.f32.mrf.mxu2  ;;  %v5965_v27 = vpop.f32.mrf.mxu3  ;;  %1659 = vmatpush.msrb.mxu2 %v3538_v37 }
 0x149   :  { %v799_v30 = vadd.f32 %v798_v22, %v764_v33  ;;  %v731_v62 = vpop.f32.mrf.mxu0  ;;  %1511 = vmatpush.msrb.mxu0 %v3511_v31 }
 0x14a   :  { %v732_v5 = vadd.f32 %v731_v62, %v5748_v54 }
 0x14b   :  { %v5970_v35 = vmax.f32 %v559_v34, %v799_v30  ;;  %v766_v21 = vpop.f32.mrf.mxu1  ;;  %v3554_v34 = vld [vmem:[%s8128_s0 + $0xd58] sm:$0xff]  ;;  %1512 = vmatpush.msrb.mxu0 %v3510_v41 }
 0x14c   :  { %3455 = vmatmul.msk.f32.gmra.mxu0 %vm112_vm1, %v5982_v43  ;;  %v767_v54 = vadd.f32 %v766_v21, %v732_v5  ;;  %1694 = vmatpush.msrb.mxu3 %v3554_v34  ;;  %v3596_v21 = vld [vmem:[%s8128_s0 + $0xea8] sm:$0xff] }
 0x14d   :  { %1448 = vmatmul.f32.gmra.mxu2 %v5395_v4  ;;  %1483 = vmatmul.f32.gmra.mxu3 %v5412_v61  ;;  %v3537_v4 = vld [vmem:[%s8128_s0 + $0xcd0] sm:$0xff]  ;;  %v3524_v61 = vld [vmem:[%s8128_s0 + $0xca0] sm:$0xff] }
 0x14e   :  { %1413 = vmatmul.f32.gmra.mxu1 %v5716_v7  ;;  %1660 = vmatpush.msrb.mxu2 %v3537_v4 }
 0x14f   :  { %1549 = vmatpush.msrb.mxu1 %v3524_v61  ;;  %1695 = vmatpush.msrb.mxu3 %v3553_v1  ;;  %v6106_v1 = vld [vmem:[%s8129_s1 + $0xc0] sm:$0xff] }
 0x150   :  { %v801_v53 = vpop.f32.mrf.mxu2  ;;  %v6013_v13 = vpop.f32.mrf.mxu3  ;;  %1661 = vmatpush.msrb.mxu2 %v3536_v47  ;;  %1513 = vmatpush.msrb.mxu0 %v3509_v16 }
 0x151   :  { %v802_v40 = vadd.f32 %v801_v53, %v767_v54  ;;  %v734_v14 = vpop.f32.mrf.mxu0  ;;  %1696 = vmatpush.msrb.mxu3 %v3552_v57  ;;  %1752 = vmatpush.msra.mxu1 %v3598_v32  ;;  %v3594_v53 = vld [vmem:[%s8128_s0 + $0xe98] sm:$0xff] }
 0x152   :  { %v735_v11 = vadd.f32 %v734_v14, %v5795_v38  ;;  %1662 = vmatpush.msrb.mxu2 %v3535_v63  ;;  %1514 = vmatpush.msrb.mxu0 %v3508_v42  ;;  %v3617_v32 = vld [vmem:[%s8128_s0 + $0xf18] sm:$0xff] }
 0x153   :  { %v6021_v20 = vmax.f32 %v560_v28, %v802_v40  ;;  %v769_v15 = vpop.f32.mrf.mxu1  ;;  %v3602_v28 = vld [vmem:[%s8128_s0 + $0xed8] sm:$0xf]  ;;  %1697 = vmatpush.msrb.mxu3 %v3551_v9  ;;  %v3577_v40 = vld [vmem:[%s8128_s0 + $0xe10] sm:$0xff] }
 0x154   :  { %3456 = vmatmul.msk.f32.gmra.mxu0 %vm112_vm1, %v6036_v2  ;;  %v770_v38 = vadd.f32 %v769_v15, %v735_v11  ;;  %3603 = vmatpush.msk.msra.mxu2 %vm131_vm0, %v3602_v28  ;;  %v3620_v11 = vld [vmem:[%s8128_s0 + $0xf30] sm:$0xff] }
 0x155   :  { %1451 = vmatmul.f32.gmra.mxu2 %v5455_v60  ;;  %1486 = vmatmul.f32.gmra.mxu3 %v5475_v6  ;;  %v3582_v60 = vld [vmem:[%s8128_s0 + $0xe38] sm:$0xff] }
 0x156   :  { %1416 = vmatmul.f32.gmra.mxu1 %v5766_v18  ;;  %v3625_v6 = vld [vmem:[%s8128_s0 + $0xf58] sm:$0xff]  ;;  %1717 = vmatpush.msra.mxu0 %v3582_v60  ;;  %v3619_v60 = vld [vmem:[%s8128_s0 + $0xf28] sm:$0xff] }
 0x157   :  { %1900 = vmatpush.msra.mxu3 %v3625_v6 }
 0x158   :  { %v804_v44 = vpop.f32.mrf.mxu2  ;;  %v6056_v33 = vpop.f32.mrf.mxu3  ;;  %1718 = vmatpush.msra.mxu0 %v3581_v19 }
 0x159   :  { %v805_v12 = vadd.f32 %v804_v44, %v770_v38  ;;  %v737_v22 = vpop.f32.mrf.mxu0  ;;  %v3593_v38 = vld [vmem:[%s8128_s0 + $0xe90] sm:$0xff]  ;;  %v3600_v44 = vld [vmem:[%s8128_s0 + $0xec8] sm:$0xff] }
 0x15a   :  { %v738_v62 = vadd.f32 %v737_v22, %v5840_v8  ;;  %v3623_v8 = vld [vmem:[%s8128_s0 + $0xf48] sm:$0xff]  ;;  %v3574_v22 = vld [vmem:[%s8128_s0 + $0xdf8] sm:$0xff] }
 0x15b   :  { %v6061_v30 = vmax.f32 %v561_v10, %v805_v12  ;;  %v772_v5 = vpop.f32.mrf.mxu1  ;;  %v3624_v10 = vld [vmem:[%s8128_s0 + $0xf50] sm:$0xff]  ;;  %v3591_v12 = vld [vmem:[%s8128_s0 + $0xe80] sm:$0xff] }
 0x15c   :  { %3457 = vmatmul.msk.f32.gmra.mxu0 %vm112_vm1, %v6067_v45  ;;  %v773_v59 = vadd.f32 %v772_v5, %v738_v62  ;;  %1901 = vmatpush.msra.mxu3 %v3624_v10 }
 0x15d   :  { %1454 = vmatmul.f32.gmra.mxu2 %v5507_v26  ;;  %1489 = vmatmul.f32.gmra.mxu3 %v5521_v36  ;;  %v3597_v26 = vld [vmem:[%s8128_s0 + $0xeb0] sm:$0xff]  ;;  %v3580_v36 = vld [vmem:[%s8128_s0 + $0xe28] sm:$0xff] }
 0x15e   :  { %1419 = vmatmul.f32.gmra.mxu1 %v5810_v46  ;;  %1719 = vmatpush.msra.mxu0 %v3580_v36 }
 0x15f   :  { %1753 = vmatpush.msra.mxu1 %v3597_v26  ;;  %1902 = vmatpush.msra.mxu3 %v3623_v8 }
 0x160   :  { %v807_v37 = vpop.f32.mrf.mxu2  ;;  %v6095_v31 = vpop.f32.mrf.mxu3  ;;  %1720 = vmatpush.msra.mxu0 %v3579_v52 }
 0x161   :  { %v808_v34 = vadd.f32 %v807_v37, %v773_v59  ;;  %v940_v4 = vpop.f32.mrf.mxu0  ;;  %1754 = vmatpush.msra.mxu1 %v3596_v21  ;;  %1903 = vmatpush.msra.mxu3 %v3622_v55  ;;  %v6186_v59 = vld [vmem:[%s8129_s1 + $0x18] sm:$0xff]  ;;  %v6195_v37 = vld [vmem:[%s8129_s1 + $0x8] sm:$0xff] }
 0x162   :  { %v941_v54 = vadd.f32 %v940_v4, %v5882_v17  ;;  %v3621_v17 = vld [vmem:[%s8128_s0 + $0xf38] sm:$0xff]  ;;  %v3616_v4 = vld [vmem:[%s8128_s0 + $0xf10] sm:$0xff]  ;;  %v3588_v55 = vld [vmem:[%s8128_s0 + $0xe68] sm:$0xff] }
 0x163   :  { %v6100_v61 = vmax.f32 %v562_v51, %v808_v34  ;;  %v975_v41 = vpop.f32.mrf.mxu1  ;;  %v3601_v51 = vld [vmem:[%s8128_s0 + $0xed0] sm:$0xff]  ;;  %1904 = vmatpush.msra.mxu3 %v3621_v17 }
 0x164   :  { %3458 = vmatmul.msk.f32.gmra.mxu0 %vm112_vm1, %v6106_v1  ;;  %v976_v47 = vadd.f32 %v975_v41, %v941_v54  ;;  %1800 = vmatpush.msra.mxu2 %v3601_v51  ;;  %v3573_v34 = vld [vmem:[%s8128_s0 + $0xdf0] sm:$0xff]  ;;  %v3572_v54 = vld [vmem:[%s8128_s0 + $0xde8] sm:$0xff] }
 0x165   :  { %1457 = vmatmul.f32.gmra.mxu2 %v5557_v3  ;;  %1492 = vmatmul.f32.gmra.mxu3 %v5579_v49  ;;  %v3595_v3 = vld [vmem:[%s8128_s0 + $0xea0] sm:$0xff]  ;;  %v3578_v49 = vld [vmem:[%s8128_s0 + $0xe18] sm:$0xff]  ;;  %v3615_v41 = vld [vmem:[%s8128_s0 + $0xf08] sm:$0xff] }
 0x166   :  { %1422 = vmatmul.f32.gmra.mxu1 %v5855_v0  ;;  %1721 = vmatpush.msra.mxu0 %v3578_v49 }
 0x167   :  { %1755 = vmatpush.msra.mxu1 %v3595_v3  ;;  %1905 = vmatpush.msra.mxu3 %v3620_v11 }
 0x168   :  { %v1010_v14 = vpop.f32.mrf.mxu2  ;;  %v1045_v57 = vpop.f32.mrf.mxu3  ;;  %1722 = vmatpush.msra.mxu0 %v3577_v40  ;;  %1801 = vmatpush.msra.mxu2 %v3600_v44  ;;  %v3571_v40 = vld [vmem:[%s8128_s0 + $0xde0] sm:$0xff] }
 0x169   :  { %v1011_v16 = vadd.f32 %v1010_v14, %v976_v47  ;;  %v943_v63 = vpop.f32.mrf.mxu0  ;;  %1756 = vmatpush.msra.mxu1 %v3594_v53  ;;  %1906 = vmatpush.msra.mxu3 %v3619_v60  ;;  %v3614_v14 = vld [vmem:[%s8128_s0 + $0xf00] sm:$0xff]  ;;  %v3586_v60 = vld [vmem:[%s8128_s0 + $0xe58] sm:$0xff] }
 0x16a   :  { %v944_v15 = vadd.f32 %v943_v63, %v5923_v29  ;;  %v3576_v29 = vld [vmem:[%s8128_s0 + $0xe08] sm:$0xff] }
 0x16b   :  { %v6140_v9 = vadd.f32 %v1045_v57, %v1011_v16  ;;  %v978_v42 = vpop.f32.mrf.mxu1  ;;  %1757 = vmatpush.msra.mxu1 %v3593_v38  ;;  %1723 = vmatpush.msra.mxu0 %v3576_v29  ;;  %v3599_v57 = vld [vmem:[%s8128_s0 + $0xec0] sm:$0xff]  ;;  %v3570_v38 = vld [vmem:[%s8128_s0 + $0xdd8] sm:$0xff] }
 0x16c   :  { %3459 = vmatmul.msk.f32.gmra.mxu0 %vm112_vm1, %v5630_v39  ;;  %v3575_v39 = vld [vmem:[%s8128_s0 + $0xe00] sm:$0xff]  ;;  %v979_v6 = vadd.f32 %v978_v42, %v944_v15  ;;  %v6248_v15 = vld [vmem:[%s8129_s1 + $0x30] sm:$0xff]  ;;  %1802 = vmatpush.msra.mxu2 %v3599_v57 }
 0x16d   :  { %v1063_v28 = vmax.f32 %v5887_v48, %v6140_v9  ;;  %1460 = vmatmul.f32.gmra.mxu2 %v5612_v25  ;;  %1495 = vmatmul.f32.gmra.mxu3 %v5639_v50  ;;  %v3592_v25 = vld [vmem:[%s8128_s0 + $0xe88] sm:$0xff]  ;;  %v3618_v50 = vld [vmem:[%s8128_s0 + $0xf20] sm:$0xff] }
 0x16e   :  { %1425 = vmatmul.f32.gmra.mxu1 %v5902_v58  ;;  %1724 = vmatpush.msra.mxu0 %v3575_v39  ;;  %v6236_v16 = vld [vmem:[%s8129_s1 + $0x40] sm:$0xff] }
 0x16f   :  { %1758 = vmatpush.msra.mxu1 %v3592_v25  ;;  %1907 = vmatpush.msra.mxu3 %v3618_v50  ;;  %v3587_v42 = vld [vmem:[%s8128_s0 + $0xe60] sm:$0xff]  ;;  %v3569_v25 = vld [vmem:[%s8128_s0 + $0xdd0] sm:$0xff] }
 0x170   :  { %v1013_v62 = vpop.f32.mrf.mxu2  ;;  %v1048_v5 = vpop.f32.mrf.mxu3  ;;  %1725 = vmatpush.msra.mxu0 %v3574_v22  ;;  %v3611_v22 = vld [vmem:[%s8128_s0 + $0xee8] sm:$0xff]  ;;  %v6665_v48 = vld [vmem:[%s8129_s1 + $0xa0] sm:$0xff] }
 0x171   :  { %v1014_v19 = vadd.f32 %v1013_v62, %v979_v6  ;;  %v946_v10 = vpop.f32.mrf.mxu0  ;;  %1759 = vmatpush.msra.mxu1 %v3591_v12  ;;  %1908 = vmatpush.msra.mxu3 %v3617_v32  ;;  %v3585_v12 = vld [vmem:[%s8128_s0 + $0xe50] sm:$0xff]  ;;  %v3568_v32 = vld [vmem:[%s8128_s0 + $0xdc8] sm:$0xff]  ;;  %v3713_v9 = vld [vmem:[%s8128_s0 + $0x11e0] sm:$0xff] }
 0x172   :  { %v947_v36 = vadd.f32 %v946_v10, %v5965_v27  ;;  %v3590_v27 = vld [vmem:[%s8128_s0 + $0xe78] sm:$0xff]  ;;  %1726 = vmatpush.msra.mxu0 %v3573_v34  ;;  %v3567_v34 = vld [vmem:[%s8128_s0 + $0xdc0] sm:$0xff] }
 0x173   :  { %v6180_v26 = vadd.f32 %v1048_v5, %v1014_v19  ;;  %v981_v8 = vpop.f32.mrf.mxu1  ;;  %1760 = vmatpush.msra.mxu1 %v3590_v27  ;;  %1909 = vmatpush.msra.mxu3 %v3616_v4  ;;  %v3584_v19 = vld [vmem:[%s8128_s0 + $0xe48] sm:$0xff]  ;;  %v6298_v27 = vld [vmem:[%s8129_s1 + $0x58] sm:$0xff] }
 0x174   :  { %1515 = vmatmul.f32.vlgmr.msrb.gmra.mxu0 %v6186_v59  ;;  %v982_v52 = vadd.f32 %v981_v8, %v947_v36  ;;  %v6286_v36 = vld [vmem:[%s8129_s1 + $0x68] sm:$0xff]  ;;  %v3673_v4 = vld [vmem:[%s8128_s0 + $0x10d8] sm:$0xff] }
 0x175   :  { %v1064_v21 = vmax.f32 %v5928_v23, %v6180_v26  ;;  %1663 = vmatmul.f32.vlgmr.msrb.gmra.mxu2 %v5675_v56  ;;  %1698 = vmatmul.f32.vlgmr.msrb.gmra.mxu3 %v6195_v37  ;;  %v3589_v56 = vld [vmem:[%s8128_s0 + $0xe70] sm:$0xff]  ;;  %v6721_v23 = vld [vmem:[%s8129_s1 + $0xc8] sm:$0x1f] }
 0x176   :  { %3529 = vmatmul.msk.f32.vlgmr.msrb.gmra.mxu1 %vm112_vm1, %v5943_v24  ;;  %1727 = vmatpush.msra.mxu0 %v3572_v54  ;;  %v3641_v54 = vld [vmem:[%s8128_s0 + $0xfd8] sm:$0xff]  ;;  %v3710_v26 = vld [vmem:[%s8128_s0 + $0x11c8] sm:$0xff] }
 0x177   :  { %1761 = vmatpush.msra.mxu1 %v3589_v56  ;;  %1910 = vmatpush.msra.mxu3 %v3615_v41  ;;  %v3677_v41 = vld [vmem:[%s8128_s0 + $0x10f8] sm:$0xf] }
 0x178   :  { %v1016_v51 = vpop.f32.mrf.mxu2  ;;  %v1051_v3 = vpop.f32.mrf.mxu3  ;;  %1728 = vmatpush.msra.mxu0 %v3571_v40  ;;  %2005 = vmatpush.msrb.mxu2 %v3673_v4  ;;  %v3657_v40 = vld [vmem:[%s8128_s0 + $0x1058] sm:$0xff] }
 0x179   :  { %v1017_v49 = vadd.f32 %v1016_v51, %v982_v52  ;;  %v949_v17 = vpop.f32.mrf.mxu0  ;;  %1762 = vmatpush.msra.mxu1 %v3588_v55  ;;  %1911 = vmatpush.msra.mxu3 %v3614_v14  ;;  %v3640_v14 = vld [vmem:[%s8128_s0 + $0xfd0] sm:$0xff]  ;;  %v3637_v4 = vld [vmem:[%s8128_s0 + $0xfb8] sm:$0xff] }
 0x17a   :  { %v950_v53 = vadd.f32 %v949_v17, %v6013_v13  ;;  %v3613_v13 = vld [vmem:[%s8128_s0 + $0xef8] sm:$0xff]  ;;  %1729 = vmatpush.msra.mxu0 %v3570_v38  ;;  %v3656_v38 = vld [vmem:[%s8128_s0 + $0x1050] sm:$0xff] }
 0x17b   :  { %v6221_v47 = vadd.f32 %v1051_v3, %v1017_v49  ;;  %v984_v11 = vpop.f32.mrf.mxu1  ;;  %1912 = vmatpush.msra.mxu3 %v3613_v13  ;;  %1763 = vmatpush.msra.mxu1 %v3587_v42  ;;  %v6346_v42 = vld [vmem:[%s8129_s1 + $0x80] sm:$0xff] }
 0x17c   :  { %1518 = vmatmul.f32.gmra.mxu0 %v6236_v16  ;;  %v985_v29 = vadd.f32 %v984_v11, %v950_v53  ;;  %v3672_v53 = vld [vmem:[%s8128_s0 + $0x10d0] sm:$0xff] }
 0x17d   :  { %v1065_v63 = vmax.f32 %v5970_v35, %v6221_v47  ;;  %1666 = vmatmul.f32.gmra.mxu2 %v5716_v7  ;;  %1701 = vmatmul.f32.gmra.mxu3 %v6248_v15  ;;  %v3612_v7 = vld [vmem:[%s8128_s0 + $0xef0] sm:$0xff]  ;;  %v3722_v35 = vld [vmem:[%s8128_s0 + $0x1228] sm:$0xff] }
 0x17e   :  { %3530 = vmatmul.msk.f32.gmra.mxu1 %vm112_vm1, %v5982_v43  ;;  %1913 = vmatpush.msra.mxu3 %v3612_v7  ;;  %v6334_v11 = vld [vmem:[%s8129_s1 + $0x90] sm:$0xff]  ;;  %v3639_v7 = vld [vmem:[%s8128_s0 + $0xfc8] sm:$0xff] }
 0x17f   :  { %1764 = vmatpush.msra.mxu1 %v3586_v60  ;;  %1730 = vmatpush.msra.mxu0 %v3569_v25  ;;  %v3655_v60 = vld [vmem:[%s8128_s0 + $0x1048] sm:$0xff] }
 0x180   :  { %v1019_v39 = vpop.f32.mrf.mxu2  ;;  %v1054_v50 = vpop.f32.mrf.mxu3  ;;  %1914 = vmatpush.msra.mxu3 %v3611_v22  ;;  %2006 = vmatpush.msrb.mxu2 %v3672_v53  ;;  %v3669_v22 = vld [vmem:[%s8128_s0 + $0x10b8] sm:$0xff]  ;;  %v3652_v53 = vld [vmem:[%s8128_s0 + $0x1030] sm:$0xff]  ;;  %v3738_v47 = vld [vmem:[%s8128_s0 + $0x12a8] sm:$0xff] }
 0x181   :  { %v1020_v6 = vadd.f32 %v1019_v39, %v985_v29  ;;  %v952_v44 = vpop.f32.mrf.mxu0  ;;  %1765 = vmatpush.msra.mxu1 %v3585_v12  ;;  %1731 = vmatpush.msra.mxu0 %v3568_v32  ;;  %v3638_v12 = vld [vmem:[%s8128_s0 + $0xfc0] sm:$0xff] }
 0x182   :  { %v953_v5 = vadd.f32 %v952_v44, %v6056_v33  ;;  %v3610_v33 = vld [vmem:[%s8128_s0 + $0xee0] sm:$0xff] }
 0x183   :  { %v6274_v62 = vadd.f32 %v1054_v50, %v1020_v6  ;;  %v987_v10 = vpop.f32.mrf.mxu1  ;;  %1766 = vmatpush.msra.mxu1 %v3584_v19  ;;  %1915 = vmatpush.msra.mxu3 %v3610_v33  ;;  %v6377_v19 = vld [vmem:[%s8129_s1 + $0xb8] sm:$0xff] }
 0x184   :  { %1521 = vmatmul.f32.gmra.mxu0 %v6286_v36  ;;  %v988_v56 = vadd.f32 %v987_v10, %v953_v5  ;;  %v3654_v5 = vld [vmem:[%s8128_s0 + $0x1040] sm:$0xff]  ;;  %v3676_v10 = vld [vmem:[%s8128_s0 + $0x10f0] sm:$0xff] }
 0x185   :  { %v1066_v8 = vmax.f32 %v6021_v20, %v6274_v62  ;;  %1669 = vmatmul.f32.gmra.mxu2 %v5766_v18  ;;  %1704 = vmatmul.f32.gmra.mxu3 %v6298_v27  ;;  %v3583_v18 = vld [vmem:[%s8128_s0 + $0xe40] sm:$0xff]  ;;  %v3719_v20 = vld [vmem:[%s8128_s0 + $0x1210] sm:$0xff] }
 0x186   :  { %3531 = vmatmul.msk.f32.gmra.mxu1 %vm112_vm1, %v6036_v2  ;;  %1732 = vmatpush.msra.mxu0 %v3567_v34  ;;  %v6389_v34 = vld [vmem:[%s8129_s1 + $0xa8] sm:$0xff] }
 0x187   :  { %1767 = vmatpush.msra.mxu1 %v3583_v18  ;;  %3678 = vmatpush.msk.msrb.mxu3 %vm131_vm0, %v3677_v41  ;;  %v3668_v18 = vld [vmem:[%s8128_s0 + $0x10b0] sm:$0xff]  ;;  %v3667_v41 = vld [vmem:[%s8128_s0 + $0x10a8] sm:$0xff] }
 0x188   :  { %v1022_v52 = vpop.f32.mrf.mxu2  ;;  %v1057_v55 = vpop.f32.mrf.mxu3  ;;  %1935 = vmatpush.msrb.mxu0 %v3641_v54  ;;  %v3636_v54 = vld [vmem:[%s8128_s0 + $0xfb0] sm:$0xff] }
 0x189   :  { %v1023_v51 = vadd.f32 %v1022_v52, %v988_v56  ;;  %v955_v3 = vpop.f32.mrf.mxu0  ;;  %1970 = vmatpush.msrb.mxu1 %v3657_v40  ;;  %2053 = vmatpush.msrb.mxu3 %v3676_v10  ;;  %v3635_v40 = vld [vmem:[%s8128_s0 + $0xfa8] sm:$0xff]  ;;  %v3664_v10 = vld [vmem:[%s8128_s0 + $0x1090] sm:$0xff] }
 0x18a   :  { %v956_v17 = vadd.f32 %v955_v3, %v6095_v31  ;;  %v3671_v31 = vld [vmem:[%s8128_s0 + $0x10c8] sm:$0xff]  ;;  %1936 = vmatpush.msrb.mxu0 %v3640_v14  ;;  %v3666_v14 = vld [vmem:[%s8128_s0 + $0x10a0] sm:$0xff] }
 0x18b   :  { %v6319_v49 = vadd.f32 %v1057_v55, %v1023_v51  ;;  %v990_v57 = vpop.f32.mrf.mxu1  ;;  %2007 = vmatpush.msrb.mxu2 %v3671_v31  ;;  %1971 = vmatpush.msrb.mxu1 %v3656_v38  ;;  %v6423_v31 = vld [vmem:[%s8129_s1 + $0xe0] sm:$0x1f]  ;;  %v6430_v38 = vld [vmem:[%s8129_s1 + $0xd0] sm:$0x1f] }
 0x18c   :  { %1524 = vmatmul.f32.gmra.mxu0 %v6334_v11  ;;  %v991_v29 = vadd.f32 %v990_v57, %v956_v17 }
 0x18d   :  { %v1067_v13 = vmax.f32 %v6061_v30, %v6319_v49  ;;  %1672 = vmatmul.f32.gmra.mxu2 %v5810_v46  ;;  %1707 = vmatmul.f32.gmra.mxu3 %v6346_v42  ;;  %v3670_v46 = vld [vmem:[%s8128_s0 + $0x10c0] sm:$0xff]  ;;  %v3807_v49 = vld [vmem:[%s8128_s0 + $0x1498] sm:$0xff] }
 0x18e   :  { %3532 = vmatmul.msk.f32.gmra.mxu1 %vm112_vm1, %v6067_v45  ;;  %1937 = vmatpush.msrb.mxu0 %v3639_v7  ;;  %v3651_v7 = vld [vmem:[%s8128_s0 + $0x1028] sm:$0xff]  ;;  %v3701_v30 = vld [vmem:[%s8128_s0 + $0x1180] sm:$0xff] }
 0x18f   :  { %2008 = vmatpush.msrb.mxu2 %v3670_v46  ;;  %1972 = vmatpush.msrb.mxu1 %v3655_v60  ;;  %v3634_v46 = vld [vmem:[%s8128_s0 + $0xfa0] sm:$0xff]  ;;  %v6445_v60 = vld [vmem:[%s8129_s1 + $0xe8] sm:$0x1f] }
 0x190   :  { %v1025_v25 = vpop.f32.mrf.mxu2  ;;  %v1060_v39 = vpop.f32.mrf.mxu3  ;;  %1938 = vmatpush.msrb.mxu0 %v3638_v12 }
 0x191   :  { %v1026_v50 = vadd.f32 %v1025_v25, %v991_v29  ;;  %v1158_v6 = vpop.f32.mrf.mxu0  ;;  %2009 = vmatpush.msrb.mxu2 %v3669_v22  ;;  %1973 = vmatpush.msrb.mxu1 %v3654_v5  ;;  %v3650_v25 = vld [vmem:[%s8128_s0 + $0x1020] sm:$0xff] }
 0x192   :  { %1939 = vmatpush.msrb.mxu0 %v3637_v4  ;;  %v3649_v4 = vld [vmem:[%s8128_s0 + $0x1018] sm:$0xff] }
 0x193   :  { %v6363_v44 = vadd.f32 %v1060_v39, %v1026_v50  ;;  %v1193_v32 = vpop.f32.mrf.mxu1  ;;  %2010 = vmatpush.msrb.mxu2 %v3668_v18  ;;  %v3633_v39 = vld [vmem:[%s8128_s0 + $0xf98] sm:$0xff]  ;;  %v3675_v50 = vld [vmem:[%s8128_s0 + $0x10e8] sm:$0xff] }
 0x194   :  { %1527 = vmatmul.f32.gmra.mxu0 %v6377_v19  ;;  %v1194_v56 = vadd.f32 %v1193_v32, %v1158_v6  ;;  %2054 = vmatpush.msrb.mxu3 %v3675_v50  ;;  %v3674_v50 = vld [vmem:[%s8128_s0 + $0x10e0] sm:$0xff] }
 0x195   :  { %v1068_v33 = vmax.f32 %v6100_v61, %v6363_v44  ;;  %1675 = vmatmul.f32.gmra.mxu2 %v5855_v0  ;;  %1710 = vmatmul.f32.gmra.mxu3 %v6389_v34  ;;  %v3653_v0 = vld [vmem:[%s8128_s0 + $0x1038] sm:$0xff]  ;;  %v3774_v61 = vld [vmem:[%s8128_s0 + $0x1390] sm:$0xff] }
 0x196   :  { %3533 = vmatmul.msk.f32.gmra.mxu1 %vm112_vm1, %v6106_v1  ;;  %1940 = vmatpush.msrb.mxu0 %v3636_v54  ;;  %v3663_v54 = vld [vmem:[%s8128_s0 + $0x1088] sm:$0xff] }
 0x197   :  { %1974 = vmatpush.msrb.mxu1 %v3653_v0  ;;  %2011 = vmatpush.msrb.mxu2 %v3667_v41  ;;  %v6469_v0 = vld [vmem:[%s8129_s1 + $0x10] sm:$0xff]  ;;  %v6483_v41 = vld [vmem:[%s8129_s1] sm:$0xff] }
 0x198   :  { %v1228_v52 = vpop.f32.mrf.mxu2  ;;  %v1263_v55 = vpop.f32.mrf.mxu3  ;;  %1941 = vmatpush.msrb.mxu0 %v3635_v40  ;;  %2055 = vmatpush.msrb.mxu3 %v3674_v50  ;;  %v3748_v50 = vld [vmem:[%s8128_s0 + $0x12f8] sm:$0xff] }
 0x199   :  { %v1229_v51 = vadd.f32 %v1228_v52, %v1194_v56  ;;  %v1161_v3 = vpop.f32.mrf.mxu0  ;;  %1975 = vmatpush.msrb.mxu1 %v3652_v53  ;;  %2012 = vmatpush.msrb.mxu2 %v3666_v14  ;;  %v3632_v56 = vld [vmem:[%s8128_s0 + $0xf90] sm:$0xff] }
 0x19a   :  { %1942 = vmatpush.msrb.mxu0 %v3634_v46  ;;  %v3648_v52 = vld [vmem:[%s8128_s0 + $0x1010] sm:$0xff]  ;;  %v3630_v46 = vld [vmem:[%s8128_s0 + $0xf80] sm:$0xff] }
 0x19b   :  { %v6409_v17 = vadd.f32 %v1263_v55, %v1229_v51  ;;  %v1196_v57 = vpop.f32.mrf.mxu1  ;;  %1976 = vmatpush.msrb.mxu1 %v3651_v7  ;;  %v3631_v55 = vld [vmem:[%s8128_s0 + $0xf88] sm:$0xff] }
 0x19c   :  { %1530 = vmatmul.f32.gmra.mxu0 %v6423_v31  ;;  %v1197_v29 = vadd.f32 %v1196_v57, %v1161_v3  ;;  %v3647_v3 = vld [vmem:[%s8128_s0 + $0x1008] sm:$0xff] }
 0x19d   :  { %1678 = vmatmul.f32.gmra.mxu2 %v5902_v58  ;;  %1713 = vmatmul.f32.gmra.mxu3 %v6430_v38  ;;  %v3665_v58 = vld [vmem:[%s8128_s0 + $0x1098] sm:$0xff] }
 0x19e   :  { %3534 = vmatmul.msk.f32.gmra.mxu1 %vm112_vm1, %v6445_v60  ;;  %2013 = vmatpush.msrb.mxu2 %v3665_v58  ;;  %v3661_v58 = vld [vmem:[%s8128_s0 + $0x1078] sm:$0xff] }
 0x19f   :  { %1977 = vmatpush.msrb.mxu1 %v3650_v25  ;;  %1943 = vmatpush.msrb.mxu0 %v3633_v39  ;;  %v6510_v25 = vld [vmem:[%s8129_s1 + $0x38] sm:$0xff]  ;;  %v3646_v39 = vld [vmem:[%s8128_s0 + $0x1000] sm:$0xff] }
 0x1a0   :  { %v1231_v6 = vpop.f32.mrf.mxu2  ;;  %v1266_v12 = vpop.f32.mrf.mxu3  ;;  %2014 = vmatpush.msrb.mxu2 %v3664_v10  ;;  %v3628_v10 = vld [vmem:[%s8128_s0 + $0xf70] sm:$0xff] }
 0x1a1   :  { %v1232_v22 = vadd.f32 %v1231_v6, %v1197_v29  ;;  %v1164_v5 = vpop.f32.mrf.mxu0  ;;  %1978 = vmatpush.msrb.mxu1 %v3649_v4  ;;  %1944 = vmatpush.msrb.mxu0 %v3632_v56  ;;  %v6524_v6 = vld [vmem:[%s8129_s1 + $0x28] sm:$0xff] }
 0x1a2   :  { %2015 = vmatpush.msrb.mxu2 %v3663_v54  ;;  %v3659_v4 = vld [vmem:[%s8128_s0 + $0x1068] sm:$0xff] }
 0x1a3   :  { %v6458_v32 = vadd.f32 %v1266_v12, %v1232_v22  ;;  %v1199_v18 = vpop.f32.mrf.mxu1  ;;  %1979 = vmatpush.msrb.mxu1 %v3648_v52  ;;  %1945 = vmatpush.msrb.mxu0 %v3631_v55  ;;  %v3629_v12 = vld [vmem:[%s8128_s0 + $0xf78] sm:$0xff]  ;;  %v3660_v22 = vld [vmem:[%s8128_s0 + $0x1070] sm:$0xff] }
 0x1a4   :  { %1733 = vmatmul.f32.vlgmr.msra.gmra.mxu0 %v6469_v0  ;;  %v1200_v51 = vadd.f32 %v1199_v18, %v1164_v5  ;;  %v3644_v55 = vld [vmem:[%s8128_s0 + $0xff0] sm:$0xff] }
 0x1a5   :  { %3604 = vmatmul.msk.f32.vlgmr.msra.gmra.mxu2 %vm112_vm1, %v5943_v24  ;;  %1916 = vmatmul.f32.vlgmr.msra.gmra.mxu3 %v6483_v41  ;;  %v3662_v24 = vld [vmem:[%s8128_s0 + $0x1080] sm:$0xff] }
 0x1a6   :  { %1768 = vmatmul.f32.vlgmr.msra.gmra.mxu1 %v6186_v59  ;;  %2016 = vmatpush.msrb.mxu2 %v3662_v24 }
 0x1a7   :  { %1980 = vmatpush.msrb.mxu1 %v3647_v3  ;;  %1946 = vmatpush.msrb.mxu0 %v3630_v46  ;;  %v3658_v3 = vld [vmem:[%s8128_s0 + $0x1060] sm:$0xff] }
 0x1a8   :  { %v1234_v53 = vpop.f32.mrf.mxu2  ;;  %v1269_v40 = vpop.f32.mrf.mxu3  ;;  %2017 = vmatpush.msrb.mxu2 %v3661_v58  ;;  %v3626_v46 = vld [vmem:[%s8128_s0 + $0xf60] sm:$0xff]  ;;  %v3732_v58 = vld [vmem:[%s8128_s0 + $0x1278] sm:$0xff]  ;;  %2258 = vmatpush.msra.mxu3 %v3748_v50 }
 0x1a9   :  { %v1235_v14 = vadd.f32 %v1234_v53, %v1200_v51  ;;  %v1167_v57 = vpop.f32.mrf.mxu0  ;;  %1981 = vmatpush.msrb.mxu1 %v3646_v39  ;;  %1947 = vmatpush.msrb.mxu0 %v3629_v12  ;;  %v3627_v51 = vld [vmem:[%s8128_s0 + $0xf68] sm:$0xff]  ;;  %v3700_v39 = vld [vmem:[%s8128_s0 + $0x1178] sm:$0xff] }
 0x1aa   :  { %2018 = vmatpush.msrb.mxu2 %v3660_v22  ;;  %v3643_v53 = vld [vmem:[%s8128_s0 + $0xfe8] sm:$0xff] }
 0x1ab   :  { %v6499_v7 = vadd.f32 %v1269_v40, %v1235_v14  ;;  %v1202_v29 = vpop.f32.mrf.mxu1  ;;  %1948 = vmatpush.msrb.mxu0 %v3628_v10  ;;  %v6560_v14 = vld [vmem:[%s8129_s1 + $0x60] sm:$0xff] }
 0x1ac   :  { %1736 = vmatmul.f32.gmra.mxu0 %v6510_v25  ;;  %v1203_v5 = vadd.f32 %v1202_v29, %v1167_v57  ;;  %2019 = vmatpush.msrb.mxu2 %v3659_v4  ;;  %v6568_v57 = vld [vmem:[%s8129_s1 + $0x50] sm:$0xff]  ;;  %v3642_v29 = vld [vmem:[%s8128_s0 + $0xfe0] sm:$0xff] }
 0x1ad   :  { %3605 = vmatmul.msk.f32.gmra.mxu2 %vm112_vm1, %v5982_v43  ;;  %1919 = vmatmul.f32.gmra.mxu3 %v6524_v6  ;;  %v3645_v43 = vld [vmem:[%s8128_s0 + $0xff8] sm:$0xff]  ;;  %v3731_v4 = vld [vmem:[%s8128_s0 + $0x1270] sm:$0xff] }
 0x1ae   :  { %1771 = vmatmul.f32.gmra.mxu1 %v6236_v16  ;;  %2020 = vmatpush.msrb.mxu2 %v3658_v3  ;;  %v3730_v3 = vld [vmem:[%s8128_s0 + $0x1268] sm:$0xff] }
 0x1af   :  { %1982 = vmatpush.msrb.mxu1 %v3645_v43  ;;  %1949 = vmatpush.msrb.mxu0 %v3627_v51  ;;  %v6612_v51 = vld [vmem:[%s8129_s1 + $0x78] sm:$0xff] }
 0x1b0   :  { %v1237_v18 = vpop.f32.mrf.mxu2  ;;  %v1272_v56 = vpop.f32.mrf.mxu3  ;;  %2223 = vmatpush.msra.mxu2 %v3732_v58  ;;  %v3729_v58 = vld [vmem:[%s8128_s0 + $0x1260] sm:$0xff] }
 0x1b1   :  { %v1238_v54 = vadd.f32 %v1237_v18, %v1203_v5  ;;  %v1170_v52 = vpop.f32.mrf.mxu0  ;;  %1983 = vmatpush.msrb.mxu1 %v3644_v55  ;;  %1950 = vmatpush.msrb.mxu0 %v3626_v46  ;;  %v3716_v18 = vld [vmem:[%s8128_s0 + $0x11f8] sm:$0xff]  ;;  %v3747_v55 = vld [vmem:[%s8128_s0 + $0x12f0] sm:$0xff] }
 0x1b2   :  { %2224 = vmatpush.msra.mxu2 %v3731_v4  ;;  %2259 = vmatpush.msra.mxu3 %v3747_v55  ;;  %v3745_v4 = vld [vmem:[%s8128_s0 + $0x12e0] sm:$0xff]  ;;  %v3744_v55 = vld [vmem:[%s8128_s0 + $0x12d8] sm:$0xff] }
 0x1b3   :  { %v6546_v24 = vadd.f32 %v1272_v56, %v1238_v54  ;;  %v1205_v40 = vpop.f32.mrf.mxu1  ;;  %1984 = vmatpush.msrb.mxu1 %v3643_v53  ;;  %2153 = vmatpush.msra.mxu0 %v3700_v39  ;;  %v6598_v54 = vld [vmem:[%s8129_s1 + $0x88] sm:$0xff]  ;;  %v3715_v53 = vld [vmem:[%s8128_s0 + $0x11f0] sm:$0xff] }
 0x1b4   :  { %1739 = vmatmul.f32.gmra.mxu0 %v6560_v14  ;;  %2225 = vmatpush.msra.mxu2 %v3730_v3  ;;  %v3743_v3 = vld [vmem:[%s8128_s0 + $0x12d0] sm:$0xff] }
 0x1b5   :  { %3606 = vmatmul.msk.f32.gmra.mxu2 %vm112_vm1, %v6036_v2  ;;  %1922 = vmatmul.f32.gmra.mxu3 %v6568_v57  ;;  %v1206_v2 = vadd.f32 %v1205_v40, %v1170_v52  ;;  %v3699_v52 = vld [vmem:[%s8128_s0 + $0x1170] sm:$0xff]  ;;  %v3746_v40 = vld [vmem:[%s8128_s0 + $0x12e8] sm:$0xff] }
 0x1b6   :  { %1774 = vmatmul.f32.gmra.mxu1 %v6286_v36  ;;  %2154 = vmatpush.msra.mxu0 %v3699_v52  ;;  %v6654_v52 = vld [vmem:[%s8129_s1 + $0xb0] sm:$0xff] }
 0x1b7   :  { %1985 = vmatpush.msrb.mxu1 %v3642_v29  ;;  %v3714_v29 = vld [vmem:[%s8128_s0 + $0x11e8] sm:$0xff]  ;;  %2260 = vmatpush.msra.mxu3 %v3746_v40 }
 0x1b8   :  { %v1240_v12 = vpop.f32.mrf.mxu2  ;;  %v1275_v22 = vpop.f32.mrf.mxu3  ;;  %2226 = vmatpush.msra.mxu2 %v3729_v58  ;;  %v3726_v58 = vld [vmem:[%s8128_s0 + $0x1248] sm:$0xff] }
 0x1b9   :  { %v1241_v43 = vadd.f32 %v1240_v12, %v1206_v2  ;;  %v1173_v5 = vpop.f32.mrf.mxu0  ;;  %2188 = vmatpush.msra.mxu1 %v3716_v18  ;;  %v3728_v18 = vld [vmem:[%s8128_s0 + $0x1258] sm:$0xff]  ;;  %2261 = vmatpush.msra.mxu3 %v3745_v4 }
 0x1ba   :  { %2227 = vmatpush.msra.mxu2 %v3728_v18  ;;  %v6710_v18 = vld [vmem:[%s8129_s1 + $0xd8] sm:$0x1f] }
 0x1bb   :  { %v6587_v10 = vadd.f32 %v1275_v22, %v1241_v43  ;;  %v1208_v56 = vpop.f32.mrf.mxu1  ;;  %2189 = vmatpush.msra.mxu1 %v3715_v53  ;;  %2262 = vmatpush.msra.mxu3 %v3744_v55  ;;  %v3712_v53 = vld [vmem:[%s8128_s0 + $0x11d8] sm:$0xff]  ;;  %v3741_v55 = vld [vmem:[%s8128_s0 + $0x12c0] sm:$0xff] }
 0x1bc   :  { %1742 = vmatmul.f32.gmra.mxu0 %v6598_v54  ;;  %v1209_v46 = vadd.f32 %v1208_v56, %v1173_v5  ;;  %v3697_v5 = vld [vmem:[%s8128_s0 + $0x1160] sm:$0xff] }
 0x1bd   :  { %3607 = vmatmul.msk.f32.gmra.mxu2 %vm112_vm1, %v6067_v45  ;;  %1925 = vmatmul.f32.gmra.mxu3 %v6612_v51  ;;  %v3698_v45 = vld [vmem:[%s8128_s0 + $0x1168] sm:$0xff] }
 0x1be   :  { %1777 = vmatmul.f32.gmra.mxu1 %v6334_v11  ;;  %2155 = vmatpush.msra.mxu0 %v3698_v45  ;;  %v3695_v45 = vld [vmem:[%s8128_s0 + $0x1150] sm:$0xff] }
 0x1bf   :  { %2190 = vmatpush.msra.mxu1 %v3714_v29  ;;  %2263 = vmatpush.msra.mxu3 %v3743_v3 }
 0x1c0   :  { %v1243_v2 = vpop.f32.mrf.mxu2  ;;  %v1278_v39 = vpop.f32.mrf.mxu3  ;;  %2156 = vmatpush.msra.mxu0 %v3697_v5  ;;  %v3742_v5 = vld [vmem:[%s8128_s0 + $0x12c8] sm:$0xff] }
 0x1c1   :  { %v1244_v50 = vadd.f32 %v1243_v2, %v1209_v46  ;;  %v1298_v12 = vpop.f32.mrf.mxu0  ;;  %2191 = vmatpush.msra.mxu1 %v3713_v9  ;;  %2264 = vmatpush.msra.mxu3 %v3742_v5  ;;  %v3724_v9 = vld [vmem:[%s8128_s0 + $0x1238] sm:$0xff]  ;;  %v3739_v5 = vld [vmem:[%s8128_s0 + $0x12b0] sm:$0xff] }
 0x1c2   :  { %v1299_v22 = vadd.f32 %v1298_v12, %v6409_v17  ;;  %v3711_v12 = vld [vmem:[%s8128_s0 + $0x11d0] sm:$0xff] }
 0x1c3   :  { %v6635_v43 = vadd.f32 %v1278_v39, %v1244_v50  ;;  %v1411_v56 = vpop.f32.mrf.mxu1  ;;  %2192 = vmatpush.msra.mxu1 %v3712_v53  ;;  %2265 = vmatpush.msra.mxu3 %v3741_v55 }
 0x1c4   :  { %v6649_v17 = vmax.f32 %v1063_v28, %v1299_v22  ;;  %1745 = vmatmul.f32.gmra.mxu0 %v6654_v52  ;;  %v3696_v28 = vld [vmem:[%s8128_s0 + $0x1158] sm:$0xff]  ;;  %v3694_v22 = vld [vmem:[%s8128_s0 + $0x1148] sm:$0xff] }
 0x1c5   :  { %3608 = vmatmul.msk.f32.gmra.mxu2 %vm112_vm1, %v6106_v1  ;;  %1928 = vmatmul.f32.gmra.mxu3 %v6665_v48  ;;  %v3727_v1 = vld [vmem:[%s8128_s0 + $0x1250] sm:$0xff] }
 0x1c6   :  { %1780 = vmatmul.f32.gmra.mxu1 %v6377_v19  ;;  %2157 = vmatpush.msra.mxu0 %v3696_v28  ;;  %v3709_v28 = vld [vmem:[%s8128_s0 + $0x11c0] sm:$0xff] }
 0x1c7   :  { %2228 = vmatpush.msra.mxu2 %v3727_v1  ;;  %2193 = vmatpush.msra.mxu1 %v3711_v12  ;;  %v3692_v1 = vld [vmem:[%s8128_s0 + $0x1138] sm:$0xff]  ;;  %v3691_v12 = vld [vmem:[%s8128_s0 + $0x1130] sm:$0xff] }
 0x1c8   :  { %v1446_v40 = vpop.f32.mrf.mxu2  ;;  %v1481_v46 = vpop.f32.mrf.mxu3  ;;  %2158 = vmatpush.msra.mxu0 %v3695_v45  ;;  %v3740_v45 = vld [vmem:[%s8128_s0 + $0x12b8] sm:$0xff] }
 0x1c9   :  { %v1447_v29 = vadd.f32 %v1446_v40, %v1411_v56  ;;  %v1301_v2 = vpop.f32.mrf.mxu0  ;;  %2229 = vmatpush.msra.mxu2 %v3726_v58  ;;  %v3725_v56 = vld [vmem:[%s8128_s0 + $0x1240] sm:$0xff]  ;;  %2194 = vmatpush.msra.mxu1 %v3710_v26 }
 0x1ca   :  { %v1302_v39 = vadd.f32 %v1301_v2, %v6458_v32  ;;  %2159 = vmatpush.msra.mxu0 %v3694_v22  ;;  %2266 = vmatpush.msra.mxu3 %v3740_v45  ;;  %v3723_v2 = vld [vmem:[%s8128_s0 + $0x1230] sm:$0xff]  ;;  %v3721_v26 = vld [vmem:[%s8128_s0 + $0x1220] sm:$0xff] }
 0x1cb   :  { %v6691_v50 = vadd.f32 %v1481_v46, %v1447_v29  ;;  %v1414_v4 = vpop.f32.mrf.mxu1  ;;  %2230 = vmatpush.msra.mxu2 %v3725_v56  ;;  %2195 = vmatpush.msra.mxu1 %v3709_v28  ;;  %v3689_v28 = vld [vmem:[%s8128_s0 + $0x1120] sm:$0xff] }
 0x1cc   :  { %v6705_v32 = vmax.f32 %v1064_v21, %v1302_v39  ;;  %1748 = vmatmul.f32.gmra.mxu0 %v6710_v18  ;;  %v3693_v21 = vld [vmem:[%s8128_s0 + $0x1140] sm:$0xff]  ;;  %v3708_v39 = vld [vmem:[%s8128_s0 + $0x11b8] sm:$0xff]  ;;  %2267 = vmatpush.msra.mxu3 %v3739_v5 }
 0x1cd   :  { %3609 = vmatmul.msk.f32.gmra.mxu2 %vm112_vm1, %v6445_v60  ;;  %1931 = vmatmul.f32.gmra.mxu3 %v6721_v23 }
 0x1ce   :  { %1783 = vmatmul.f32.gmra.mxu1 %v6423_v31  ;;  %2160 = vmatpush.msra.mxu0 %v3693_v21  ;;  %v3706_v21 = vld [vmem:[%s8128_s0 + $0x11a8] sm:$0xff] }
 0x1cf   :  { %2231 = vmatpush.msra.mxu2 %v3724_v9  ;;  %2196 = vmatpush.msra.mxu1 %v3708_v39  ;;  %v6825_v39 = vld [vmem:[%s8129_s1 + $0x48] sm:$0xff] }
 0x1d0   :  { %v1449_v3 = vpop.f32.mrf.mxu2  ;;  %v1484_v53 = vpop.f32.mrf.mxu3  ;;  %2161 = vmatpush.msra.mxu0 %v3692_v1  ;;  %2268 = vmatpush.msra.mxu3 %v3738_v47  ;;  %v3737_v1 = vld [vmem:[%s8128_s0 + $0x12a0] sm:$0xff]  ;;  %v3734_v47 = vld [vmem:[%s8128_s0 + $0x1288] sm:$0xff] }
 0x1d1   :  { %v1450_v40 = vadd.f32 %v1449_v3, %v1414_v4  ;;  %v1304_v46 = vpop.f32.mrf.mxu0  ;;  %2232 = vmatpush.msra.mxu2 %v3723_v2  ;;  %v6771_v4 = vld [vmem:[%s8129_s1 + $0x20] sm:$0xff]  ;;  %v3720_v3 = vld [vmem:[%s8128_s0 + $0x1218] sm:$0xff] }
 0x1d2   :  { %v1305_v58 = vadd.f32 %v1304_v46, %v6499_v7  ;;  %2162 = vmatpush.msra.mxu0 %v3691_v12  ;;  %2269 = vmatpush.msra.mxu3 %v3737_v1  ;;  %v3688_v46 = vld [vmem:[%s8128_s0 + $0x1118] sm:$0xff]  ;;  %v3735_v12 = vld [vmem:[%s8128_s0 + $0x1290] sm:$0xff] }
 0x1d3   :  { %v6747_v29 = vadd.f32 %v1484_v53, %v1450_v40  ;;  %v1417_v22 = vpop.f32.mrf.mxu1  ;;  %2233 = vmatpush.msra.mxu2 %v3722_v35  ;;  %v3705_v40 = vld [vmem:[%s8128_s0 + $0x11a0] sm:$0xff]  ;;  %v3736_v2 = vld [vmem:[%s8128_s0 + $0x1298] sm:$0xff]  ;;  %v6879_v1 = vld [vmem:[%s8129_s1 + $0x70] sm:$0xff] }
 0x1d4   :  { %v6761_v7 = vmax.f32 %v1065_v63, %v1305_v58  ;;  %1951 = vmatmul.f32.vlgmr.msrb.gmra.mxu0 %v6195_v37  ;;  %v3690_v37 = vld [vmem:[%s8128_s0 + $0x1128] sm:$0xff]  ;;  %2270 = vmatpush.msra.mxu3 %v3736_v2 }
 0x1d5   :  { %2021 = vmatmul.f32.vlgmr.msrb.gmra.mxu2 %v6186_v59  ;;  %3679 = vmatmul.msk.f32.vlgmr.msrb.gmra.mxu3 %vm112_vm1, %v6771_v4  ;;  %v3707_v59 = vld [vmem:[%s8128_s0 + $0x11b0] sm:$0xff] }
 0x1d6   :  { %1986 = vmatmul.f32.vlgmr.msrb.gmra.mxu1 %v6469_v0  ;;  %2163 = vmatpush.msra.mxu0 %v3690_v37  ;;  %v3686_v37 = vld [vmem:[%s8128_s0 + $0x1108] sm:$0xff] }
 0x1d7   :  { %2197 = vmatpush.msra.mxu1 %v3707_v59  ;;  %2234 = vmatpush.msra.mxu2 %v3721_v26  ;;  %v3703_v59 = vld [vmem:[%s8128_s0 + $0x1190] sm:$0xff] }
 0x1d8   :  { %v1452_v63 = vpop.f32.mrf.mxu2  ;;  %v1487_v56 = vpop.f32.mrf.mxu3  ;;  %2164 = vmatpush.msra.mxu0 %v3689_v28  ;;  %2271 = vmatpush.msra.mxu3 %v3735_v12  ;;  %v3733_v28 = vld [vmem:[%s8128_s0 + $0x1280] sm:$0xff]  ;;  %v3773_v12 = vld [vmem:[%s8128_s0 + $0x1388] sm:$0xff] }
 0x1d9   :  { %v1453_v55 = vadd.f32 %v1452_v63, %v1417_v22  ;;  %v1307_v9 = vpop.f32.mrf.mxu0  ;;  %2198 = vmatpush.msra.mxu1 %v3706_v21  ;;  %2235 = vmatpush.msra.mxu2 %v3720_v3  ;;  %v3718_v22 = vld [vmem:[%s8128_s0 + $0x1208] sm:$0xff] }
 0x1da   :  { %v1308_v53 = vadd.f32 %v1307_v9, %v6546_v24  ;;  %2165 = vmatpush.msra.mxu0 %v3688_v46  ;;  %2272 = vmatpush.msra.mxu3 %v3734_v47  ;;  %v3702_v21 = vld [vmem:[%s8128_s0 + $0x1188] sm:$0xff]  ;;  %v3790_v46 = vld [vmem:[%s8128_s0 + $0x1410] sm:$0xff]  ;;  %v3772_v47 = vld [vmem:[%s8128_s0 + $0x1380] sm:$0xff] }
 0x1db   :  { %v6804_v45 = vadd.f32 %v1487_v56, %v1453_v55  ;;  %v1420_v24 = vpop.f32.mrf.mxu1  ;;  %2199 = vmatpush.msra.mxu1 %v3705_v40  ;;  %2236 = vmatpush.msra.mxu2 %v3719_v20  ;;  %v3717_v56 = vld [vmem:[%s8128_s0 + $0x1200] sm:$0xff]  ;;  %v3806_v20 = vld [vmem:[%s8128_s0 + $0x1490] sm:$0xff] }
 0x1dc   :  { %v6815_v58 = vmax.f32 %v1066_v8, %v1308_v53  ;;  %1954 = vmatmul.f32.gmra.mxu0 %v6248_v15  ;;  %v3687_v15 = vld [vmem:[%s8128_s0 + $0x1110] sm:$0xff]  ;;  %v3685_v55 = vld [vmem:[%s8128_s0 + $0x1100] sm:$0xff]  ;;  %2273 = vmatpush.msra.mxu3 %v3733_v28 }
 0x1dd   :  { %2024 = vmatmul.f32.gmra.mxu2 %v6236_v16  ;;  %3680 = vmatmul.msk.f32.gmra.mxu3 %vm112_vm1, %v6825_v39  ;;  %v3704_v16 = vld [vmem:[%s8128_s0 + $0x1198] sm:$0xff] }
 0x1de   :  { %1989 = vmatmul.f32.gmra.mxu1 %v6510_v25  ;;  %2166 = vmatpush.msra.mxu0 %v3687_v15 }
 0x1df   :  { %2200 = vmatpush.msra.mxu1 %v3704_v16  ;;  %2237 = vmatpush.msra.mxu2 %v3718_v22  ;;  %v3789_v16 = vld [vmem:[%s8128_s0 + $0x1408] sm:$0xff] }
 0x1e0   :  { %v1455_v62 = vpop.f32.mrf.mxu2  ;;  %v1490_v8 = vpop.f32.mrf.mxu3  ;;  %2167 = vmatpush.msra.mxu0 %v3686_v37  ;;  %2476 = vmatpush.msrb.mxu3 %v3807_v49  ;;  %v3785_v49 = vld [vmem:[%s8128_s0 + $0x13e8] sm:$0xff] }
 0x1e1   :  { %v1456_v5 = vadd.f32 %v1455_v62, %v1420_v24  ;;  %v1310_v35 = vpop.f32.mrf.mxu0  ;;  %2201 = vmatpush.msra.mxu1 %v3703_v59  ;;  %2238 = vmatpush.msra.mxu2 %v3717_v56  ;;  %v3775_v24 = vld [vmem:[%s8128_s0 + $0x1398] sm:$0xff] }
 0x1e2   :  { %v1311_v63 = vadd.f32 %v1310_v35, %v6587_v10  ;;  %2168 = vmatpush.msra.mxu0 %v3685_v55  ;;  %2477 = vmatpush.msrb.mxu3 %v3806_v20  ;;  %v3804_v35 = vld [vmem:[%s8128_s0 + $0x1480] sm:$0xff]  ;;  %v3787_v59 = vld [vmem:[%s8128_s0 + $0x13f8] sm:$0xff] }
 0x1e3   :  { %v6858_v26 = vadd.f32 %v1490_v8, %v1456_v5  ;;  %v1423_v9 = vpop.f32.mrf.mxu1  ;;  %2202 = vmatpush.msra.mxu1 %v3702_v21  ;;  %v3803_v21 = vld [vmem:[%s8128_s0 + $0x1478] sm:$0xff] }
 0x1e4   :  { %v6869_v10 = vmax.f32 %v1067_v13, %v1311_v63  ;;  %1957 = vmatmul.f32.gmra.mxu0 %v6298_v27  ;;  %v3752_v27 = vld [vmem:[%s8128_s0 + $0x1318] sm:$0xf]  ;;  %v3751_v63 = vld [vmem:[%s8128_s0 + $0x1310] sm:$0xff] }
 0x1e5   :  { %2027 = vmatmul.f32.gmra.mxu2 %v6286_v36  ;;  %3681 = vmatmul.msk.f32.gmra.mxu3 %vm112_vm1, %v6879_v1  ;;  %v3791_v36 = vld [vmem:[%s8128_s0 + $0x1418] sm:$0xff] }
 0x1e6   :  { %1992 = vmatmul.f32.gmra.mxu1 %v6560_v14  ;;  %2441 = vmatpush.msrb.mxu2 %v3791_v36 }
 0x1e7   :  { %2203 = vmatpush.msra.mxu1 %v3701_v30  ;;  %3753 = vmatpush.msk.msrb.mxu0 %vm131_vm0, %v3752_v27  ;;  %v3802_v30 = vld [vmem:[%s8128_s0 + $0x1470] sm:$0xff] }
 0x1e8   :  { %v1458_v13 = vpop.f32.mrf.mxu2  ;;  %v1493_v3 = vpop.f32.mrf.mxu3  ;;  %2442 = vmatpush.msrb.mxu2 %v3790_v46 }
 0x1e9   :  { %v1459_v53 = vadd.f32 %v1458_v13, %v1423_v9  ;;  %v1313_v40 = vpop.f32.mrf.mxu0  ;;  %2406 = vmatpush.msrb.mxu1 %v3775_v24  ;;  %2306 = vmatpush.msrb.mxu0 %v3751_v63  ;;  %v6964_v9 = vld [vmem:[%s8129_s1 + $0xc0] sm:$0xff]  ;;  %v3766_v63 = vld [vmem:[%s8128_s0 + $0x1350] sm:$0xff] }
 0x1ea   :  { %v1314_v2 = vadd.f32 %v1313_v40, %v6635_v43  ;;  %2443 = vmatpush.msrb.mxu2 %v3789_v16  ;;  %v6922_v43 = vld [vmem:[%s8129_s1 + $0x98] sm:$0xff]  ;;  %v3801_v40 = vld [vmem:[%s8128_s0 + $0x1468] sm:$0xff]  ;;  %v3784_v24 = vld [vmem:[%s8128_s0 + $0x13e0] sm:$0xff] }
 0x1eb   :  { %v6910_v15 = vadd.f32 %v1493_v3, %v1459_v53  ;;  %v1426_v8 = vpop.f32.mrf.mxu1  ;;  %2407 = vmatpush.msrb.mxu1 %v3774_v61  ;;  %v3770_v53 = vld [vmem:[%s8128_s0 + $0x1370] sm:$0xff] }
 0x1ec   :  { %v6915_v62 = vmax.f32 %v1068_v33, %v1314_v2  ;;  %1960 = vmatmul.f32.gmra.mxu0 %v6346_v42  ;;  %v3805_v42 = vld [vmem:[%s8128_s0 + $0x1488] sm:$0xff] }
 0x1ed   :  { %2030 = vmatmul.f32.gmra.mxu2 %v6334_v11  ;;  %3682 = vmatmul.msk.f32.gmra.mxu3 %vm112_vm1, %v6922_v43  ;;  %v3788_v11 = vld [vmem:[%s8128_s0 + $0x1400] sm:$0xff]  ;;  %v3769_v2 = vld [vmem:[%s8128_s0 + $0x1368] sm:$0xff] }
 0x1ee   :  { %1995 = vmatmul.f32.gmra.mxu1 %v6598_v54  ;;  %2478 = vmatpush.msrb.mxu3 %v3805_v42  ;;  %v3750_v42 = vld [vmem:[%s8128_s0 + $0x1308] sm:$0xff] }
 0x1ef   :  { %2444 = vmatpush.msrb.mxu2 %v3788_v11  ;;  %2408 = vmatpush.msrb.mxu1 %v3773_v12  ;;  %v3799_v11 = vld [vmem:[%s8128_s0 + $0x1458] sm:$0xff]  ;;  %v3782_v12 = vld [vmem:[%s8128_s0 + $0x13d0] sm:$0xff] }
 0x1f0   :  { %v1461_v44 = vpop.f32.mrf.mxu2  ;;  %v1496_v33 = vpop.f32.mrf.mxu3  ;;  %2479 = vmatpush.msrb.mxu3 %v3804_v35  ;;  %2307 = vmatpush.msrb.mxu0 %v3750_v42  ;;  %v3798_v35 = vld [vmem:[%s8128_s0 + $0x1450] sm:$0xff] }
 0x1f1   :  { %v1462_v22 = vadd.f32 %v1461_v44, %v1426_v8  ;;  %v1516_v5 = vpop.f32.mrf.mxu0  ;;  %2445 = vmatpush.msrb.mxu2 %v3787_v59  ;;  %2409 = vmatpush.msrb.mxu1 %v3772_v47  ;;  %v3800_v8 = vld [vmem:[%s8128_s0 + $0x1460] sm:$0xff]  ;;  %v3781_v59 = vld [vmem:[%s8128_s0 + $0x13c8] sm:$0xff] }
 0x1f2   :  { %v1517_v37 = vadd.f32 %v1516_v5, %v6691_v50  ;;  %2480 = vmatpush.msrb.mxu3 %v3803_v21  ;;  %v3780_v21 = vld [vmem:[%s8128_s0 + $0x13c0] sm:$0xff] }
 0x1f3   :  { %v6952_v56 = vadd.f32 %v1496_v33, %v1462_v22  ;;  %v1551_v55 = vpop.f32.mrf.mxu1  ;;  %v3767_v22 = vld [vmem:[%s8128_s0 + $0x1358] sm:$0xff] }
 0x1f4   :  { %1963 = vmatmul.f32.gmra.mxu0 %v6389_v34  ;;  %v6958_v50 = vadd.f32 %v1551_v55, %v1517_v37  ;;  %v3786_v34 = vld [vmem:[%s8128_s0 + $0x13f0] sm:$0xff]  ;;  %2481 = vmatpush.msrb.mxu3 %v3802_v30  ;;  %v7061_v55 = vld [vmem:[%s8129_s1 + $0x8] sm:$0xff] }
 0x1f5   :  { %2033 = vmatmul.f32.gmra.mxu2 %v6377_v19  ;;  %3683 = vmatmul.msk.f32.gmra.mxu3 %vm112_vm1, %v6964_v9  ;;  %v3771_v19 = vld [vmem:[%s8128_s0 + $0x1378] sm:$0xff] }
 0x1f6   :  { %v1569_v28 = vmax.f32 %v6649_v17, %v6958_v50  ;;  %1998 = vmatmul.f32.gmra.mxu1 %v6654_v52  ;;  %2446 = vmatpush.msrb.mxu2 %v3786_v34  ;;  %v3765_v34 = vld [vmem:[%s8128_s0 + $0x1348] sm:$0xff]  ;;  %v7278_v17 = vld [vmem:[%s8129_s1 + $0xe0] sm:$0x1f] }
 0x1f7   :  { %2410 = vmatpush.msrb.mxu1 %v3771_v19  ;;  %2482 = vmatpush.msrb.mxu3 %v3801_v40  ;;  %v3764_v40 = vld [vmem:[%s8128_s0 + $0x1340] sm:$0xff] }
 0x1f8   :  { %v1664_v36 = vpop.f32.mrf.mxu2  ;;  %v1699_v27 = vpop.f32.mrf.mxu3  ;;  %2447 = vmatpush.msrb.mxu2 %v3785_v49  ;;  %v3816_v50 = vld [vmem:[%s8128_s0 + $0x14e0] sm:$0xff] }
 0x1f9   :  { %v6983_v13 = vadd.f32 %v1699_v27, %v1664_v36  ;;  %v1519_v3 = vpop.f32.mrf.mxu0  ;;  %2411 = vmatpush.msrb.mxu1 %v3770_v53  ;;  %2483 = vmatpush.msrb.mxu3 %v3800_v8  ;;  %v3779_v53 = vld [vmem:[%s8128_s0 + $0x13b8] sm:$0xff] }
 0x1fa   :  { %v1520_v46 = vadd.f32 %v1519_v3, %v6747_v29  ;;  %2448 = vmatpush.msrb.mxu2 %v3784_v24  ;;  %v3796_v3 = vld [vmem:[%s8128_s0 + $0x1440] sm:$0xff] }
 0x1fb   :  { %v1554_v20 = vpop.f32.mrf.mxu1  ;;  %2412 = vmatpush.msrb.mxu1 %v3769_v2  ;;  %2484 = vmatpush.msrb.mxu3 %v3799_v11  ;;  %v7089_v2 = vld [vmem:[%s8129_s1 + $0x40] sm:$0xff] }
 0x1fc   :  { %1966 = vmatmul.f32.gmra.mxu0 %v6430_v38  ;;  %v6999_v16 = vadd.f32 %v1554_v20, %v1520_v46  ;;  %v3783_v38 = vld [vmem:[%s8128_s0 + $0x13d8] sm:$0xff]  ;;  %v3778_v20 = vld [vmem:[%s8128_s0 + $0x13b0] sm:$0xff] }
 0x1fd   :  { %2036 = vmatmul.f32.gmra.mxu2 %v6423_v31  ;;  %3684 = vmatmul.msk.f32.gmra.mxu3 %vm112_vm1, %v6445_v60  ;;  %v3768_v31 = vld [vmem:[%s8128_s0 + $0x1360] sm:$0xff] }
 0x1fe   :  { %v1570_v29 = vmax.f32 %v6705_v32, %v6999_v16  ;;  %2001 = vmatmul.f32.gmra.mxu1 %v6710_v18  ;;  %2449 = vmatpush.msrb.mxu2 %v3783_v38  ;;  %v7106_v38 = vld [vmem:[%s8129_s1 + $0x30] sm:$0xff] }
 0x1ff   :  { %2413 = vmatpush.msrb.mxu1 %v3768_v31  ;;  %2485 = vmatpush.msrb.mxu3 %v3798_v35  ;;  %v3794_v31 = vld [vmem:[%s8128_s0 + $0x1430] sm:$0xff]  ;;  %v3776_v35 = vld [vmem:[%s8128_s0 + $0x13a0] sm:$0xff] }
 0x200   :  { %v1667_v61 = vpop.f32.mrf.mxu2  ;;  %v1702_v60 = vpop.f32.mrf.mxu3  ;;  %2450 = vmatpush.msrb.mxu2 %v3782_v12  ;;  %v3762_v12 = vld [vmem:[%s8128_s0 + $0x1330] sm:$0xff] }
 0x201   :  { %v7022_v44 = vadd.f32 %v1702_v60, %v1667_v61  ;;  %v1522_v33 = vpop.f32.mrf.mxu0  ;;  %2414 = vmatpush.msrb.mxu1 %v3767_v22  ;;  %v3777_v61 = vld [vmem:[%s8128_s0 + $0x13a8] sm:$0xff]  ;;  %v3857_v32 = vld [vmem:[%s8128_s0 + $0x15f0] sm:$0xff] }
 0x202   :  { %v1523_v5 = vadd.f32 %v1522_v33, %v6804_v45  ;;  %v7044_v45 = vld [vmem:[%s8129_s1 + $0x18] sm:$0xff]  ;;  %2451 = vmatpush.msrb.mxu2 %v3781_v59  ;;  %v3793_v22 = vld [vmem:[%s8128_s0 + $0x1428] sm:$0xff]  ;;  %v7328_v16 = vld [vmem:[%s8129_s1 + $0x10] sm:$0xff] }
 0x203   :  { %v1557_v37 = vpop.f32.mrf.mxu1  ;;  %2415 = vmatpush.msrb.mxu1 %v3766_v63  ;;  %v3761_v59 = vld [vmem:[%s8128_s0 + $0x1328] sm:$0xff]  ;;  %v3792_v63 = vld [vmem:[%s8128_s0 + $0x1420] sm:$0xff] }
 0x204   :  { %2169 = vmatmul.f32.vlgmr.msra.gmra.mxu0 %v6483_v41  ;;  %v7038_v47 = vadd.f32 %v1557_v37, %v1523_v5  ;;  %v3797_v41 = vld [vmem:[%s8128_s0 + $0x1448] sm:$0xff]  ;;  %2452 = vmatpush.msrb.mxu2 %v3780_v21  ;;  %v3760_v21 = vld [vmem:[%s8128_s0 + $0x1320] sm:$0xff] }
 0x205   :  { %2239 = vmatmul.f32.vlgmr.msra.gmra.mxu2 %v6469_v0  ;;  %2274 = vmatmul.f32.vlgmr.msra.gmra.mxu3 %v7044_v45 }
 0x206   :  { %v1571_v0 = vmax.f32 %v6761_v7, %v7038_v47  ;;  %2204 = vmatmul.f32.vlgmr.msra.gmra.mxu1 %v7061_v55  ;;  %2486 = vmatpush.msrb.mxu3 %v3797_v41  ;;  %v7140_v41 = vld [vmem:[%s8129_s1 + $0x68] sm:$0xff]  ;;  %v7369_v7 = vld [vmem:[%s8129_s1 + $0x38] sm:$0xff] }
 0x207   :  { %2416 = vmatpush.msrb.mxu1 %v3765_v34  ;;  %2453 = vmatpush.msrb.mxu2 %v3779_v53  ;;  %v7154_v34 = vld [vmem:[%s8129_s1 + $0x58] sm:$0xff] }
 0x208   :  { %v1670_v19 = vpop.f32.mrf.mxu2  ;;  %v1705_v30 = vpop.f32.mrf.mxu3  ;;  %2487 = vmatpush.msrb.mxu3 %v3796_v3  ;;  %v3838_v47 = vld [vmem:[%s8128_s0 + $0x1558] sm:$0xff] }
 0x209   :  { %v7067_v36 = vadd.f32 %v1705_v30, %v1670_v19  ;;  %v1525_v27 = vpop.f32.mrf.mxu0  ;;  %2417 = vmatpush.msrb.mxu1 %v3764_v40  ;;  %2454 = vmatpush.msrb.mxu2 %v3778_v20  ;;  %v3823_v19 = vld [vmem:[%s8128_s0 + $0x1518] sm:$0xff] }
 0x20a   :  { %v1526_v49 = vadd.f32 %v1525_v27, %v6858_v26  ;;  %v3749_v26 = vld [vmem:[%s8128_s0 + $0x1300] sm:$0xff]  ;;  %v3866_v30 = vld [vmem:[%s8128_s0 + $0x1638] sm:$0xff] }
 0x20b   :  { %v1560_v46 = vpop.f32.mrf.mxu1  ;;  %2308 = vmatpush.msrb.mxu0 %v3749_v26  ;;  %2455 = vmatpush.msrb.mxu2 %v3777_v61  ;;  %v3827_v26 = vld [vmem:[%s8128_s0 + $0x1538] sm:$0xf]  ;;  %v3821_v61 = vld [vmem:[%s8128_s0 + $0x1508] sm:$0xff] }
 0x20c   :  { %2172 = vmatmul.f32.gmra.mxu0 %v6524_v6  ;;  %v7083_v24 = vadd.f32 %v1560_v46, %v1526_v49  ;;  %v3795_v6 = vld [vmem:[%s8128_s0 + $0x1438] sm:$0xff]  ;;  %v3849_v46 = vld [vmem:[%s8128_s0 + $0x15b0] sm:$0xff] }
 0x20d   :  { %2242 = vmatmul.f32.gmra.mxu2 %v6510_v25  ;;  %2277 = vmatmul.f32.gmra.mxu3 %v7089_v2  ;;  %v3763_v25 = vld [vmem:[%s8128_s0 + $0x1338] sm:$0xff] }
 0x20e   :  { %v1572_v8 = vmax.f32 %v6815_v58, %v7083_v24  ;;  %2207 = vmatmul.f32.gmra.mxu1 %v7106_v38  ;;  %2488 = vmatpush.msrb.mxu3 %v3795_v6  ;;  %v3822_v6 = vld [vmem:[%s8128_s0 + $0x1510] sm:$0xff]  ;;  %v7428_v58 = vld [vmem:[%s8129_s1 + $0x60] sm:$0xff] }
 0x20f   :  { %2418 = vmatpush.msrb.mxu1 %v3763_v25  ;;  %2456 = vmatpush.msrb.mxu2 %v3776_v35  ;;  %v3808_v24 = vld [vmem:[%s8128_s0 + $0x14a0] sm:$0xff] }
 0x210   :  { %v1673_v60 = vpop.f32.mrf.mxu2  ;;  %v1708_v42 = vpop.f32.mrf.mxu3  ;;  %2489 = vmatpush.msrb.mxu3 %v3794_v31  ;;  %2511 = vmatpush.msra.mxu0 %v3823_v19  ;;  %v7185_v31 = vld [vmem:[%s8129_s1 + $0x90] sm:$0xff]  ;;  %v7229_v19 = vld [vmem:[%s8129_s1 + $0xb8] sm:$0xff] }
 0x211   :  { %v7115_v11 = vadd.f32 %v1708_v42, %v1673_v60  ;;  %v1528_v33 = vpop.f32.mrf.mxu0  ;;  %2419 = vmatpush.msrb.mxu1 %v3762_v12  ;;  %v7203_v42 = vld [vmem:[%s8129_s1 + $0x80] sm:$0xff] }
 0x212   :  { %v1529_v5 = vadd.f32 %v1528_v33, %v6910_v15  ;;  %2490 = vmatpush.msrb.mxu3 %v3793_v22  ;;  %2512 = vmatpush.msra.mxu0 %v3822_v6  ;;  %v3847_v33 = vld [vmem:[%s8128_s0 + $0x15a0] sm:$0xff] }
 0x213   :  { %v1563_v37 = vpop.f32.mrf.mxu1  ;;  %2420 = vmatpush.msrb.mxu1 %v3761_v59 }
 0x214   :  { %2175 = vmatmul.f32.gmra.mxu0 %v6568_v57  ;;  %v7134_v15 = vadd.f32 %v1563_v37, %v1529_v5  ;;  %v3850_v57 = vld [vmem:[%s8128_s0 + $0x15b8] sm:$0xff]  ;;  %2491 = vmatpush.msrb.mxu3 %v3792_v63  ;;  %v3820_v37 = vld [vmem:[%s8128_s0 + $0x1500] sm:$0xff] }
 0x215   :  { %2245 = vmatmul.f32.gmra.mxu2 %v6560_v14  ;;  %2280 = vmatmul.f32.gmra.mxu3 %v7140_v41  ;;  %v3863_v63 = vld [vmem:[%s8128_s0 + $0x1620] sm:$0xff] }
 0x216   :  { %v1573_v14 = vmax.f32 %v6869_v10, %v7134_v15  ;;  %2210 = vmatmul.f32.gmra.mxu1 %v7154_v34  ;;  %2659 = vmatpush.msra.mxu2 %v3850_v57  ;;  %v3846_v57 = vld [vmem:[%s8128_s0 + $0x1598] sm:$0xff]  ;;  %v3881_v15 = vld [vmem:[%s8128_s0 + $0x16b0] sm:$0xff] }
 0x217   :  { %2421 = vmatpush.msrb.mxu1 %v3760_v21  ;;  %2694 = vmatpush.msra.mxu3 %v3866_v30  ;;  %v3819_v30 = vld [vmem:[%s8128_s0 + $0x14f8] sm:$0xff] }
 0x218   :  { %v1676_v27 = vpop.f32.mrf.mxu2  ;;  %v1711_v49 = vpop.f32.mrf.mxu3  ;;  %2660 = vmatpush.msra.mxu2 %v3849_v46  ;;  %2513 = vmatpush.msra.mxu0 %v3821_v61  ;;  %v3844_v46 = vld [vmem:[%s8128_s0 + $0x1588] sm:$0xff]  ;;  %v3898_v10 = vld [vmem:[%s8128_s0 + $0x1738] sm:$0xff] }
 0x219   :  { %v7163_v3 = vadd.f32 %v1711_v49, %v1676_v27  ;;  %v1531_v53 = vpop.f32.mrf.mxu0  ;;  %3828 = vmatpush.msk.msra.mxu1 %vm131_vm0, %v3827_v26  ;;  %v3861_v27 = vld [vmem:[%s8128_s0 + $0x1610] sm:$0xff] }
 0x21a   :  { %v1532_v40 = vadd.f32 %v1531_v53, %v6952_v56  ;;  %v3865_v56 = vld [vmem:[%s8128_s0 + $0x1630] sm:$0xff]  ;;  %2514 = vmatpush.msra.mxu0 %v3820_v37  ;;  %v7247_v53 = vld [vmem:[%s8129_s1 + $0xa8] sm:$0xff] }
 0x21b   :  { %v1566_v20 = vpop.f32.mrf.mxu1  ;;  %2695 = vmatpush.msra.mxu3 %v3865_v56 }
 0x21c   :  { %2178 = vmatmul.f32.gmra.mxu0 %v6612_v51  ;;  %v7179_v25 = vadd.f32 %v1566_v20, %v1532_v40  ;;  %v3848_v51 = vld [vmem:[%s8128_s0 + $0x15a8] sm:$0xff]  ;;  %v3818_v40 = vld [vmem:[%s8128_s0 + $0x14f0] sm:$0xff] }
 0x21d   :  { %2248 = vmatmul.f32.gmra.mxu2 %v6598_v54  ;;  %2283 = vmatmul.f32.gmra.mxu3 %v7185_v31  ;;  %v3864_v54 = vld [vmem:[%s8128_s0 + $0x1628] sm:$0xff] }
 0x21e   :  { %v1574_v60 = vmax.f32 %v6915_v62, %v7179_v25  ;;  %2213 = vmatmul.f32.gmra.mxu1 %v7203_v42  ;;  %2661 = vmatpush.msra.mxu2 %v3848_v51  ;;  %v3879_v62 = vld [vmem:[%s8128_s0 + $0x16a0] sm:$0xff] }
 0x21f   :  { %2696 = vmatpush.msra.mxu3 %v3864_v54  ;;  %2515 = vmatpush.msra.mxu0 %v3819_v30  ;;  %v3817_v54 = vld [vmem:[%s8128_s0 + $0x14e8] sm:$0xff]  ;;  %v3922_v25 = vld [vmem:[%s8128_s0 + $0x17c0] sm:$0xff] }
 0x220   :  { %v1679_v12 = vpop.f32.mrf.mxu2  ;;  %v1714_v22 = vpop.f32.mrf.mxu3  ;;  %2662 = vmatpush.msra.mxu2 %v3847_v33  ;;  %v3860_v33 = vld [vmem:[%s8128_s0 + $0x1608] sm:$0xff] }
 0x221   :  { %v7209_v5 = vadd.f32 %v1714_v22, %v1679_v12  ;;  %v1734_v35 = vpop.f32.mrf.mxu0  ;;  %2697 = vmatpush.msra.mxu3 %v3863_v63  ;;  %2516 = vmatpush.msra.mxu0 %v3818_v40  ;;  %v3843_v12 = vld [vmem:[%s8128_s0 + $0x1580] sm:$0xff] }
 0x222   :  { %v1735_v59 = vadd.f32 %v1734_v35, %v6983_v13  ;;  %v3862_v13 = vld [vmem:[%s8128_s0 + $0x1618] sm:$0xff]  ;;  %2663 = vmatpush.msra.mxu2 %v3846_v57 }
 0x223   :  { %v1769_v21 = vpop.f32.mrf.mxu1  ;;  %2698 = vmatpush.msra.mxu3 %v3862_v13  ;;  %2517 = vmatpush.msra.mxu0 %v3817_v54  ;;  %v3815_v35 = vld [vmem:[%s8128_s0 + $0x14d8] sm:$0xff] }
 0x224   :  { %2181 = vmatmul.f32.gmra.mxu0 %v6665_v48  ;;  %v3845_v48 = vld [vmem:[%s8128_s0 + $0x1590] sm:$0xff]  ;;  %v1770_v49 = vadd.f32 %v1769_v21, %v1735_v59  ;;  %v3858_v59 = vld [vmem:[%s8128_s0 + $0x15f8] sm:$0xff] }
 0x225   :  { %2251 = vmatmul.f32.gmra.mxu2 %v6654_v52  ;;  %2286 = vmatmul.f32.gmra.mxu3 %v7229_v19  ;;  %v3826_v52 = vld [vmem:[%s8128_s0 + $0x1530] sm:$0xff] }
 0x226   :  { %2216 = vmatmul.f32.gmra.mxu1 %v7247_v53  ;;  %2664 = vmatpush.msra.mxu2 %v3845_v48  ;;  %v3841_v48 = vld [vmem:[%s8128_s0 + $0x1570] sm:$0xff] }
 0x227   :  { %2559 = vmatpush.msra.mxu1 %v3826_v52  ;;  %2699 = vmatpush.msra.mxu3 %v3861_v27  ;;  %v3825_v52 = vld [vmem:[%s8128_s0 + $0x1528] sm:$0xff]  ;;  %v3814_v27 = vld [vmem:[%s8128_s0 + $0x14d0] sm:$0xff] }
 0x228   :  { %v1804_v26 = vpop.f32.mrf.mxu2  ;;  %v7256_v6 = vpop.f32.mrf.mxu3  ;;  %2665 = vmatpush.msra.mxu2 %v3844_v46  ;;  %2518 = vmatpush.msra.mxu0 %v3816_v50  ;;  %v7343_v46 = vld [vmem:[%s8129_s1] sm:$0xff] }
 0x229   :  { %v1805_v20 = vadd.f32 %v1804_v26, %v1770_v49  ;;  %v1737_v56 = vpop.f32.mrf.mxu0  ;;  %2700 = vmatpush.msra.mxu3 %v3860_v33  ;;  %2560 = vmatpush.msra.mxu1 %v3825_v52  ;;  %v3839_v26 = vld [vmem:[%s8128_s0 + $0x1560] sm:$0xff] }
 0x22a   :  { %v1738_v61 = vadd.f32 %v1737_v56, %v7022_v44  ;;  %2666 = vmatpush.msra.mxu2 %v3843_v12  ;;  %v7293_v44 = vld [vmem:[%s8129_s1 + $0xd0] sm:$0x1f]  ;;  %2519 = vmatpush.msra.mxu0 %v3815_v35  ;;  %v3855_v50 = vld [vmem:[%s8128_s0 + $0x15e0] sm:$0xff]  ;;  %v7390_v35 = vld [vmem:[%s8129_s1 + $0x28] sm:$0xff] }
 0x22b   :  { %v7261_v51 = vmax.f32 %v1569_v28, %v1805_v20  ;;  %v1772_v22 = vpop.f32.mrf.mxu1  ;;  %v3859_v28 = vld [vmem:[%s8128_s0 + $0x1600] sm:$0xff] }
 0x22c   :  { %2184 = vmatmul.f32.gmra.mxu0 %v6721_v23  ;;  %v3842_v23 = vld [vmem:[%s8128_s0 + $0x1578] sm:$0xff]  ;;  %2701 = vmatpush.msra.mxu3 %v3859_v28 }
 0x22d   :  { %2254 = vmatmul.f32.gmra.mxu2 %v6710_v18  ;;  %2289 = vmatmul.f32.gmra.mxu3 %v7278_v17  ;;  %v1773_v18 = vadd.f32 %v1772_v22, %v1738_v61  ;;  %v3812_v22 = vld [vmem:[%s8128_s0 + $0x14c0] sm:$0xff] }
 0x22e   :  { %2219 = vmatmul.f32.gmra.mxu1 %v7293_v44  ;;  %2667 = vmatpush.msra.mxu2 %v3842_v23  ;;  %v3824_v23 = vld [vmem:[%s8128_s0 + $0x1520] sm:$0xff] }
 0x22f   :  { %2702 = vmatpush.msra.mxu3 %v3858_v59  ;;  %2520 = vmatpush.msra.mxu0 %v3814_v27  ;;  %v3810_v59 = vld [vmem:[%s8128_s0 + $0x14b0] sm:$0xff]  ;;  %v3852_v27 = vld [vmem:[%s8128_s0 + $0x15c8] sm:$0xff] }
 0x230   :  { %v1807_v37 = vpop.f32.mrf.mxu2  ;;  %v7302_v63 = vpop.f32.mrf.mxu3  ;;  %2668 = vmatpush.msra.mxu2 %v3841_v48  ;;  %2561 = vmatpush.msra.mxu1 %v3824_v23  ;;  %v7488_v23 = vld [vmem:[%s8129_s1 + $0x78] sm:$0xff] }
 0x231   :  { %v1808_v57 = vadd.f32 %v1807_v37, %v1773_v18  ;;  %v1740_v21 = vpop.f32.mrf.mxu0  ;;  %2703 = vmatpush.msra.mxu3 %v3857_v32  ;;  %v3853_v37 = vld [vmem:[%s8128_s0 + $0x15d0] sm:$0xff] }
 0x232   :  { %v1741_v30 = vadd.f32 %v1740_v21, %v7067_v36  ;;  %v3856_v36 = vld [vmem:[%s8128_s0 + $0x15e8] sm:$0xff] }
 0x233   :  { %v7307_v13 = vmax.f32 %v1570_v29, %v1808_v57  ;;  %v1775_v49 = vpop.f32.mrf.mxu1  ;;  %v3840_v29 = vld [vmem:[%s8128_s0 + $0x1568] sm:$0xff]  ;;  %2704 = vmatpush.msra.mxu3 %v3856_v36  ;;  %v3851_v36 = vld [vmem:[%s8128_s0 + $0x15c0] sm:$0xff] }
 0x234   :  { %3754 = vmatmul.msk.f32.vlgmr.msrb.gmra.mxu0 %vm112_vm1, %v6771_v4  ;;  %v3813_v4 = vld [vmem:[%s8128_s0 + $0x14c8] sm:$0xff]  ;;  %v1776_v40 = vadd.f32 %v1775_v49, %v1741_v30  ;;  %2669 = vmatpush.msra.mxu2 %v3840_v29 }
 0x235   :  { %2457 = vmatmul.f32.vlgmr.msrb.gmra.mxu2 %v7061_v55  ;;  %2492 = vmatmul.f32.vlgmr.msrb.gmra.mxu3 %v7328_v16  ;;  %v3836_v57 = vld [vmem:[%s8128_s0 + $0x1548] sm:$0xff] }
 0x236   :  { %2422 = vmatmul.f32.vlgmr.msrb.gmra.mxu1 %v7343_v46  ;;  %2521 = vmatpush.msra.mxu0 %v3813_v4  ;;  %v3809_v29 = vld [vmem:[%s8128_s0 + $0x14a8] sm:$0xff]  ;;  %v3835_v4 = vld [vmem:[%s8128_s0 + $0x1540] sm:$0xff] }
 0x237   :  { %2670 = vmatpush.msra.mxu2 %v3839_v26  ;;  %2705 = vmatpush.msra.mxu3 %v3855_v50  ;;  %v3882_v26 = vld [vmem:[%s8128_s0 + $0x16b8] sm:$0xff] }
 0x238   :  { %v1810_v20 = vpop.f32.mrf.mxu2  ;;  %v7349_v56 = vpop.f32.mrf.mxu3  ;;  %2522 = vmatpush.msra.mxu0 %v3812_v22  ;;  %2764 = vmatpush.msrb.mxu1 %v3898_v10 }
 0x239   :  { %v1811_v61 = vadd.f32 %v1810_v20, %v1776_v40  ;;  %v1743_v54 = vpop.f32.mrf.mxu0  ;;  %2671 = vmatpush.msra.mxu2 %v3838_v47  ;;  %v3925_v20 = vld [vmem:[%s8128_s0 + $0x17d8] sm:$0xff] }
 0x23a   :  { %v1744_v12 = vadd.f32 %v1743_v54, %v7115_v11  ;;  %v3837_v11 = vld [vmem:[%s8128_s0 + $0x1550] sm:$0xff] }
 0x23b   :  { %v7354_v33 = vmax.f32 %v1571_v0, %v1811_v61  ;;  %v1778_v28 = vpop.f32.mrf.mxu1  ;;  %v3811_v0 = vld [vmem:[%s8128_s0 + $0x14b8] sm:$0xff]  ;;  %2672 = vmatpush.msra.mxu2 %v3837_v11 }
 0x23c   :  { %3755 = vmatmul.msk.f32.gmra.mxu0 %vm112_vm1, %v6825_v39  ;;  %v3854_v39 = vld [vmem:[%s8128_s0 + $0x15d8] sm:$0xff]  ;;  %v1779_v18 = vadd.f32 %v1778_v28, %v1744_v12 }
 0x23d   :  { %2460 = vmatmul.f32.gmra.mxu2 %v7106_v38  ;;  %2495 = vmatmul.f32.gmra.mxu3 %v7369_v7 }
 0x23e   :  { %2425 = vmatmul.f32.gmra.mxu1 %v7390_v35  ;;  %2706 = vmatpush.msra.mxu3 %v3854_v39  ;;  %v3923_v39 = vld [vmem:[%s8128_s0 + $0x17c8] sm:$0xff] }
 0x23f   :  { %2523 = vmatpush.msra.mxu0 %v3811_v0  ;;  %2673 = vmatpush.msra.mxu2 %v3836_v57  ;;  %v7464_v0 = vld [vmem:[%s8129_s1 + $0x88] sm:$0xff] }
 0x240   :  { %v1813_v21 = vpop.f32.mrf.mxu2  ;;  %v7402_v30 = vpop.f32.mrf.mxu3  ;;  %2707 = vmatpush.msra.mxu3 %v3853_v37 }
 0x241   :  { %v1814_v48 = vadd.f32 %v1813_v21, %v1779_v18  ;;  %v1746_v52 = vpop.f32.mrf.mxu0  ;;  %2524 = vmatpush.msra.mxu0 %v3810_v59  ;;  %2674 = vmatpush.msra.mxu2 %v3835_v4  ;;  %v3896_v18 = vld [vmem:[%s8128_s0 + $0x1728] sm:$0xff] }
 0x242   :  { %v1747_v32 = vadd.f32 %v1746_v52, %v7163_v3  ;;  %2708 = vmatpush.msra.mxu3 %v3852_v27  ;;  %v7440_v3 = vld [vmem:[%s8129_s1 + $0x50] sm:$0xff] }
 0x243   :  { %v7410_v49 = vmax.f32 %v1572_v8, %v1814_v48  ;;  %v1781_v40 = vpop.f32.mrf.mxu1  ;;  %v3902_v8 = vld [vmem:[%s8128_s0 + $0x1758] sm:$0xf]  ;;  %2525 = vmatpush.msra.mxu0 %v3809_v29 }
 0x244   :  { %3756 = vmatmul.msk.f32.gmra.mxu0 %vm112_vm1, %v6879_v1  ;;  %2709 = vmatpush.msra.mxu3 %v3851_v36  ;;  %v1782_v1 = vadd.f32 %v1781_v40, %v1747_v32  ;;  %v7508_v32 = vld [vmem:[%s8129_s1 + $0xb0] sm:$0xff]  ;;  %v3921_v29 = vld [vmem:[%s8128_s0 + $0x17b8] sm:$0xff]  ;;  %v7532_v36 = vld [vmem:[%s8129_s1 + $0xa0] sm:$0xff] }
 0x245   :  { %2463 = vmatmul.f32.gmra.mxu2 %v7154_v34  ;;  %2498 = vmatmul.f32.gmra.mxu3 %v7428_v58  ;;  %v3894_v40 = vld [vmem:[%s8128_s0 + $0x1718] sm:$0xff] }
 0x246   :  { %2428 = vmatmul.f32.gmra.mxu1 %v7440_v3  ;;  %3903 = vmatpush.msk.msrb.mxu2 %vm131_vm0, %v3902_v8 }
 0x247   :  { %2526 = vmatpush.msra.mxu0 %v3808_v24  ;;  %2912 = vmatpush.msrb.mxu3 %v3925_v20  ;;  %v3877_v24 = vld [vmem:[%s8128_s0 + $0x1690] sm:$0xff] }
 0x248   :  { %v1816_v61 = vpop.f32.mrf.mxu2  ;;  %v7450_v54 = vpop.f32.mrf.mxu3 }
 0x249   :  { %v1817_v12 = vadd.f32 %v1816_v61, %v1782_v1  ;;  %v1749_v22 = vpop.f32.mrf.mxu0  ;;  %2729 = vmatpush.msrb.mxu0 %v3882_v26  ;;  %v3920_v26 = vld [vmem:[%s8128_s0 + $0x17b0] sm:$0xff] }
 0x24a   :  { %v1750_v28 = vadd.f32 %v1749_v22, %v7209_v5  ;;  %v3880_v5 = vld [vmem:[%s8128_s0 + $0x16a8] sm:$0xff] }
 0x24b   :  { %v7455_v50 = vmax.f32 %v1573_v14, %v1817_v12  ;;  %v1784_v47 = vpop.f32.mrf.mxu1  ;;  %2730 = vmatpush.msrb.mxu0 %v3881_v15  ;;  %v3897_v14 = vld [vmem:[%s8128_s0 + $0x1730] sm:$0xff]  ;;  %v7560_v15 = vld [vmem:[%s8129_s1 + $0xd8] sm:$0x1f] }
 0x24c   :  { %3757 = vmatmul.msk.f32.gmra.mxu0 %vm112_vm1, %v6922_v43  ;;  %v3924_v43 = vld [vmem:[%s8128_s0 + $0x17d0] sm:$0xff]  ;;  %v1785_v11 = vadd.f32 %v1784_v47, %v1750_v28  ;;  %2765 = vmatpush.msrb.mxu1 %v3897_v14  ;;  %v7550_v47 = vld [vmem:[%s8129_s1 + $0xe8] sm:$0x1f] }
 0x24d   :  { %2466 = vmatmul.f32.gmra.mxu2 %v7203_v42  ;;  %2501 = vmatmul.f32.gmra.mxu3 %v7464_v0  ;;  %v3919_v14 = vld [vmem:[%s8128_s0 + $0x17a8] sm:$0xff] }
 0x24e   :  { %2431 = vmatmul.f32.gmra.mxu1 %v7488_v23  ;;  %2913 = vmatpush.msrb.mxu3 %v3924_v43  ;;  %v3876_v43 = vld [vmem:[%s8128_s0 + $0x1688] sm:$0xff] }
 0x24f   :  { %2731 = vmatpush.msrb.mxu0 %v3880_v5  ;;  %2766 = vmatpush.msrb.mxu1 %v3896_v18  ;;  %v3892_v5 = vld [vmem:[%s8128_s0 + $0x1708] sm:$0xff] }
 0x250   :  { %v1819_v59 = vpop.f32.mrf.mxu2  ;;  %v7494_v37 = vpop.f32.mrf.mxu3  ;;  %2914 = vmatpush.msrb.mxu3 %v3923_v39  ;;  %v3875_v39 = vld [vmem:[%s8128_s0 + $0x1680] sm:$0xff] }
 0x251   :  { %v1820_v57 = vadd.f32 %v1819_v59, %v1785_v11  ;;  %v1952_v21 = vpop.f32.mrf.mxu0  ;;  %2732 = vmatpush.msrb.mxu0 %v3879_v62  ;;  %v3918_v11 = vld [vmem:[%s8128_s0 + $0x17a0] sm:$0xff]  ;;  %v7584_v59 = vld [vmem:[%s8129_s1 + $0xc8] sm:$0x1f] }
 0x252   :  { %v1953_v52 = vadd.f32 %v1952_v21, %v7256_v6  ;;  %2915 = vmatpush.msrb.mxu3 %v3922_v25  ;;  %v3878_v6 = vld [vmem:[%s8128_s0 + $0x1698] sm:$0xff]  ;;  %v3891_v21 = vld [vmem:[%s8128_s0 + $0x1700] sm:$0xff] }
 0x253   :  { %v7499_v48 = vmax.f32 %v1574_v60, %v1820_v57  ;;  %v1987_v27 = vpop.f32.mrf.mxu1  ;;  %v3895_v60 = vld [vmem:[%s8128_s0 + $0x1720] sm:$0xff]  ;;  %2733 = vmatpush.msrb.mxu0 %v3878_v6  ;;  %v3900_v57 = vld [vmem:[%s8128_s0 + $0x1748] sm:$0xff]  ;;  %v3917_v25 = vld [vmem:[%s8128_s0 + $0x1798] sm:$0xff] }
 0x254   :  { %3758 = vmatmul.msk.f32.gmra.mxu0 %vm112_vm1, %v6964_v9  ;;  %v3901_v9 = vld [vmem:[%s8128_s0 + $0x1750] sm:$0xff]  ;;  %v1988_v4 = vadd.f32 %v1987_v27, %v1953_v52  ;;  %2767 = vmatpush.msrb.mxu1 %v3895_v60  ;;  %v3874_v52 = vld [vmem:[%s8128_s0 + $0x1678] sm:$0xff] }
 0x255   :  { %2469 = vmatmul.f32.gmra.mxu2 %v7247_v53  ;;  %2504 = vmatmul.f32.gmra.mxu3 %v7508_v32 }
 0x256   :  { %2434 = vmatmul.f32.gmra.mxu1 %v7532_v36  ;;  %2812 = vmatpush.msrb.mxu2 %v3901_v9 }
 0x257   :  { %2916 = vmatpush.msrb.mxu3 %v3921_v29  ;;  %2768 = vmatpush.msrb.mxu1 %v3894_v40 }
 0x258   :  { %v2022_v8 = vpop.f32.mrf.mxu2  ;;  %v2057_v1 = vpop.f32.mrf.mxu3  ;;  %2734 = vmatpush.msrb.mxu0 %v3877_v24  ;;  %2813 = vmatpush.msrb.mxu2 %v3900_v57  ;;  %v3890_v24 = vld [vmem:[%s8128_s0 + $0x16f8] sm:$0xff] }
 0x259   :  { %v2023_v20 = vadd.f32 %v2022_v8, %v1988_v4  ;;  %v1955_v61 = vpop.f32.mrf.mxu0  ;;  %2917 = vmatpush.msrb.mxu3 %v3920_v26  ;;  %v3873_v8 = vld [vmem:[%s8128_s0 + $0x1670] sm:$0xff] }
 0x25a   :  { %v1956_v22 = vadd.f32 %v1955_v61, %v7302_v63  ;;  %v3893_v63 = vld [vmem:[%s8128_s0 + $0x1710] sm:$0xff]  ;;  %2735 = vmatpush.msrb.mxu0 %v3876_v43  ;;  %v3888_v61 = vld [vmem:[%s8128_s0 + $0x16e8] sm:$0xff] }
 0x25b   :  { %v7544_v12 = vadd.f32 %v2057_v1, %v2023_v20  ;;  %v1990_v28 = vpop.f32.mrf.mxu1  ;;  %2769 = vmatpush.msrb.mxu1 %v3893_v63  ;;  %2918 = vmatpush.msrb.mxu3 %v3919_v14  ;;  %v3915_v1 = vld [vmem:[%s8128_s0 + $0x1788] sm:$0xff]  ;;  %v7628_v20 = vld [vmem:[%s8129_s1 + $0x20] sm:$0xff] }
 0x25c   :  { %3759 = vmatmul.msk.f32.gmra.mxu0 %vm112_vm1, %v7550_v47  ;;  %v1991_v18 = vadd.f32 %v1990_v28, %v1956_v22 }
 0x25d   :  { %v2075_v10 = vmax.f32 %v7261_v51, %v7544_v12  ;;  %2472 = vmatmul.f32.gmra.mxu2 %v7293_v44  ;;  %2507 = vmatmul.f32.gmra.mxu3 %v7560_v15  ;;  %v4091_v51 = vmov 0   ;;  %v3093_v12 = vld [vmem:[%s8130_s2] sm:$0xff] }
 0x25e   :  { %2437 = vmatmul.f32.gmra.mxu1 %v7584_v59  ;;  %2736 = vmatpush.msrb.mxu0 %v3875_v39  ;;  %v3871_v39 = vld [vmem:[%s8128_s0 + $0x1660] sm:$0xff] }
 0x25f   :  { %2770 = vmatpush.msrb.mxu1 %v3892_v5  ;;  %2919 = vmatpush.msrb.mxu3 %v3918_v11  ;;  %v3914_v11 = vld [vmem:[%s8128_s0 + $0x1780] sm:$0xff] }
 0x260   :  { %v2025_v27 = vpop.f32.mrf.mxu2  ;;  %v2060_v62 = vpop.f32.mrf.mxu3  ;;  %2737 = vmatpush.msrb.mxu0 %v3874_v52  ;;  %v3887_v52 = vld [vmem:[%s8128_s0 + $0x16e0] sm:$0xff]  ;;  %3986 = vset.pattern.permute.xlu0 %v4091_v51 }
 0x261   :  { %v2026_v9 = vadd.f32 %v2025_v27, %v1991_v18  ;;  %v1958_v60 = vpop.f32.mrf.mxu0  ;;  %2771 = vmatpush.msrb.mxu1 %v3891_v21  ;;  %2920 = vmatpush.msrb.mxu3 %v3917_v25  ;;  %v3899_v18 = vld [vmem:[%s8128_s0 + $0x1740] sm:$0xff]  ;;  %v3912_v27 = vld [vmem:[%s8128_s0 + $0x1770] sm:$0xff]  ;;  %v7667_v25 = vld [vmem:[%s8129_s1 + $0x48] sm:$0xff] }
 0x262   :  { %v1959_v29 = vadd.f32 %v1958_v60, %v7349_v56  ;;  %v3916_v56 = vld [vmem:[%s8128_s0 + $0x1790] sm:$0xff]  ;;  %2738 = vmatpush.msrb.mxu0 %v3873_v8  ;;  %2814 = vmatpush.msrb.mxu2 %v3899_v18 }
 0x263   :  { %v7599_v6 = vadd.f32 %v2060_v62, %v2026_v9  ;;  %v1993_v4 = vpop.f32.mrf.mxu1  ;;  %2772 = vmatpush.msrb.mxu1 %v3890_v24  ;;  %2921 = vmatpush.msrb.mxu3 %v3916_v56  ;;  %v3869_v9 = vld [vmem:[%s8128_s0 + $0x1650] sm:$0xff] }
 0x264   :  { %2527 = vmatmul.f32.vlgmr.msra.gmra.mxu0 %v7044_v45  ;;  %v3889_v45 = vld [vmem:[%s8128_s0 + $0x16f0] sm:$0xff]  ;;  %v1994_v26 = vadd.f32 %v1993_v4, %v1959_v29  ;;  %3987 = vset.pattern.permute.xlu1 %v4091_v51 }
 0x265   :  { %v2076_v40 = vmax.f32 %v7307_v13, %v7599_v6  ;;  %2675 = vmatmul.f32.vlgmr.msra.gmra.mxu2 %v7343_v46  ;;  %2710 = vmatmul.f32.vlgmr.msra.gmra.mxu3 %v7061_v55  ;;  %v3872_v55 = vld [vmem:[%s8128_s0 + $0x1668] sm:$0xff]  ;;  %v3885_v8 = vld [vmem:[%s8128_s0 + $0x16d0] sm:$0xff] }
 0x266   :  { %3829 = vmatmul.msk.f32.vlgmr.msra.gmra.mxu1 %vm112_vm1, %v7628_v20  ;;  %2739 = vmatpush.msrb.mxu0 %v3872_v55  ;;  %v3868_v55 = vld [vmem:[%s8128_s0 + $0x1648] sm:$0xff] }
 0x267   :  { %2773 = vmatpush.msrb.mxu1 %v3889_v45  ;;  %2922 = vmatpush.msrb.mxu3 %v3915_v1  ;;  %v3911_v1 = vld [vmem:[%s8128_s0 + $0x1768] sm:$0xff] }
 0x268   :  { %v2028_v22 = vpop.f32.mrf.mxu2  ;;  %v2063_v28 = vpop.f32.mrf.mxu3  ;;  %2740 = vmatpush.msrb.mxu0 %v3871_v39  ;;  %v3977_v39 = vld [vmem:[%s8128_s0 + $0x1978] sm:$0xf]  ;;  %3101 = vperm.xlu0 %3986, %v3093_v12  }
 0x269   :  { %v2029_v63 = vadd.f32 %v2028_v22, %v1994_v26  ;;  %v1961_v43 = vpop.f32.mrf.mxu0  ;;  %2774 = vmatpush.msrb.mxu1 %v3888_v61  ;;  %2923 = vmatpush.msrb.mxu3 %v3914_v11  ;;  %v3867_v22 = vld [vmem:[%s8128_s0 + $0x1640] sm:$0xff] }
 0x26a   :  { %v1962_v5 = vadd.f32 %v1961_v43, %v7402_v30  ;;  %v3913_v30 = vld [vmem:[%s8128_s0 + $0x1778] sm:$0xff]  ;;  %v3883_v43 = vld [vmem:[%s8128_s0 + $0x16c0] sm:$0xff]  ;;  %3988 = vset.pattern.permute.xlu2 %v4091_v51 }
 0x26b   :  { %v7635_v14 = vadd.f32 %v2063_v28, %v2029_v63  ;;  %v1996_v57 = vpop.f32.mrf.mxu1  ;;  %2924 = vmatpush.msrb.mxu3 %v3913_v30  ;;  %2775 = vmatpush.msrb.mxu1 %v3887_v52  ;;  %v3910_v28 = vld [vmem:[%s8128_s0 + $0x1760] sm:$0xff] }
 0x26c   :  { %2530 = vmatmul.f32.gmra.mxu0 %v7089_v2  ;;  %v3870_v2 = vld [vmem:[%s8128_s0 + $0x1658] sm:$0xff]  ;;  %v1997_v62 = vadd.f32 %v1996_v57, %v1962_v5  ;;  %v3097_v51 = vld [vmem:[%s8130_s2 + $0x20] sm:$0xff] }
 0x26d   :  { %v2077_v21 = vmax.f32 %v7354_v33, %v7635_v14  ;;  %2678 = vmatmul.f32.gmra.mxu2 %v7390_v35  ;;  %2713 = vmatmul.f32.gmra.mxu3 %v7106_v38  ;;  %v3886_v38 = vld [vmem:[%s8128_s0 + $0x16d8] sm:$0xff] }
 0x26e   :  { %3830 = vmatmul.msk.f32.gmra.mxu1 %vm112_vm1, %v7667_v25  ;;  %2741 = vmatpush.msrb.mxu0 %v3870_v2  ;;  %v3941_v5 = vld [vmem:[%s8128_s0 + $0x1858] sm:$0xff] }
 0x26f   :  { %2925 = vmatpush.msrb.mxu3 %v3912_v27  ;;  %2776 = vmatpush.msrb.mxu1 %v3886_v38  ;;  %v3972_v27 = vld [vmem:[%s8128_s0 + $0x1950] sm:$0xff] }
 0x270   :  { %v2031_v60 = vpop.f32.mrf.mxu2  ;;  %v2066_v29 = vpop.f32.mrf.mxu3  ;;  %2742 = vmatpush.msrb.mxu0 %v3869_v9  ;;  %v3940_v38 = vld [vmem:[%s8128_s0 + $0x1850] sm:$0xff]  ;;  %3121 = vperm.xlu2 %3988, %v3097_v51  }
 0x271   :  { %v2032_v4 = vadd.f32 %v2031_v60, %v1997_v62  ;;  %v1964_v24 = vpop.f32.mrf.mxu0  ;;  %2777 = vmatpush.msrb.mxu1 %v3885_v8  ;;  %2926 = vmatpush.msrb.mxu3 %v3911_v1  ;;  %v3957_v62 = vld [vmem:[%s8128_s0 + $0x18d8] sm:$0xff] }
 0x272   :  { %v1965_v45 = vadd.f32 %v1964_v24, %v7450_v54  ;;  %v3884_v54 = vld [vmem:[%s8128_s0 + $0x16c8] sm:$0xff]  ;;  %2743 = vmatpush.msrb.mxu0 %v3868_v55  ;;  %v7755_v8 = vld [vmem:[%s8129_s1 + $0x98] sm:$0xff] }
 0x273   :  { %v7680_v56 = vadd.f32 %v2066_v29, %v2032_v4  ;;  %v1999_v26 = vpop.f32.mrf.mxu1  ;;  %2778 = vmatpush.msrb.mxu1 %v3884_v54  ;;  %2927 = vmatpush.msrb.mxu3 %v3910_v28  ;;  %v3956_v29 = vld [vmem:[%s8128_s0 + $0x18d0] sm:$0xff]  ;;  %v3970_v4 = vld [vmem:[%s8128_s0 + $0x1940] sm:$0xff] }
 0x274   :  { %2533 = vmatmul.f32.gmra.mxu0 %v7140_v41  ;;  %v3973_v41 = vld [vmem:[%s8128_s0 + $0x1958] sm:$0xff]  ;;  %v2000_v63 = vadd.f32 %v1999_v26, %v1965_v45  ;;  %v3954_v28 = vld [vmem:[%s8128_s0 + $0x18c0] sm:$0xff] }
 0x275   :  { %v2078_v61 = vmax.f32 %v7410_v49, %v7680_v56  ;;  %2681 = vmatmul.f32.gmra.mxu2 %v7440_v3  ;;  %2716 = vmatmul.f32.gmra.mxu3 %v7154_v34  ;;  %v7709_v34 = vld [vmem:[%s8129_s1 + $0x70] sm:$0xff]  ;;  %v3096_v56 = vld [vmem:[%s8130_s2 + $0x18] sm:$0xff] }
 0x276   :  { %3831 = vmatmul.msk.f32.gmra.mxu1 %vm112_vm1, %v7709_v34  ;;  %3017 = vmatpush.msra.mxu2 %v3973_v41  ;;  %v3969_v41 = vld [vmem:[%s8128_s0 + $0x1938] sm:$0xff] }
 0x277   :  { %2744 = vmatpush.msrb.mxu0 %v3867_v22  ;;  %2779 = vmatpush.msrb.mxu1 %v3883_v43  ;;  %v3938_v22 = vld [vmem:[%s8128_s0 + $0x1840] sm:$0xff]  ;;  %v3976_v43 = vld [vmem:[%s8128_s0 + $0x1970] sm:$0xff] }
 0x278   :  { %v2034_v11 = vpop.f32.mrf.mxu2  ;;  %v2069_v18 = vpop.f32.mrf.mxu3  ;;  %3978 = vmatpush.msk.msra.mxu3 %vm131_vm0, %v3977_v39  ;;  %3018 = vmatpush.msra.mxu2 %v3972_v27  ;;  %v3937_v39 = vld [vmem:[%s8128_s0 + $0x1838] sm:$0xff] }
 0x279   :  { %v2035_v57 = vadd.f32 %v2034_v11, %v2000_v63  ;;  %v1967_v30 = vpop.f32.mrf.mxu0  ;;  %2947 = vmatpush.msra.mxu0 %v3941_v5  ;;  %2982 = vmatpush.msra.mxu1 %v3957_v62  ;;  %v3968_v11 = vld [vmem:[%s8128_s0 + $0x1930] sm:$0xff] }
 0x27a   :  { %v1968_v2 = vadd.f32 %v1967_v30, %v7494_v37  ;;  %v3971_v37 = vld [vmem:[%s8128_s0 + $0x1948] sm:$0xff]  ;;  %v7793_v30 = vld [vmem:[%s8129_s1 + $0xc0] sm:$0xff]  ;;  %3065 = vmatpush.msra.mxu3 %v3976_v43 }
 0x27b   :  { %v7723_v52 = vadd.f32 %v2069_v18, %v2035_v57  ;;  %v2002_v9 = vpop.f32.mrf.mxu1  ;;  %2948 = vmatpush.msra.mxu0 %v3940_v38  ;;  %3019 = vmatpush.msra.mxu2 %v3971_v37  ;;  %v3953_v18 = vld [vmem:[%s8128_s0 + $0x18b8] sm:$0xff] }
 0x27c   :  { %2536 = vmatmul.f32.gmra.mxu0 %v7185_v31  ;;  %v3939_v31 = vld [vmem:[%s8128_s0 + $0x1848] sm:$0xff]  ;;  %v2003_v24 = vadd.f32 %v2002_v9, %v1968_v2  ;;  %2983 = vmatpush.msra.mxu1 %v3956_v29  ;;  %v3952_v29 = vld [vmem:[%s8128_s0 + $0x18b0] sm:$0xff] }
 0x27d   :  { %v2079_v60 = vmax.f32 %v7455_v50, %v7723_v52  ;;  %2684 = vmatmul.f32.gmra.mxu2 %v7488_v23  ;;  %2719 = vmatmul.f32.gmra.mxu3 %v7203_v42  ;;  %v3955_v42 = vld [vmem:[%s8128_s0 + $0x18c8] sm:$0xff] }
 0x27e   :  { %3832 = vmatmul.msk.f32.gmra.mxu1 %vm112_vm1, %v7755_v8  ;;  %2949 = vmatpush.msra.mxu0 %v3939_v31  ;;  %v3967_v2 = vld [vmem:[%s8128_s0 + $0x1928] sm:$0xff] }
 0x27f   :  { %3020 = vmatpush.msra.mxu2 %v3970_v4  ;;  %2984 = vmatpush.msra.mxu1 %v3955_v42  ;;  %v3935_v31 = vld [vmem:[%s8128_s0 + $0x1828] sm:$0xff]  ;;  %v3966_v4 = vld [vmem:[%s8128_s0 + $0x1920] sm:$0xff] }
 0x280   :  { %v2037_v45 = vpop.f32.mrf.mxu2  ;;  %v2072_v55 = vpop.f32.mrf.mxu3  ;;  %2950 = vmatpush.msra.mxu0 %v3938_v22  ;;  %v3951_v42 = vld [vmem:[%s8128_s0 + $0x18a8] sm:$0xff] }
 0x281   :  { %v2038_v1 = vadd.f32 %v2037_v45, %v2003_v24  ;;  %v2170_v26 = vpop.f32.mrf.mxu0  ;;  %3021 = vmatpush.msra.mxu2 %v3969_v41  ;;  %2985 = vmatpush.msra.mxu1 %v3954_v28  ;;  %v3934_v45 = vld [vmem:[%s8128_s0 + $0x1820] sm:$0xff]  ;;  %v3975_v22 = vld [vmem:[%s8128_s0 + $0x1968] sm:$0xff] }
 0x282   :  { %2951 = vmatpush.msra.mxu0 %v3937_v39  ;;  %3066 = vmatpush.msra.mxu3 %v3975_v22  ;;  %v3974_v22 = vld [vmem:[%s8128_s0 + $0x1960] sm:$0xff] }
 0x283   :  { %v7762_v54 = vadd.f32 %v2072_v55, %v2038_v1  ;;  %v2205_v63 = vpop.f32.mrf.mxu1  ;;  %3022 = vmatpush.msra.mxu2 %v3968_v11  ;;  %2986 = vmatpush.msra.mxu1 %v3953_v18  ;;  %v3965_v55 = vld [vmem:[%s8128_s0 + $0x1918] sm:$0xff]  ;;  %v3964_v11 = vld [vmem:[%s8128_s0 + $0x1910] sm:$0xff] }
 0x284   :  { %2539 = vmatmul.f32.gmra.mxu0 %v7229_v19  ;;  %v2206_v57 = vadd.f32 %v2205_v63, %v2170_v26  ;;  %v3933_v26 = vld [vmem:[%s8128_s0 + $0x1818] sm:$0xff]  ;;  %3067 = vmatpush.msra.mxu3 %v3974_v22 }
 0x285   :  { %v2080_v5 = vmax.f32 %v7499_v48, %v7762_v54  ;;  %2687 = vmatmul.f32.gmra.mxu2 %v7532_v36  ;;  %2722 = vmatmul.f32.gmra.mxu3 %v7247_v53  ;;  %v3936_v53 = vld [vmem:[%s8128_s0 + $0x1830] sm:$0xff]  ;;  %v3949_v18 = vld [vmem:[%s8128_s0 + $0x1898] sm:$0xff] }
 0x286   :  { %3833 = vmatmul.msk.f32.gmra.mxu1 %vm112_vm1, %v7793_v30  ;;  %2952 = vmatpush.msra.mxu0 %v3936_v53  ;;  %v3932_v53 = vld [vmem:[%s8128_s0 + $0x1810] sm:$0xff] }
 0x287   :  { %3023 = vmatpush.msra.mxu2 %v3967_v2  ;;  %2987 = vmatpush.msra.mxu1 %v3952_v29  ;;  %v3963_v2 = vld [vmem:[%s8128_s0 + $0x1908] sm:$0xff]  ;;  %v7867_v29 = vld [vmem:[%s8129_s1 + $0x18] sm:$0xff] }
 0x288   :  { %v2240_v27 = vpop.f32.mrf.mxu2  ;;  %v2275_v62 = vpop.f32.mrf.mxu3  ;;  %2953 = vmatpush.msra.mxu0 %v3935_v31 }
 0x289   :  { %v2241_v38 = vadd.f32 %v2240_v27, %v2206_v57  ;;  %v2173_v9 = vpop.f32.mrf.mxu0  ;;  %3024 = vmatpush.msra.mxu2 %v3966_v4  ;;  %2988 = vmatpush.msra.mxu1 %v3951_v42  ;;  %v3948_v27 = vld [vmem:[%s8128_s0 + $0x1890] sm:$0xff] }
 0x28a   :  { %2954 = vmatpush.msra.mxu0 %v3934_v45 }
 0x28b   :  { %v7803_v37 = vadd.f32 %v2275_v62, %v2241_v38  ;;  %v2208_v24 = vpop.f32.mrf.mxu1  ;;  %3025 = vmatpush.msra.mxu2 %v3965_v55  ;;  %v3931_v62 = vld [vmem:[%s8128_s0 + $0x1808] sm:$0xff]  ;;  %v3962_v38 = vld [vmem:[%s8128_s0 + $0x1900] sm:$0xff] }
 0x28c   :  { %2542 = vmatmul.f32.gmra.mxu0 %v7278_v17  ;;  %v2209_v1 = vadd.f32 %v2208_v24, %v2173_v9  ;;  %v3930_v55 = vld [vmem:[%s8128_s0 + $0x1800] sm:$0xff] }
 0x28d   :  { %2690 = vmatmul.f32.gmra.mxu2 %v7584_v59  ;;  %2725 = vmatmul.f32.gmra.mxu3 %v7293_v44  ;;  %v3950_v44 = vld [vmem:[%s8128_s0 + $0x18a0] sm:$0xff] }
 0x28e   :  { %3834 = vmatmul.msk.f32.gmra.mxu1 %vm112_vm1, %v7550_v47  ;;  %2955 = vmatpush.msra.mxu0 %v3933_v26  ;;  %v3946_v26 = vld [vmem:[%s8128_s0 + $0x1880] sm:$0xff] }
 0x28f   :  { %2989 = vmatpush.msra.mxu1 %v3950_v44  ;;  %3026 = vmatpush.msra.mxu2 %v3964_v11  ;;  %v7903_v11 = vld [vmem:[%s8129_s1 + $0x40] sm:$0xff] }
 0x290   :  { %v2243_v41 = vpop.f32.mrf.mxu2  ;;  %v2278_v28 = vpop.f32.mrf.mxu3  ;;  %2956 = vmatpush.msra.mxu0 %v3932_v53 }
 0x291   :  { %v2244_v63 = vadd.f32 %v2243_v41, %v2209_v1  ;;  %v2176_v43 = vpop.f32.mrf.mxu0  ;;  %2990 = vmatpush.msra.mxu1 %v3949_v18  ;;  %3027 = vmatpush.msra.mxu2 %v3963_v2  ;;  %v3961_v1 = vld [vmem:[%s8128_s0 + $0x18f8] sm:$0xff]  ;;  %v3959_v18 = vld [vmem:[%s8128_s0 + $0x18e8] sm:$0xff] }
 0x292   :  { %2957 = vmatpush.msra.mxu0 %v3931_v62  ;;  %v3929_v41 = vld [vmem:[%s8128_s0 + $0x17f8] sm:$0xff]  ;;  %v3944_v62 = vld [vmem:[%s8128_s0 + $0x1870] sm:$0xff] }
 0x293   :  { %v7837_v39 = vadd.f32 %v2278_v28, %v2244_v63  ;;  %v2211_v57 = vpop.f32.mrf.mxu1  ;;  %2991 = vmatpush.msra.mxu1 %v3948_v27  ;;  %3028 = vmatpush.msra.mxu2 %v3962_v38  ;;  %v3960_v28 = vld [vmem:[%s8128_s0 + $0x18f0] sm:$0xff]  ;;  %v3945_v63 = vld [vmem:[%s8128_s0 + $0x1878] sm:$0xff] }
 0x294   :  { %2745 = vmatmul.f32.vlgmr.msrb.gmra.mxu0 %v7328_v16  ;;  %v2212_v9 = vadd.f32 %v2211_v57, %v2176_v43 }
 0x295   :  { %3904 = vmatmul.msk.f32.vlgmr.msrb.gmra.mxu2 %vm112_vm1, %v7628_v20  ;;  %2928 = vmatmul.f32.vlgmr.msrb.gmra.mxu3 %v7343_v46  ;;  %v3947_v46 = vld [vmem:[%s8128_s0 + $0x1888] sm:$0xff] }
 0x296   :  { %2780 = vmatmul.f32.vlgmr.msrb.gmra.mxu1 %v7867_v29  ;;  %3029 = vmatpush.msra.mxu2 %v3961_v1  ;;  %v7939_v1 = vld [vmem:[%s8129_s1 + $0x68] sm:$0xff] }
 0x297   :  { %2992 = vmatpush.msra.mxu1 %v3947_v46  ;;  %2958 = vmatpush.msra.mxu0 %v3930_v55  ;;  %v3958_v46 = vld [vmem:[%s8128_s0 + $0x18e0] sm:$0xff] }
 0x298   :  { %v2246_v31 = vpop.f32.mrf.mxu2  ;;  %v2281_v4 = vpop.f32.mrf.mxu3  ;;  %3030 = vmatpush.msra.mxu2 %v3960_v28 }
 0x299   :  { %v2247_v24 = vadd.f32 %v2246_v31, %v2212_v9  ;;  %v2179_v42 = vpop.f32.mrf.mxu0  ;;  %2993 = vmatpush.msra.mxu1 %v3946_v26  ;;  %2959 = vmatpush.msra.mxu0 %v3929_v41  ;;  %v3927_v9 = vld [vmem:[%s8128_s0 + $0x17e8] sm:$0xff] }
 0x29a   :  { %3031 = vmatpush.msra.mxu2 %v3959_v18  ;;  %v3943_v31 = vld [vmem:[%s8128_s0 + $0x1868] sm:$0xff] }
 0x29b   :  { %v7873_v45 = vadd.f32 %v2281_v4, %v2247_v24  ;;  %v2214_v44 = vpop.f32.mrf.mxu1  ;;  %2994 = vmatpush.msra.mxu1 %v3945_v63  ;;  %v3926_v24 = vld [vmem:[%s8128_s0 + $0x17e0] sm:$0xff] }
 0x29c   :  { %2748 = vmatmul.f32.gmra.mxu0 %v7369_v7  ;;  %v2215_v43 = vadd.f32 %v2214_v44, %v2179_v42  ;;  %3032 = vmatpush.msra.mxu2 %v3958_v46  ;;  %v3942_v42 = vld [vmem:[%s8128_s0 + $0x1860] sm:$0xff] }
 0x29d   :  { %3905 = vmatmul.msk.f32.gmra.mxu2 %vm112_vm1, %v7667_v25  ;;  %2931 = vmatmul.f32.gmra.mxu3 %v7390_v35  ;;  %v3928_v35 = vld [vmem:[%s8128_s0 + $0x17f0] sm:$0xff] }
 0x29e   :  { %2783 = vmatmul.f32.gmra.mxu1 %v7903_v11  ;;  %2960 = vmatpush.msra.mxu0 %v3928_v35 }
 0x29f   :  { %2995 = vmatpush.msra.mxu1 %v3944_v62 }
 0x2a0   :  { %v2249_v57 = vpop.f32.mrf.mxu2  ;;  %v2284_v53 = vpop.f32.mrf.mxu3  ;;  %2961 = vmatpush.msra.mxu0 %v3927_v9 }
 0x2a1   :  { %v2250_v2 = vadd.f32 %v2249_v57, %v2215_v43  ;;  %v2182_v27 = vpop.f32.mrf.mxu0  ;;  %2996 = vmatpush.msra.mxu1 %v3943_v31  ;;  %v7951_v43 = vld [vmem:[%s8129_s1 + $0x90] sm:$0xff] }
 0x2a2   :  { %2962 = vmatpush.msra.mxu0 %v3926_v24 }
 0x2a3   :  { %v7915_v38 = vadd.f32 %v2284_v53, %v2250_v2  ;;  %v2217_v4 = vpop.f32.mrf.mxu1  ;;  %2997 = vmatpush.msra.mxu1 %v3942_v42 }
 0x2a4   :  { %2751 = vmatmul.f32.gmra.mxu0 %v7428_v58  ;;  %v2218_v55 = vadd.f32 %v2217_v4, %v2182_v27 }
 0x2a5   :  { %3906 = vmatmul.msk.f32.gmra.mxu2 %vm112_vm1, %v7709_v34  ;;  %2934 = vmatmul.f32.gmra.mxu3 %v7440_v3 }
 0x2a6   :  { %2786 = vmatmul.f32.gmra.mxu1 %v7939_v1 }
 0x2a8   :  { %v2252_v44 = vpop.f32.mrf.mxu2  ;;  %v2287_v3 = vpop.f32.mrf.mxu3 }
 0x2a9   :  { %v2253_v26 = vadd.f32 %v2252_v44, %v2218_v55  ;;  %v2185_v22 = vpop.f32.mrf.mxu0 }
 0x2ab   :  { %v7942_v41 = vadd.f32 %v2287_v3, %v2253_v26  ;;  %v2220_v28 = vpop.f32.mrf.mxu1 }
 0x2ac   :  { %2754 = vmatmul.f32.gmra.mxu0 %v7464_v0  ;;  %v2221_v63 = vadd.f32 %v2220_v28, %v2185_v22 }
 0x2ad   :  { %3907 = vmatmul.msk.f32.gmra.mxu2 %vm112_vm1, %v7755_v8  ;;  %2937 = vmatmul.f32.gmra.mxu3 %v7488_v23 }
 0x2ae   :  { %2789 = vmatmul.f32.gmra.mxu1 %v7951_v43 }
 0x2b0   :  { %v2255_v35 = vpop.f32.mrf.mxu2  ;;  %v2290_v18 = vpop.f32.mrf.mxu3 }
 0x2b1   :  { %v2256_v57 = vadd.f32 %v2255_v35, %v2221_v63  ;;  %v2310_v53 = vpop.f32.mrf.mxu0 }
 0x2b2   :  { %v2311_v2 = vadd.f32 %v2310_v53, %v7803_v37 }
 0x2b3   :  { %v7955_v27 = vadd.f32 %v2290_v18, %v2256_v57  ;;  %v2423_v62 = vpop.f32.mrf.mxu1 }
 0x2b4   :  { %v7960_v23 = vmax.f32 %v2075_v10, %v2311_v2  ;;  %2757 = vmatmul.f32.gmra.mxu0 %v7508_v32 }
 0x2b5   :  { %3908 = vmatmul.msk.f32.gmra.mxu2 %vm112_vm1, %v7793_v30  ;;  %2940 = vmatmul.f32.gmra.mxu3 %v7532_v36 }
 0x2b6   :  { %2792 = vmatmul.f32.gmra.mxu1 %v7229_v19 }
 0x2b8   :  { %v2458_v9 = vpop.f32.mrf.mxu2  ;;  %v2493_v46 = vpop.f32.mrf.mxu3 }
 0x2b9   :  { %v2459_v37 = vadd.f32 %v2458_v9, %v2423_v62  ;;  %v2313_v31 = vpop.f32.mrf.mxu0  ;;  %v4087_v9 = vld [vmem:[%s8129_s1 + $0xa8] sm:$0xff] }
 0x2ba   :  { %v2314_v4 = vadd.f32 %v2313_v31, %v7837_v39 }
 0x2bb   :  { %v7968_v24 = vadd.f32 %v2493_v46, %v2459_v37  ;;  %v2426_v19 = vpop.f32.mrf.mxu1 }
 0x2bc   :  { %v7976_v36 = vmax.f32 %v2076_v40, %v2314_v4  ;;  %2760 = vmatmul.f32.gmra.mxu0 %v7560_v15  ;;  %v3094_v40 = vld [vmem:[%s8130_s2 + $0x8] sm:$0xff] }
 0x2bd   :  { %3909 = vmatmul.msk.f32.gmra.mxu2 %vm112_vm1, %v7550_v47  ;;  %2943 = vmatmul.f32.gmra.mxu3 %v7584_v59 }
 0x2be   :  { %2795 = vmatmul.f32.gmra.mxu1 %v7278_v17  ;;  %v4083_v17 = vld [vmem:[%s8129_s1 + $0x8] sm:$0xff]  ;;  %3106 = vperm.xlu0 %3986, %v3094_v40  }
 0x2bf   :  { %v3098_v40 = vld [vmem:[%s8130_s2 + $0x28] sm:$0x1f] }
 0x2c0   :  { %v2461_v10 = vpop.f32.mrf.mxu2  ;;  %v2496_v39 = vpop.f32.mrf.mxu3  ;;  %3126 = vperm.xlu2 %3988, %v3098_v40  }
 0x2c1   :  { %v2462_v42 = vadd.f32 %v2461_v10, %v2426_v19  ;;  %v2316_v55 = vpop.f32.mrf.mxu0 }
 0x2c2   :  { %v2317_v13 = vadd.f32 %v2316_v55, %v7873_v45 }
 0x2c3   :  { %v7984_v6 = vadd.f32 %v2496_v39, %v2462_v42  ;;  %v2429_v59 = vpop.f32.mrf.mxu1 }
 0x2c4   :  { %v7992_v44 = vmax.f32 %v2077_v21, %v2317_v13  ;;  %2963 = vmatmul.f32.vlgmr.msra.gmra.mxu0 %v4083_v17  ;;  %v3095_v21 = vld [vmem:[%s8130_s2 + $0x10] sm:$0xff] }
 0x2c5   :  { %3033 = vmatmul.f32.vlgmr.msra.gmra.mxu2 %v7867_v29  ;;  %3979 = vmatmul.msk.f32.vlgmr.msra.gmra.mxu3 %vm112_vm1, %v7628_v20 }
 0x2c6   :  { %2998 = vmatmul.f32.vlgmr.msra.gmra.mxu1 %v7328_v16  ;;  %3111 = vperm.xlu1 %3987, %v3095_v21   ;;  %v4084_v16 = vld [vmem:[%s8129_s1 + $0x30] sm:$0xff] }
 0x2c8   :  { %v2464_v45 = vpop.f32.mrf.mxu2  ;;  %v2499_v3 = vpop.f32.mrf.mxu3 }
 0x2c9   :  { %v2465_v26 = vadd.f32 %v2464_v45, %v2429_v59  ;;  %v2319_v33 = vpop.f32.mrf.mxu0 }
 0x2ca   :  { %v2320_v14 = vadd.f32 %v2319_v33, %v7915_v38 }
 0x2cb   :  { %v8005_v22 = vadd.f32 %v2499_v3, %v2465_v26  ;;  %v2432_v20 = vpop.f32.mrf.mxu1 }
 0x2cc   :  { %v8010_v29 = vmax.f32 %v2078_v61, %v2320_v14  ;;  %2966 = vmatmul.f32.gmra.mxu0 %v4084_v16 }
 0x2cd   :  { %3036 = vmatmul.f32.gmra.mxu2 %v7903_v11  ;;  %3980 = vmatmul.msk.f32.gmra.mxu3 %vm112_vm1, %v7667_v25 }
 0x2ce   :  { %3001 = vmatmul.f32.gmra.mxu1 %v7369_v7  ;;  %3116 = vperm.xlu1 %3987, %v3096_v56   ;;  %v4085_v7 = vld [vmem:[%s8129_s1 + $0x58] sm:$0xff] }
 0x2d0   :  { %v2467_v38 = vpop.f32.mrf.mxu2  ;;  %v2502_v28 = vpop.f32.mrf.mxu3 }
 0x2d1   :  { %v2468_v63 = vadd.f32 %v2467_v38, %v2432_v20  ;;  %v2322_v35 = vpop.f32.mrf.mxu0 }
 0x2d2   :  { %v2323_v49 = vadd.f32 %v2322_v35, %v7942_v41 }
 0x2d3   :  { %v8023_v61 = vadd.f32 %v2502_v28, %v2468_v63  ;;  %v2435_v25 = vpop.f32.mrf.mxu1 }
 0x2d4   :  { %v8028_v11 = vmax.f32 %v2079_v60, %v2323_v49  ;;  %2969 = vmatmul.f32.gmra.mxu0 %v4085_v7 }
 0x2d5   :  { %3039 = vmatmul.f32.gmra.mxu2 %v7939_v1  ;;  %3981 = vmatmul.msk.f32.gmra.mxu3 %vm112_vm1, %v7709_v34  ;;  %v4086_v1 = vld [vmem:[%s8129_s1 + $0x80] sm:$0xff] }
 0x2d6   :  { %3004 = vmatmul.f32.gmra.mxu1 %v7428_v58 }
 0x2d8   :  { %v2470_v41 = vpop.f32.mrf.mxu2  ;;  %v2505_v18 = vpop.f32.mrf.mxu3 }
 0x2d9   :  { %v2471_v57 = vadd.f32 %v2470_v41, %v2435_v25  ;;  %v2325_v53 = vpop.f32.mrf.mxu0 }
 0x2da   :  { %v2326_v50 = vadd.f32 %v2325_v53, %v7955_v27 }
 0x2db   :  { %v2506_v52 = vadd.f32 %v2505_v18, %v2471_v57  ;;  %v2438_v2 = vpop.f32.mrf.mxu1 }
 0x2dc   :  { %v8041_v60 = vmax.f32 %v2080_v5, %v2326_v50  ;;  %2972 = vmatmul.f32.gmra.mxu0 %v4086_v1 }
 0x2dd   :  { %3042 = vmatmul.f32.gmra.mxu2 %v7951_v43  ;;  %3982 = vmatmul.msk.f32.gmra.mxu3 %vm112_vm1, %v7755_v8  ;;  %v4088_v8 = vld [vmem:[%s8129_s1 + $0xb8] sm:$0xff] }
 0x2de   :  { %3007 = vmatmul.f32.gmra.mxu1 %v7464_v0 }
 0x2e0   :  { %v2473_v58 = vpop.f32.mrf.mxu2  ;;  %v2508_v34 = vpop.f32.mrf.mxu3 }
 0x2e1   :  { %v2474_v27 = vadd.f32 %v2473_v58, %v2438_v2  ;;  %v2528_v62 = vpop.f32.mrf.mxu0 }
 0x2e2   :  { %v2529_v48 = vadd.f32 %v2528_v62, %v7968_v24 }
 0x2e3   :  { %v2509_v54 = vadd.f32 %v2508_v34, %v2474_v27  ;;  %v2563_v5 = vpop.f32.mrf.mxu1 }
 0x2e4   :  { %2975 = vmatmul.f32.gmra.mxu0 %v4087_v9  ;;  %v8054_v46 = vadd.f32 %v2563_v5, %v2529_v48 }
 0x2e5   :  { %3045 = vmatmul.f32.gmra.mxu2 %v4088_v8  ;;  %3983 = vmatmul.msk.f32.gmra.mxu3 %vm112_vm1, %v7793_v30  ;;  %v4089_v30 = vld [vmem:[%s8129_s1 + $0xd0] sm:$0x1f] }
 0x2e6   :  { %v2581_v0 = vmax.f32 %v7960_v23, %v8054_v46  ;;  %3010 = vmatmul.f32.gmra.mxu1 %v7508_v32  ;;  %v4090_v32 = vld [vmem:[%s8129_s1 + $0xe0] sm:$0x1f] }
 0x2e8   :  { %v2676_v43 = vpop.f32.mrf.mxu2  ;;  %v2711_v37 = vpop.f32.mrf.mxu3 }
 0x2e9   :  { %v2712_v31 = vadd.f32 %v2711_v37, %v2676_v43  ;;  %v2531_v4 = vpop.f32.mrf.mxu0 }
 0x2ea   :  { %v2532_v24 = vadd.f32 %v2531_v4, %v7984_v6 }
 0x2eb   :  { %v2566_v12 = vpop.f32.mrf.mxu1 }
 0x2ec   :  { %2978 = vmatmul.f32.gmra.mxu0 %v4089_v30  ;;  %v2567_v19 = vadd.f32 %v2566_v12, %v2532_v24 }
 0x2ed   :  { %3048 = vmatmul.f32.gmra.mxu2 %v4090_v32  ;;  %3984 = vmatmul.msk.f32.gmra.mxu3 %vm112_vm1, %v7550_v47 }
 0x2ee   :  { %v2582_v10 = vmax.f32 %v7976_v36, %v2567_v19  ;;  %3013 = vmatmul.f32.gmra.mxu1 %v7560_v15 }
 0x2f0   :  { %v2679_v39 = vpop.f32.mrf.mxu2  ;;  %v2714_v42 = vpop.f32.mrf.mxu3 }
 0x2f1   :  { %v2715_v55 = vadd.f32 %v2714_v42, %v2679_v39  ;;  %v2534_v13 = vpop.f32.mrf.mxu0 }
 0x2f2   :  { %v2535_v6 = vadd.f32 %v2534_v13, %v8005_v22 }
 0x2f3   :  { %v2569_v59 = vpop.f32.mrf.mxu1 }
 0x2f4   :  { %v2570_v17 = vadd.f32 %v2569_v59, %v2535_v6 }
 0x2f6   :  { %v2583_v45 = vmax.f32 %v7992_v44, %v2570_v17 }
 0x2f8   :  { %v2682_v47 = vpop.f32.mrf.mxu2  ;;  %v2717_v3 = vpop.f32.mrf.mxu3 }
 0x2f9   :  { %v2718_v36 = vadd.f32 %v2717_v3, %v2682_v47  ;;  %v2537_v26 = vpop.f32.mrf.mxu0 }
 0x2fa   :  { %v2538_v15 = vadd.f32 %v2537_v26, %v8023_v61 }
 0x2fb   :  { %v2572_v33 = vpop.f32.mrf.mxu1 }
 0x2fc   :  { %v2573_v14 = vadd.f32 %v2572_v33, %v2538_v15 }
 0x2fe   :  { %v2584_v21 = vmax.f32 %v8010_v29, %v2573_v14 }
 0x300   :  { %v2685_v22 = vpop.f32.mrf.mxu2  ;;  %v2720_v20 = vpop.f32.mrf.mxu3 }
 0x301   :  { %v2721_v16 = vadd.f32 %v2720_v20, %v2685_v22  ;;  %v2540_v38 = vpop.f32.mrf.mxu0 }
 0x302   :  { %v2541_v28 = vadd.f32 %v2540_v38, %v2506_v52 }
 0x303   :  { %v2575_v63 = vpop.f32.mrf.mxu1 }
 0x304   :  { %v2576_v35 = vadd.f32 %v2575_v63, %v2541_v28 }
 0x306   :  { %v2585_v49 = vmax.f32 %v8028_v11, %v2576_v35 }
 0x308   :  { %v2688_v44 = vpop.f32.mrf.mxu2  ;;  %v2723_v56 = vpop.f32.mrf.mxu3 }
 0x309   :  { %v2724_v25 = vadd.f32 %v2723_v56, %v2688_v44  ;;  %v2543_v7 = vpop.f32.mrf.mxu0 }
 0x30a   :  { %v2544_v41 = vadd.f32 %v2543_v7, %v2509_v54 }
 0x30b   :  { %v2578_v18 = vpop.f32.mrf.mxu1 }
 0x30c   :  { %v2579_v61 = vadd.f32 %v2578_v18, %v2544_v41  ;;  %v3102_v41 = vpop.permute.xlu0 %3101 }
 0x30e   :  { %v2586_v57 = vmax.f32 %v8041_v60, %v2579_v61 }
 0x310   :  { %v2691_v53 = vpop.f32.mrf.mxu2  ;;  %v2726_v29 = vpop.f32.mrf.mxu3 }
 0x311   :  { %v2727_v50 = vadd.f32 %v2726_v29, %v2691_v53  ;;  %v2746_v2 = vpop.f32.mrf.mxu0 }
 0x312   :  { %v2747_v1 = vadd.f32 %v2746_v2, %v2712_v31 }
 0x313   :  { %v2781_v58 = vpop.f32.mrf.mxu1 }
 0x314   :  { %v2782_v52 = vadd.f32 %v2781_v58, %v2747_v1 }
 0x318   :  { %v2816_v34 = vpop.f32.mrf.mxu2  ;;  %v2929_v27 = vpop.f32.mrf.mxu3 }
 0x319   :  { %v2817_v62 = vadd.f32 %v2816_v34, %v2782_v52  ;;  %v2749_v11 = vpop.f32.mrf.mxu0 }
 0x31a   :  { %v2750_v54 = vadd.f32 %v2749_v11, %v2715_v55 }
 0x31b   :  { %v2834_v48 = vmax.f32 %v2581_v0, %v2817_v62  ;;  %v2784_v5 = vpop.f32.mrf.mxu1 }
 0x31c   :  { %v2785_v9 = vadd.f32 %v2784_v5, %v2750_v54 }
 0x320   :  { %v2819_v8 = vpop.f32.mrf.mxu2  ;;  %v2932_v60 = vpop.f32.mrf.mxu3 }
 0x321   :  { %v2820_v43 = vadd.f32 %v2819_v8, %v2785_v9  ;;  %v2752_v37 = vpop.f32.mrf.mxu0 }
 0x322   :  { %v2753_v24 = vadd.f32 %v2752_v37, %v2718_v36 }
 0x323   :  { %v2835_v4 = vmax.f32 %v2582_v10, %v2820_v43  ;;  %v2787_v31 = vpop.f32.mrf.mxu1 }
 0x324   :  { %v2788_v51 = vadd.f32 %v2787_v31, %v2753_v24 }
 0x328   :  { %v2822_v12 = vpop.f32.mrf.mxu2  ;;  %v2935_v30 = vpop.f32.mrf.mxu3 }
 0x329   :  { %v2823_v19 = vadd.f32 %v2822_v12, %v2788_v51  ;;  %v2755_v32 = vpop.f32.mrf.mxu0 }
 0x32a   :  { %v2756_v42 = vadd.f32 %v2755_v32, %v2721_v16 }
 0x32b   :  { %v8090_v39 = vmax.f32 %v2583_v45, %v2823_v19  ;;  %v2790_v23 = vpop.f32.mrf.mxu1 }
 0x32c   :  { %v2791_v46 = vadd.f32 %v2790_v23, %v2756_v42 }
 0x330   :  { %v2825_v0 = vpop.f32.mrf.mxu2  ;;  %v2938_v55 = vpop.f32.mrf.mxu3 }
 0x331   :  { %v2826_v13 = vadd.f32 %v2825_v0, %v2791_v46  ;;  %v2758_v6 = vpop.f32.mrf.mxu0  ;;  %v3107_v11 = vpop.permute.xlu0 %3106 }
 0x332   :  { %v2759_v59 = vadd.f32 %v2758_v6, %v2724_v25 }
 0x333   :  { %v8092_v40 = vmax.f32 %v2584_v21, %v2826_v13  ;;  %v2793_v10 = vpop.f32.mrf.mxu1 }
 0x334   :  { %v2794_v17 = vadd.f32 %v2793_v10, %v2759_v59 }
 0x338   :  { %v2828_v47 = vpop.f32.mrf.mxu2  ;;  %v2941_v3 = vpop.f32.mrf.mxu3 }
 0x339   :  { %v2829_v36 = vadd.f32 %v2828_v47, %v2794_v17  ;;  %v2761_v26 = vpop.f32.mrf.mxu0  ;;  %v3112_v24 = vpop.permute.xlu1 %3111 }
 0x33a   :  { %v2762_v45 = vadd.f32 %v2761_v26, %v2727_v50 }
 0x33b   :  { %v8094_v15 = vmax.f32 %v2585_v49, %v2829_v36  ;;  %v2796_v33 = vpop.f32.mrf.mxu1 }
 0x33c   :  { %v2797_v14 = vadd.f32 %v2796_v33, %v2762_v45 }
 0x340   :  { %v2831_v22 = vpop.f32.mrf.mxu2  ;;  %v8096_v20 = vpop.f32.mrf.mxu3 }
 0x341   :  { %v2832_v16 = vadd.f32 %v2831_v22, %v2797_v14  ;;  %v2964_v38 = vpop.f32.mrf.mxu0  ;;  %v3122_v22 = vpop.permute.xlu2 %3121 }
 0x342   :  { %v2965_v21 = vadd.f32 %v2964_v38, %v2929_v27 }
 0x343   :  { %v8098_v28 = vmax.f32 %v2586_v57, %v2832_v16  ;;  %v2999_v63 = vpop.f32.mrf.mxu1 }
 0x344   :  { %v3000_v35 = vadd.f32 %v2999_v63, %v2965_v21 }
 0x348   :  { %v3034_v44 = vpop.f32.mrf.mxu2  ;;  %v3069_v56 = vpop.f32.mrf.mxu3 }
 0x349   :  { %v3035_v25 = vadd.f32 %v3034_v44, %v3000_v35  ;;  %v2967_v7 = vpop.f32.mrf.mxu0 }
 0x34a   :  { %v2968_v49 = vadd.f32 %v2967_v7, %v2932_v60 }
 0x34b   :  { %v3070_v18 = vadd.f32 %v3069_v56, %v3035_v25  ;;  %v3002_v61 = vpop.f32.mrf.mxu1 }
 0x34c   :  { %v3003_v29 = vadd.f32 %v3002_v61, %v2968_v49 }
 0x34d   :  { %v3087_v53 = vmax.f32 %v2834_v48, %v3070_v18 }
 0x34f   :  { %v3129_v50 = vadd.f32 %v3102_v41, %v3087_v53 }
 0x350   :  { %v3037_v2 = vpop.f32.mrf.mxu2  ;;  %v3072_v1 = vpop.f32.mrf.mxu3 }
 0x351   :  { %v3135_v58 = vmax.f32 %v3129_v50, 0.0  ;;  %v3038_v57 = vadd.f32 %v3037_v2, %v3003_v29  ;;  %v2970_v52 = vpop.f32.mrf.mxu0 }
 0x352   :  { %v2971_v34 = vadd.f32 %v2970_v52, %v2935_v30 }
 0x353   :  { %3142 = vst.msk [vmem:[%s8131_s3] sm:$0xff] %vm3141_vm2, %v3135_v58  ;;  %v3073_v27 = vadd.f32 %v3072_v1, %v3038_v57  ;;  %v3005_v62 = vpop.f32.mrf.mxu1 }
 0x354   :  { %v3006_v5 = vadd.f32 %v3005_v62, %v2971_v34 }
 0x355   :  { %v3088_v54 = vmax.f32 %v2835_v4, %v3073_v27 }
 0x357   :  { %v3130_v48 = vadd.f32 %v3107_v11, %v3088_v54 }
 0x358   :  { %v3040_v9 = vpop.f32.mrf.mxu2  ;;  %v3075_v8 = vpop.f32.mrf.mxu3 }
 0x359   :  { %v3136_v60 = vmax.f32 %v3130_v48, 0.0  ;;  %v3041_v43 = vadd.f32 %v3040_v9, %v3006_v5  ;;  %v2973_v37 = vpop.f32.mrf.mxu0 }
 0x35a   :  { %v2974_v31 = vadd.f32 %v2973_v37, %v2938_v55  ;;  %v3117_v55 = vpop.permute.xlu1 %3116 }
 0x35b   :  { %3143 = vst.msk [vmem:[%s8131_s3 + $0x8] sm:$0xff] %vm3141_vm2, %v3136_v60  ;;  %v3076_v51 = vadd.f32 %v3075_v8, %v3041_v43  ;;  %v3008_v12 = vpop.f32.mrf.mxu1 }
 0x35c   :  { %v3009_v19 = vadd.f32 %v3008_v12, %v2974_v31 }
 0x35d   :  { %v3089_v30 = vmax.f32 %v8090_v39, %v3076_v51 }
 0x35f   :  { %v3131_v4 = vadd.f32 %v3112_v24, %v3089_v30 }
 0x360   :  { %v3043_v32 = vpop.f32.mrf.mxu2  ;;  %v3078_v42 = vpop.f32.mrf.mxu3 }
 0x361   :  { %v3137_v23 = vmax.f32 %v3131_v4, 0.0  ;;  %v3044_v46 = vadd.f32 %v3043_v32, %v3009_v19  ;;  %v2976_v0 = vpop.f32.mrf.mxu0 }
 0x362   :  { %v2977_v13 = vadd.f32 %v2976_v0, %v2941_v3 }
 0x363   :  { %3144 = vst.msk [vmem:[%s8131_s3 + $0x10] sm:$0xff] %vm3141_vm2, %v3137_v23  ;;  %v3079_v6 = vadd.f32 %v3078_v42, %v3044_v46  ;;  %v3011_v59 = vpop.f32.mrf.mxu1 }
 0x364   :  { %v3012_v17 = vadd.f32 %v3011_v59, %v2977_v13 }
 0x365   :  { %v3090_v10 = vmax.f32 %v8092_v40, %v3079_v6 }
 0x367   :  { %v3132_v39 = vadd.f32 %v3117_v55, %v3090_v10 }
 0x368   :  { %v3046_v47 = vpop.f32.mrf.mxu2  ;;  %v3081_v36 = vpop.f32.mrf.mxu3 }
 0x369   :  { %v3138_v26 = vmax.f32 %v3132_v39, 0.0  ;;  %v3047_v45 = vadd.f32 %v3046_v47, %v3012_v17  ;;  %v2979_v33 = vpop.f32.mrf.mxu0 }
 0x36a   :  { %v2980_v14 = vadd.f32 %v2979_v33, %v8096_v20  ;;  %v3127_v20 = vpop.permute.xlu2 %3126 }
 0x36b   :  { %3145 = vst.msk [vmem:[%s8131_s3 + $0x18] sm:$0xff] %vm3141_vm2, %v3138_v26  ;;  %v3082_v3 = vadd.f32 %v3081_v36, %v3047_v45  ;;  %v3014_v16 = vpop.f32.mrf.mxu1 }
 0x36c   :  { %v3015_v21 = vadd.f32 %v3014_v16, %v2980_v14 }
 0x36d   :  { %v3091_v38 = vmax.f32 %v8094_v15, %v3082_v3 }
 0x36f   :  { %v3133_v40 = vadd.f32 %v3122_v22, %v3091_v38 }
 0x370   :  { %v3049_v63 = vpop.f32.mrf.mxu2  ;;  %v3084_v35 = vpop.f32.mrf.mxu3 }
 0x371   :  { %v3139_v44 = vmax.f32 %v3133_v40, 0.0  ;;  %v3050_v56 = vadd.f32 %v3049_v63, %v3015_v21 }
 0x373   :  { %3146 = vst.msk [vmem:[%s8131_s3 + $0x20] sm:$0xff] %vm3141_vm2, %v3139_v44  ;;  %v3085_v25 = vadd.f32 %v3084_v35, %v3050_v56 }
 0x375   :  { %v3092_v7 = vmax.f32 %v8098_v28, %v3085_v25 }
 0x377   :  { %v3134_v41 = vadd.f32 %v3127_v20, %v3092_v7 }
 0x379   :  { %v3140_v49 = vmax.f32 %v3134_v41, 0.0 }
 0x37b   :  { %3148 = vst.msk [vmem:[%s8131_s3 + $0x28] sm:$0x1f] %vm3147_vm3, %v3140_v49 }

// kernel: split_forward.5
= control target key start
LH: loop header
LB: loop body
LE: loop exit
PB: predicated region body
PF: predicated region fallthrough
CT: control target
= control target key end

     0   :  { %vm359_vm0 = vcmask 1044480   ;;  %s2118_s0 = inlined_call_operand.vmem [shape: f32[4,1125], index: 0, kind: input, shape index: {}]   ;;  %s2119_s1 = inlined_call_operand.vmem [shape: f32[1125,250], index: 1, kind: input, shape index: {}]   ;;  %s2120_s2 = inlined_call_operand.vmem [shape: f32[1,250], index: 2, kind: input, shape index: {}]   ;;  %s2121_s3 = inlined_call_operand.vmem [shape: f32[250,100], index: 3, kind: input, shape index: {}]   ;;  %s2122_s4 = inlined_call_operand.vmem [shape: f32[1,100], index: 4, kind: input, shape index: {}]   ;;  %s2123_s5 = inlined_call_operand.vmem [shape: f32[100,50], index: 5, kind: input, shape index: {}]   ;;  %s2124_s6 = inlined_call_operand.vmem [shape: f32[1,50], index: 6, kind: input, shape index: {}]   ;;  %s2125_s7 = inlined_call_operand.vmem [shape: f32[50,2], index: 7, kind: input, shape index: {}]   ;;  %s2126_s8 = inlined_call_operand.vmem [shape: f32[1,2], index: 8, kind: input, shape index: {}]   ;;  %s2127_s9 = inlined_call_operand.hbm [shape: f32[2,2], index: 9, kind: output, shape index: {}]  }
   0x1   :  { %v68_v0 = vld [vmem:[%s2119_s1 + $0xf0] sm:$0xff]  ;;  %v66_v1 = vld [vmem:[%s2119_s1 + $0xe0] sm:$0xff] }
   0x2   :  { %v100_v2 = vld [vmem:[%s2119_s1 + $0x1f0] sm:$0xff]  ;;  %366 = vmatpush.msra.mxu0 %v68_v0  ;;  %v98_v3 = vld [vmem:[%s2119_s1 + $0x1e0] sm:$0xff] }
   0x3   :  { %386 = vmatpush.msra.mxu1 %v100_v2  ;;  %v64_v4 = vld [vmem:[%s2119_s1 + $0xd0] sm:$0xff]  ;;  %v130_v7 = vld [vmem:[%s2119_s1 + $0x2e0] sm:$0xff] }
   0x4   :  { %v96_v5 = vld [vmem:[%s2119_s1 + $0x1d0] sm:$0xff]  ;;  %367 = vmatpush.msra.mxu0 %v66_v1  ;;  %v62_v9 = vld [vmem:[%s2119_s1 + $0xc0] sm:$0xff] }
   0x5   :  { %v132_v6 = vld [vmem:[%s2119_s1 + $0x2f0] sm:$0xff]  ;;  %387 = vmatpush.msra.mxu1 %v98_v3  ;;  %v94_v10 = vld [vmem:[%s2119_s1 + $0x1c0] sm:$0xff] }
   0x6   :  { %v164_v8 = vld [vmem:[%s2119_s1 + $0x3f0] sm:$0xff]  ;;  %406 = vmatpush.msra.mxu2 %v132_v6  ;;  %368 = vmatpush.msra.mxu0 %v64_v4  ;;  %v162_v12 = vld [vmem:[%s2119_s1 + $0x3e0] sm:$0xff] }
   0x7   :  { %426 = vmatpush.msra.mxu3 %v164_v8  ;;  %388 = vmatpush.msra.mxu1 %v96_v5  ;;  %v128_v11 = vld [vmem:[%s2119_s1 + $0x2d0] sm:$0xff]  ;;  %v126_v16 = vld [vmem:[%s2119_s1 + $0x2c0] sm:$0xff] }
   0x8   :  { %v60_v13 = vld [vmem:[%s2119_s1 + $0xb0] sm:$0xff]  ;;  %407 = vmatpush.msra.mxu2 %v130_v7  ;;  %369 = vmatpush.msra.mxu0 %v62_v9  ;;  %v158_v17 = vld [vmem:[%s2119_s1 + $0x3c0] sm:$0xff] }
   0x9   :  { %v92_v14 = vld [vmem:[%s2119_s1 + $0x1b0] sm:$0xff]  ;;  %427 = vmatpush.msra.mxu3 %v162_v12  ;;  %389 = vmatpush.msra.mxu1 %v94_v10  ;;  %v58_v18 = vld [vmem:[%s2119_s1 + $0xa0] sm:$0xff] }
   0xa   :  { %v160_v15 = vld [vmem:[%s2119_s1 + $0x3d0] sm:$0xff]  ;;  %408 = vmatpush.msra.mxu2 %v128_v11  ;;  %v90_v19 = vld [vmem:[%s2119_s1 + $0x1a0] sm:$0xff]  ;;  %370 = vmatpush.msra.mxu0 %v60_v13 }
   0xb   :  { %428 = vmatpush.msra.mxu3 %v160_v15  ;;  %390 = vmatpush.msra.mxu1 %v92_v14  ;;  %v124_v20 = vld [vmem:[%s2119_s1 + $0x2b0] sm:$0xff]  ;;  %v122_v24 = vld [vmem:[%s2119_s1 + $0x2a0] sm:$0xff] }
   0xc   :  { %v156_v21 = vld [vmem:[%s2119_s1 + $0x3b0] sm:$0xff]  ;;  %409 = vmatpush.msra.mxu2 %v126_v16  ;;  %371 = vmatpush.msra.mxu0 %v58_v18  ;;  %v154_v25 = vld [vmem:[%s2119_s1 + $0x3a0] sm:$0xff]  ;;  %v34_v16 = vld [vmem:[%s2118_s0 + $0x8] sm:$0xff] }
   0xd   :  { %v56_v22 = vld [vmem:[%s2119_s1 + $0x90] sm:$0xff]  ;;  %429 = vmatpush.msra.mxu3 %v158_v17  ;;  %391 = vmatpush.msra.mxu1 %v90_v19  ;;  %v54_v26 = vld [vmem:[%s2119_s1 + $0x80] sm:$0xff]  ;;  %333 = vst [vmem:[#allocation1 + $0x10] ss:$2 sm:$0xff] %v34_v16  ;;  %v101_v16 = vld [vmem:[%s2119_s1 + $0x1f8] sm:$0xff] }
   0xe   :  { %v88_v23 = vld [vmem:[%s2119_s1 + $0x190] sm:$0xff]  ;;  %410 = vmatpush.msra.mxu2 %v124_v20  ;;  %v86_v27 = vld [vmem:[%s2119_s1 + $0x180] sm:$0xff]  ;;  %372 = vmatpush.msra.mxu0 %v56_v22 }
   0xf   :  { %430 = vmatpush.msra.mxu3 %v156_v21  ;;  %392 = vmatpush.msra.mxu1 %v88_v23  ;;  %v120_v28 = vld [vmem:[%s2119_s1 + $0x290] sm:$0xff]  ;;  %v118_v32 = vld [vmem:[%s2119_s1 + $0x280] sm:$0xff] }
  0x10   :  { %v152_v29 = vld [vmem:[%s2119_s1 + $0x390] sm:$0xff]  ;;  %411 = vmatpush.msra.mxu2 %v122_v24  ;;  %373 = vmatpush.msra.mxu0 %v54_v26  ;;  %v150_v33 = vld [vmem:[%s2119_s1 + $0x380] sm:$0xff] }
  0x11   :  { %v52_v30 = vld [vmem:[%s2119_s1 + $0x70] sm:$0xff]  ;;  %431 = vmatpush.msra.mxu3 %v154_v25  ;;  %393 = vmatpush.msra.mxu1 %v86_v27  ;;  %v50_v34 = vld [vmem:[%s2119_s1 + $0x60] sm:$0xff] }
  0x12   :  { %v84_v31 = vld [vmem:[%s2119_s1 + $0x170] sm:$0xff]  ;;  %412 = vmatpush.msra.mxu2 %v120_v28  ;;  %v82_v35 = vld [vmem:[%s2119_s1 + $0x160] sm:$0xff]  ;;  %374 = vmatpush.msra.mxu0 %v52_v30 }
  0x13   :  { %432 = vmatpush.msra.mxu3 %v152_v29  ;;  %394 = vmatpush.msra.mxu1 %v84_v31  ;;  %v116_v36 = vld [vmem:[%s2119_s1 + $0x270] sm:$0xff]  ;;  %v114_v40 = vld [vmem:[%s2119_s1 + $0x260] sm:$0xff] }
  0x14   :  { %v148_v37 = vld [vmem:[%s2119_s1 + $0x370] sm:$0xff]  ;;  %413 = vmatpush.msra.mxu2 %v118_v32  ;;  %375 = vmatpush.msra.mxu0 %v50_v34  ;;  %v146_v41 = vld [vmem:[%s2119_s1 + $0x360] sm:$0xff]  ;;  %v36_v34 = vld [vmem:[%s2118_s0 + $0x18] sm:$0xff] }
  0x15   :  { %v48_v38 = vld [vmem:[%s2119_s1 + $0x50] sm:$0xff]  ;;  %433 = vmatpush.msra.mxu3 %v150_v33  ;;  %395 = vmatpush.msra.mxu1 %v82_v35  ;;  %v46_v42 = vld [vmem:[%s2119_s1 + $0x40] sm:$0xff]  ;;  %337 = vst [vmem:[#allocation1 + $0x30] ss:$2 sm:$0xff] %v36_v34 }
  0x16   :  { %v80_v39 = vld [vmem:[%s2119_s1 + $0x150] sm:$0xff]  ;;  %414 = vmatpush.msra.mxu2 %v116_v36  ;;  %v78_v43 = vld [vmem:[%s2119_s1 + $0x140] sm:$0xff]  ;;  %376 = vmatpush.msra.mxu0 %v48_v38 }
  0x17   :  { %434 = vmatpush.msra.mxu3 %v148_v37  ;;  %396 = vmatpush.msra.mxu1 %v80_v39  ;;  %v112_v44 = vld [vmem:[%s2119_s1 + $0x250] sm:$0xff]  ;;  %v110_v48 = vld [vmem:[%s2119_s1 + $0x240] sm:$0xff] }
  0x18   :  { %v144_v45 = vld [vmem:[%s2119_s1 + $0x350] sm:$0xff]  ;;  %415 = vmatpush.msra.mxu2 %v114_v40  ;;  %377 = vmatpush.msra.mxu0 %v46_v42  ;;  %v142_v49 = vld [vmem:[%s2119_s1 + $0x340] sm:$0xff] }
  0x19   :  { %v44_v46 = vld [vmem:[%s2119_s1 + $0x30] sm:$0xff]  ;;  %435 = vmatpush.msra.mxu3 %v146_v41  ;;  %397 = vmatpush.msra.mxu1 %v78_v43  ;;  %v42_v50 = vld [vmem:[%s2119_s1 + $0x20] sm:$0xff] }
  0x1a   :  { %v76_v47 = vld [vmem:[%s2119_s1 + $0x130] sm:$0xff]  ;;  %416 = vmatpush.msra.mxu2 %v112_v44  ;;  %v74_v51 = vld [vmem:[%s2119_s1 + $0x120] sm:$0xff]  ;;  %378 = vmatpush.msra.mxu0 %v44_v46 }
  0x1b   :  { %436 = vmatpush.msra.mxu3 %v144_v45  ;;  %398 = vmatpush.msra.mxu1 %v76_v47  ;;  %v108_v52 = vld [vmem:[%s2119_s1 + $0x230] sm:$0xff]  ;;  %v106_v56 = vld [vmem:[%s2119_s1 + $0x220] sm:$0xff] }
  0x1c   :  { %v140_v53 = vld [vmem:[%s2119_s1 + $0x330] sm:$0xff]  ;;  %417 = vmatpush.msra.mxu2 %v110_v48  ;;  %379 = vmatpush.msra.mxu0 %v42_v50  ;;  %v138_v57 = vld [vmem:[%s2119_s1 + $0x320] sm:$0xff] }
  0x1d   :  { %v40_v54 = vld [vmem:[%s2119_s1 + $0x10] sm:$0xff]  ;;  %437 = vmatpush.msra.mxu3 %v142_v49  ;;  %399 = vmatpush.msra.mxu1 %v74_v51  ;;  %v38_v58 = vld [vmem:[%s2119_s1] sm:$0xff] }
  0x1e   :  { %v72_v55 = vld [vmem:[%s2119_s1 + $0x110] sm:$0xff]  ;;  %418 = vmatpush.msra.mxu2 %v108_v52  ;;  %v70_v59 = vld [vmem:[%s2119_s1 + $0x100] sm:$0xff]  ;;  %380 = vmatpush.msra.mxu0 %v40_v54 }
  0x1f   :  { %438 = vmatpush.msra.mxu3 %v140_v53  ;;  %400 = vmatpush.msra.mxu1 %v72_v55  ;;  %v196_v60 = vld [vmem:[%s2119_s1 + $0x4f0] sm:$0xff]  ;;  %v194_v0 = vld [vmem:[%s2119_s1 + $0x4e0] sm:$0xff] }
  0x20   :  { %v228_v61 = vld [vmem:[%s2119_s1 + $0x5f0] sm:$0xff]  ;;  %419 = vmatpush.msra.mxu2 %v106_v56  ;;  %381 = vmatpush.msra.mxu0 %v38_v58  ;;  %v226_v1 = vld [vmem:[%s2119_s1 + $0x5e0] sm:$0xff] }
  0x21   :  { %v104_v62 = vld [vmem:[%s2119_s1 + $0x210] sm:$0xff]  ;;  %439 = vmatpush.msra.mxu3 %v138_v57  ;;  %401 = vmatpush.msra.mxu1 %v70_v59  ;;  %v102_v2 = vld [vmem:[%s2119_s1 + $0x200] sm:$0xff] }
  0x22   :  { %v136_v63 = vld [vmem:[%s2119_s1 + $0x310] sm:$0xff]  ;;  %446 = vmatpush.msrb.mxu0 %v196_v60  ;;  %v134_v3 = vld [vmem:[%s2119_s1 + $0x300] sm:$0xff]  ;;  %420 = vmatpush.msra.mxu2 %v104_v62 }
  0x23   :  { %466 = vmatpush.msrb.mxu1 %v228_v61  ;;  %v192_v4 = vld [vmem:[%s2119_s1 + $0x4d0] sm:$0xff]  ;;  %440 = vmatpush.msra.mxu3 %v136_v63  ;;  %v190_v8 = vld [vmem:[%s2119_s1 + $0x4c0] sm:$0xff] }
  0x24   :  { %v224_v5 = vld [vmem:[%s2119_s1 + $0x5d0] sm:$0xff]  ;;  %447 = vmatpush.msrb.mxu0 %v194_v0  ;;  %421 = vmatpush.msra.mxu2 %v102_v2  ;;  %v222_v9 = vld [vmem:[%s2119_s1 + $0x5c0] sm:$0xff]  ;;  %v1418_v0 = vld.sshfl [vmem:[#allocation1 + $0x18] sm:$0xff pattern:$0x75316420] }
  0x25   :  { %467 = vmatpush.msrb.mxu1 %v226_v1  ;;  %v260_v6 = vld [vmem:[%s2119_s1 + $0x6f0] sm:$0xff]  ;;  %441 = vmatpush.msra.mxu3 %v134_v3  ;;  %v258_v10 = vld [vmem:[%s2119_s1 + $0x6e0] sm:$0xff] }
  0x26   :  { %v292_v7 = vld [vmem:[%s2119_s1 + $0x7f0] sm:$0xff]  ;;  %448 = vmatpush.msrb.mxu0 %v192_v4  ;;  %v290_v11 = vld [vmem:[%s2119_s1 + $0x7e0] sm:$0xff]  ;;  %486 = vmatpush.msrb.mxu2 %v260_v6  ;;  %v69_v6 = vld [vmem:[%s2119_s1 + $0xf8] sm:$0xff] }
  0x27   :  { %468 = vmatpush.msrb.mxu1 %v224_v5  ;;  %v188_v12 = vld [vmem:[%s2119_s1 + $0x4b0] sm:$0xff]  ;;  %506 = vmatpush.msrb.mxu3 %v292_v7  ;;  %v186_v17 = vld [vmem:[%s2119_s1 + $0x4a0] sm:$0xff] }
  0x28   :  { %v220_v13 = vld [vmem:[%s2119_s1 + $0x5b0] sm:$0xff]  ;;  %449 = vmatpush.msrb.mxu0 %v190_v8  ;;  %487 = vmatpush.msrb.mxu2 %v258_v10  ;;  %v218_v18 = vld [vmem:[%s2119_s1 + $0x5a0] sm:$0xff]  ;;  %v67_v10 = vld [vmem:[%s2119_s1 + $0xe8] sm:$0xff] }
  0x29   :  { %469 = vmatpush.msrb.mxu1 %v222_v9  ;;  %v256_v14 = vld [vmem:[%s2119_s1 + $0x6d0] sm:$0xff]  ;;  %507 = vmatpush.msrb.mxu3 %v290_v11  ;;  %v254_v19 = vld [vmem:[%s2119_s1 + $0x6c0] sm:$0xff] }
  0x2a   :  { %v288_v15 = vld [vmem:[%s2119_s1 + $0x7d0] sm:$0xff]  ;;  %450 = vmatpush.msrb.mxu0 %v188_v12  ;;  %v286_v20 = vld [vmem:[%s2119_s1 + $0x7c0] sm:$0xff]  ;;  %488 = vmatpush.msrb.mxu2 %v256_v14 }
  0x2b   :  { %470 = vmatpush.msrb.mxu1 %v220_v13  ;;  %v33_v21 = vld [vmem:[%s2118_s0] sm:$0xff]  ;;  %v184_v22 = vld [vmem:[%s2119_s1 + $0x490] sm:$0xff]  ;;  %508 = vmatpush.msrb.mxu3 %v288_v15  ;;  %v65_v15 = vld [vmem:[%s2119_s1 + $0xd8] sm:$0xff] }
  0x2c   :  { %v216_v23 = vld [vmem:[%s2119_s1 + $0x590] sm:$0xff]  ;;  %331 = vst [vmem:[#allocation1] ss:$2 sm:$0xff] %v33_v21  ;;  %451 = vmatpush.msrb.mxu0 %v186_v17  ;;  %489 = vmatpush.msrb.mxu2 %v254_v19  ;;  %v182_v26 = vld [vmem:[%s2119_s1 + $0x480] sm:$0xff]  ;;  %v63_v21 = vld [vmem:[%s2119_s1 + $0xc8] sm:$0xff] }
  0x2d   :  { %471 = vmatpush.msrb.mxu1 %v218_v18  ;;  %v252_v24 = vld [vmem:[%s2119_s1 + $0x6b0] sm:$0xff]  ;;  %509 = vmatpush.msrb.mxu3 %v286_v20  ;;  %v214_v27 = vld [vmem:[%s2119_s1 + $0x580] sm:$0xff]  ;;  %v1478_v19 = vld.sshfl [vmem:[#allocation1 + $0x38] sm:$0xff pattern:$0x75316420] }
  0x2e   :  { %v284_v25 = vld [vmem:[%s2119_s1 + $0x7b0] sm:$0xff]  ;;  %452 = vmatpush.msrb.mxu0 %v184_v22  ;;  %v250_v29 = vld [vmem:[%s2119_s1 + $0x6a0] sm:$0xff]  ;;  %490 = vmatpush.msrb.mxu2 %v252_v24  ;;  %v99_v22 = vld [vmem:[%s2119_s1 + $0x1e8] sm:$0xff] }
  0x2f   :  { %472 = vmatpush.msrb.mxu1 %v216_v23  ;;  %v180_v28 = vld [vmem:[%s2119_s1 + $0x470] sm:$0xff]  ;;  %v282_v30 = vld [vmem:[%s2119_s1 + $0x7a0] sm:$0xff]  ;;  %510 = vmatpush.msrb.mxu3 %v284_v25  ;;  %v133_v23 = vld [vmem:[%s2119_s1 + $0x2f8] sm:$0xff] }
  0x30   :  { %v178_v31 = vld [vmem:[%s2119_s1 + $0x460] sm:$0xff]  ;;  %v212_v32 = vld [vmem:[%s2119_s1 + $0x570] sm:$0xff]  ;;  %453 = vmatpush.msrb.mxu0 %v182_v26  ;;  %491 = vmatpush.msrb.mxu2 %v250_v29  ;;  %v61_v26 = vld [vmem:[%s2119_s1 + $0xb8] sm:$0xff] }
  0x31   :  { %v248_v33 = vld [vmem:[%s2119_s1 + $0x690] sm:$0xff]  ;;  %473 = vmatpush.msrb.mxu1 %v214_v27  ;;  %v210_v35 = vld [vmem:[%s2119_s1 + $0x560] sm:$0xff]  ;;  %511 = vmatpush.msrb.mxu3 %v282_v30 }
  0x32   :  { %v280_v36 = vld [vmem:[%s2119_s1 + $0x790] sm:$0xff]  ;;  %v37_v37 = vld [vmem:[%s2118_s0 + $0x20] sm:$0xf]  ;;  %454 = vmatpush.msrb.mxu0 %v180_v28  ;;  %492 = vmatpush.msrb.mxu2 %v248_v33 }
  0x33   :  { %v246_v38 = vld [vmem:[%s2119_s1 + $0x680] sm:$0xff]  ;;  %v35_v40 = vld [vmem:[%s2118_s0 + $0x10] sm:$0xff]  ;;  %474 = vmatpush.msrb.mxu1 %v212_v32  ;;  %v1354_v42 = vld.sshfl [vmem:[#allocation1 + $0x8] sm:$0xff pattern:$0x75316420]  ;;  %512 = vmatpush.msrb.mxu3 %v280_v36 }
  0x34   :  { %v278_v39 = vld [vmem:[%s2119_s1 + $0x780] sm:$0xff]  ;;  %v176_v43 = vld [vmem:[%s2119_s1 + $0x450] sm:$0xff]  ;;  %455 = vmatpush.msrb.mxu0 %v178_v31  ;;  %335 = vst [vmem:[#allocation1 + $0x20] ss:$2 sm:$0xff] %v35_v40  ;;  %493 = vmatpush.msrb.mxu2 %v246_v38 }
  0x35   :  { %v1352_v41 = vld.sshfl [vmem:[#allocation1] sm:$0xff pattern:$0x75316420]  ;;  %v208_v44 = vld [vmem:[%s2119_s1 + $0x550] sm:$0xff]  ;;  %475 = vmatpush.msrb.mxu1 %v210_v35  ;;  %513 = vmatpush.msrb.mxu3 %v278_v39 }
  0x36   :  { %346 = vst [vmem:[#allocation1] ss:$2 sm:$0xff] %v37_v37  ;;  %v244_v45 = vld [vmem:[%s2119_s1 + $0x670] sm:$0xff]  ;;  %v174_v47 = vld [vmem:[%s2119_s1 + $0x440] sm:$0xff]  ;;  %456 = vmatpush.msrb.mxu0 %v176_v43  ;;  %442 = vmatmul.f32.vlgmr.msra.gmra.mxu3 %v1418_v0 }
  0x37   :  { %v276_v46 = vld [vmem:[%s2119_s1 + $0x770] sm:$0xff]  ;;  %v206_v48 = vld [vmem:[%s2119_s1 + $0x540] sm:$0xff]  ;;  %476 = vmatpush.msrb.mxu1 %v208_v44  ;;  %494 = vmatpush.msrb.mxu2 %v244_v45 }
  0x38   :  { %v242_v49 = vld [vmem:[%s2119_s1 + $0x660] sm:$0xff]  ;;  %v172_v51 = vld [vmem:[%s2119_s1 + $0x430] sm:$0xff]  ;;  %514 = vmatpush.msrb.mxu3 %v276_v46  ;;  %457 = vmatpush.msrb.mxu0 %v174_v47 }
  0x39   :  { %v274_v50 = vld [vmem:[%s2119_s1 + $0x760] sm:$0xff]  ;;  %v204_v52 = vld [vmem:[%s2119_s1 + $0x530] sm:$0xff]  ;;  %477 = vmatpush.msrb.mxu1 %v206_v48  ;;  %495 = vmatpush.msrb.mxu2 %v242_v49 }
  0x3a   :  { %v240_v53 = vld [vmem:[%s2119_s1 + $0x650] sm:$0xff]  ;;  %v170_v55 = vld [vmem:[%s2119_s1 + $0x420] sm:$0xff]  ;;  %515 = vmatpush.msrb.mxu3 %v274_v50  ;;  %458 = vmatpush.msrb.mxu0 %v172_v51 }
  0x3b   :  { %v272_v54 = vld [vmem:[%s2119_s1 + $0x750] sm:$0xff]  ;;  %v202_v56 = vld [vmem:[%s2119_s1 + $0x520] sm:$0xff]  ;;  %478 = vmatpush.msrb.mxu1 %v204_v52  ;;  %496 = vmatpush.msrb.mxu2 %v240_v53  ;;  %v1493_v24 = vld.sshfl [vmem:[#allocation1 + $0x28] sm:$0xff pattern:$0x75316420] }
  0x3c   :  { %v238_v57 = vld [vmem:[%s2119_s1 + $0x640] sm:$0xff]  ;;  %v168_v59 = vld [vmem:[%s2119_s1 + $0x410] sm:$0xff]  ;;  %516 = vmatpush.msrb.mxu3 %v272_v54  ;;  %459 = vmatpush.msrb.mxu0 %v170_v55 }
  0x3d   :  { %v270_v58 = vld [vmem:[%s2119_s1 + $0x740] sm:$0xff]  ;;  %v1407_v60 = vld.sshfl [vmem:[#allocation1 + $0x10] sm:$0xff pattern:$0x75316420]  ;;  %479 = vmatpush.msrb.mxu1 %v202_v56  ;;  %497 = vmatpush.msrb.mxu2 %v238_v57 }
  0x3e   :  { %v200_v61 = vld [vmem:[%s2119_s1 + $0x510] sm:$0xff]  ;;  %v166_v63 = vld [vmem:[%s2119_s1 + $0x400] sm:$0xff]  ;;  %517 = vmatpush.msrb.mxu3 %v270_v58  ;;  %460 = vmatpush.msrb.mxu0 %v168_v59 }
  0x3f   :  { %v236_v62 = vld [vmem:[%s2119_s1 + $0x630] sm:$0xff]  ;;  %422 = vmatmul.f32.vlgmr.msra.gmra.mxu2 %v1407_v60  ;;  %v198_v1 = vld [vmem:[%s2119_s1 + $0x500] sm:$0xff]  ;;  %480 = vmatpush.msrb.mxu1 %v200_v61 }
  0x40   :  { %498 = vmatpush.msrb.mxu2 %v236_v62  ;;  %v318_v2 = vld [vmem:[%s2119_s1 + $0x8c0] sm:$0x1f]  ;;  %461 = vmatpush.msrb.mxu0 %v166_v63  ;;  %v268_v4 = vld [vmem:[%s2119_s1 + $0x730] sm:$0xff] }
  0x41   :  { %v234_v3 = vld [vmem:[%s2119_s1 + $0x620] sm:$0xff]  ;;  %382 = vmatmul.f32.vlgmr.msra.gmra.mxu0 %v1352_v41  ;;  %481 = vmatpush.msrb.mxu1 %v198_v1  ;;  %v316_v5 = vld [vmem:[%s2119_s1 + $0x8b0] sm:$0xff] }
  0x42   :  { %942 = vmatpush.msk.msra.mxu0 %vm359_vm0, %v318_v2  ;;  %499 = vmatpush.msrb.mxu2 %v234_v3  ;;  %v232_v7 = vld [vmem:[%s2119_s1 + $0x610] sm:$0xff]  ;;  %v266_v8 = vld [vmem:[%s2119_s1 + $0x720] sm:$0xff] }
  0x43   :  { %518 = vmatpush.msrb.mxu3 %v268_v4  ;;  %402 = vmatmul.f32.vlgmr.msra.gmra.mxu1 %v1354_v42  ;;  %v314_v9 = vld [vmem:[%s2119_s1 + $0x8a0] sm:$0xff]  ;;  %v264_v12 = vld [vmem:[%s2119_s1 + $0x710] sm:$0xff] }
  0x44   :  { %530 = vmatpush.msra.mxu0 %v316_v5  ;;  %546 = vmatpush.msra.mxu1 %v69_v6  ;;  %v230_v11 = vld [vmem:[%s2119_s1 + $0x600] sm:$0xff]  ;;  %v1461_v13 = vld.sshfl [vmem:[#allocation1 + $0x30] sm:$0xff pattern:$0x75316420] }
  0x45   :  { %500 = vmatpush.msrb.mxu2 %v232_v7  ;;  %519 = vmatpush.msrb.mxu3 %v266_v8  ;;  %v312_v14 = vld [vmem:[%s2119_s1 + $0x890] sm:$0xff]  ;;  %v262_v17 = vld [vmem:[%s2119_s1 + $0x700] sm:$0xff] }
  0x46   :  { %531 = vmatpush.msra.mxu0 %v314_v9  ;;  %547 = vmatpush.msra.mxu1 %v67_v10  ;;  %v1475_v18 = vld.sshfl [vmem:[#allocation1 + $0x20] sm:$0xff pattern:$0x75316420]  ;;  %v308_v25 = vld [vmem:[%s2119_s1 + $0x870] sm:$0xff] }
  0x47   :  { %501 = vmatpush.msrb.mxu2 %v230_v11  ;;  %520 = vmatpush.msrb.mxu3 %v264_v12  ;;  %v310_v20 = vld [vmem:[%s2119_s1 + $0x880] sm:$0xff] }
  0x48   :  { %502 = vmatmul.f32.vlgmr.msrb.gmra.mxu2 %v1461_v13  ;;  %532 = vmatpush.msra.mxu0 %v312_v14 }
  0x49   :  { %548 = vmatpush.msra.mxu1 %v65_v15  ;;  %566 = vmatpush.msra.mxu2 %v101_v16 }
  0x4a   :  { %521 = vmatpush.msrb.mxu3 %v262_v17  ;;  %462 = vmatmul.f32.vlgmr.msrb.gmra.mxu0 %v1475_v18 }
  0x4b   :  { %522 = vmatmul.f32.vlgmr.msrb.gmra.mxu3 %v1478_v19  ;;  %533 = vmatpush.msra.mxu0 %v310_v20 }
  0x4c   :  { %14 = vsyncpa [#allocation3], 0  ;;  %549 = vmatpush.msra.mxu1 %v63_v21  ;;  %567 = vmatpush.msra.mxu2 %v99_v22  ;;  %v97_v27 = vld [vmem:[%s2119_s1 + $0x1d8] sm:$0xff]  ;;  %v131_v28 = vld [vmem:[%s2119_s1 + $0x2e8] sm:$0xff]  ;;  %vm356_vm1 = vcmask 826368   ;;  %vm768_vm2 = vcmask 1041408  }
  0x4d   :  { %586 = vmatpush.msra.mxu3 %v133_v23  ;;  %482 = vmatmul.f32.vlgmr.msrb.gmra.mxu1 %v1493_v24  ;;  %v306_v29 = vld [vmem:[%s2119_s1 + $0x860] sm:$0xff]  ;;  %v59_v30 = vld [vmem:[%s2119_s1 + $0xa8] sm:$0xff]  ;;  %v129_v32 = vld [vmem:[%s2119_s1 + $0x2d8] sm:$0xff]  ;;  %vm764_vm3 = vcmask 998400   ;;  %vm833_vm4 = vcmask 1043456   ;;  %vm829_vm5 = vcmask 818176  }
  0x4e   :  { %534 = vmatpush.msra.mxu0 %v308_v25  ;;  %550 = vmatpush.msra.mxu1 %v61_v26  ;;  %v95_v31 = vld [vmem:[%s2119_s1 + $0x1c8] sm:$0xff]  ;;  %v304_v33 = vld [vmem:[%s2119_s1 + $0x850] sm:$0xff]  ;;  %v57_v34 = vld [vmem:[%s2119_s1 + $0x98] sm:$0xff]  ;;  %vm873_vm6 = vcmask 408576   ;;  %vm900_vm7 = vcmask 9216   ;;  %s933_s11 = sshll.u32 %s2127_s9, 4  ;;  %s934_s11 = int_to_ptr.hbm [resolvable:$true] %s933_s11 }
  0x4f   :  { %568 = vmatpush.msra.mxu2 %v97_v27  ;;  %587 = vmatpush.msra.mxu3 %v131_v28  ;;  %v93_v35 = vld [vmem:[%s2119_s1 + $0x1b8] sm:$0xff]  ;;  %v127_v36 = vld [vmem:[%s2119_s1 + $0x2c8] sm:$0xff]  ;;  %v302_v37 = vld [vmem:[%s2119_s1 + $0x840] sm:$0xff] }
  0x50   :  { %535 = vmatpush.msra.mxu0 %v306_v29  ;;  %551 = vmatpush.msra.mxu1 %v59_v30  ;;  %v55_v38 = vld [vmem:[%s2119_s1 + $0x88] sm:$0xff]  ;;  %v125_v40 = vld [vmem:[%s2119_s1 + $0x2b8] sm:$0xff]  ;;  %v300_v43 = vld [vmem:[%s2119_s1 + $0x830] sm:$0xff] }
  0x51   :  { %569 = vmatpush.msra.mxu2 %v95_v31  ;;  %588 = vmatpush.msra.mxu3 %v129_v32  ;;  %v91_v39 = vld [vmem:[%s2119_s1 + $0x1a8] sm:$0xff]  ;;  %v53_v44 = vld [vmem:[%s2119_s1 + $0x78] sm:$0xff]  ;;  %v298_v47 = vld [vmem:[%s2119_s1 + $0x820] sm:$0xff] }
  0x52   :  { %536 = vmatpush.msra.mxu0 %v304_v33  ;;  %552 = vmatpush.msra.mxu1 %v57_v34  ;;  %v89_v45 = vld [vmem:[%s2119_s1 + $0x198] sm:$0xff]  ;;  %v123_v46 = vld [vmem:[%s2119_s1 + $0x2a8] sm:$0xff]  ;;  %v296_v51 = vld [vmem:[%s2119_s1 + $0x810] sm:$0xff] }
  0x53   :  { %570 = vmatpush.msra.mxu2 %v93_v35  ;;  %589 = vmatpush.msra.mxu3 %v127_v36  ;;  %v51_v48 = vld [vmem:[%s2119_s1 + $0x68] sm:$0xff]  ;;  %v121_v50 = vld [vmem:[%s2119_s1 + $0x298] sm:$0xff]  ;;  %v294_v55 = vld [vmem:[%s2119_s1 + $0x800] sm:$0xff] }
  0x54   :  { %537 = vmatpush.msra.mxu0 %v302_v37  ;;  %553 = vmatpush.msra.mxu1 %v55_v38  ;;  %v87_v49 = vld [vmem:[%s2119_s1 + $0x188] sm:$0xff]  ;;  %v49_v52 = vld [vmem:[%s2119_s1 + $0x58] sm:$0xff]  ;;  %v1593_v59 = vld.sshfl [vmem:[#allocation1] sm:$0xff pattern:$0x75316420] }
  0x55   :  { %571 = vmatpush.msra.mxu2 %v91_v39  ;;  %590 = vmatpush.msra.mxu3 %v125_v40  ;;  %v85_v53 = vld [vmem:[%s2119_s1 + $0x178] sm:$0xff]  ;;  %v119_v54 = vld [vmem:[%s2119_s1 + $0x288] sm:$0xff] }
  0x56   :  { %538 = vmatpush.msra.mxu0 %v300_v43  ;;  %554 = vmatpush.msra.mxu1 %v53_v44  ;;  %v47_v56 = vld [vmem:[%s2119_s1 + $0x48] sm:$0xff]  ;;  %v117_v58 = vld [vmem:[%s2119_s1 + $0x278] sm:$0xff] }
  0x57   :  { %572 = vmatpush.msra.mxu2 %v89_v45  ;;  %591 = vmatpush.msra.mxu3 %v123_v46  ;;  %v83_v57 = vld [vmem:[%s2119_s1 + $0x168] sm:$0xff]  ;;  %v45_v61 = vld [vmem:[%s2119_s1 + $0x38] sm:$0xff] }
  0x58   :  { %539 = vmatpush.msra.mxu0 %v298_v47  ;;  %555 = vmatpush.msra.mxu1 %v51_v48  ;;  %v165_v62 = vld [vmem:[%s2119_s1 + $0x3f8] sm:$0xff]  ;;  %v115_v1 = vld [vmem:[%s2119_s1 + $0x268] sm:$0xff] }
  0x59   :  { %573 = vmatpush.msra.mxu2 %v87_v49  ;;  %592 = vmatpush.msra.mxu3 %v121_v50  ;;  %v81_v63 = vld [vmem:[%s2119_s1 + $0x158] sm:$0xff]  ;;  %v43_v2 = vld [vmem:[%s2119_s1 + $0x28] sm:$0xff] }
  0x5a   :  { %540 = vmatpush.msra.mxu0 %v296_v51  ;;  %556 = vmatpush.msra.mxu1 %v49_v52  ;;  %v163_v3 = vld [vmem:[%s2119_s1 + $0x3e8] sm:$0xff]  ;;  %v113_v5 = vld [vmem:[%s2119_s1 + $0x258] sm:$0xff] }
  0x5b   :  { %574 = vmatpush.msra.mxu2 %v85_v53  ;;  %593 = vmatpush.msra.mxu3 %v119_v54  ;;  %v79_v4 = vld [vmem:[%s2119_s1 + $0x148] sm:$0xff]  ;;  %v41_v6 = vld [vmem:[%s2119_s1 + $0x18] sm:$0xff] }
  0x5c   :  { %541 = vmatpush.msra.mxu0 %v294_v55  ;;  %557 = vmatpush.msra.mxu1 %v47_v56  ;;  %v161_v7 = vld [vmem:[%s2119_s1 + $0x3d8] sm:$0xff]  ;;  %v111_v9 = vld [vmem:[%s2119_s1 + $0x248] sm:$0xff] }
  0x5d   :  { %575 = vmatpush.msra.mxu2 %v83_v57  ;;  %594 = vmatpush.msra.mxu3 %v117_v58  ;;  %v77_v8 = vld [vmem:[%s2119_s1 + $0x138] sm:$0xff]  ;;  %v39_v10 = vld [vmem:[%s2119_s1 + $0x8] sm:$0xff] }
  0x5e   :  { %943 = vmatmul.msk.f32.vlgmr.msra.gmra.mxu0 %vm356_vm1, %v1593_v59  ;;  %558 = vmatpush.msra.mxu1 %v45_v61  ;;  %v159_v11 = vld [vmem:[%s2119_s1 + $0x3c8] sm:$0xff]  ;;  %v109_v14 = vld [vmem:[%s2119_s1 + $0x238] sm:$0xff] }
  0x5f   :  { %606 = vmatpush.msrb.mxu0 %v165_v62  ;;  %576 = vmatpush.msra.mxu2 %v81_v63  ;;  %v75_v12 = vld [vmem:[%s2119_s1 + $0x128] sm:$0xff]  ;;  %v197_v15 = vld [vmem:[%s2119_s1 + $0x4f8] sm:$0xff] }
  0x60   :  { %595 = vmatpush.msra.mxu3 %v115_v1  ;;  %559 = vmatpush.msra.mxu1 %v43_v2  ;;  %v157_v16 = vld [vmem:[%s2119_s1 + $0x3b8] sm:$0xff]  ;;  %v107_v20 = vld [vmem:[%s2119_s1 + $0x228] sm:$0xff] }
  0x61   :  { %607 = vmatpush.msrb.mxu0 %v163_v3  ;;  %577 = vmatpush.msra.mxu2 %v79_v4  ;;  %v73_v17 = vld [vmem:[%s2119_s1 + $0x118] sm:$0xff]  ;;  %v195_v21 = vld [vmem:[%s2119_s1 + $0x4e8] sm:$0xff] }
  0x62   :  { %596 = vmatpush.msra.mxu3 %v113_v5  ;;  %560 = vmatpush.msra.mxu1 %v41_v6  ;;  %v155_v22 = vld [vmem:[%s2119_s1 + $0x3a8] sm:$0xff]  ;;  %v105_v25 = vld [vmem:[%s2119_s1 + $0x218] sm:$0xff] }
  0x63   :  { %608 = vmatpush.msrb.mxu0 %v161_v7  ;;  %578 = vmatpush.msra.mxu2 %v77_v8  ;;  %v71_v23 = vld [vmem:[%s2119_s1 + $0x108] sm:$0xff]  ;;  %v193_v26 = vld [vmem:[%s2119_s1 + $0x4d8] sm:$0xff] }
  0x64   :  { %597 = vmatpush.msra.mxu3 %v111_v9  ;;  %561 = vmatpush.msra.mxu1 %v39_v10  ;;  %v153_v27 = vld [vmem:[%s2119_s1 + $0x398] sm:$0xff]  ;;  %v103_v29 = vld [vmem:[%s2119_s1 + $0x208] sm:$0xff] }
  0x65   :  { %609 = vmatpush.msrb.mxu0 %v159_v11  ;;  %579 = vmatpush.msra.mxu2 %v75_v12  ;;  %v229_v28 = vld [vmem:[%s2119_s1 + $0x5f8] sm:$0xff]  ;;  %v191_v30 = vld [vmem:[%s2119_s1 + $0x4c8] sm:$0xff] }
  0x66   :  { %598 = vmatpush.msra.mxu3 %v109_v14  ;;  %626 = vmatpush.msrb.mxu1 %v197_v15  ;;  %v151_v31 = vld [vmem:[%s2119_s1 + $0x388] sm:$0xff]  ;;  %v261_v33 = vld [vmem:[%s2119_s1 + $0x6f8] sm:$0xff] }
  0x67   :  { %610 = vmatpush.msrb.mxu0 %v157_v16  ;;  %580 = vmatpush.msra.mxu2 %v73_v17  ;;  %v227_v32 = vld [vmem:[%s2119_s1 + $0x5e8] sm:$0xff]  ;;  %v189_v34 = vld [vmem:[%s2119_s1 + $0x4b8] sm:$0xff] }
  0x68   :  { %599 = vmatpush.msra.mxu3 %v107_v20  ;;  %627 = vmatpush.msrb.mxu1 %v195_v21  ;;  %v149_v35 = vld [vmem:[%s2119_s1 + $0x378] sm:$0xff]  ;;  %v259_v37 = vld [vmem:[%s2119_s1 + $0x6e8] sm:$0xff] }
  0x69   :  { %611 = vmatpush.msrb.mxu0 %v155_v22  ;;  %581 = vmatpush.msra.mxu2 %v71_v23  ;;  %v225_v36 = vld [vmem:[%s2119_s1 + $0x5d8] sm:$0xff]  ;;  %v187_v38 = vld [vmem:[%s2119_s1 + $0x4a8] sm:$0xff] }
  0x6a   :  { %600 = vmatpush.msra.mxu3 %v105_v25  ;;  %628 = vmatpush.msrb.mxu1 %v193_v26  ;;  %v147_v39 = vld [vmem:[%s2119_s1 + $0x368] sm:$0xff]  ;;  %v257_v43 = vld [vmem:[%s2119_s1 + $0x6d8] sm:$0xff] }
  0x6b   :  { %612 = vmatpush.msrb.mxu0 %v153_v27  ;;  %646 = vmatpush.msrb.mxu2 %v229_v28  ;;  %v223_v40 = vld [vmem:[%s2119_s1 + $0x5c8] sm:$0xff]  ;;  %v185_v44 = vld [vmem:[%s2119_s1 + $0x498] sm:$0xff] }
  0x6c   :  { %601 = vmatpush.msra.mxu3 %v103_v29  ;;  %629 = vmatpush.msrb.mxu1 %v191_v30  ;;  %v145_v45 = vld [vmem:[%s2119_s1 + $0x358] sm:$0xff]  ;;  %v255_v47 = vld [vmem:[%s2119_s1 + $0x6c8] sm:$0xff] }
  0x6d   :  { %613 = vmatpush.msrb.mxu0 %v151_v31  ;;  %647 = vmatpush.msrb.mxu2 %v227_v32  ;;  %v221_v46 = vld [vmem:[%s2119_s1 + $0x5b8] sm:$0xff]  ;;  %v183_v48 = vld [vmem:[%s2119_s1 + $0x488] sm:$0xff] }
  0x6e   :  { %666 = vmatpush.msrb.mxu3 %v261_v33  ;;  %630 = vmatpush.msrb.mxu1 %v189_v34  ;;  %v143_v49 = vld [vmem:[%s2119_s1 + $0x348] sm:$0xff]  ;;  %v253_v51 = vld [vmem:[%s2119_s1 + $0x6b8] sm:$0xff] }
  0x6f   :  { %614 = vmatpush.msrb.mxu0 %v149_v35  ;;  %648 = vmatpush.msrb.mxu2 %v225_v36  ;;  %v219_v50 = vld [vmem:[%s2119_s1 + $0x5a8] sm:$0xff]  ;;  %v181_v52 = vld [vmem:[%s2119_s1 + $0x478] sm:$0xff] }
  0x70   :  { %667 = vmatpush.msrb.mxu3 %v259_v37  ;;  %631 = vmatpush.msrb.mxu1 %v187_v38  ;;  %v141_v53 = vld [vmem:[%s2119_s1 + $0x338] sm:$0xff]  ;;  %v251_v55 = vld [vmem:[%s2119_s1 + $0x6a8] sm:$0xff] }
  0x71   :  { %615 = vmatpush.msrb.mxu0 %v147_v39  ;;  %649 = vmatpush.msrb.mxu2 %v223_v40  ;;  %v217_v54 = vld [vmem:[%s2119_s1 + $0x598] sm:$0xff]  ;;  %v179_v56 = vld [vmem:[%s2119_s1 + $0x468] sm:$0xff] }
  0x72   :  { %668 = vmatpush.msrb.mxu3 %v257_v43  ;;  %632 = vmatpush.msrb.mxu1 %v185_v44  ;;  %v139_v57 = vld [vmem:[%s2119_s1 + $0x328] sm:$0xff]  ;;  %v249_v61 = vld [vmem:[%s2119_s1 + $0x698] sm:$0xff] }
  0x73   :  { %616 = vmatpush.msrb.mxu0 %v145_v45  ;;  %650 = vmatpush.msrb.mxu2 %v221_v46  ;;  %v215_v58 = vld [vmem:[%s2119_s1 + $0x588] sm:$0xff]  ;;  %v177_v62 = vld [vmem:[%s2119_s1 + $0x458] sm:$0xff] }
  0x74   :  { %669 = vmatpush.msrb.mxu3 %v255_v47  ;;  %633 = vmatpush.msrb.mxu1 %v183_v48  ;;  %v137_v63 = vld [vmem:[%s2119_s1 + $0x318] sm:$0xff]  ;;  %v247_v2 = vld [vmem:[%s2119_s1 + $0x688] sm:$0xff] }
  0x75   :  { %617 = vmatpush.msrb.mxu0 %v143_v49  ;;  %651 = vmatpush.msrb.mxu2 %v219_v50  ;;  %v213_v1 = vld [vmem:[%s2119_s1 + $0x578] sm:$0xff]  ;;  %v175_v3 = vld [vmem:[%s2119_s1 + $0x448] sm:$0xff] }
  0x76   :  { %670 = vmatpush.msrb.mxu3 %v253_v51  ;;  %634 = vmatpush.msrb.mxu1 %v181_v52  ;;  %v135_v4 = vld [vmem:[%s2119_s1 + $0x308] sm:$0xff]  ;;  %v245_v6 = vld [vmem:[%s2119_s1 + $0x678] sm:$0xff] }
  0x77   :  { %618 = vmatpush.msrb.mxu0 %v141_v53  ;;  %652 = vmatpush.msrb.mxu2 %v217_v54  ;;  %v211_v5 = vld [vmem:[%s2119_s1 + $0x568] sm:$0xff]  ;;  %v293_v7 = vld [vmem:[%s2119_s1 + $0x7f8] sm:$0xff]  ;;  %v742_v53 = vld [vmem:[%s2121_s3 + $0x70] sm:$0xff] }
  0x78   :  { %671 = vmatpush.msrb.mxu3 %v251_v55  ;;  %635 = vmatpush.msrb.mxu1 %v179_v56  ;;  %v173_v8 = vld [vmem:[%s2119_s1 + $0x438] sm:$0xff]  ;;  %v243_v10 = vld [vmem:[%s2119_s1 + $0x668] sm:$0xff]  ;;  %v740_v55 = vld [vmem:[%s2121_s3 + $0x60] sm:$0xff] }
  0x79   :  { %619 = vmatpush.msrb.mxu0 %v139_v57  ;;  %653 = vmatpush.msrb.mxu2 %v215_v58  ;;  %v209_v9 = vld [vmem:[%s2119_s1 + $0x558] sm:$0xff]  ;;  %v291_v11 = vld [vmem:[%s2119_s1 + $0x7e8] sm:$0xff]  ;;  %v736_v57 = vld [vmem:[%s2121_s3 + $0x40] sm:$0xff] }
  0x7a   :  { %672 = vmatpush.msrb.mxu3 %v249_v61  ;;  %636 = vmatpush.msrb.mxu1 %v177_v62  ;;  %v171_v12 = vld [vmem:[%s2119_s1 + $0x428] sm:$0xff]  ;;  %v241_v15 = vld [vmem:[%s2119_s1 + $0x658] sm:$0xff]  ;;  %v734_v61 = vld [vmem:[%s2121_s3 + $0x30] sm:$0xff] }
  0x7b   :  { %620 = vmatpush.msrb.mxu0 %v137_v63  ;;  %654 = vmatpush.msrb.mxu2 %v213_v1  ;;  %v207_v14 = vld [vmem:[%s2119_s1 + $0x548] sm:$0xff]  ;;  %v289_v16 = vld [vmem:[%s2119_s1 + $0x7d8] sm:$0xff]  ;;  %v732_v63 = vld [vmem:[%s2121_s3 + $0x20] sm:$0xff] }
  0x7c   :  { %673 = vmatpush.msrb.mxu3 %v247_v2  ;;  %637 = vmatpush.msrb.mxu1 %v175_v3  ;;  %v169_v17 = vld [vmem:[%s2119_s1 + $0x418] sm:$0xff]  ;;  %v239_v21 = vld [vmem:[%s2119_s1 + $0x648] sm:$0xff]  ;;  %v1980_v2 = vld [vmem:[%s2120_s2] sm:$0x3] }
  0x7d   :  { %621 = vmatpush.msrb.mxu0 %v135_v4  ;;  %655 = vmatpush.msrb.mxu2 %v211_v5  ;;  %v205_v20 = vld [vmem:[%s2119_s1 + $0x538] sm:$0xff]  ;;  %v287_v22 = vld [vmem:[%s2119_s1 + $0x7c8] sm:$0xff]  ;;  %v322_v3 = vperm.slane %v1980_v2, 0  ;;  %v730_v5 = vld [vmem:[%s2121_s3 + $0x10] sm:$0xff] }
  0x7e   :  { %674 = vmatpush.msrb.mxu3 %v245_v6  ;;  %638 = vmatpush.msrb.mxu1 %v173_v8  ;;  %v167_v23 = vld [vmem:[%s2119_s1 + $0x408] sm:$0xff]  ;;  %v285_v26 = vld [vmem:[%s2119_s1 + $0x7b8] sm:$0xff] }
  0x7f   :  { %686 = vmatpush.msra.mxu0 %v293_v7  ;;  %656 = vmatpush.msrb.mxu2 %v209_v9  ;;  %v203_v25 = vld [vmem:[%s2119_s1 + $0x528] sm:$0xff]  ;;  %v201_v28 = vld [vmem:[%s2119_s1 + $0x518] sm:$0xff]  ;;  %v728_v9 = vld [vmem:[%s2121_s3] sm:$0xff] }
  0x80   :  { %675 = vmatpush.msrb.mxu3 %v243_v10  ;;  %639 = vmatpush.msrb.mxu1 %v171_v12  ;;  %v319_v27 = vld [vmem:[%s2119_s1 + $0x8c8] sm:$0x1f]  ;;  %v317_v30 = vld [vmem:[%s2119_s1 + $0x8b8] sm:$0xff] }
  0x81   :  { %687 = vmatpush.msra.mxu0 %v291_v11  ;;  %657 = vmatpush.msrb.mxu2 %v207_v14  ;;  %v235_v29 = vld [vmem:[%s2119_s1 + $0x628] sm:$0xff]  ;;  %v233_v32 = vld [vmem:[%s2119_s1 + $0x618] sm:$0xff] }
  0x82   :  { %676 = vmatpush.msrb.mxu3 %v241_v15  ;;  %582 = vmatmul.f32.vlgmr.msra.gmra.mxu2 %v1354_v42  ;;  %v237_v42 = vld [vmem:[%s2119_s1 + $0x638] sm:$0xff]  ;;  %v199_v31 = vld [vmem:[%s2119_s1 + $0x508] sm:$0xff] }
  0x83   :  { %688 = vmatpush.msra.mxu0 %v289_v16  ;;  %640 = vmatpush.msrb.mxu1 %v169_v17  ;;  %v315_v33 = vld [vmem:[%s2119_s1 + $0x8a8] sm:$0xff]  ;;  %v313_v36 = vld [vmem:[%s2119_s1 + $0x898] sm:$0xff] }
  0x84   :  { %658 = vmatpush.msrb.mxu2 %v205_v20  ;;  %677 = vmatpush.msrb.mxu3 %v239_v21  ;;  %v231_v34 = vld [vmem:[%s2119_s1 + $0x608] sm:$0xff]  ;;  %v743_v37 = vld [vmem:[%s2121_s3 + $0x78] sm:$0xff] }
  0x85   :  { %602 = vmatmul.f32.vlgmr.msra.gmra.mxu3 %v1407_v60  ;;  %689 = vmatpush.msra.mxu0 %v287_v22  ;;  %v283_v60 = vld [vmem:[%s2119_s1 + $0x7a8] sm:$0xff]  ;;  %v305_v43 = vld [vmem:[%s2119_s1 + $0x858] sm:$0xff] }
  0x86   :  { %641 = vmatpush.msrb.mxu1 %v167_v23  ;;  %659 = vmatpush.msrb.mxu2 %v203_v25  ;;  %v279_v35 = vld [vmem:[%s2119_s1 + $0x788] sm:$0xff]  ;;  %v269_v44 = vld [vmem:[%s2119_s1 + $0x738] sm:$0xff] }
  0x87   :  { %678 = vmatpush.msrb.mxu3 %v237_v42  ;;  %562 = vmatmul.f32.vlgmr.msra.gmra.mxu1 %v1352_v41  ;;  %v281_v41 = vld [vmem:[%s2119_s1 + $0x798] sm:$0xff]  ;;  %v311_v38 = vld [vmem:[%s2119_s1 + $0x888] sm:$0xff] }
  0x88   :  { %690 = vmatpush.msra.mxu0 %v285_v26  ;;  %944 = vmatpush.msk.msra.mxu1 %vm359_vm0, %v319_v27  ;;  %v275_v39 = vld [vmem:[%s2119_s1 + $0x768] sm:$0xff]  ;;  %v301_v47 = vld [vmem:[%s2119_s1 + $0x838] sm:$0xff] }
  0x89   :  { %660 = vmatpush.msrb.mxu2 %v201_v28  ;;  %679 = vmatpush.msrb.mxu3 %v235_v29  ;;  %v307_v40 = vld [vmem:[%s2119_s1 + $0x868] sm:$0xff]  ;;  %v265_v48 = vld [vmem:[%s2119_s1 + $0x718] sm:$0xff] }
  0x8a   :  { %691 = vmatpush.msra.mxu0 %v283_v60  ;;  %710 = vmatpush.msra.mxu1 %v317_v30  ;;  %v303_v45 = vld [vmem:[%s2119_s1 + $0x848] sm:$0xff]  ;;  %v297_v51 = vld [vmem:[%s2119_s1 + $0x818] sm:$0xff]  ;;  %v758_v60 = vld [vmem:[%s2121_s3 + $0xf0] sm:$0xff] }
  0x8b   :  { %661 = vmatpush.msrb.mxu2 %v199_v31  ;;  %680 = vmatpush.msrb.mxu3 %v233_v32  ;;  %v267_v46 = vld [vmem:[%s2119_s1 + $0x728] sm:$0xff]  ;;  %v739_v56 = vld [vmem:[%s2121_s3 + $0x58] sm:$0xff]  ;;  %v756_v31 = vld [vmem:[%s2121_s3 + $0xe0] sm:$0xff] }
  0x8c   :  { %662 = vmatmul.f32.vlgmr.msrb.gmra.mxu2 %v1493_v24  ;;  %692 = vmatpush.msra.mxu0 %v281_v41  ;;  %v277_v24 = vld [vmem:[%s2119_s1 + $0x778] sm:$0xff]  ;;  %v299_v49 = vld [vmem:[%s2119_s1 + $0x828] sm:$0xff]  ;;  %v754_v41 = vld [vmem:[%s2121_s3 + $0xd0] sm:$0xff] }
  0x8d   :  { %711 = vmatpush.msra.mxu1 %v315_v33  ;;  %681 = vmatpush.msrb.mxu3 %v231_v34  ;;  %v263_v50 = vld [vmem:[%s2119_s1 + $0x708] sm:$0xff]  ;;  %v735_v58 = vld [vmem:[%s2121_s3 + $0x38] sm:$0xff]  ;;  %v752_v34 = vld [vmem:[%s2121_s3 + $0xc0] sm:$0xff] }
  0x8e   :  { %622 = vmatmul.f32.vlgmr.msrb.gmra.mxu0 %v1418_v0  ;;  %682 = vmatmul.f32.vlgmr.msrb.gmra.mxu3 %v1461_v13  ;;  %v309_v0 = vld [vmem:[%s2119_s1 + $0x878] sm:$0xff]  ;;  %v295_v52 = vld [vmem:[%s2119_s1 + $0x808] sm:$0xff] }
  0x8f   :  { %693 = vmatpush.msra.mxu0 %v279_v35  ;;  %712 = vmatpush.msra.mxu1 %v313_v36  ;;  %v273_v13 = vld [vmem:[%s2119_s1 + $0x758] sm:$0xff]  ;;  %v741_v54 = vld [vmem:[%s2121_s3 + $0x68] sm:$0xff]  ;;  %v750_v36 = vld [vmem:[%s2121_s3 + $0xb0] sm:$0xff] }
  0x90   :  { %642 = vmatmul.f32.vlgmr.msrb.gmra.mxu1 %v1475_v18  ;;  %772 = vmatpush.msra.mxu2 %v743_v37  ;;  %v271_v18 = vld [vmem:[%s2119_s1 + $0x748] sm:$0xff]  ;;  %v731_v1 = vld [vmem:[%s2121_s3 + $0x18] sm:$0xff] }
  0x91   :  { %694 = vmatpush.msra.mxu0 %v277_v24  ;;  %713 = vmatpush.msra.mxu1 %v311_v38  ;;  %v733_v62 = vld [vmem:[%s2121_s3 + $0x28] sm:$0xff]  ;;  %v759_v10 = vld [vmem:[%s2121_s3 + $0xf8] sm:$0x3]  ;;  %v748_v24 = vld [vmem:[%s2121_s3 + $0xa0] sm:$0xff] }
  0x92   :  { %773 = vmatpush.msra.mxu2 %v742_v53  ;;  %v729_v6 = vld [vmem:[%s2121_s3 + $0x8] sm:$0xff]  ;;  %946 = vmatpush.msk.msra.mxu3 %vm768_vm2, %v759_v10  ;;  %v755_v32 = vld [vmem:[%s2121_s3 + $0xd8] sm:$0xff]  ;;  %v812_v10 = vld [vmem:[%s2123_s5] sm:$0xff] }
  0x93   :  { %695 = vmatpush.msra.mxu0 %v275_v39  ;;  %714 = vmatpush.msra.mxu1 %v309_v0  ;;  %v757_v30 = vld [vmem:[%s2121_s3 + $0xe8] sm:$0xff]  ;;  %v751_v35 = vld [vmem:[%s2121_s3 + $0xb8] sm:$0xff]  ;;  %v746_v39 = vld [vmem:[%s2121_s3 + $0x90] sm:$0xff] }
  0x94   :  { %774 = vmatpush.msra.mxu2 %v741_v54  ;;  %793 = vmatpush.msra.mxu3 %v758_v60  ;;  %v753_v33 = vld [vmem:[%s2121_s3 + $0xc8] sm:$0xff]  ;;  %v747_v38 = vld [vmem:[%s2121_s3 + $0x98] sm:$0xff] }
  0x95   :  { %696 = vmatpush.msra.mxu0 %v273_v13  ;;  %715 = vmatpush.msra.mxu1 %v307_v40  ;;  %v749_v37 = vld [vmem:[%s2121_s3 + $0xa8] sm:$0xff]  ;;  %v323_v13 = vperm.slane %v1980_v2, 1  ;;  %v744_v40 = vld [vmem:[%s2121_s3 + $0x80] sm:$0xff] }
  0x96   :  { %775 = vmatpush.msra.mxu2 %v740_v55  ;;  %794 = vmatpush.msra.mxu3 %v757_v30  ;;  %v745_v0 = vld [vmem:[%s2121_s3 + $0x88] sm:$0xff]  ;;  %v820_v2 = vld [vmem:[%s2123_s5 + $0x40] sm:$0xff] }
  0x97   :  { %697 = vmatpush.msra.mxu0 %v271_v18  ;;  %716 = vmatpush.msra.mxu1 %v305_v43 }
  0x98   :  { %776 = vmatpush.msra.mxu2 %v739_v56  ;;  %795 = vmatpush.msra.mxu3 %v756_v31  ;;  %v955_v31 = vld [vmem:[%s2126_s8] ss:$0 sm:$0xff] }
  0x99   :  { %698 = vmatpush.msra.mxu0 %v269_v44  ;;  %717 = vmatpush.msra.mxu1 %v303_v45 }
  0x9a   :  { %796 = vmatpush.msra.mxu3 %v755_v32 }
  0x9b   :  { %699 = vmatpush.msra.mxu0 %v267_v46  ;;  %718 = vmatpush.msra.mxu1 %v301_v47 }
  0x9c   :  { %797 = vmatpush.msra.mxu3 %v754_v41 }
  0x9d   :  { %700 = vmatpush.msra.mxu0 %v265_v48  ;;  %719 = vmatpush.msra.mxu1 %v299_v49 }
  0x9e   :  { %798 = vmatpush.msra.mxu3 %v753_v33 }
  0x9f   :  { %701 = vmatpush.msra.mxu0 %v263_v50  ;;  %720 = vmatpush.msra.mxu1 %v297_v51 }
  0xa0   :  { %702 = vmatmul.f32.vlgmr.msra.gmra.mxu0 %v1478_v19  ;;  %v738_v19 = vld [vmem:[%s2121_s3 + $0x50] sm:$0xff]  ;;  %799 = vmatpush.msra.mxu3 %v752_v34 }
  0xa1   :  { %721 = vmatpush.msra.mxu1 %v295_v52  ;;  %777 = vmatpush.msra.mxu2 %v738_v19 }
  0xa2   :  { %945 = vmatmul.msk.f32.vlgmr.msra.gmra.mxu1 %vm356_vm1, %v1593_v59  ;;  %v737_v59 = vld [vmem:[%s2121_s3 + $0x48] sm:$0xff]  ;;  %800 = vmatpush.msra.mxu3 %v751_v35 }
  0xa3   :  { %778 = vmatpush.msra.mxu2 %v737_v59 }
  0xa4   :  { %801 = vmatpush.msra.mxu3 %v750_v36 }
  0xa5   :  { %779 = vmatpush.msra.mxu2 %v736_v57 }
  0xa6   :  { %802 = vmatpush.msra.mxu3 %v749_v37 }
  0xa7   :  { %780 = vmatpush.msra.mxu2 %v735_v58 }
  0xa8   :  { %803 = vmatpush.msra.mxu3 %v748_v24 }
  0xa9   :  { %781 = vmatpush.msra.mxu2 %v734_v61  ;;  %v824_v61 = vld [vmem:[%s2123_s5 + $0x60] sm:$0xf] }
  0xaa   :  { %804 = vmatpush.msra.mxu3 %v747_v38  ;;  %948 = vmatpush.msk.msrb.mxu0 %vm833_vm4, %v824_v61 }
  0xab   :  { %782 = vmatpush.msra.mxu2 %v733_v62  ;;  %v823_v62 = vld [vmem:[%s2123_s5 + $0x58] sm:$0xff] }
  0xac   :  { %805 = vmatpush.msra.mxu3 %v746_v39  ;;  %841 = vmatpush.msrb.mxu0 %v823_v62 }
  0xad   :  { %783 = vmatpush.msra.mxu2 %v732_v63  ;;  %v822_v63 = vld [vmem:[%s2123_s5 + $0x50] sm:$0xff] }
  0xae   :  { %806 = vmatpush.msra.mxu3 %v745_v0  ;;  %842 = vmatpush.msrb.mxu0 %v822_v63 }
  0xaf   :  { %784 = vmatpush.msra.mxu2 %v731_v1  ;;  %v821_v1 = vld [vmem:[%s2123_s5 + $0x48] sm:$0xff] }
  0xb0   :  { %807 = vmatpush.msra.mxu3 %v744_v40  ;;  %843 = vmatpush.msrb.mxu0 %v821_v1 }
  0xb1   :  { %785 = vmatpush.msra.mxu2 %v730_v5  ;;  %v817_v5 = vld [vmem:[%s2123_s5 + $0x28] sm:$0xff] }
  0xb2   :  { %844 = vmatpush.msrb.mxu0 %v820_v2 }
  0xb3   :  { %786 = vmatpush.msra.mxu2 %v729_v6  ;;  %v816_v6 = vld [vmem:[%s2123_s5 + $0x20] sm:$0xff] }
  0xb5   :  { %787 = vmatpush.msra.mxu2 %v728_v9  ;;  %v813_v9 = vld [vmem:[%s2123_s5 + $0x8] sm:$0xff] }
  0xb9   :  { %v443_v15 = vpop.f32.mrf.mxu3 }
  0xbe   :  { %v383_v4 = vpop.f32.mrf.mxu0 }
  0xbf   :  { %v384_v7 = vadd.f32 %v383_v4, %v322_v3  ;;  %v819_v3 = vld [vmem:[%s2123_s5 + $0x38] sm:$0xff]  ;;  %v818_v4 = vld [vmem:[%s2123_s5 + $0x30] sm:$0xff] }
  0xc0   :  { %v403_v8 = vpop.f32.mrf.mxu1  ;;  %845 = vmatpush.msrb.mxu0 %v819_v3 }
  0xc1   :  { %v404_v11 = vadd.f32 %v403_v8, %v384_v7  ;;  %v815_v7 = vld [vmem:[%s2123_s5 + $0x18] sm:$0xff]  ;;  %v814_v8 = vld [vmem:[%s2123_s5 + $0x10] sm:$0xff] }
  0xc2   :  { %v423_v12 = vpop.f32.mrf.mxu2  ;;  %846 = vmatpush.msrb.mxu0 %v818_v4 }
  0xc3   :  { %v424_v14 = vadd.f32 %v423_v12, %v404_v11  ;;  %v868_v11 = vld [vmem:[%s2125_s7 + $0x30] sm:$0x3]  ;;  %v867_v12 = vld [vmem:[%s2125_s7 + $0x28] sm:$0xff] }
  0xc4   :  { %847 = vmatpush.msrb.mxu0 %v817_v5  ;;  %950 = vmatpush.msk.msrb.mxu1 %vm768_vm2, %v868_v11 }
  0xc5   :  { %v444_v16 = vadd.f32 %v443_v15, %v424_v14  ;;  %v953_v14 = vld [vmem:[%s2122_s4] ss:$0 sm:$0xff] }
  0xc6   :  { %848 = vmatpush.msrb.mxu0 %v816_v6  ;;  %890 = vmatpush.msrb.mxu1 %v867_v12 }
  0xc7   :  { %v463_v17 = vpop.f32.mrf.mxu0 }
  0xc8   :  { %v464_v20 = vadd.f32 %v463_v17, %v444_v16  ;;  %849 = vmatpush.msrb.mxu0 %v815_v7 }
  0xca   :  { %v483_v21 = vpop.f32.mrf.mxu1  ;;  %850 = vmatpush.msrb.mxu0 %v814_v8 }
  0xcb   :  { %v484_v22 = vadd.f32 %v483_v21, %v464_v20  ;;  %v503_v23 = vpop.f32.mrf.mxu2  ;;  %v866_v21 = vld [vmem:[%s2125_s7 + $0x20] sm:$0xff] }
  0xcc   :  { %851 = vmatpush.msrb.mxu0 %v813_v9  ;;  %891 = vmatpush.msrb.mxu1 %v866_v21 }
  0xcd   :  { %v504_v25 = vadd.f32 %v503_v23, %v484_v22  ;;  %v865_v22 = vld [vmem:[%s2125_s7 + $0x18] sm:$0xff]  ;;  %v864_v23 = vld [vmem:[%s2125_s7 + $0x10] sm:$0xff] }
  0xce   :  { %v523_v42 = vpop.f32.mrf.mxu3  ;;  %852 = vmatpush.msrb.mxu0 %v812_v10  ;;  %892 = vmatpush.msrb.mxu1 %v865_v22 }
  0xcf   :  { %v524_v26 = vadd.f32 %v523_v42, %v504_v25  ;;  %v863_v25 = vld [vmem:[%s2125_s7 + $0x8] sm:$0xff]  ;;  %v862_v42 = vld [vmem:[%s2125_s7] sm:$0xff] }
  0xd0   :  { %893 = vmatpush.msrb.mxu1 %v864_v23 }
  0xd2   :  { %894 = vmatpush.msrb.mxu1 %v863_v25 }
  0xd4   :  { %895 = vmatpush.msrb.mxu1 %v862_v42 }
  0xdb   :  { %v543_v27 = vpop.f32.mrf.mxu0 }
  0xdc   :  { %v544_v28 = vadd.f32 %v543_v27, %v524_v26  ;;  %v954_v26 = vld [vmem:[%s2124_s6] ss:$0 sm:$0xff]  ;;  %s986_s6 = smov [#allocation2]  }
  0xdd   :  { %s931_s7 = sshll.u32 %s986_s6, 4  ;;  %s932_s7 = int_to_ptr.vmem [resolvable:$true] %s931_s7 }
  0xde   :  { %v726_v29 = vmax.f32 %v544_v28, 0.0 }
  0xe0   :  { %788 = vmatmul.f32.vlgmr.msra.gmra.mxu2 %v726_v29 }
 0x104   :  { %v563_v18 = vpop.f32.mrf.mxu1 }
 0x105   :  { %v564_v43 = vadd.f32 %v563_v18, %v323_v13  ;;  %v583_v44 = vpop.f32.mrf.mxu2 }
 0x107   :  { %v584_v45 = vadd.f32 %v583_v44, %v564_v43 }
 0x108   :  { %v603_v46 = vpop.f32.mrf.mxu3 }
 0x109   :  { %v604_v47 = vadd.f32 %v603_v46, %v584_v45 }
 0x10b   :  { %v623_v48 = vpop.f32.mrf.mxu0 }
 0x10c   :  { %v624_v49 = vadd.f32 %v623_v48, %v604_v47 }
 0x10d   :  { %v643_v50 = vpop.f32.mrf.mxu1 }
 0x10e   :  { %v644_v51 = vadd.f32 %v643_v50, %v624_v49 }
 0x10f   :  { %v663_v52 = vpop.f32.mrf.mxu2 }
 0x110   :  { %v664_v53 = vadd.f32 %v663_v52, %v644_v51 }
 0x111   :  { %v683_v54 = vpop.f32.mrf.mxu3 }
 0x112   :  { %v684_v55 = vadd.f32 %v683_v54, %v664_v53 }
 0x11d   :  { %v703_v56 = vpop.f32.mrf.mxu0 }
 0x11e   :  { %v704_v19 = vadd.f32 %v703_v56, %v684_v55 }
 0x11f   :  { %v723_v59 = vpop.f32.mrf.mxu1 }
 0x120   :  { %v724_v57 = vadd.f32 %v723_v59, %v704_v19 }
 0x122   :  { %v727_v58 = vmax.f32 %v724_v57, 0.0 }
 0x124   :  { %947 = vmatmul.msk.f32.vlgmr.msra.gmra.mxu3 %vm764_vm3, %v727_v58 }
 0x163   :  { %v789_v15 = vpop.f32.mrf.mxu2 }
 0x164   :  { %v790_v16 = vadd.f32 %v953_v14, %v789_v15 }
 0x1a7   :  { %v809_v17 = vpop.f32.mrf.mxu3 }
 0x1a8   :  { %v810_v20 = vadd.f32 %v809_v17, %v790_v16 }
 0x1aa   :  { %949 = vmatmul.msk.f32.vlgmr.msrb.gmra.mxu0 %vm829_vm5, %v810_v20 }
 0x227   :  { %v854_v27 = vpop.f32.mrf.mxu0 }
 0x228   :  { %v855_v28 = vadd.f32 %v954_v26, %v854_v27 }
 0x22a   :  { %v858_v29 = vrot.slane %v855_v28, 2 }
 0x22c   :  { %v860_v60 = vsub.f32 %v855_v28, %v858_v29 }
 0x22e   :  { %v861_v30 = vand.u32 2147483647, %v860_v60 }
 0x230   :  { %951 = vmatmul.msk.f32.vlgmr.msrb.gmra.mxu1 %vm873_vm6, %v861_v30 }
 0x2ad   :  { %v897_v32 = vpop.f32.mrf.mxu1 }
 0x2ae   :  { %v898_v41 = vadd.f32 %v955_v31, %v897_v32 }
 0x2b0   :  { %v901_v33 = vsel %vm900_vm7, %v898_v41, -inf }
 0x2b1   :  { %902 = vmax.xlane.f32.xlu0 %v901_v33 }
 0x324   :  { %v903_v34 = vpop.xlane.xlu0 %902 }
 0x325   :  { %v904_v35 = vsub.f32 %v898_v41, %v903_v34 }
 0x327   :  { %v905_v36 = vmul.f32 1.442695, %v904_v35 }
 0x329   :  { %956 = vpow2.f32 %v905_v36 }
 0x32f   :  { %v957_v37 = vpop.eup %956 }
 0x330   :  { %v907_v24 = vsel %vm900_vm7, %v957_v37, 0.0 }
 0x331   :  { %908 = vadd.xlane.f32.xlu0 %v907_v24 }
 0x3a4   :  { %v909_v38 = vpop.xlane.xlu0 %908 }
 0x3a5   :  { %958 = vrcp.f32 %v909_v38  ;;  %v921_v40 = vand.u32 2147483648, %v909_v38  ;;  %v919_v43 = vand.u32 2147483647, %v909_v38  ;;  %vm915_vm9 = vweird.f32 %v909_v38 }
 0x3a7   :  { %v922_v45 = vor.u32 1.1754944e-38, %v921_v40  ;;  %vm920_vm11 = vcmp.eq.f32.partialorder %v919_v43, 8.507059e+37 }
 0x3ab   :  { %v959_v39 = vpop.eup %958 }
 0x3ac   :  { %v911_v0 = vmul.f32 %v959_v39, %v909_v38  ;;  %vm916_vm8 = vweird.f32 %v959_v39 }
 0x3ad   :  { %vm917_vm10 = vmor %vm915_vm9, %vm916_vm8 }
 0x3ae   :  { %v912_v13 = vsub.f32 1.0, %v911_v0 }
 0x3b0   :  { %v913_v18 = vmul.f32 %v959_v39, %v912_v13 }
 0x3b2   :  { %v914_v44 = vadd.f32 %v959_v39, %v913_v18 }
 0x3b4   :  { %v918_v46 = vsel %vm917_vm10, %v959_v39, %v914_v44 }
 0x3b5   :  { %v923_v47 = vsel %vm920_vm11, %v922_v45, %v918_v46 }
 0x3b6   :  { %v924_v48 = vmul.f32 %v957_v37, %v923_v47 }
 0x3b8   :  { %925 = vst.msk [vmem:[#allocation2] sm:$0x3] %vm900_vm7, %v924_v48 }
 0x3b9   :  { %936 = dma.vmem_to_hbm [thread:$0]  %s932_s7, 32, %s934_s11, [#allocation3]  }
 0x3ba   :  { %984 = dma.done.wait [#allocation3], 32  }
 0x3bb   :  { %985 = vsyncadd [#allocation3], 4294967264 }
 0x3bc   :  { %941 = vsyncpa [#allocation3], 1 }

</bundles_post_ra>
